<compile_context>
chip_gen: v7x
topology: tpu7x:2x2x1
jax: 0.10.0
libtpu: 0.0.40
codegen_flags: <defaults>
</compile_context>

<pallas_src>
import functools
import math

import jax
import jax.numpy as jnp
from jax import lax
from jax.experimental import pallas as pl
from jax.experimental.pallas import tpu as pltpu

LANE = 128
_VMEM_LIMIT = 32 * 1024 * 1024   # >= default scoped VMEM on v5e, <= physical on v7x


def _round_up(x, m):
    return (x + m - 1) // m * m


def _pick_tile(dim, target, min_align):
    """Largest tile <= target that divides dim and is a multiple of min_align.

    Falls back to the full dim (full-dim blocks are always layout-legal)."""
    if dim <= target:
        return dim
    t = (target // min_align) * min_align
    while t >= min_align:
        if dim % t == 0:
            return t
        t -= min_align
    return dim


# ----------------------------------------------------------------------------
# Tiled linear:  y = x @ W + b   (bf16 inputs, f32 accumulation)
# ----------------------------------------------------------------------------
def _linear_kernel(x_ref, w_ref, b_ref, o_ref, acc_ref):
    @pl.when(pl.program_id(2) == 0)
    def _():
        acc_ref[...] = jnp.zeros_like(acc_ref)

    acc_ref[...] += jnp.dot(
        x_ref[...], w_ref[...], preferred_element_type=jnp.float32
    )

    @pl.when(pl.program_id(2) == pl.num_programs(2) - 1)
    def _():
        # Bias added once, at finalize (inner loop is pure MXU work).
        o_ref[...] = (acc_ref[...] + b_ref[...]).astype(o_ref.dtype)


def _linear(x, w, b, out_dtype):
    """x: (M, K) bf16, w: (K, N) bf16, b: (N,) f32 -> (M, N) out_dtype."""
    M, K = x.shape
    N = w.shape[1]
    tm = _pick_tile(M, 512, 8)
    tn = _pick_tile(N, 512, LANE)
    tk = _pick_tile(K, 512, LANE)
    grid = (M // tm, N // tn, K // tk)
    return pl.pallas_call(
        _linear_kernel,
        out_shape=jax.ShapeDtypeStruct((M, N), out_dtype),
        grid=grid,
        in_specs=[
            pl.BlockSpec((tm, tk), lambda i, j, k: (i, k)),
            pl.BlockSpec((tk, tn), lambda i, j, k: (k, j)),
            pl.BlockSpec((1, tn), lambda i, j, k: (0, j)),
        ],
        out_specs=pl.BlockSpec((tm, tn), lambda i, j, k: (i, j)),
        scratch_shapes=[pltpu.VMEM((tm, tn), jnp.float32)],
        compiler_params=pltpu.CompilerParams(
            dimension_semantics=("parallel", "parallel", "arbitrary"),
            vmem_limit_bytes=_VMEM_LIMIT,
        ),
    )(x, w, b.reshape(1, N))


# ----------------------------------------------------------------------------
# Flash-style GQA attention, grid = (B, kv_group, q_tiles, kv_tiles)
# ----------------------------------------------------------------------------
def _attn_kernel(q_ref, k_ref, v_ref, o_ref, m_scr, l_scr, acc_scr, *,
                 heads_per_group, head_dim, kv_tile, seq_len, seq_pad):
    ki = pl.program_id(3)
    D = head_dim
    hpg = heads_per_group

    @pl.when(ki == 0)
    def _():
        m_scr[...] = jnp.full_like(m_scr, -jnp.inf)
        l_scr[...] = jnp.zeros_like(l_scr)
        acc_scr[...] = jnp.zeros_like(acc_scr)

    # Mask for the padded KV tail (only emitted when padding exists).
    if seq_pad != seq_len:
        kv_pos = ki * kv_tile + lax.broadcasted_iota(jnp.int32, (1, kv_tile), 1)
        kv_valid = kv_pos < seq_len
    else:
        kv_valid = None

    # Only hpg heads per grid step (group dim lives on the grid); all their
    # per-head slices are lane-aligned because head_dim % 128 == 0.
    for hh in range(hpg):
        qh = q_ref[0, :, hh * D:(hh + 1) * D]               # (tq, D) bf16
        # Contract last dims directly on the MXU: no K-tile transpose.
        s = lax.dot_general(
            qh, k_ref[0],
            dimension_numbers=(((1,), (1,)), ((), ())),
            preferred_element_type=jnp.float32)              # (tq, tkv) f32
        if kv_valid is not None:
            s = jnp.where(kv_valid, s, -1e9)

        m_prev = m_scr[hh]                                   # (tq, 1)
        l_prev = l_scr[hh]
        m_new = jnp.maximum(m_prev, jnp.max(s, axis=-1, keepdims=True))
        alpha = jnp.exp(m_prev - m_new)
        p = jnp.exp(s - m_new)
        l_scr[hh] = alpha * l_prev + jnp.sum(p, axis=-1, keepdims=True)
        acc_scr[:, hh * D:(hh + 1) * D] = (
            alpha * acc_scr[:, hh * D:(hh + 1) * D]
            + jnp.dot(p.astype(jnp.bfloat16), v_ref[0],
                      preferred_element_type=jnp.float32))
        m_scr[hh] = m_new

    @pl.when(ki == pl.num_programs(3) - 1)
    def _():
        for hh in range(hpg):
            # approx=True: EUP reciprocal (small relative error, bf16 output).
            inv_l = pl.reciprocal(l_scr[hh], approx=True)
            acc_scr[:, hh * D:(hh + 1) * D] = (
                acc_scr[:, hh * D:(hh + 1) * D] * inv_l)
        o_ref[0] = acc_scr[...].astype(o_ref.dtype)          # lane-dense store


def _attention(qkv, *, num_heads, num_group, head_dim):
    """qkv: (B, S, (H + 2G) * head_dim) bf16, packed as [q | k | v] columns.

    head_dim must be a multiple of 128 (prepare_params pads heads to 128).
    Returns (B, S, H * head_dim) bf16.
    """
    B, S, _ = qkv.shape
    hpg = num_heads // num_group
    D = head_dim
    assert D % LANE == 0

    # Sequence tiling; pad S so tiles always divide (padded KV is masked
    # in-kernel, padded Q rows are sliced off afterwards).
    if S <= 256:
        tq = tkv = _round_up(S, 8)
    else:
        tq = 256
        tkv = 512 if S >= 1024 else 256
    S_pad = _round_up(S, tkv)                 # tkv is a multiple of tq here
    if S_pad != S:
        qkv = jnp.pad(qkv, ((0, 0), (0, S_pad - S), (0, 0)))

    grid = (B, num_group, S_pad // tq, S_pad // tkv)

    # The packed qkv tensor is passed three times; each spec windows its own
    # column region, so q/k/v are never sliced apart in HBM.
    q_spec = pl.BlockSpec((1, tq, hpg * D),
                          lambda b, g, qi, ki: (b, qi, g))
    k_spec = pl.BlockSpec((1, tkv, D),
                          lambda b, g, qi, ki: (b, ki, num_heads + g))
    v_spec = pl.BlockSpec((1, tkv, D),
                          lambda b, g, qi, ki: (b, ki, num_heads + num_group + g))
    o_spec = pl.BlockSpec((1, tq, hpg * D),
                          lambda b, g, qi, ki: (b, qi, g))

    kernel = functools.partial(
        _attn_kernel, heads_per_group=hpg, head_dim=D, kv_tile=tkv,
        seq_len=S, seq_pad=S_pad)

    # K/V in_specs could use pipeline_mode=pl.Buffered(3) on v6e if xprof
    # shows exposed K/V DMA; depth 2 kept here to stay safe on v7x (64 MiB/TC).
    out = pl.pallas_call(
        kernel,
        out_shape=jax.ShapeDtypeStruct((B, S_pad, num_heads * D), jnp.bfloat16),
        grid=grid,
        in_specs=[q_spec, k_spec, v_spec],
        out_specs=o_spec,
        scratch_shapes=[
            pltpu.VMEM((hpg, tq, 1), jnp.float32),    # running max  m (per head)
            pltpu.VMEM((hpg, tq, 1), jnp.float32),    # running sum  l (per head)
            pltpu.VMEM((tq, hpg * D), jnp.float32),   # output accumulator
        ],
        compiler_params=pltpu.CompilerParams(
            dimension_semantics=("parallel", "parallel", "parallel", "arbitrary"),
            vmem_limit_bytes=_VMEM_LIMIT,
        ),
    )(qkv, qkv, qkv)

    if S_pad != S:
        out = out[:, :S, :]
    return out


# ----------------------------------------------------------------------------
# One-time parameter preparation (call OUTSIDE the jitted forward)
# ----------------------------------------------------------------------------
def prepare_params(params, *, num_heads, num_group):
    hidden_dim = params["wq"].shape[0]
    head_dim = hidden_dim // num_heads
    Dp = _round_up(head_dim, LANE)            # lane-pad each head (exact: zeros)
    scale = 1.0 / math.sqrt(float(head_dim))  # folded into wq/bq in f32

    def _pad_heads(w, b, n, fold_scale):
        w = w.reshape(hidden_dim, n, head_dim)
        b = b.reshape(n, head_dim)
        if fold_scale:
            w = w * scale
            b = b * scale
        if Dp != head_dim:
            w = jnp.pad(w, ((0, 0), (0, 0), (0, Dp - head_dim)))
            b = jnp.pad(b, ((0, 0), (0, Dp - head_dim)))
        return w.reshape(hidden_dim, n * Dp), b.reshape(n * Dp)

    wq, bq = _pad_heads(params["wq"], params["bq"], num_heads, True)
    wk, bk = _pad_heads(params["wk"], params["bk"], num_group, False)
    wv, bv = _pad_heads(params["wv"], params["bv"], num_group, False)

    wo = params["wo"].reshape(num_heads, head_dim, hidden_dim)
    if Dp != head_dim:
        wo = jnp.pad(wo, ((0, 0), (0, Dp - head_dim), (0, 0)))  # zero rows: exact
    wo = wo.reshape(num_heads * Dp, hidden_dim)

    return {
        "w_qkv": jnp.concatenate([wq, wk, wv], axis=1).astype(jnp.bfloat16),
        "b_qkv": jnp.concatenate([bq, bk, bv], axis=0).astype(jnp.float32),
        "wo": wo.astype(jnp.bfloat16),
        "bo": params["bo"].astype(jnp.float32),
    }


# ----------------------------------------------------------------------------
# GroupQueryAttention forward (expects prepared params)
# ----------------------------------------------------------------------------
def gqa_forward(hidden_state, prepared, *, num_heads, num_group,
                causal_mask=None, padding_mask=None, out_dtype=jnp.float32):
    # TODO(synk): additive causal/padding mask support (module defaults None).
    assert causal_mask is None and padding_mask is None
    B, S, hidden_dim = hidden_state.shape
    Dp = prepared["wo"].shape[0] // num_heads          # lane-padded head_dim

    x = hidden_state.reshape(B * S, hidden_dim).astype(jnp.bfloat16)

    # Fused QKV projection: x is streamed from HBM once; weights were
    # pre-concatenated / scaled / bf16-cast at load time (outside jit).
    qkv = _linear(x, prepared["w_qkv"], prepared["b_qkv"], out_dtype=jnp.bfloat16)
    qkv = qkv.reshape(B, S, (num_heads + 2 * num_group) * Dp)

    attn = _attention(qkv, num_heads=num_heads, num_group=num_group,
                      head_dim=Dp)                     # (B, S, H*Dp) bf16

    out = _linear(attn.reshape(B * S, num_heads * Dp),
                  prepared["wo"], prepared["bo"], out_dtype=out_dtype)
    return out.reshape(B, S, hidden_dim)


def init_params(key, hidden_dim, num_heads, num_group):
    head_dim = hidden_dim // num_heads
    kv_dim = num_group * head_dim
    ks = jax.random.split(key, 8)
    scale = 0.02
    # Weights stored as (in, out); equivalent to PyTorch's (out, in) transposed.
    return {
        "wq": scale * jax.random.normal(ks[0], (hidden_dim, hidden_dim), jnp.float32),
        "bq": scale * jax.random.normal(ks[1], (hidden_dim,), jnp.float32),
        "wk": scale * jax.random.normal(ks[2], (hidden_dim, kv_dim), jnp.float32),
        "bk": scale * jax.random.normal(ks[3], (kv_dim,), jnp.float32),
        "wv": scale * jax.random.normal(ks[4], (hidden_dim, kv_dim), jnp.float32),
        "bv": scale * jax.random.normal(ks[5], (kv_dim,), jnp.float32),
        "wo": scale * jax.random.normal(ks[6], (hidden_dim, hidden_dim), jnp.float32),
        "bo": scale * jax.random.normal(ks[7], (hidden_dim,), jnp.float32),
    }


def _reference_forward(x, params, *, num_heads, num_group):
    """Pure-JAX f32 reference of the PyTorch module (repeat_interleave KV)."""
    B, S, H = x.shape
    D = H // num_heads
    hpg = num_heads // num_group
    q = x @ params["wq"] + params["bq"]
    k = x @ params["wk"] + params["bk"]
    v = x @ params["wv"] + params["bv"]
    q = q.reshape(B, S, num_heads, D).transpose(0, 2, 1, 3)
    k = k.reshape(B, S, num_group, D).transpose(0, 2, 1, 3)
    v = v.reshape(B, S, num_group, D).transpose(0, 2, 1, 3)
    k = jnp.repeat(k, hpg, axis=1)
    v = jnp.repeat(v, hpg, axis=1)
    s = jnp.einsum("bhqd,bhkd->bhqk", q, k) / math.sqrt(float(D))
    p = jax.nn.softmax(s, axis=-1)
    o = jnp.einsum("bhqk,bhkd->bhqd", p, v)
    o = o.transpose(0, 2, 1, 3).reshape(B, S, num_heads * D)
    return o @ params["wo"] + params["bo"]


if __name__ == "__main__":
    # Small, TPU-friendly shapes: batch=2, seq=128, hidden=512,
    # num_heads=4, num_group=2 -> head_dim=128 (lane-aligned, no head padding).
    batch, seq_len, hidden_dim = 2, 128, 512
    num_heads, num_group = 4, 2

    key = jax.random.PRNGKey(0)
    k_x, k_p = jax.random.split(key)
    hidden_state = jax.random.normal(k_x, (batch, seq_len, hidden_dim), jnp.float32)
    params = init_params(k_p, hidden_dim, num_heads, num_group)

    # Parameter preparation happens once, outside the jitted forward.
    prepared = jax.block_until_ready(
        prepare_params(params, num_heads=num_heads, num_group=num_group))

    fwd = jax.jit(functools.partial(
        gqa_forward, num_heads=num_heads, num_group=num_group))
    out = fwd(hidden_state, prepared)
    jax.block_until_ready(out)

    assert out.shape == (batch, seq_len, hidden_dim)
    assert bool(jnp.all(jnp.isfinite(out)))

    # Loose sanity check against a pure-JAX f32 reference (kernel uses bf16
    # matmuls with f32 accumulation + approx reciprocal).
    ref = _reference_forward(hidden_state, params,
                             num_heads=num_heads, num_group=num_group)
    err = float(jnp.max(jnp.abs(out.astype(jnp.float32) - ref)))
    ref_scale = float(jnp.max(jnp.abs(ref))) + 1e-6
    assert err <= 0.1 * ref_scale + 1e-2, (
        f"mismatch vs reference: max_err={err}, ref_scale={ref_scale}")

    print("KERNEL_OK")
</pallas_src>

<mosaic_0001>
module attributes {stable_mosaic.version = 11 : i64} {
  func.func @_linear_kernel(%arg0: i32, %arg1: i32, %arg2: i32, %arg3: memref<256x512xbf16, #tpu.memory_space<vmem>>, %arg4: memref<512x512xbf16, #tpu.memory_space<vmem>>, %arg5: memref<1x512xf32, #tpu.memory_space<vmem>>, %arg6: memref<256x512xbf16, #tpu.memory_space<vmem>>, %arg7: memref<256x512xf32, #tpu.memory_space<vmem>>) attributes {dimension_semantics = [#tpu.dimension_semantics<parallel>, #tpu.dimension_semantics<parallel>, #tpu.dimension_semantics<arbitrary>], iteration_bounds = array<i64: 1, 2, 1>, scalar_prefetch = 0 : i64, scratch_operands = 1 : i64, tpu.core_type = #tpu.core_type<tc>, window_params = [{transform_indices = @transform_0, window_bounds = array<i64: 256, 512>}, {transform_indices = @transform_1, window_bounds = array<i64: 512, 512>}, {transform_indices = @transform_2, window_bounds = array<i64: 1, 512>}, {transform_indices = @transform_3, window_bounds = array<i64: 256, 512>}]} {
    %c0_i32 = arith.constant 0 : i32
    %0 = arith.cmpi eq, %arg2, %c0_i32 : i32
    %1 = arith.extui %0 : i1 to i32
    %c0_i32_0 = arith.constant 0 : i32
    %2 = arith.cmpi ne, %1, %c0_i32_0 : i32
    scf.if %2 {
      %cst_10 = arith.constant 0.000000e+00 : f32
      %12 = vector.broadcast %cst_10 : f32 to vector<256x512xf32>
      %c0_11 = arith.constant 0 : index
      %c0_12 = arith.constant 0 : index
      %13 = vector.load %arg7[%c0_11, %c0_12] : memref<256x512xf32, #tpu.memory_space<vmem>>, vector<256x512xf32>
      tpu.vector_store %arg7[%c0_11, %c0_12], %12 {strides = array<i32>} : memref<256x512xf32, #tpu.memory_space<vmem>>, vector<256x512xf32>,
    } else {
    }
    %c0 = arith.constant 0 : index
    %c0_1 = arith.constant 0 : index
    %3 = vector.load %arg7[%c0, %c0_1] : memref<256x512xf32, #tpu.memory_space<vmem>>, vector<256x512xf32>
    %c0_2 = arith.constant 0 : index
    %c0_3 = arith.constant 0 : index
    %4 = vector.load %arg3[%c0_2, %c0_3] : memref<256x512xbf16, #tpu.memory_space<vmem>>, vector<256x512xbf16>
    %c0_4 = arith.constant 0 : index
    %c0_5 = arith.constant 0 : index
    %5 = vector.load %arg4[%c0_4, %c0_5] : memref<512x512xbf16, #tpu.memory_space<vmem>>, vector<512x512xbf16>
    %cst = arith.constant dense<0.000000e+00> : vector<256x512xf32>
    %6 = tpu.matmul %4, %5, %cst {dimension_numbers = #tpu.dot_dimension_numbers<[1], [0], [0], [1], [0, 0, 1, 1], [], []>} : vector<256x512xbf16>, vector<512x512xbf16>, vector<256x512xf32> -> vector<256x512xf32>
    %7 = arith.addf %3, %6 : vector<256x512xf32>
    %c0_6 = arith.constant 0 : index
    %c0_7 = arith.constant 0 : index
    %8 = vector.load %arg7[%c0_6, %c0_7] : memref<256x512xf32, #tpu.memory_space<vmem>>, vector<256x512xf32>
    tpu.vector_store %arg7[%c0_6, %c0_7], %7 {strides = array<i32>} : memref<256x512xf32, #tpu.memory_space<vmem>>, vector<256x512xf32>,
    %c0_i32_8 = arith.constant 0 : i32
    %9 = arith.cmpi eq, %arg2, %c0_i32_8 : i32
    %10 = arith.extui %9 : i1 to i32
    %c0_i32_9 = arith.constant 0 : i32
    %11 = arith.cmpi ne, %10, %c0_i32_9 : i32
    scf.if %11 {
      %c0_10 = arith.constant 0 : index
      %c0_11 = arith.constant 0 : index
      %12 = vector.load %arg7[%c0_10, %c0_11] : memref<256x512xf32, #tpu.memory_space<vmem>>, vector<256x512xf32>
      %c0_12 = arith.constant 0 : index
      %c0_13 = arith.constant 0 : index
      %13 = vector.load %arg5[%c0_12, %c0_13] : memref<1x512xf32, #tpu.memory_space<vmem>>, vector<1x512xf32>
      %14 = vector.broadcast %13 : vector<1x512xf32> to vector<256x512xf32>
      %15 = arith.addf %12, %14 : vector<256x512xf32>
      %16 = arith.truncf %15 : vector<256x512xf32> to vector<256x512xbf16>
      %c0_14 = arith.constant 0 : index
      %c0_15 = arith.constant 0 : index
      %17 = vector.load %arg6[%c0_14, %c0_15] : memref<256x512xbf16, #tpu.memory_space<vmem>>, vector<256x512xbf16>
      tpu.vector_store %arg6[%c0_14, %c0_15], %16 {strides = array<i32>} : memref<256x512xbf16, #tpu.memory_space<vmem>>, vector<256x512xbf16>,
    } else {
    }
    return
  }
  func.func @transform_0(%arg0: i32, %arg1: i32, %arg2: i32) -> (i32, i32) {
    %c0_i32 = arith.constant 0 : i32
    return %arg0, %arg2 : i32, i32
  }
  func.func @transform_1(%arg0: i32, %arg1: i32, %arg2: i32) -> (i32, i32) {
    %c0_i32 = arith.constant 0 : i32
    return %arg2, %arg1 : i32, i32
  }
  func.func @transform_2(%arg0: i32, %arg1: i32, %arg2: i32) -> (i32, i32) {
    %c0_i32 = arith.constant 0 : i32
    %c0_i32_0 = arith.constant 0 : i32
    return %c0_i32, %arg1 : i32, i32
  }
  func.func @transform_3(%arg0: i32, %arg1: i32, %arg2: i32) -> (i32, i32) {
    %c0_i32 = arith.constant 0 : i32
    return %arg0, %arg1 : i32, i32
  }
}

module attributes {stable_mosaic.version = 11 : i64} {
  func.func @_linear_kernel(%arg0: i32, %arg1: i32, %arg2: i32, %arg3: memref<256x512xbf16, #tpu.memory_space<vmem>>, %arg4: memref<512x512xbf16, #tpu.memory_space<vmem>>, %arg5: memref<1x512xf32, #tpu.memory_space<vmem>>, %arg6: memref<256x512xf32, #tpu.memory_space<vmem>>, %arg7: memref<256x512xf32, #tpu.memory_space<vmem>>) attributes {dimension_semantics = [#tpu.dimension_semantics<parallel>, #tpu.dimension_semantics<parallel>, #tpu.dimension_semantics<arbitrary>], iteration_bounds = array<i64: 1, 1, 1>, scalar_prefetch = 0 : i64, scratch_operands = 1 : i64, tpu.core_type = #tpu.core_type<tc>, window_params = [{transform_indices = @transform_0, window_bounds = array<i64: 256, 512>}, {transform_indices = @transform_1, window_bounds = array<i64: 512, 512>}, {transform_indices = @transform_2, window_bounds = array<i64: 1, 512>}, {transform_indices = @transform_3, window_bounds = array<i64: 256, 512>}]} {
    %c0_i32 = arith.constant 0 : i32
    %0 = arith.cmpi eq, %arg2, %c0_i32 : i32
    %1 = arith.extui %0 : i1 to i32
    %c0_i32_0 = arith.constant 0 : i32
    %2 = arith.cmpi ne, %1, %c0_i32_0 : i32
    scf.if %2 {
      %cst_10 = arith.constant 0.000000e+00 : f32
      %12 = vector.broadcast %cst_10 : f32 to vector<256x512xf32>
      %c0_11 = arith.constant 0 : index
      %c0_12 = arith.constant 0 : index
      %13 = vector.load %arg7[%c0_11, %c0_12] : memref<256x512xf32, #tpu.memory_space<vmem>>, vector<256x512xf32>
      tpu.vector_store %arg7[%c0_11, %c0_12], %12 {strides = array<i32>} : memref<256x512xf32, #tpu.memory_space<vmem>>, vector<256x512xf32>,
    } else {
    }
    %c0 = arith.constant 0 : index
    %c0_1 = arith.constant 0 : index
    %3 = vector.load %arg7[%c0, %c0_1] : memref<256x512xf32, #tpu.memory_space<vmem>>, vector<256x512xf32>
    %c0_2 = arith.constant 0 : index
    %c0_3 = arith.constant 0 : index
    %4 = vector.load %arg3[%c0_2, %c0_3] : memref<256x512xbf16, #tpu.memory_space<vmem>>, vector<256x512xbf16>
    %c0_4 = arith.constant 0 : index
    %c0_5 = arith.constant 0 : index
    %5 = vector.load %arg4[%c0_4, %c0_5] : memref<512x512xbf16, #tpu.memory_space<vmem>>, vector<512x512xbf16>
    %cst = arith.constant dense<0.000000e+00> : vector<256x512xf32>
    %6 = tpu.matmul %4, %5, %cst {dimension_numbers = #tpu.dot_dimension_numbers<[1], [0], [0], [1], [0, 0, 1, 1], [], []>} : vector<256x512xbf16>, vector<512x512xbf16>, vector<256x512xf32> -> vector<256x512xf32>
    %7 = arith.addf %3, %6 : vector<256x512xf32>
    %c0_6 = arith.constant 0 : index
    %c0_7 = arith.constant 0 : index
    %8 = vector.load %arg7[%c0_6, %c0_7] : memref<256x512xf32, #tpu.memory_space<vmem>>, vector<256x512xf32>
    tpu.vector_store %arg7[%c0_6, %c0_7], %7 {strides = array<i32>} : memref<256x512xf32, #tpu.memory_space<vmem>>, vector<256x512xf32>,
    %c0_i32_8 = arith.constant 0 : i32
    %9 = arith.cmpi eq, %arg2, %c0_i32_8 : i32
    %10 = arith.extui %9 : i1 to i32
    %c0_i32_9 = arith.constant 0 : i32
    %11 = arith.cmpi ne, %10, %c0_i32_9 : i32
    scf.if %11 {
      %c0_10 = arith.constant 0 : index
      %c0_11 = arith.constant 0 : index
      %12 = vector.load %arg7[%c0_10, %c0_11] : memref<256x512xf32, #tpu.memory_space<vmem>>, vector<256x512xf32>
      %c0_12 = arith.constant 0 : index
      %c0_13 = arith.constant 0 : index
      %13 = vector.load %arg5[%c0_12, %c0_13] : memref<1x512xf32, #tpu.memory_space<vmem>>, vector<1x512xf32>
      %14 = vector.broadcast %13 : vector<1x512xf32> to vector<256x512xf32>
      %15 = arith.addf %12, %14 : vector<256x512xf32>
      %c0_14 = arith.constant 0 : index
      %c0_15 = arith.constant 0 : index
      %16 = vector.load %arg6[%c0_14, %c0_15] : memref<256x512xf32, #tpu.memory_space<vmem>>, vector<256x512xf32>
      tpu.vector_store %arg6[%c0_14, %c0_15], %15 {strides = array<i32>} : memref<256x512xf32, #tpu.memory_space<vmem>>, vector<256x512xf32>,
    } else {
    }
    return
  }
  func.func @transform_0(%arg0: i32, %arg1: i32, %arg2: i32) -> (i32, i32) {
    %c0_i32 = arith.constant 0 : i32
    return %arg0, %arg2 : i32, i32
  }
  func.func @transform_1(%arg0: i32, %arg1: i32, %arg2: i32) -> (i32, i32) {
    %c0_i32 = arith.constant 0 : i32
    return %arg2, %arg1 : i32, i32
  }
  func.func @transform_2(%arg0: i32, %arg1: i32, %arg2: i32) -> (i32, i32) {
    %c0_i32 = arith.constant 0 : i32
    %c0_i32_0 = arith.constant 0 : i32
    return %c0_i32, %arg1 : i32, i32
  }
  func.func @transform_3(%arg0: i32, %arg1: i32, %arg2: i32) -> (i32, i32) {
    %c0_i32 = arith.constant 0 : i32
    return %arg0, %arg1 : i32, i32
  }
}

module attributes {stable_mosaic.version = 11 : i64} {
  func.func @_attn_kernel(%arg0: i32, %arg1: i32, %arg2: i32, %arg3: i32, %arg4: memref<1x128x256xbf16, #tpu.memory_space<vmem>>, %arg5: memref<1x128x128xbf16, #tpu.memory_space<vmem>>, %arg6: memref<1x128x128xbf16, #tpu.memory_space<vmem>>, %arg7: memref<1x128x256xbf16, #tpu.memory_space<vmem>>, %arg8: memref<2x128x1xf32, #tpu.memory_space<vmem>>, %arg9: memref<2x128x1xf32, #tpu.memory_space<vmem>>, %arg10: memref<128x256xf32, #tpu.memory_space<vmem>>) attributes {dimension_semantics = [#tpu.dimension_semantics<parallel>, #tpu.dimension_semantics<parallel>, #tpu.dimension_semantics<parallel>, #tpu.dimension_semantics<arbitrary>], iteration_bounds = array<i64: 2, 2, 1, 1>, scalar_prefetch = 0 : i64, scratch_operands = 3 : i64, tpu.core_type = #tpu.core_type<tc>, window_params = [{transform_indices = @transform_0, window_bounds = array<i64: 1, 128, 256>}, {transform_indices = @transform_1, window_bounds = array<i64: 1, 128, 128>}, {transform_indices = @transform_2, window_bounds = array<i64: 1, 128, 128>}, {transform_indices = @transform_3, window_bounds = array<i64: 1, 128, 256>}]} {
    %c0_i32 = arith.constant 0 : i32
    %0 = arith.cmpi eq, %arg3, %c0_i32 : i32
    %1 = arith.extui %0 : i1 to i32
    %c0_i32_0 = arith.constant 0 : i32
    %2 = arith.cmpi ne, %1, %c0_i32_0 : i32
    scf.if %2 {
      %cst_57 = arith.constant 0xFF800000 : f32
      %78 = vector.broadcast %cst_57 : f32 to vector<2x128x1xf32>
      %c0_58 = arith.constant 0 : index
      %c0_59 = arith.constant 0 : index
      %c0_60 = arith.constant 0 : index
      %79 = vector.load %arg8[%c0_58, %c0_59, %c0_60] : memref<2x128x1xf32, #tpu.memory_space<vmem>>, vector<2x128x1xf32>
      tpu.vector_store %arg8[%c0_58, %c0_59, %c0_60], %78 {strides = array<i32>} : memref<2x128x1xf32, #tpu.memory_space<vmem>>, vector<2x128x1xf32>,
      %cst_61 = arith.constant 0.000000e+00 : f32
      %80 = vector.broadcast %cst_61 : f32 to vector<2x128x1xf32>
      %c0_62 = arith.constant 0 : index
      %c0_63 = arith.constant 0 : index
      %c0_64 = arith.constant 0 : index
      %81 = vector.load %arg9[%c0_62, %c0_63, %c0_64] : memref<2x128x1xf32, #tpu.memory_space<vmem>>, vector<2x128x1xf32>
      tpu.vector_store %arg9[%c0_62, %c0_63, %c0_64], %80 {strides = array<i32>} : memref<2x128x1xf32, #tpu.memory_space<vmem>>, vector<2x128x1xf32>,
      %cst_65 = arith.constant 0.000000e+00 : f32
      %82 = vector.broadcast %cst_65 : f32 to vector<128x256xf32>
      %c0_66 = arith.constant 0 : index
      %c0_67 = arith.constant 0 : index
      %83 = vector.load %arg10[%c0_66, %c0_67] : memref<128x256xf32, #tpu.memory_space<vmem>>, vector<128x256xf32>
      tpu.vector_store %arg10[%c0_66, %c0_67], %82 {strides = array<i32>} : memref<128x256xf32, #tpu.memory_space<vmem>>, vector<128x256xf32>,
    } else {
    }
    %c0 = arith.constant 0 : index
    %c0_1 = arith.constant 0 : index
    %c0_2 = arith.constant 0 : index
    %3 = vector.load %arg4[%c0, %c0_1, %c0_2] : memref<1x128x256xbf16, #tpu.memory_space<vmem>>, vector<1x128x128xbf16>
    %4 = vector.shape_cast %3 : vector<1x128x128xbf16> to vector<128x128xbf16>
    %c0_3 = arith.constant 0 : index
    %c0_4 = arith.constant 0 : index
    %c0_5 = arith.constant 0 : index
    %5 = vector.load %arg5[%c0_3, %c0_4, %c0_5] : memref<1x128x128xbf16, #tpu.memory_space<vmem>>, vector<1x128x128xbf16>
    %6 = vector.shape_cast %5 : vector<1x128x128xbf16> to vector<128x128xbf16>
    %cst = arith.constant dense<0.000000e+00> : vector<128x128xf32>
    %7 = tpu.matmul %4, %6, %cst {dimension_numbers = #tpu.dot_dimension_numbers<[1], [1], [0], [0], [0, 0, 1, 0], [], []>} : vector<128x128xbf16>, vector<128x128xbf16>, vector<128x128xf32> -> vector<128x128xf32>
    %c0_6 = arith.constant 0 : index
    %c0_7 = arith.constant 0 : index
    %c0_8 = arith.constant 0 : index
    %8 = vector.load %arg8[%c0_6, %c0_7, %c0_8] : memref<2x128x1xf32, #tpu.memory_space<vmem>>, vector<1x128x1xf32>
    %9 = vector.shape_cast %8 : vector<1x128x1xf32> to vector<128x1xf32>
    %c0_9 = arith.constant 0 : index
    %c0_10 = arith.constant 0 : index
    %c0_11 = arith.constant 0 : index
    %10 = vector.load %arg9[%c0_9, %c0_10, %c0_11] : memref<2x128x1xf32, #tpu.memory_space<vmem>>, vector<1x128x1xf32>
    %11 = vector.shape_cast %10 : vector<1x128x1xf32> to vector<128x1xf32>
    %cst_12 = arith.constant dense<0xFF800000> : vector<128xf32>
    %12 = vector.multi_reduction <maximumf>, %7, %cst_12 [1] : vector<128x128xf32> to vector<128xf32>
    %13 = vector.shape_cast %12 : vector<128xf32> to vector<128x1xf32>
    %14 = arith.maximumf %9, %13 : vector<128x1xf32>
    %15 = arith.subf %9, %14 : vector<128x1xf32>
    %16 = math.exp %15 : vector<128x1xf32>
    %17 = vector.broadcast %14 : vector<128x1xf32> to vector<128x128xf32>
    %18 = arith.subf %7, %17 : vector<128x128xf32>
    %19 = math.exp %18 : vector<128x128xf32>
    %20 = arith.mulf %16, %11 : vector<128x1xf32>
    %cst_13 = arith.constant dense<0.000000e+00> : vector<128xf32>
    %21 = vector.multi_reduction <add>, %19, %cst_13 [1] : vector<128x128xf32> to vector<128xf32>
    %22 = vector.shape_cast %21 : vector<128xf32> to vector<128x1xf32>
    %23 = arith.addf %20, %22 : vector<128x1xf32>
    %c0_14 = arith.constant 0 : index
    %c0_15 = arith.constant 0 : index
    %c0_16 = arith.constant 0 : index
    %24 = vector.load %arg9[%c0_14, %c0_15, %c0_16] : memref<2x128x1xf32, #tpu.memory_space<vmem>>, vector<1x128x1xf32>
    %25 = vector.shape_cast %24 : vector<1x128x1xf32> to vector<128x1xf32>
    %26 = vector.shape_cast %23 : vector<128x1xf32> to vector<1x128x1xf32>
    tpu.vector_store %arg9[%c0_14, %c0_15, %c0_16], %26 {strides = array<i32>} : memref<2x128x1xf32, #tpu.memory_space<vmem>>, vector<1x128x1xf32>,
    %c0_17 = arith.constant 0 : index
    %c0_18 = arith.constant 0 : index
    %27 = vector.load %arg10[%c0_17, %c0_18] : memref<128x256xf32, #tpu.memory_space<vmem>>, vector<128x128xf32>
    %28 = vector.broadcast %16 : vector<128x1xf32> to vector<128x128xf32>
    %29 = arith.mulf %28, %27 : vector<128x128xf32>
    %30 = arith.truncf %19 : vector<128x128xf32> to vector<128x128xbf16>
    %c0_19 = arith.constant 0 : index
    %c0_20 = arith.constant 0 : index
    %c0_21 = arith.constant 0 : index
    %31 = vector.load %arg6[%c0_19, %c0_20, %c0_21] : memref<1x128x128xbf16, #tpu.memory_space<vmem>>, vector<1x128x128xbf16>
    %32 = vector.shape_cast %31 : vector<1x128x128xbf16> to vector<128x128xbf16>
    %cst_22 = arith.constant dense<0.000000e+00> : vector<128x128xf32>
    %33 = tpu.matmul %30, %32, %cst_22 {dimension_numbers = #tpu.dot_dimension_numbers<[1], [0], [0], [1], [0, 0, 1, 1], [], []>} : vector<128x128xbf16>, vector<128x128xbf16>, vector<128x128xf32> -> vector<128x128xf32>
    %34 = arith.addf %29, %33 : vector<128x128xf32>
    %c0_23 = arith.constant 0 : index
    %c0_24 = arith.constant 0 : index
    %35 = vector.load %arg10[%c0_23, %c0_24] : memref<128x256xf32, #tpu.memory_space<vmem>>, vector<128x128xf32>
    tpu.vector_store %arg10[%c0_23, %c0_24], %34 {strides = array<i32>} : memref<128x256xf32, #tpu.memory_space<vmem>>, vector<128x128xf32>,
    %c0_25 = arith.constant 0 : index
    %c0_26 = arith.constant 0 : index
    %c0_27 = arith.constant 0 : index
    %36 = vector.load %arg8[%c0_25, %c0_26, %c0_27] : memref<2x128x1xf32, #tpu.memory_space<vmem>>, vector<1x128x1xf32>
    %37 = vector.shape_cast %36 : vector<1x128x1xf32> to vector<128x1xf32>
    %38 = vector.shape_cast %14 : vector<128x1xf32> to vector<1x128x1xf32>
    tpu.vector_store %arg8[%c0_25, %c0_26, %c0_27], %38 {strides = array<i32>} : memref<2x128x1xf32, #tpu.memory_space<vmem>>, vector<1x128x1xf32>,
    %c0_28 = arith.constant 0 : index
    %c0_29 = arith.constant 0 : index
    %c128 = arith.constant 128 : index
    %39 = vector.load %arg4[%c0_28, %c0_29, %c128] : memref<1x128x256xbf16, #tpu.memory_space<vmem>>, vector<1x128x128xbf16>
    %40 = vector.shape_cast %39 : vector<1x128x128xbf16> to vector<128x128xbf16>
    %c0_30 = arith.constant 0 : index
    %c0_31 = arith.constant 0 : index
    %c0_32 = arith.constant 0 : index
    %41 = vector.load %arg5[%c0_30, %c0_31, %c0_32] : memref<1x128x128xbf16, #tpu.memory_space<vmem>>, vector<1x128x128xbf16>
    %42 = vector.shape_cast %41 : vector<1x128x128xbf16> to vector<128x128xbf16>
    %cst_33 = arith.constant dense<0.000000e+00> : vector<128x128xf32>
    %43 = tpu.matmul %40, %42, %cst_33 {dimension_numbers = #tpu.dot_dimension_numbers<[1], [1], [0], [0], [0, 0, 1, 0], [], []>} : vector<128x128xbf16>, vector<128x128xbf16>, vector<128x128xf32> -> vector<128x128xf32>
    %c1 = arith.constant 1 : index
    %c0_34 = arith.constant 0 : index
    %c0_35 = arith.constant 0 : index
    %44 = vector.load %arg8[%c1, %c0_34, %c0_35] : memref<2x128x1xf32, #tpu.memory_space<vmem>>, vector<1x128x1xf32>
    %45 = vector.shape_cast %44 : vector<1x128x1xf32> to vector<128x1xf32>
    %c1_36 = arith.constant 1 : index
    %c0_37 = arith.constant 0 : index
    %c0_38 = arith.constant 0 : index
    %46 = vector.load %arg9[%c1_36, %c0_37, %c0_38] : memref<2x128x1xf32, #tpu.memory_space<vmem>>, vector<1x128x1xf32>
    %47 = vector.shape_cast %46 : vector<1x128x1xf32> to vector<128x1xf32>
    %cst_39 = arith.constant dense<0xFF800000> : vector<128xf32>
    %48 = vector.multi_reduction <maximumf>, %43, %cst_39 [1] : vector<128x128xf32> to vector<128xf32>
    %49 = vector.shape_cast %48 : vector<128xf32> to vector<128x1xf32>
    %50 = arith.maximumf %45, %49 : vector<128x1xf32>
    %51 = arith.subf %45, %50 : vector<128x1xf32>
    %52 = math.exp %51 : vector<128x1xf32>
    %53 = vector.broadcast %50 : vector<128x1xf32> to vector<128x128xf32>
    %54 = arith.subf %43, %53 : vector<128x128xf32>
    %55 = math.exp %54 : vector<128x128xf32>
    %56 = arith.mulf %52, %47 : vector<128x1xf32>
    %cst_40 = arith.constant dense<0.000000e+00> : vector<128xf32>
    %57 = vector.multi_reduction <add>, %55, %cst_40 [1] : vector<128x128xf32> to vector<128xf32>
    %58 = vector.shape_cast %57 : vector<128xf32> to vector<128x1xf32>
    %59 = arith.addf %56, %58 : vector<128x1xf32>
    %c1_41 = arith.constant 1 : index
    %c0_42 = arith.constant 0 : index
    %c0_43 = arith.constant 0 : index
    %60 = vector.load %arg9[%c1_41, %c0_42, %c0_43] : memref<2x128x1xf32, #tpu.memory_space<vmem>>, vector<1x128x1xf32>
    %61 = vector.shape_cast %60 : vector<1x128x1xf32> to vector<128x1xf32>
    %62 = vector.shape_cast %59 : vector<128x1xf32> to vector<1x128x1xf32>
    tpu.vector_store %arg9[%c1_41, %c0_42, %c0_43], %62 {strides = array<i32>} : memref<2x128x1xf32, #tpu.memory_space<vmem>>, vector<1x128x1xf32>,
    %c0_44 = arith.constant 0 : index
    %c128_45 = arith.constant 128 : index
    %63 = vector.load %arg10[%c0_44, %c128_45] : memref<128x256xf32, #tpu.memory_space<vmem>>, vector<128x128xf32>
    %64 = vector.broadcast %52 : vector<128x1xf32> to vector<128x128xf32>
    %65 = arith.mulf %64, %63 : vector<128x128xf32>
    %66 = arith.truncf %55 : vector<128x128xf32> to vector<128x128xbf16>
    %c0_46 = arith.constant 0 : index
    %c0_47 = arith.constant 0 : index
    %c0_48 = arith.constant 0 : index
    %67 = vector.load %arg6[%c0_46, %c0_47, %c0_48] : memref<1x128x128xbf16, #tpu.memory_space<vmem>>, vector<1x128x128xbf16>
    %68 = vector.shape_cast %67 : vector<1x128x128xbf16> to vector<128x128xbf16>
    %cst_49 = arith.constant dense<0.000000e+00> : vector<128x128xf32>
    %69 = tpu.matmul %66, %68, %cst_49 {dimension_numbers = #tpu.dot_dimension_numbers<[1], [0], [0], [1], [0, 0, 1, 1], [], []>} : vector<128x128xbf16>, vector<128x128xbf16>, vector<128x128xf32> -> vector<128x128xf32>
    %70 = arith.addf %65, %69 : vector<128x128xf32>
    %c0_50 = arith.constant 0 : index
    %c128_51 = arith.constant 128 : index
    %71 = vector.load %arg10[%c0_50, %c128_51] : memref<128x256xf32, #tpu.memory_space<vmem>>, vector<128x128xf32>
    tpu.vector_store %arg10[%c0_50, %c128_51], %70 {strides = array<i32>} : memref<128x256xf32, #tpu.memory_space<vmem>>, vector<128x128xf32>,
    %c1_52 = arith.constant 1 : index
    %c0_53 = arith.constant 0 : index
    %c0_54 = arith.constant 0 : index
    %72 = vector.load %arg8[%c1_52, %c0_53, %c0_54] : memref<2x128x1xf32, #tpu.memory_space<vmem>>, vector<1x128x1xf32>
    %73 = vector.shape_cast %72 : vector<1x128x1xf32> to vector<128x1xf32>
    %74 = vector.shape_cast %50 : vector<128x1xf32> to vector<1x128x1xf32>
    tpu.vector_store %arg8[%c1_52, %c0_53, %c0_54], %74 {strides = array<i32>} : memref<2x128x1xf32, #tpu.memory_space<vmem>>, vector<1x128x1xf32>,
    %c0_i32_55 = arith.constant 0 : i32
    %75 = arith.cmpi eq, %arg3, %c0_i32_55 : i32
    %76 = arith.extui %75 : i1 to i32
    %c0_i32_56 = arith.constant 0 : i32
    %77 = arith.cmpi ne, %76, %c0_i32_56 : i32
    scf.if %77 {
      %c0_57 = arith.constant 0 : index
      %c0_58 = arith.constant 0 : index
      %c0_59 = arith.constant 0 : index
      %78 = vector.load %arg9[%c0_57, %c0_58, %c0_59] : memref<2x128x1xf32, #tpu.memory_space<vmem>>, vector<1x128x1xf32>
      %79 = vector.shape_cast %78 : vector<1x128x1xf32> to vector<128x1xf32>
      %80 = tpu.reciprocal %79 {approx = true} : vector<128x1xf32> -> vector<128x1xf32>
      %c0_60 = arith.constant 0 : index
      %c0_61 = arith.constant 0 : index
      %81 = vector.load %arg10[%c0_60, %c0_61] : memref<128x256xf32, #tpu.memory_space<vmem>>, vector<128x128xf32>
      %82 = vector.broadcast %80 : vector<128x1xf32> to vector<128x128xf32>
      %83 = arith.mulf %81, %82 : vector<128x128xf32>
      %c0_62 = arith.constant 0 : index
      %c0_63 = arith.constant 0 : index
      %84 = vector.load %arg10[%c0_62, %c0_63] : memref<128x256xf32, #tpu.memory_space<vmem>>, vector<128x128xf32>
      tpu.vector_store %arg10[%c0_62, %c0_63], %83 {strides = array<i32>} : memref<128x256xf32, #tpu.memory_space<vmem>>, vector<128x128xf32>,
      %c1_64 = arith.constant 1 : index
      %c0_65 = arith.constant 0 : index
      %c0_66 = arith.constant 0 : index
      %85 = vector.load %arg9[%c1_64, %c0_65, %c0_66] : memref<2x128x1xf32, #tpu.memory_space<vmem>>, vector<1x128x1xf32>
      %86 = vector.shape_cast %85 : vector<1x128x1xf32> to vector<128x1xf32>
      %87 = tpu.reciprocal %86 {approx = true} : vector<128x1xf32> -> vector<128x1xf32>
      %c0_67 = arith.constant 0 : index
      %c128_68 = arith.constant 128 : index
      %88 = vector.load %arg10[%c0_67, %c128_68] : memref<128x256xf32, #tpu.memory_space<vmem>>, vector<128x128xf32>
      %89 = vector.broadcast %87 : vector<128x1xf32> to vector<128x128xf32>
      %90 = arith.mulf %88, %89 : vector<128x128xf32>
      %c0_69 = arith.constant 0 : index
      %c128_70 = arith.constant 128 : index
      %91 = vector.load %arg10[%c0_69, %c128_70] : memref<128x256xf32, #tpu.memory_space<vmem>>, vector<128x128xf32>
      tpu.vector_store %arg10[%c0_69, %c128_70], %90 {strides = array<i32>} : memref<128x256xf32, #tpu.memory_space<vmem>>, vector<128x128xf32>,
      %c0_71 = arith.constant 0 : index
      %c0_72 = arith.constant 0 : index
      %92 = vector.load %arg10[%c0_71, %c0_72] : memref<128x256xf32, #tpu.memory_space<vmem>>, vector<128x256xf32>
      %93 = arith.truncf %92 : vector<128x256xf32> to vector<128x256xbf16>
      %c0_73 = arith.constant 0 : index
      %c0_74 = arith.constant 0 : index
      %c0_75 = arith.constant 0 : index
      %94 = vector.load %arg7[%c0_73, %c0_74, %c0_75] : memref<1x128x256xbf16, #tpu.memory_space<vmem>>, vector<1x128x256xbf16>
      %95 = vector.shape_cast %94 : vector<1x128x256xbf16> to vector<128x256xbf16>
      %96 = vector.shape_cast %93 : vector<128x256xbf16> to vector<1x128x256xbf16>
      tpu.vector_store %arg7[%c0_73, %c0_74, %c0_75], %96 {strides = array<i32>} : memref<1x128x256xbf16, #tpu.memory_space<vmem>>, vector<1x128x256xbf16>,
    } else {
    }
    return
  }
  func.func @transform_0(%arg0: i32, %arg1: i32, %arg2: i32, %arg3: i32) -> (i32, i32, i32) {
    %c0_i32 = arith.constant 0 : i32
    return %arg0, %arg2, %arg1 : i32, i32, i32
  }
  func.func @transform_1(%arg0: i32, %arg1: i32, %arg2: i32, %arg3: i32) -> (i32, i32, i32) {
    %c4_i32 = arith.constant 4 : i32
    %0 = arith.addi %c4_i32, %arg1 : i32
    %c0_i32 = arith.constant 0 : i32
    return %arg0, %arg3, %0 : i32, i32, i32
  }
  func.func @transform_2(%arg0: i32, %arg1: i32, %arg2: i32, %arg3: i32) -> (i32, i32, i32) {
    %c6_i32 = arith.constant 6 : i32
    %0 = arith.addi %c6_i32, %arg1 : i32
    %c0_i32 = arith.constant 0 : i32
    return %arg0, %arg3, %0 : i32, i32, i32
  }
  func.func @transform_3(%arg0: i32, %arg1: i32, %arg2: i32, %arg3: i32) -> (i32, i32, i32) {
    %c0_i32 = arith.constant 0 : i32
    return %arg0, %arg2, %arg1 : i32, i32, i32
  }
}

</mosaic_0001>

<bundles_post_ra>
// kernel: gqa_forward.4
= control target key start
LH: loop header
LB: loop body
LE: loop exit
PB: predicated region body
PF: predicated region fallthrough
CT: control target
= control target key end

     0   :  { %s5182_s0 = inlined_call_operand.vmem [shape: bf16[2,128,1024], index: 0, kind: input, shape index: {}, may-alias: {0,1,2}]   ;;  %s5183_s1 = inlined_call_operand.vmem [shape: bf16[2,128,1024], index: 1, kind: input, shape index: {}, may-alias: {0,1,2}]   ;;  %s5184_s2 = inlined_call_operand.vmem [shape: bf16[2,128,1024], index: 2, kind: input, shape index: {}, may-alias: {0,1,2}]   ;;  %s5185_s3 = inlined_call_operand.vmem [shape: bf16[2,128,512], index: 3, kind: output, shape index: {}]  }
   0x1   :  { %5187 = sst [smem:[#allocation22_spill]] %s5185_s3 }
   0x2   :  { %s3935_s12 = smov 0   ;;  %s3937_s13 = smov 0  }
   0x3   :  { %s3939_s14 = smov 0   ;;  %s3941_s15 = smov 0  }
   0x4   :  { %s3943_s16 = smov 0   ;;  %s3945_s17 = smov 0  }
   0x5   :  { %s3947_s18 = smov 0   ;;  %s3949_s19 = smov 0  }
   0x6   :  { %s3951_s20 = smov 0   ;;  %s3953_s21 = smov 0  }
   0x7   :  { %s3955_s22 = smov 0  }
   0x8 LB: > { %s35_s24 = sadd.s32 1, %s3902_s20  ;;  %s39_s25 = sadd.s32 1, %s3906_s21  ;;  %s3910_s22 = sphi %s3955_s22, %s13_s22   ;;  %s3906_s21 = sphi %s3953_s21, %s5231_s21   ;;  %s3902_s20 = sphi %s3951_s20, %s5230_s20   ;;  %s3898_s19 = sphi %s3949_s19, %s5229_s19   ;;  %s3894_s18 = sphi %s3947_s18, %s5228_s18   ;;  %s3890_s17 = sphi %s3945_s17, %s5227_s17   ;;  %s3886_s16 = sphi %s3943_s16, %s5226_s16   ;;  %s3882_s15 = sphi %s3941_s15, %s5225_s15   ;;  %s3878_s14 = sphi %s3939_s14, %s5224_s14   ;;  %s3874_s13 = sphi %s3937_s13, %s5223_s13   ;;  %s3870_s12 = sphi %s3935_s12, %s5222_s12  }
   0x9   : > { %p37_p0 = scmp.ge.s32.totalorder %s35_s24, 2  ;;  %s50_s26 = sadd.s32 1, %s3890_s17 }
   0xa   : > { %p57_p1 = scmp.ne.s32.totalorder %s3890_s17, %s3886_s16  ;;  %p58_p2 = scmp.eq.s32.totalorder %s3910_s22, 0 }
   0xb   : > { %s5233_s24 = smov (%p37_p0, %s35_s24), 0  ;;  %s5235_s25 = smov (!%p37_p0, %s39_s25), %s3906_s21 }
   0xc   : > { %s46_s27 = ssub.s32 %s3902_s20, %s5233_s24  ;;  %p41_p3 = scmp.ge.s32.totalorder %s5235_s25, 2 }
   0xd   : > { %s73_s28 = sadd.s32 4, %s3902_s20  ;;  %p4008_p4 = por %p58_p2, %p57_p1 }
   0xe   : > { %s74_s30 = sadd.s32 4, %s5233_s24  ;;  %s5237_s25 = smov (%p41_p3, %s5235_s25), 0 }
   0xf   : > { %5189 = sst [smem:[#allocation9_spill]] %s5237_s25  ;;  %s78_s4 = ssub.s32 %s73_s28, %s74_s30 }
  0x10   : > { %s82_s5 = sadd.s32 1, %s3882_s15  ;;  %s43_s6 = ssub.s32 %s3906_s21, %s5237_s25 }
  0x11   : > { %p89_p5 = scmp.ne.s32.totalorder %s3882_s15, %s3878_s14  ;;  %s47_s7 = sor.u32 %s46_s27, %s43_s6 }
  0x12   : > { %s79_s8 = sor.u32 %s78_s4, %s43_s6  ;;  %p48_p6 = scmp.eq.s32.totalorder %s47_s7, 0 }
  0x13   : > { %p80_p7 = scmp.eq.s32.totalorder %s79_s8, 0  ;;  %p4022_p8 = por %p89_p5, %p58_p2 }
  0x14   : > { %s105_s10 = sadd.s32 6, %s3902_s20  ;;  %s106_s30 = sadd.s32 6, %s5233_s24 }
  0x15   : > { %s4028_s11 = scalar_select %p48_p6, %s3890_s17, %s50_s26  }
  0x16   : > { %s4031_s28 = scalar_select %p80_p7, %s3882_s15, %s82_s5  }
  0x17   : > { %s114_s23 = sadd.s32 1, %s3874_s13  ;;  %s110_s25 = ssub.s32 %s105_s10, %s106_s30 }
  0x18   : > { %p121_p9 = scmp.ne.s32.totalorder %s3874_s13, %s3870_s12  ;;  %s111_s27 = sor.u32 %s110_s25, %s43_s6 }
  0x19   : > { %s5191_s3 = sadd.s32 4294967295, %s3910_s22   ;;  %p112_p11 = scmp.eq.s32.totalorder %s111_s27, 0 }
  0x1a   : > { %p155_p10 = scmp.eq.s32.totalorder %s5191_s3, 3  ;;  %p4041_p12 = por %p121_p9, %p58_p2 }
  0x1b   : > { %s4053_s26 = scalar_select %p112_p11, %s3874_s13, %s114_s23  }
  0x1c   : > { %p4048_p13 = por %p155_p10, %p57_p1  ;;  %p3165_p0 = scmp.ge.s32.totalorder %s3910_s22, 4 }
  0x1e   : > { %177 = sbr.rel (%p3165_p0) target bundleno = 104 (0x68), region = 16 }
  0x25   : > { %180 = sbr.rel (!%p4008_p4) target bundleno = 60 (0x3c), region = 20  ;;  %s182_s3 = sand.u32 (%p4008_p4), 1, %s3890_s17  }
  0x26   : > { %s3167_s25 = sshll.u32 (%p4008_p4), %s3902_s20, 1  ;;  %s3166_s5 = sshll.u32 (%p4008_p4), %s182_s3, 7 }
  0x27   : > { %s3168_s6 = sshll.u32 (%p4008_p4), %s3906_s21, 7  ;;  %s184_s29 = scalar_lea.vmem (%p4008_p4), [#allocation5], %s3166_s5 }
  0x28   : > { %s190_s8 = sadd.s32 (%p4008_p4), %s3168_s6, %s3167_s25 }
  0x29   : > { %s3169_s10 = sshll.u32 (%p4008_p4), %s190_s8, 2 }
  0x2a   : > { %s4064_s23 = scalar_lea.vmem (%p4008_p4), %s5182_s0, %s3169_s10 }
  0x2b   : > { %v250_v0 = vld [vmem:[%s4064_s23] sm:$0xff] (%p4008_p4) }
  0x2c   : > { %v252_v1 = vld [vmem:[%s4064_s23 + $0x20] sm:$0xff]  ;;  %251 = vst [vmem:[%s184_s29] sm:$0xff] %v250_v0 }
  0x2d   : > { %v254_v2 = vld [vmem:[%s4064_s23 + $0x40] sm:$0xff]  ;;  %253 = vst [vmem:[%s184_s29 + $0x8] sm:$0xff] %v252_v1 }
  0x2e   : > { %255 = vst [vmem:[%s184_s29 + $0x10] sm:$0xff] %v254_v2  ;;  %v256_v3 = vld [vmem:[%s4064_s23 + $0x60] sm:$0xff] }
  0x2f   : > { %v258_v4 = vld [vmem:[%s4064_s23 + $0x80] sm:$0xff]  ;;  %257 = vst [vmem:[%s184_s29 + $0x18] sm:$0xff] %v256_v3 }
  0x30   : > { %v260_v5 = vld [vmem:[%s4064_s23 + $0xa0] sm:$0xff]  ;;  %259 = vst [vmem:[%s184_s29 + $0x20] sm:$0xff] %v258_v4 }
  0x31   : > { %261 = vst [vmem:[%s184_s29 + $0x28] sm:$0xff] %v260_v5  ;;  %v262_v6 = vld [vmem:[%s4064_s23 + $0xc0] sm:$0xff] }
  0x32   : > { %v264_v7 = vld [vmem:[%s4064_s23 + $0xe0] sm:$0xff]  ;;  %263 = vst [vmem:[%s184_s29 + $0x30] sm:$0xff] %v262_v6 }
  0x33   : > { %v266_v8 = vld [vmem:[%s4064_s23 + $0x100] sm:$0xff]  ;;  %265 = vst [vmem:[%s184_s29 + $0x38] sm:$0xff] %v264_v7 }
  0x34   : > { %267 = vst [vmem:[%s184_s29 + $0x40] sm:$0xff] %v266_v8  ;;  %v268_v9 = vld [vmem:[%s4064_s23 + $0x120] sm:$0xff] }
  0x35   : > { %v270_v10 = vld [vmem:[%s4064_s23 + $0x140] sm:$0xff]  ;;  %269 = vst [vmem:[%s184_s29 + $0x48] sm:$0xff] %v268_v9 }
  0x36   : > { %v272_v11 = vld [vmem:[%s4064_s23 + $0x160] sm:$0xff]  ;;  %271 = vst [vmem:[%s184_s29 + $0x50] sm:$0xff] %v270_v10 }
  0x37   : > { %273 = vst [vmem:[%s184_s29 + $0x58] sm:$0xff] %v272_v11  ;;  %v274_v12 = vld [vmem:[%s4064_s23 + $0x180] sm:$0xff] }
  0x38   : > { %v276_v13 = vld [vmem:[%s4064_s23 + $0x1a0] sm:$0xff]  ;;  %275 = vst [vmem:[%s184_s29 + $0x60] sm:$0xff] %v274_v12 }
  0x39   : > { %v278_v14 = vld [vmem:[%s4064_s23 + $0x1c0] sm:$0xff]  ;;  %277 = vst [vmem:[%s184_s29 + $0x68] sm:$0xff] %v276_v13 }
  0x3a   : > { %279 = vst [vmem:[%s184_s29 + $0x70] sm:$0xff] %v278_v14  ;;  %v280_v15 = vld [vmem:[%s4064_s23 + $0x1e0] sm:$0xff] }
  0x3b   : > { %281 = vst [vmem:[%s184_s29 + $0x78] sm:$0xff] %v280_v15 }
  0x3c PF: > { %287 = sbr.rel (!%p4022_p8) target bundleno = 82 (0x52), region = 58  ;;  %s289_s3 = sand.u32 (%p4022_p8), 1, %s3882_s15  }
  0x3d   : > { %s3171_s25 = sshll.u32 (%p4022_p8), %s3906_s21, 7  ;;  %s3170_s5 = sshll.u32 (%p4022_p8), %s289_s3, 6 }
  0x3e   : > { %s3058_s6 = sadd.s32 (%p4022_p8), %s3902_s20, %s3171_s25  ;;  %s291_s9 = scalar_lea.vmem (%p4022_p8), [#allocation6], %s3170_s5 }
  0x3f   : > { %s3172_s8 = sshll.u32 (%p4022_p8), %s3058_s6, 2 }
  0x40   : > { %s4090_s27 = scalar_lea.vmem (%p4022_p8), %s5183_s1, %s3172_s8 }
  0x41   : > { %v3173_v16 = vld [vmem:[%s4090_s27 + $0x10] sm:$0xf] (%p4022_p8) }
  0x42   : > { %v3174_v17 = vld [vmem:[%s4090_s27 + $0x30] sm:$0xf] (%p4022_p8)  ;;  %316 = vst [vmem:[%s291_s9] sm:$0xf] (%p4022_p8), %v3173_v16 }
  0x43   : > { %v3175_v18 = vld [vmem:[%s4090_s27 + $0x50] sm:$0xf]  ;;  %318 = vst [vmem:[%s291_s9 + $0x4] sm:$0xf] %v3174_v17 }
  0x44   : > { %320 = vst [vmem:[%s291_s9 + $0x8] sm:$0xf] %v3175_v18  ;;  %v3176_v19 = vld [vmem:[%s4090_s27 + $0x70] sm:$0xf] }
  0x45   : > { %v3177_v20 = vld [vmem:[%s4090_s27 + $0x90] sm:$0xf]  ;;  %322 = vst [vmem:[%s291_s9 + $0xc] sm:$0xf] %v3176_v19 }
  0x46   : > { %v3178_v21 = vld [vmem:[%s4090_s27 + $0xb0] sm:$0xf]  ;;  %324 = vst [vmem:[%s291_s9 + $0x10] sm:$0xf] %v3177_v20 }
  0x47   : > { %326 = vst [vmem:[%s291_s9 + $0x14] sm:$0xf] %v3178_v21  ;;  %v3179_v22 = vld [vmem:[%s4090_s27 + $0xd0] sm:$0xf] }
  0x48   : > { %v3180_v23 = vld [vmem:[%s4090_s27 + $0xf0] sm:$0xf]  ;;  %328 = vst [vmem:[%s291_s9 + $0x18] sm:$0xf] %v3179_v22 }
  0x49   : > { %v3181_v24 = vld [vmem:[%s4090_s27 + $0x110] sm:$0xf]  ;;  %330 = vst [vmem:[%s291_s9 + $0x1c] sm:$0xf] %v3180_v23 }
  0x4a   : > { %332 = vst [vmem:[%s291_s9 + $0x20] sm:$0xf] %v3181_v24  ;;  %v3182_v25 = vld [vmem:[%s4090_s27 + $0x130] sm:$0xf] }
  0x4b   : > { %v3183_v26 = vld [vmem:[%s4090_s27 + $0x150] sm:$0xf]  ;;  %334 = vst [vmem:[%s291_s9 + $0x24] sm:$0xf] %v3182_v25 }
  0x4c   : > { %v3184_v27 = vld [vmem:[%s4090_s27 + $0x170] sm:$0xf]  ;;  %336 = vst [vmem:[%s291_s9 + $0x28] sm:$0xf] %v3183_v26 }
  0x4d   : > { %338 = vst [vmem:[%s291_s9 + $0x2c] sm:$0xf] %v3184_v27  ;;  %v3185_v28 = vld [vmem:[%s4090_s27 + $0x190] sm:$0xf] }
  0x4e   : > { %v3186_v29 = vld [vmem:[%s4090_s27 + $0x1b0] sm:$0xf]  ;;  %340 = vst [vmem:[%s291_s9 + $0x30] sm:$0xf] %v3185_v28 }
  0x4f   : > { %v3187_v30 = vld [vmem:[%s4090_s27 + $0x1d0] sm:$0xf]  ;;  %342 = vst [vmem:[%s291_s9 + $0x34] sm:$0xf] %v3186_v29 }
  0x50   : > { %344 = vst [vmem:[%s291_s9 + $0x38] sm:$0xf] %v3187_v30  ;;  %v3188_v31 = vld [vmem:[%s4090_s27 + $0x1f0] sm:$0xf] }
  0x51   : > { %346 = vst [vmem:[%s291_s9 + $0x3c] sm:$0xf] %v3188_v31 }
  0x52 PF: > { %401 = sbr.rel (!%p4041_p12) target bundleno = 104 (0x68), region = 99  ;;  %s403_s23 = sand.u32 (%p4041_p12), 1, %s3874_s13  }
  0x53   : > { %s3190_s29 = sshll.u32 (%p4041_p12), %s3906_s21, 7  ;;  %s3189_s3 = sshll.u32 (%p4041_p12), %s403_s23, 6 }
  0x54   : > { %s3067_s25 = sadd.s32 (%p4041_p12), %s3902_s20, %s3190_s29  ;;  %s405_s4 = scalar_lea.vmem (%p4041_p12), [#allocation7], %s3189_s3 }
  0x55   : > { %s3191_s5 = sshll.u32 (%p4041_p12), %s3067_s25, 2 }
  0x56   : > { %s4116_s10 = scalar_lea.vmem (%p4041_p12), %s5184_s2, %s3191_s5 }
  0x57   : > { %v3192_v32 = vld [vmem:[%s4116_s10 + $0x18] sm:$0xf] (%p4041_p12) }
  0x58   : > { %v3193_v33 = vld [vmem:[%s4116_s10 + $0x38] sm:$0xf] (%p4041_p12)  ;;  %430 = vst [vmem:[%s405_s4] sm:$0xf] (%p4041_p12), %v3192_v32 }
  0x59   : > { %v3194_v34 = vld [vmem:[%s4116_s10 + $0x58] sm:$0xf]  ;;  %432 = vst [vmem:[%s405_s4 + $0x4] sm:$0xf] %v3193_v33 }
  0x5a   : > { %434 = vst [vmem:[%s405_s4 + $0x8] sm:$0xf] %v3194_v34  ;;  %v3195_v35 = vld [vmem:[%s4116_s10 + $0x78] sm:$0xf] }
  0x5b   : > { %v3196_v36 = vld [vmem:[%s4116_s10 + $0x98] sm:$0xf]  ;;  %436 = vst [vmem:[%s405_s4 + $0xc] sm:$0xf] %v3195_v35 }
  0x5c   : > { %v3197_v37 = vld [vmem:[%s4116_s10 + $0xb8] sm:$0xf]  ;;  %438 = vst [vmem:[%s405_s4 + $0x10] sm:$0xf] %v3196_v36 }
  0x5d   : > { %440 = vst [vmem:[%s405_s4 + $0x14] sm:$0xf] %v3197_v37  ;;  %v3198_v38 = vld [vmem:[%s4116_s10 + $0xd8] sm:$0xf] }
  0x5e   : > { %v3199_v39 = vld [vmem:[%s4116_s10 + $0xf8] sm:$0xf]  ;;  %442 = vst [vmem:[%s405_s4 + $0x18] sm:$0xf] %v3198_v38 }
  0x5f   : > { %v3200_v40 = vld [vmem:[%s4116_s10 + $0x118] sm:$0xf]  ;;  %444 = vst [vmem:[%s405_s4 + $0x1c] sm:$0xf] %v3199_v39 }
  0x60   : > { %446 = vst [vmem:[%s405_s4 + $0x20] sm:$0xf] %v3200_v40  ;;  %v3201_v41 = vld [vmem:[%s4116_s10 + $0x138] sm:$0xf] }
  0x61   : > { %v3202_v42 = vld [vmem:[%s4116_s10 + $0x158] sm:$0xf]  ;;  %448 = vst [vmem:[%s405_s4 + $0x24] sm:$0xf] %v3201_v41 }
  0x62   : > { %v3203_v43 = vld [vmem:[%s4116_s10 + $0x178] sm:$0xf]  ;;  %450 = vst [vmem:[%s405_s4 + $0x28] sm:$0xf] %v3202_v42 }
  0x63   : > { %452 = vst [vmem:[%s405_s4 + $0x2c] sm:$0xf] %v3203_v43  ;;  %v3204_v44 = vld [vmem:[%s4116_s10 + $0x198] sm:$0xf] }
  0x64   : > { %v3205_v45 = vld [vmem:[%s4116_s10 + $0x1b8] sm:$0xf]  ;;  %454 = vst [vmem:[%s405_s4 + $0x30] sm:$0xf] %v3204_v44 }
  0x65   : > { %v3206_v46 = vld [vmem:[%s4116_s10 + $0x1d8] sm:$0xf]  ;;  %456 = vst [vmem:[%s405_s4 + $0x34] sm:$0xf] %v3205_v45 }
  0x66   : > { %458 = vst [vmem:[%s405_s4 + $0x38] sm:$0xf] %v3206_v46  ;;  %v3207_v47 = vld [vmem:[%s4116_s10 + $0x1f8] sm:$0xf] }
  0x67   : > { %460 = vst [vmem:[%s405_s4 + $0x3c] sm:$0xf] %v3207_v47 }
  0x68 PF: > { %p3208_p1 = scmp.ge.s32.totalorder %s3910_s22, 1  ;;  %p514_p2 = scmp.lt.s32.totalorder %s3910_s22, 5 }
  0x6a   : > { %p515_p3 = pnand %p3208_p1, %p514_p2 }
  0x6c   : > { %518 = sbr.rel (%p515_p3) target bundleno = 1602 (0x642), region = 140 }
  0x73   : > { %s528_s30 = sand.u32 1, %s3878_s14   ;;  %s521_s9 = sand.u32 1, %s3886_s16   ;;  %vm578_vm0 = vcmask 7168   ;;  %v3912_v0 = vmov -inf   ;;  %v3913_v10 = vmov 0   ;;  %v3914_v16 = vmov 0.0  }
  0x74   : > { %s3210_s27 = sshll.u32 %s528_s30, 6  ;;  %s4142_s29 = sshll.u32 %s521_s9, 7  ;;  %581 = vst.msk [vmem:[#allocation2 + $0x10] sm:$0xff] %vm578_vm0, %v3912_v0  ;;  %579 = vst.msk [vmem:[#allocation2] sm:$0xff] %vm578_vm0, %v3912_v0  ;;  %3583 = vset.pattern.permute.xlu1 %v3913_v10  ;;  %3582 = vset.pattern.permute.xlu0 %v3913_v10 }
  0x75   : > { %s4138_s23 = scalar_lea.vmem [#allocation6], %s3210_s27  ;;  %s4146_s14 = scalar_lea.vmem [#allocation5], %s4142_s29  ;;  %580 = vst.msk [vmem:[#allocation2 + $0x8] sm:$0xff] %vm578_vm0, %v3912_v0  ;;  %582 = vst.msk [vmem:[#allocation2 + $0x18] sm:$0xff] %vm578_vm0, %v3912_v0 }
  0x76   : > { %v3584_v48 = vld [vmem:[%s4138_s23] sm:$0xff]   ;;  %v3585_v49 = vld [vmem:[%s4138_s23 + $0x8] sm:$0xff]   ;;  %v3586_v50 = vld [vmem:[%s4138_s23 + $0x10] sm:$0xff]   ;;  %583 = vst.msk [vmem:[#allocation2 + $0x20] sm:$0xff] %vm578_vm0, %v3912_v0  ;;  %s535_s16 = sand.u32 1, %s3870_s12   ;;  %s5067_s12 = scalar_lea.vmem [#allocation8], %s4142_s29 }
  0x77   : > { %3363 = vmatprep.subr.bf16.mxu0 %v3584_v48  ;;  %v3592_v51 = vld [vmem:[%s4146_s14] ss:$8 sps:$4 sm:$0xff]   ;;  %v3587_v52 = vld [vmem:[%s4138_s23 + $0x18] sm:$0xff]   ;;  %v3590_v55 = vld [vmem:[%s4138_s23 + $0x30] sm:$0xff]   ;;  %584 = vst.msk [vmem:[#allocation2 + $0x28] sm:$0xff] %vm578_vm0, %v3912_v0  ;;  %s3211_s3 = sshll.u32 %s535_s16, 6 }
  0x78   : > { %3364 = vmatpush3.bf16.xpose.msra.mxu0 %v3584_v48  ;;  %3379 = vmatprep.mubr.bf16.mxu0 %v3592_v51  ;;  %v3588_v53 = vld [vmem:[%s4138_s23 + $0x20] sm:$0xff]   ;;  %v3589_v54 = vld [vmem:[%s4138_s23 + $0x28] sm:$0xff]   ;;  %v3591_v56 = vld [vmem:[%s4138_s23 + $0x38] sm:$0xff]   ;;  %585 = vst.msk [vmem:[#allocation2 + $0x30] sm:$0xff] %vm578_vm0, %v3912_v0  ;;  %s4274_s25 = scalar_lea.vmem [#allocation7], %s3211_s3  ;;  %s3278_s5 = sshll.u32 (%p4048_p13), %s3894_s18, 1 }
  0x79   : > { %3365 = vmatprep.subr.bf16.mxu0 %v3585_v49  ;;  %v3593_v57 = vld [vmem:[%s4146_s14 + $0x10] ss:$8 sps:$4 sm:$0xff]   ;;  %v3594_v58 = vld [vmem:[%s4146_s14 + $0x20] ss:$8 sps:$4 sm:$0xff]   ;;  %586 = vst.msk [vmem:[#allocation2 + $0x38] sm:$0xff] %vm578_vm0, %v3912_v0  ;;  %587 = vst.msk [vmem:[#allocation2 + $0x40] sm:$0xff] %vm578_vm0, %v3912_v0 }
  0x7a   : > { %v3595_v59 = vld [vmem:[%s4146_s14 + $0x30] ss:$8 sps:$4 sm:$0xff]   ;;  %v3596_v60 = vld [vmem:[%s4146_s14 + $0x40] ss:$8 sps:$4 sm:$0xff]   ;;  %588 = vst.msk [vmem:[#allocation2 + $0x48] sm:$0xff] %vm578_vm0, %v3912_v0  ;;  %589 = vst.msk [vmem:[#allocation2 + $0x50] sm:$0xff] %vm578_vm0, %v3912_v0 }
  0x7b   : > { %v3597_v61 = vld [vmem:[%s4146_s14 + $0x50] ss:$8 sps:$4 sm:$0xff]   ;;  %v3598_v62 = vld [vmem:[%s4146_s14 + $0x60] ss:$8 sps:$4 sm:$0xff]   ;;  %590 = vst.msk [vmem:[#allocation2 + $0x58] sm:$0xff] %vm578_vm0, %v3912_v0  ;;  %591 = vst.msk [vmem:[#allocation2 + $0x60] sm:$0xff] %vm578_vm0, %v3912_v0 }
  0x7c   : > { %v3599_v63 = vld [vmem:[%s4146_s14 + $0x70] ss:$8 sps:$4 sm:$0xff]   ;;  %592 = vst.msk [vmem:[#allocation2 + $0x68] sm:$0xff] %vm578_vm0, %v3912_v0  ;;  %593 = vst.msk [vmem:[#allocation2 + $0x70] sm:$0xff] %vm578_vm0, %v3912_v0  ;;  %v3600_v19 = vld [vmem:[%s4274_s25] sm:$0xff]   ;;  %s3279_s6 = sshll.u32 (%p4048_p13), %s3898_s19, 6 }
  0x7d   : > { %594 = vst.msk [vmem:[#allocation2 + $0x78] sm:$0xff] %vm578_vm0, %v3912_v0  ;;  %595 = vst.msk [vmem:[#allocation2 + $0x80] sm:$0xff] %vm578_vm0, %v3912_v0  ;;  %v3601_v20 = vld [vmem:[%s4274_s25 + $0x8] sm:$0xff]   ;;  %3395 = vmatprep.subr.bf16.mxu1 %v3600_v19  ;;  %v3602_v21 = vld [vmem:[%s4274_s25 + $0x10] sm:$0xff]   ;;  %s2937_s7 = sadd.s32 (%p4048_p13), %s3279_s6, %s3278_s5  ;;  %s5220_s30 = sld [smem:[#allocation22_spill]] (%p4048_p13) }
  0x7e   : > { %596 = vst.msk [vmem:[#allocation2 + $0x88] sm:$0xff] %vm578_vm0, %v3912_v0  ;;  %597 = vst.msk [vmem:[#allocation2 + $0x90] sm:$0xff] %vm578_vm0, %v3912_v0  ;;  %3396 = vmatpush3.bf16.msra.mxu1 %v3600_v19  ;;  %v4279_v22 = vld [vmem:[#allocation2 + $0x10] sm:$0xff]  ;;  %v4281_v23 = vld [vmem:[#allocation2] sm:$0xff]  ;;  %s3280_s8 = sshll.u32 (%p4048_p13), %s2937_s7, 2 }
  0x7f   : > { %598 = vst.msk [vmem:[#allocation2 + $0x98] sm:$0xff] %vm578_vm0, %v3912_v0  ;;  %599 = vst.msk [vmem:[#allocation2 + $0xa0] sm:$0xff] %vm578_vm0, %v3912_v0  ;;  %3397 = vmatprep.subr.bf16.mxu1 %v3601_v20  ;;  %v3603_v27 = vld [vmem:[%s4274_s25 + $0x18] sm:$0xff]   ;;  %v4295_v30 = vld [vmem:[#allocation2 + $0x8] sm:$0xff] }
  0x80   : > { %3366 = vmatpush3.bf16.xpose.msra.mxu0 %v3585_v49  ;;  %600 = vst.msk [vmem:[#allocation2 + $0xa8] sm:$0xff] %vm578_vm0, %v3912_v0  ;;  %601 = vst.msk [vmem:[#allocation2 + $0xb0] sm:$0xff] %vm578_vm0, %v3912_v0  ;;  %v4290_v29 = vld [vmem:[#allocation2 + $0x18] sm:$0xff]  ;;  %v3604_v34 = vld [vmem:[%s4274_s25 + $0x20] sm:$0xff]  }
  0x81   : > { %3367 = vmatprep.subr.bf16.mxu0 %v3586_v50  ;;  %602 = vst.msk [vmem:[#allocation2 + $0xb8] sm:$0xff] %vm578_vm0, %v3912_v0  ;;  %603 = vst.msk [vmem:[#allocation2 + $0xc0] sm:$0xff] %vm578_vm0, %v3912_v0  ;;  %v4309_v36 = vld [vmem:[#allocation2 + $0x30] sm:$0xff]  ;;  %v4314_v37 = vld [vmem:[#allocation2 + $0x38] sm:$0xff] }
  0x82   : > { %604 = vst.msk [vmem:[#allocation2 + $0xc8] sm:$0xff] %vm578_vm0, %v3912_v0  ;;  %605 = vst.msk [vmem:[#allocation2 + $0xd0] sm:$0xff] %vm578_vm0, %v3912_v0  ;;  %3398 = vmatpush3.bf16.msra.mxu1 %v3601_v20  ;;  %v3605_v39 = vld [vmem:[%s4274_s25 + $0x28] sm:$0xff]   ;;  %v4323_v43 = vld [vmem:[#allocation2 + $0x20] sm:$0xff] }
  0x83   : > { %606 = vst.msk [vmem:[#allocation2 + $0xd8] sm:$0xff] %vm578_vm0, %v3912_v0  ;;  %607 = vst.msk [vmem:[#allocation2 + $0xe0] sm:$0xff] %vm578_vm0, %v3912_v0  ;;  %3399 = vmatprep.subr.bf16.mxu1 %v3602_v21  ;;  %v4328_v44 = vld [vmem:[#allocation2 + $0x28] sm:$0xff]  ;;  %v3606_v47 = vld [vmem:[%s4274_s25 + $0x30] sm:$0xff]   ;;  %s2939_s27 = scalar_lea.vmem (%p4048_p13), %s5220_s30, %s3280_s8 }
  0x84   : > { %608 = vst.msk [vmem:[#allocation2 + $0xe8] sm:$0xff] %vm578_vm0, %v3912_v0  ;;  %609 = vst.msk [vmem:[#allocation2 + $0xf0] sm:$0xff] %vm578_vm0, %v3912_v0  ;;  %v4339_v51 = vld [vmem:[#allocation2 + $0x50] sm:$0xff]  ;;  %v4377_v20 = vld [vmem:[#allocation2 + $0x78] sm:$0xff] }
  0x85   : > { %610 = vst.msk [vmem:[#allocation2 + $0xf8] sm:$0xff] %vm578_vm0, %v3912_v0  ;;  %613 = vst.msk [vmem:[#allocation3 + $0x10] sm:$0xff] %vm578_vm0, %v3914_v16  ;;  %v4375_v19 = vld [vmem:[#allocation2 + $0x70] sm:$0xff] }
  0x86   : > { %611 = vst.msk [vmem:[#allocation3] sm:$0xff] %vm578_vm0, %v3914_v16  ;;  %612 = vst.msk [vmem:[#allocation3 + $0x8] sm:$0xff] %vm578_vm0, %v3914_v16  ;;  %3400 = vmatpush3.bf16.msra.mxu1 %v3602_v21 }
  0x87   : > { %614 = vst.msk [vmem:[#allocation3 + $0x18] sm:$0xff] %vm578_vm0, %v3914_v16  ;;  %615 = vst.msk [vmem:[#allocation3 + $0x20] sm:$0xff] %vm578_vm0, %v3914_v16  ;;  %3401 = vmatprep.subr.bf16.mxu1 %v3603_v27 }
  0x88   : > { %3368 = vmatpush3.bf16.xpose.msra.mxu0 %v3586_v50  ;;  %616 = vst.msk [vmem:[#allocation3 + $0x28] sm:$0xff] %vm578_vm0, %v3914_v16  ;;  %617 = vst.msk [vmem:[#allocation3 + $0x30] sm:$0xff] %vm578_vm0, %v3914_v16 }
  0x89   : > { %3369 = vmatprep.subr.bf16.mxu0 %v3587_v52  ;;  %618 = vst.msk [vmem:[#allocation3 + $0x38] sm:$0xff] %vm578_vm0, %v3914_v16  ;;  %619 = vst.msk [vmem:[#allocation3 + $0x40] sm:$0xff] %vm578_vm0, %v3914_v16 }
  0x8a   : > { %620 = vst.msk [vmem:[#allocation3 + $0x48] sm:$0xff] %vm578_vm0, %v3914_v16  ;;  %621 = vst.msk [vmem:[#allocation3 + $0x50] sm:$0xff] %vm578_vm0, %v3914_v16  ;;  %3402 = vmatpush3.bf16.msra.mxu1 %v3603_v27 }
  0x8b   : > { %622 = vst.msk [vmem:[#allocation3 + $0x58] sm:$0xff] %vm578_vm0, %v3914_v16  ;;  %623 = vst.msk [vmem:[#allocation3 + $0x60] sm:$0xff] %vm578_vm0, %v3914_v16  ;;  %3403 = vmatprep.subr.bf16.mxu1 %v3604_v34 }
  0x8c   : > { %624 = vst.msk [vmem:[#allocation3 + $0x68] sm:$0xff] %vm578_vm0, %v3914_v16  ;;  %625 = vst.msk [vmem:[#allocation3 + $0x70] sm:$0xff] %vm578_vm0, %v3914_v16 }
  0x8d   : > { %626 = vst.msk [vmem:[#allocation3 + $0x78] sm:$0xff] %vm578_vm0, %v3914_v16  ;;  %627 = vst.msk [vmem:[#allocation3 + $0x80] sm:$0xff] %vm578_vm0, %v3914_v16 }
  0x8e   : > { %628 = vst.msk [vmem:[#allocation3 + $0x88] sm:$0xff] %vm578_vm0, %v3914_v16  ;;  %629 = vst.msk [vmem:[#allocation3 + $0x90] sm:$0xff] %vm578_vm0, %v3914_v16  ;;  %3404 = vmatpush3.bf16.msra.mxu1 %v3604_v34 }
  0x8f   : > { %630 = vst.msk [vmem:[#allocation3 + $0x98] sm:$0xff] %vm578_vm0, %v3914_v16  ;;  %631 = vst.msk [vmem:[#allocation3 + $0xa0] sm:$0xff] %vm578_vm0, %v3914_v16  ;;  %3405 = vmatprep.subr.bf16.mxu1 %v3605_v39 }
  0x90   : > { %3370 = vmatpush3.bf16.xpose.msra.mxu0 %v3587_v52  ;;  %632 = vst.msk [vmem:[#allocation3 + $0xa8] sm:$0xff] %vm578_vm0, %v3914_v16  ;;  %633 = vst.msk [vmem:[#allocation3 + $0xb0] sm:$0xff] %vm578_vm0, %v3914_v16  ;;  %v4344_v52 = vld [vmem:[#allocation2 + $0x58] sm:$0xff] }
  0x91   : > { %3371 = vmatprep.subr.bf16.mxu0 %v3588_v53  ;;  %634 = vst.msk [vmem:[#allocation3 + $0xb8] sm:$0xff] %vm578_vm0, %v3914_v16  ;;  %635 = vst.msk [vmem:[#allocation3 + $0xc0] sm:$0xff] %vm578_vm0, %v3914_v16 }
  0x92   : > { %636 = vst.msk [vmem:[#allocation3 + $0xc8] sm:$0xff] %vm578_vm0, %v3914_v16  ;;  %637 = vst.msk [vmem:[#allocation3 + $0xd0] sm:$0xff] %vm578_vm0, %v3914_v16  ;;  %3406 = vmatpush3.bf16.msra.mxu1 %v3605_v39 }
  0x93   : > { %638 = vst.msk [vmem:[#allocation3 + $0xd8] sm:$0xff] %vm578_vm0, %v3914_v16  ;;  %639 = vst.msk [vmem:[#allocation3 + $0xe0] sm:$0xff] %vm578_vm0, %v3914_v16  ;;  %3407 = vmatprep.subr.bf16.mxu1 %v3606_v47 }
  0x94   : > { %640 = vst.msk [vmem:[#allocation3 + $0xe8] sm:$0xff] %vm578_vm0, %v3914_v16  ;;  %641 = vst.msk [vmem:[#allocation3 + $0xf0] sm:$0xff] %vm578_vm0, %v3914_v16 }
  0x95   : > { %642 = vst.msk [vmem:[#allocation3 + $0xf8] sm:$0xff] %vm578_vm0, %v3914_v16 }
  0x96   : > { %3408 = vmatpush3.bf16.msra.mxu1 %v3606_v47 }
  0x98   : > { %3372 = vmatpush3.bf16.xpose.msra.mxu0 %v3588_v53 }
  0x99   : > { %3373 = vmatprep.subr.bf16.mxu0 %v3589_v54 }
  0xa0   : > { %3374 = vmatpush3.bf16.xpose.msra.mxu0 %v3589_v54  ;;  %v3607_v54 = vld [vmem:[%s4274_s25 + $0x38] sm:$0xff]  }
  0xa1   : > { %3375 = vmatprep.subr.bf16.mxu0 %v3590_v55  ;;  %3409 = vmatprep.subr.bf16.mxu1 %v3607_v54 }
  0xa2   : > { %3410 = vmatpush3.bf16.msra.mxu1 %v3607_v54 }
  0xa8   : > { %3376 = vmatpush3.bf16.xpose.msra.mxu0 %v3590_v55 }
  0xa9   : > { %3377 = vmatprep.subr.bf16.mxu0 %v3591_v56 }
  0xb0   : > { %3378 = vmatpush3.bf16.xpose.msra.mxu0 %v3591_v56 }
  0xb7   : > { %3380 = vmatmul.mubr.bf16.vlgmr.msra.gmra.mrb[0].mxu0 %v3593_v57 }
  0xb8   : > { %3383 = vmatprep.mubr.bf16.mxu0 %v3594_v58  ;;  %v4354_v58 = vld [vmem:[#allocation2 + $0x40] sm:$0xff] }
  0xbf   : > { %3384 = vmatmul.mubr.bf16.gmra.mrb[4].mxu0 %v3595_v59  ;;  %v4357_v59 = vld [vmem:[#allocation2 + $0x48] sm:$0xff] }
  0xc0   : > { %3387 = vmatprep.mubr.bf16.mxu0 %v3596_v60 }
  0xc7   : > { %3388 = vmatmul.mubr.bf16.gmra.mrb[8].mxu0 %v3597_v61 }
  0xc8   : > { %3391 = vmatprep.mubr.bf16.mxu0 %v3598_v62 }
  0xcf   : > { %3392 = vmatmul.mubr.bf16.gmra.mrb[12].mxu0 %v3599_v63 }
 0x18a   : > { %v4193_v1 = vpop.f32.mrb[0].mxu0 }
 0x18b   : > { %936 = vmax.xlane.f32.xlu1 %v4193_v1  ;;  %v4196_v2 = vpop.f32.mrb[1].mxu0 }
 0x18c   : > { %932 = vmax.xlane.f32.xlu0 %v4196_v2  ;;  %v4199_v3 = vpop.f32.mrb[2].mxu0 }
 0x18d   : > { %v4201_v4 = vpop.f32.mrb[3].mxu0 }
 0x18f   : > { %938 = vmax.xlane.f32.xlu1 %v4199_v3 }
 0x190   : > { %934 = vmax.xlane.f32.xlu0 %v4201_v4 }
 0x192   : > { %v4205_v5 = vpop.f32.mrb[4].mxu0 }
 0x193   : > { %v4207_v6 = vpop.f32.mrb[5].mxu0 }
 0x194   : > { %v4209_v7 = vpop.f32.mrb[6].mxu0  ;;  %944 = vmax.xlane.f32.xlu0 %v4205_v5 }
 0x195   : > { %946 = vmax.xlane.f32.xlu1 %v4209_v7  ;;  %v4213_v8 = vpop.f32.mrb[7].mxu0 }
 0x198   : > { %940 = vmax.xlane.f32.xlu0 %v4207_v6 }
 0x199   : > { %942 = vmax.xlane.f32.xlu1 %v4213_v8 }
 0x19a   : > { %v4217_v9 = vpop.f32.mrb[8].mxu0 }
 0x19b   : > { %v4219_v11 = vpop.f32.mrb[9].mxu0 }
 0x19c   : > { %v4221_v12 = vpop.f32.mrb[10].mxu0  ;;  %952 = vmax.xlane.f32.xlu0 %v4217_v9 }
 0x19d   : > { %954 = vmax.xlane.f32.xlu1 %v4221_v12  ;;  %v4225_v13 = vpop.f32.mrb[11].mxu0 }
 0x1a0   : > { %948 = vmax.xlane.f32.xlu0 %v4219_v11 }
 0x1a1   : > { %950 = vmax.xlane.f32.xlu1 %v4225_v13 }
 0x1a2   : > { %v4229_v14 = vpop.f32.mrb[12].mxu0 }
 0x1a3   : > { %v4231_v15 = vpop.f32.mrb[13].mxu0 }
 0x1a4   : > { %v4265_v17 = vpop.f32.mrb[14].mxu0  ;;  %960 = vmax.xlane.f32.xlu0 %v4229_v14 }
 0x1a5   : > { %962 = vmax.xlane.f32.xlu1 %v4265_v17  ;;  %v4269_v18 = vpop.f32.mrb[15].mxu0 }
 0x1a8   : > { %956 = vmax.xlane.f32.xlu0 %v4231_v15 }
 0x1a9   : > { %958 = vmax.xlane.f32.xlu1 %v4269_v18 }
 0x218   : > { %v937_v24 = vpop.xlane.xlu1 %936 }
 0x219   : > { %v4284_v25 = vmax.f32 %v4279_v22, %v937_v24  ;;  %v933_v26 = vpop.xlane.xlu0 %932 }
 0x21a   : > { %v4288_v28 = vmax.f32 %v4281_v23, %v933_v26 }
 0x21b   : > { %1552 = vst.msk [vmem:[#allocation2 + $0x10] sm:$0xff] %vm578_vm0, %v4284_v25  ;;  %1040 = vperm.xlu1 %3583, %v4284_v25  }
 0x21c   : > { %1550 = vst.msk [vmem:[#allocation2] sm:$0xff] %vm578_vm0, %v4288_v28  ;;  %v939_v31 = vpop.xlane.xlu1 %938  ;;  %1030 = vperm.xlu0 %3582, %v4288_v28   ;;  %v980_v63 = vsub.f32 %v4281_v23, %v4288_v28 }
 0x21d   : > { %v4301_v32 = vmax.f32 %v4290_v29, %v939_v31  ;;  %v935_v33 = vpop.xlane.xlu0 %934 }
 0x21e   : > { %v4305_v35 = vmax.f32 %v4295_v30, %v935_v33  ;;  %v996_v26 = vmul.f32 1.442695, %v980_v63  ;;  %v4394_v33 = vld [vmem:[%s4138_s23] sm:$0xff]  }
 0x21f   : > { %1553 = vst.msk [vmem:[#allocation2 + $0x18] sm:$0xff] %vm578_vm0, %v4301_v32  ;;  %v983_v27 = vsub.f32 %v4290_v29, %v4301_v32  ;;  %3427 = vmatprep.subr.bf16.mxu1 %v4394_v33 }
 0x220   : > { %1551 = vst.msk [vmem:[#allocation2 + $0x8] sm:$0xff] %vm578_vm0, %v4305_v35  ;;  %1035 = vperm.xlu1 %3583, %v4305_v35   ;;  %3632 = vpow2.f32 %v996_v26 }
 0x221   : > { %v945_v38 = vpop.xlane.xlu0 %944  ;;  %v1002_v47 = vmul.f32 1.442695, %v983_v27 }
 0x222   : > { %v947_v40 = vpop.xlane.xlu1 %946  ;;  %v4318_v41 = vmax.f32 %v4309_v36, %v945_v38  ;;  %v4399_v38 = vld [vmem:[#allocation2 + $0x60] sm:$0xff] }
 0x223   : > { %v4321_v42 = vmax.f32 %v4314_v37, %v947_v40  ;;  %v4403_v40 = vld [vmem:[#allocation2 + $0x68] sm:$0xff]  ;;  %3634 = vpow2.f32 %v1002_v47 }
 0x224   : > { %1045 = vperm.xlu1 %3583, %v4301_v32   ;;  %1556 = vst.msk [vmem:[#allocation2 + $0x30] sm:$0xff] %vm578_vm0, %v4318_v41  ;;  %v981_v32 = vsub.f32 %v4295_v30, %v4305_v35  ;;  %v982_v35 = vsub.f32 %v4279_v22, %v4284_v25  ;;  %v986_v25 = vsub.f32 %v4309_v36, %v4318_v41 }
 0x225   : > { %v987_v45 = vsub.f32 %v4314_v37, %v4321_v42  ;;  %1557 = vst.msk [vmem:[#allocation2 + $0x38] sm:$0xff] %vm578_vm0, %v4321_v42  ;;  %v941_v46 = vpop.xlane.xlu0 %940 }
 0x226   : > { %v943_v48 = vpop.xlane.xlu1 %942  ;;  %v4336_v49 = vmax.f32 %v4323_v43, %v941_v46  ;;  %v1000_v63 = vmul.f32 1.442695, %v982_v35  ;;  %v1008_v27 = vmul.f32 1.442695, %v986_v25 }
 0x227   : > { %v969_v50 = vmax.f32 %v4328_v44, %v943_v48 }
 0x228   : > { %1060 = vperm.xlu1 %3583, %v4318_v41   ;;  %1554 = vst.msk [vmem:[#allocation2 + $0x20] sm:$0xff] %vm578_vm0, %v4336_v49 }
 0x229   : > { %1555 = vst.msk [vmem:[#allocation2 + $0x28] sm:$0xff] %vm578_vm0, %v969_v50  ;;  %v953_v53 = vpop.xlane.xlu0 %952  ;;  %v985_v39 = vsub.f32 %v4328_v44, %v969_v50 }
 0x22a   : > { %v955_v55 = vpop.xlane.xlu1 %954  ;;  %v4349_v56 = vmax.f32 %v4339_v51, %v953_v53  ;;  %v4439_v22 = vpop.eup %3632 }
 0x22b   : > { %v4352_v57 = vmax.f32 %v4344_v52, %v955_v55  ;;  %v1006_v54 = vmul.f32 1.442695, %v985_v39  ;;  %v998_v55 = vmul.f32 1.442695, %v981_v32 }
 0x22c   : > { %1050 = vperm.xlu1 %3583, %v4336_v49   ;;  %v990_v60 = vsub.f32 %v4339_v51, %v4349_v56  ;;  %1560 = vst.msk [vmem:[#allocation2 + $0x50] sm:$0xff] %vm578_vm0, %v4349_v56 }
 0x22d   : > { %v991_v61 = vsub.f32 %v4344_v52, %v4352_v57  ;;  %1561 = vst.msk [vmem:[#allocation2 + $0x58] sm:$0xff] %vm578_vm0, %v4352_v57  ;;  %v949_v62 = vpop.xlane.xlu0 %948  ;;  %3636 = vpow2.f32 %v1006_v54  ;;  %v4445_v26 = vpop.eup %3634 }
 0x22e   : > { %v951_v0 = vpop.xlane.xlu1 %950  ;;  %v4370_v10 = vmax.f32 %v4354_v58, %v949_v62  ;;  %3638 = vpow2.f32 %v998_v55 }
 0x22f   : > { %v4373_v16 = vmax.f32 %v4357_v59, %v951_v0  ;;  %v984_v0 = vsub.f32 %v4323_v43, %v4336_v49  ;;  %3640 = vpow2.f32 %v1000_v63 }
 0x230   : > { %1055 = vperm.xlu1 %3583, %v969_v50   ;;  %v988_v21 = vsub.f32 %v4354_v58, %v4370_v10  ;;  %1558 = vst.msk [vmem:[#allocation2 + $0x40] sm:$0xff] %vm578_vm0, %v4370_v10 }
 0x231   : > { %v989_v23 = vsub.f32 %v4357_v59, %v4373_v16  ;;  %1559 = vst.msk [vmem:[#allocation2 + $0x48] sm:$0xff] %vm578_vm0, %v4373_v16  ;;  %1075 = vperm.xlu0 %3582, %v4373_v16   ;;  %v961_v24 = vpop.xlane.xlu0 %960  ;;  %v921_v59 = vld [vmem:[#allocation3 + $0x28] sm:$0xff] }
 0x232   : > { %v963_v28 = vpop.xlane.xlu1 %962  ;;  %v4391_v31 = vmax.f32 %v4375_v19, %v961_v24  ;;  %v1004_v24 = vmul.f32 1.442695, %v984_v0 }
 0x233   : > { %v4397_v34 = vmax.f32 %v4377_v20, %v963_v28  ;;  %v1014_v51 = vmul.f32 1.442695, %v989_v23 }
 0x234   : > { %1065 = vperm.xlu1 %3583, %v4321_v42   ;;  %v994_v29 = vsub.f32 %v4375_v19, %v4391_v31  ;;  %1564 = vst.msk [vmem:[#allocation2 + $0x70] sm:$0xff] %vm578_vm0, %v4391_v31  ;;  %3642 = vpow2.f32 %v1004_v24  ;;  %v1018_v42 = vmul.f32 1.442695, %v991_v61 }
 0x235   : > { %v995_v46 = vsub.f32 %v4377_v20, %v4397_v34  ;;  %1565 = vst.msk [vmem:[#allocation2 + $0x78] sm:$0xff] %vm578_vm0, %v4397_v34  ;;  %1085 = vperm.xlu0 %3582, %v4352_v57   ;;  %v957_v44 = vpop.xlane.xlu0 %956  ;;  %3644 = vpow2.f32 %v1008_v27 }
 0x236   : > { %v959_v48 = vpop.xlane.xlu1 %958  ;;  %v4418_v50 = vmax.f32 %v4399_v38, %v957_v44  ;;  %v1024_v57 = vmul.f32 1.442695, %v994_v29  ;;  %v926_v29 = vld [vmem:[#allocation3 + $0x50] sm:$0xff] }
 0x237   : > { %v4421_v53 = vmax.f32 %v4403_v40, %v959_v48  ;;  %v4449_v43 = vpop.eup %3636  ;;  %v1026_v58 = vmul.f32 1.442695, %v995_v46  ;;  %v927_v46 = vld [vmem:[#allocation3 + $0x58] sm:$0xff] }
 0x238   : > { %1070 = vperm.xlu1 %3583, %v4370_v10   ;;  %v992_v30 = vsub.f32 %v4399_v38, %v4418_v50  ;;  %1562 = vst.msk [vmem:[#allocation2 + $0x60] sm:$0xff] %vm578_vm0, %v4418_v50  ;;  %v4451_v49 = vpop.eup %3638  ;;  %v1161_v20 = vmul.f32 %v4449_v43, %v921_v59 }
 0x239   : > { %1563 = vst.msk [vmem:[#allocation2 + $0x68] sm:$0xff] %vm578_vm0, %v4421_v53  ;;  %1095 = vperm.xlu0 %3582, %v4421_v53   ;;  %v4455_v36 = vpop.eup %3640  ;;  %v5198_v19 = vsub.f32 %v4403_v40, %v4421_v53 }
 0x23a   : > { %v1020_v10 = vmul.f32 1.442695, %v992_v30 }
 0x23c   : > { %1080 = vperm.xlu1 %3583, %v4349_v56   ;;  %v923_v56 = vld [vmem:[#allocation3 + $0x38] sm:$0xff] }
 0x23d   : > { %1105 = vperm.xlu0 %3582, %v4397_v34  }
 0x23e   : > { %v4458_v41 = vpop.eup %3642 }
 0x23f   : > { %v4461_v28 = vpop.eup %3644 }
 0x240   : > { %1090 = vperm.xlu1 %3583, %v4418_v50  }
 0x241   : > { %1255 = vperm.xlu0 %3582, %v4439_v22  }
 0x244   : > { %1100 = vperm.xlu1 %3583, %v4391_v31  }
 0x245   : > { %1270 = vperm.xlu0 %3582, %v4445_v26  }
 0x248   : > { %1260 = vperm.xlu1 %3583, %v4451_v49  }
 0x249   : > { %1280 = vperm.xlu0 %3582, %v4449_v43  }
 0x24c   : > { %1265 = vperm.xlu1 %3583, %v4455_v36  }
 0x250   : > { %1275 = vperm.xlu1 %3583, %v4458_v41  }
 0x254   : > { %1285 = vperm.xlu1 %3583, %v4461_v28  }
 0x29a   : > { %v1041_v39 = vpop.permute.xlu1 %1040 }
 0x29b   : > { %v1110_v32 = vsub.f32 %v4193_v1, %v1041_v39  ;;  %v1031_v44 = vpop.permute.xlu0 %1030 }
 0x29c   : > { %v1108_v47 = vsub.f32 %v4196_v2, %v1031_v44 }
 0x29d   : > { %v1128_v48 = vmul.f32 1.442695, %v1110_v32 }
 0x29e   : > { %v1124_v54 = vmul.f32 1.442695, %v1108_v47 }
 0x29f   : > { %3646 = vpow2.f32 %v1128_v48  ;;  %v1036_v35 = vpop.permute.xlu1 %1035 }
 0x2a0   : > { %3648 = vpow2.f32 %v1124_v54  ;;  %v1109_v55 = vsub.f32 %v4201_v4, %v1036_v35 }
 0x2a2   : > { %v1126_v63 = vmul.f32 1.442695, %v1109_v55 }
 0x2a3   : > { %v1046_v0 = vpop.permute.xlu1 %1045 }
 0x2a4   : > { %3650 = vpow2.f32 %v1126_v63  ;;  %v1111_v25 = vsub.f32 %v4199_v3, %v1046_v0 }
 0x2a6   : > { %v1130_v24 = vmul.f32 1.442695, %v1111_v25 }
 0x2a7   : > { %v1061_v27 = vpop.permute.xlu1 %1060 }
 0x2a8   : > { %3652 = vpow2.f32 %v1130_v24  ;;  %v1114_v1 = vsub.f32 %v4205_v5, %v1061_v27  ;;  %v3609_v24 = vld [vmem:[%s4138_s23 + $0x8] sm:$0xff]  }
 0x2a9   : > { %v3647_v39 = vpop.eup %3646 }
 0x2aa   : > { %v3649_v62 = vpop.eup %3648  ;;  %v1136_v2 = vmul.f32 1.442695, %v1114_v1  ;;  %1176 = vadd.xlane.f32.xlu0 %v3647_v39 }
 0x2ab   : > { %1172 = vadd.xlane.f32.xlu1 %v3649_v62  ;;  %v1051_v32 = vpop.permute.xlu1 %1050 }
 0x2ac   : > { %3654 = vpow2.f32 %v1136_v2  ;;  %v1112_v44 = vsub.f32 %v4207_v6, %v1051_v32 }
 0x2ae   : > { %v3651_v4 = vpop.eup %3650  ;;  %v1132_v47 = vmul.f32 1.442695, %v1112_v44 }
 0x2af   : > { %1174 = vadd.xlane.f32.xlu0 %v3651_v4  ;;  %v1056_v48 = vpop.permute.xlu1 %1055  ;;  %v1349_v3 = vpack.c.bf16 %v3651_v4, %v3649_v62 }
 0x2b0   : > { %3656 = vpow2.f32 %v1132_v47  ;;  %v1113_v54 = vsub.f32 %v4213_v8, %v1056_v48  ;;  %v1076_v35 = vpop.permute.xlu0 %1075 }
 0x2b1   : > { %3411 = vmatprep.mubr.bf16.mxu1 %v1349_v3  ;;  %v1117_v63 = vsub.f32 %v4225_v13, %v1076_v35 }
 0x2b2   : > { %v3653_v5 = vpop.eup %3652  ;;  %v1134_v55 = vmul.f32 1.442695, %v1113_v54 }
 0x2b3   : > { %1178 = vadd.xlane.f32.xlu1 %v3653_v5  ;;  %v1066_v0 = vpop.permute.xlu1 %1065  ;;  %v1350_v25 = vpack.c.bf16 %v3653_v5, %v3647_v39  ;;  %v1142_v8 = vmul.f32 1.442695, %v1117_v63 }
 0x2b4   : > { %3658 = vpow2.f32 %v1134_v55  ;;  %v1115_v6 = vsub.f32 %v4209_v7, %v1066_v0  ;;  %v1086_v27 = vpop.permute.xlu0 %1085 }
 0x2b5   : > { %3412 = vmatmul.mubr.bf16.vlgmr.msra.gmra.mrb[0].mxu1 %v1350_v25  ;;  %v1119_v2 = vsub.f32 %v4221_v12, %v1086_v27 }
 0x2b6   : > { %v3655_v1 = vpop.eup %3654  ;;  %v1138_v62 = vmul.f32 1.442695, %v1115_v6  ;;  %3428 = vmatpush3.bf16.xpose.msra.mxu1 %v4394_v33  ;;  %v3610_v33 = vld [vmem:[%s4138_s23 + $0x10] sm:$0xff]  }
 0x2b7   : > { %1184 = vadd.xlane.f32.xlu0 %v3655_v1  ;;  %v1071_v32 = vpop.permute.xlu1 %1070  ;;  %3429 = vmatprep.subr.bf16.mxu1 %v3609_v24  ;;  %v1146_v7 = vmul.f32 1.442695, %v1119_v2 }
 0x2b8   : > { %3660 = vpow2.f32 %v1138_v62  ;;  %v1116_v13 = vsub.f32 %v4219_v11, %v1071_v32  ;;  %v1096_v39 = vpop.permute.xlu0 %1095 }
 0x2b9   : > { %3662 = vpow2.f32 %v1142_v8  ;;  %v1121_v47 = vsub.f32 %v4269_v18, %v1096_v39  ;;  %v3612_v39 = vld [vmem:[%s4138_s23 + $0x20] sm:$0xff]  }
 0x2ba   : > { %v3657_v44 = vpop.eup %3656  ;;  %v1140_v4 = vmul.f32 1.442695, %v1116_v13 }
 0x2bb   : > { %1180 = vadd.xlane.f32.xlu0 %v3657_v44  ;;  %v1081_v48 = vpop.permute.xlu1 %1080  ;;  %v1150_v11 = vmul.f32 1.442695, %v1121_v47 }
 0x2bc   : > { %3664 = vpow2.f32 %v1140_v4  ;;  %v1118_v3 = vsub.f32 %v4217_v9, %v1081_v48  ;;  %v1106_v12 = vpop.permute.xlu0 %1105  ;;  %v3616_v48 = vld [vmem:[%s4146_s14 + $0x4] ss:$8 sps:$4 sm:$0xff]  }
 0x2bd   : > { %3666 = vpow2.f32 %v1146_v7  ;;  %v1123_v5 = vsub.f32 %v4265_v17, %v1106_v12  ;;  %v3614_v12 = vld [vmem:[%s4138_s23 + $0x30] sm:$0xff]  }
 0x2be   : > { %v3659_v54 = vpop.eup %3658  ;;  %v1144_v35 = vmul.f32 1.442695, %v1118_v3  ;;  %3430 = vmatpush3.bf16.xpose.msra.mxu1 %v3609_v24  ;;  %v3611_v24 = vld [vmem:[%s4138_s23 + $0x18] sm:$0xff]   ;;  %v3613_v3 = vld [vmem:[%s4138_s23 + $0x28] sm:$0xff]  }
 0x2bf   : > { %v1091_v55 = vpop.permute.xlu1 %1090  ;;  %v1351_v63 = vpack.c.bf16 %v3659_v54, %v3657_v44  ;;  %3431 = vmatprep.subr.bf16.mxu1 %v3610_v33  ;;  %v1154_v9 = vmul.f32 1.442695, %v1123_v5  ;;  %v3619_v5 = vld [vmem:[%s4146_s14 + $0x34] ss:$8 sps:$4 sm:$0xff]  }
 0x2c0   : > { %3668 = vpow2.f32 %v1144_v35  ;;  %v1120_v18 = vsub.f32 %v4231_v15, %v1091_v55  ;;  %v3617_v35 = vld [vmem:[%s4146_s14 + $0x14] ss:$8 sps:$4 sm:$0xff]   ;;  %v3620_v55 = vld [vmem:[%s4146_s14 + $0x44] ss:$8 sps:$4 sm:$0xff]  }
 0x2c1   : > { %3415 = vmatprep.mubr.bf16.mxu1 %v1351_v63  ;;  %3670 = vpow2.f32 %v1150_v11  ;;  %v3618_v11 = vld [vmem:[%s4146_s14 + $0x24] ss:$8 sps:$4 sm:$0xff]   ;;  %v3621_v63 = vld [vmem:[%s4146_s14 + $0x54] ss:$8 sps:$4 sm:$0xff]  }
 0x2c2   : > { %v3661_v0 = vpop.eup %3660  ;;  %v1148_v25 = vmul.f32 1.442695, %v1120_v18  ;;  %v3622_v18 = vld [vmem:[%s4146_s14 + $0x64] ss:$8 sps:$4 sm:$0xff]  }
 0x2c3   : > { %1186 = vadd.xlane.f32.xlu1 %v3661_v0  ;;  %v1101_v6 = vpop.permute.xlu1 %1100  ;;  %v1352_v27 = vpack.c.bf16 %v3661_v0, %v3655_v1  ;;  %v3663_v8 = vpop.eup %3662  ;;  %v3623_v0 = vld [vmem:[%s4146_s14 + $0x74] ss:$8 sps:$4 sm:$0xff]  }
 0x2c4   : > { %3672 = vpow2.f32 %v1148_v25  ;;  %v1122_v62 = vsub.f32 %v4229_v14, %v1101_v6 }
 0x2c5   : > { %3416 = vmatmul.mubr.bf16.gmra.mrb[4].mxu1 %v1352_v27  ;;  %3674 = vpow2.f32 %v1154_v9  ;;  %v4498_v9 = vpop.permute.xlu0 %1255 }
 0x2c6   : > { %v3665_v17 = vpop.eup %3664  ;;  %v1152_v2 = vmul.f32 1.442695, %v1122_v62  ;;  %3432 = vmatpush3.bf16.xpose.msra.mxu1 %v3610_v33 }
 0x2c7   : > { %1182 = vadd.xlane.f32.xlu1 %v3659_v54  ;;  %v1353_v15 = vpack.c.bf16 %v3663_v8, %v3665_v17  ;;  %3433 = vmatprep.subr.bf16.mxu1 %v3611_v24  ;;  %v3667_v32 = vpop.eup %3666  ;;  %v3615_v54 = vld [vmem:[%s4138_s23 + $0x38] sm:$0xff]   ;;  %v4496_v25 = vpop.permute.xlu1 %1260 }
 0x2c8   : > { %3676 = vpow2.f32 %v1152_v2  ;;  %5194 = vst [vmem:[#allocation10_spill] sm:$0xff] %v4496_v25  ;;  %v916_v2 = vld [vmem:[#allocation3] sm:$0xff] }
 0x2c9   : > { %3419 = vmatprep.mubr.bf16.mxu1 %v1353_v15  ;;  %v4502_v27 = vpop.permute.xlu0 %1270  ;;  %v4787_v25 = vld [vmem:[#allocation2 + $0xe0] sm:$0xff] }
 0x2ca   : > { %v3669_v13 = vpop.eup %3668 }
 0x2cb   : > { %1194 = vadd.xlane.f32.xlu1 %v3667_v32  ;;  %1192 = vadd.xlane.f32.xlu0 %v3669_v13  ;;  %v1354_v1 = vpack.c.bf16 %v3667_v32, %v3669_v13  ;;  %v3671_v14 = vpop.eup %3670  ;;  %v4500_v6 = vpop.permute.xlu1 %1265  ;;  %v1156_v13 = vmul.f32 %v4439_v22, %v916_v2 }
 0x2cd   : > { %3420 = vmatmul.mubr.bf16.gmra.mrb[8].mxu1 %v1354_v1  ;;  %v4506_v62 = vpop.permute.xlu0 %1280 }
 0x2ce   : > { %v3673_v44 = vpop.eup %3672  ;;  %3434 = vmatpush3.bf16.xpose.msra.mxu1 %v3611_v24  ;;  %5196 = vst [vmem:[#allocation12_spill] sm:$0xff] %v4506_v62  ;;  %v4766_v62 = vld [vmem:[#allocation2 + $0xf0] sm:$0xff] }
 0x2cf   : > { %1190 = vadd.xlane.f32.xlu1 %v3663_v8  ;;  %1188 = vadd.xlane.f32.xlu0 %v3665_v17  ;;  %v1355_v4 = vpack.c.bf16 %v3671_v14, %v3673_v44  ;;  %v3675_v7 = vpop.eup %3674  ;;  %v4504_v24 = vpop.permute.xlu1 %1275  ;;  %v918_v8 = vld [vmem:[#allocation3 + $0x10] sm:$0xff] }
 0x2d0   : > { %3435 = vmatprep.subr.bf16.mxu1 %v3612_v39  ;;  %5195 = vst [vmem:[#allocation11_spill] sm:$0xff] %v4504_v24  ;;  %v1158_v15 = vmul.f32 %v4455_v36, %v918_v8  ;;  %v1010_v36 = vmul.f32 1.442695, %v987_v45 }
 0x2d1   : > { %3423 = vmatprep.mubr.bf16.mxu1 %v1355_v4 }
 0x2d2   : > { %v3677_v47 = vpop.eup %3676  ;;  %3678 = vpow2.f32 %v1010_v36 }
 0x2d3   : > { %1202 = vadd.xlane.f32.xlu1 %v3675_v7  ;;  %1200 = vadd.xlane.f32.xlu0 %v3677_v47  ;;  %v1356_v33 = vpack.c.bf16 %v3675_v7, %v3677_v47  ;;  %v4508_v17 = vpop.permute.xlu1 %1285  ;;  %v919_v47 = vld [vmem:[#allocation3 + $0x18] sm:$0xff] }
 0x2d4   : > { %5197 = vst [vmem:[#allocation13_spill] sm:$0xff] %v4508_v17  ;;  %v1159_v22 = vmul.f32 %v4445_v26, %v919_v47  ;;  %v4777_v17 = vld [vmem:[#allocation2 + $0xf8] sm:$0xff] }
 0x2d5   : > { %3424 = vmatmul.mubr.bf16.gmra.mrb[12].mxu1 %v1356_v33 }
 0x2d6   : > { %3436 = vmatpush3.bf16.xpose.msra.mxu1 %v3612_v39  ;;  %3443 = vmatprep.mubr.bf16.mxu1 %v3616_v48 }
 0x2d7   : > { %1198 = vadd.xlane.f32.xlu1 %v3671_v14  ;;  %1196 = vadd.xlane.f32.xlu0 %v3673_v44  ;;  %v917_v14 = vld [vmem:[#allocation3 + $0x8] sm:$0xff] }
 0x2d8   : > { %3437 = vmatprep.subr.bf16.mxu1 %v3613_v3  ;;  %v1157_v4 = vmul.f32 %v4451_v49, %v917_v14  ;;  %v931_v14 = vld [vmem:[#allocation3 + $0x78] sm:$0xff] }
 0x2dc   : > { %v4537_v52 = vpop.eup %3678 }
 0x2de   : > { %3438 = vmatpush3.bf16.xpose.msra.mxu1 %v3613_v3  ;;  %v922_v3 = vld [vmem:[#allocation3 + $0x30] sm:$0xff] }
 0x2df   : > { %3439 = vmatprep.subr.bf16.mxu1 %v3614_v12 }
 0x2e6   : > { %3440 = vmatpush3.bf16.xpose.msra.mxu1 %v3614_v12 }
 0x2e7   : > { %3441 = vmatprep.subr.bf16.mxu1 %v3615_v54 }
 0x2ee   : > { %3442 = vmatpush3.bf16.xpose.msra.mxu1 %v3615_v54  ;;  %v1162_v54 = vmul.f32 %v4461_v28, %v922_v3  ;;  %v1012_v28 = vmul.f32 1.442695, %v988_v21  ;;  %v1022_v21 = vmul.f32 1.442695, %v5198_v19  ;;  %v928_v3 = vld [vmem:[#allocation3 + $0x60] sm:$0xff] }
 0x2f5   : > { %3444 = vmatmul.mubr.bf16.vlgmr.msra.gmra.mrb[16].mxu1 %v3617_v35  ;;  %v920_v35 = vld [vmem:[#allocation3 + $0x20] sm:$0xff] }
 0x2f6   : > { %3447 = vmatprep.mubr.bf16.mxu1 %v3618_v11  ;;  %v1016_v11 = vmul.f32 1.442695, %v990_v60  ;;  %v1160_v45 = vmul.f32 %v4458_v41, %v920_v35  ;;  %v1163_v60 = vmul.f32 %v4537_v52, %v923_v56 }
 0x2f8   : > { %3680 = vpow2.f32 %v1016_v11 }
 0x2f9   : > { %3682 = vpow2.f32 %v1018_v42 }
 0x2fa   : > { %3684 = vpow2.f32 %v1012_v28 }
 0x2fb   : > { %3686 = vpow2.f32 %v1014_v51 }
 0x2fc   : > { %3688 = vpow2.f32 %v1024_v57 }
 0x2fd   : > { %3448 = vmatmul.mubr.bf16.gmra.mrb[20].mxu1 %v3619_v5  ;;  %3690 = vpow2.f32 %v1026_v58 }
 0x2fe   : > { %3451 = vmatprep.mubr.bf16.mxu1 %v3620_v55  ;;  %3692 = vpow2.f32 %v1020_v10  ;;  %v924_v55 = vld [vmem:[#allocation3 + $0x40] sm:$0xff] }
 0x2ff   : > { %3694 = vpow2.f32 %v1022_v21 }
 0x302   : > { %v4552_v23 = vpop.eup %3680 }
 0x303   : > { %v4556_v31 = vpop.eup %3682  ;;  %v1166_v40 = vmul.f32 %v4552_v23, %v926_v29 }
 0x304   : > { %v4558_v50 = vpop.eup %3684  ;;  %v1167_v53 = vmul.f32 %v4556_v31, %v927_v46 }
 0x305   : > { %3452 = vmatmul.mubr.bf16.gmra.mrb[24].mxu1 %v3621_v63  ;;  %v4563_v30 = vpop.eup %3686  ;;  %v925_v63 = vld [vmem:[#allocation3 + $0x48] sm:$0xff]  ;;  %v1164_v2 = vmul.f32 %v4558_v50, %v924_v55 }
 0x306   : > { %3455 = vmatprep.mubr.bf16.mxu1 %v3622_v18  ;;  %v4565_v8 = vpop.eup %3688 }
 0x30d   : > { %3456 = vmatmul.mubr.bf16.gmra.mrb[28].mxu1 %v3623_v0 }
 0x337   : > { %v1177_v32 = vpop.xlane.xlu0 %1176 }
 0x338   : > { %v1206_v1 = vadd.f32 %v1177_v32, %v1158_v15  ;;  %v1173_v39 = vpop.xlane.xlu1 %1172  ;;  %v1165_v15 = vmul.f32 %v4563_v30, %v925_v63  ;;  %v4571_v32 = vpop.eup %3690 }
 0x339   : > { %v1204_v44 = vadd.f32 %v1173_v39, %v1156_v13  ;;  %v930_v39 = vld [vmem:[#allocation3 + $0x70] sm:$0xff] }
 0x33a   : > { %1223 = vst.msk [vmem:[#allocation3 + $0x10] sm:$0xff] %vm578_vm0, %v1206_v1  ;;  %v1170_v47 = vmul.f32 %v4565_v8, %v930_v39 }
 0x33b   : > { %1221 = vst.msk [vmem:[#allocation3] sm:$0xff] %vm578_vm0, %v1204_v44 }
 0x33c   : > { %v1175_v7 = vpop.xlane.xlu0 %1174 }
 0x33d   : > { %v1205_v48 = vadd.f32 %v1175_v7, %v1157_v4  ;;  %v4573_v7 = vpop.eup %3692 }
 0x33e   : > { %v4579_v36 = vpop.eup %3694  ;;  %v1168_v35 = vmul.f32 %v4573_v7, %v928_v3 }
 0x33f   : > { %1222 = vst.msk [vmem:[#allocation3 + $0x8] sm:$0xff] %vm578_vm0, %v1205_v48  ;;  %v1171_v48 = vmul.f32 %v4571_v32, %v931_v14 }
 0x340   : > { %v1179_v33 = vpop.xlane.xlu1 %1178 }
 0x341   : > { %v1207_v12 = vadd.f32 %v1179_v33, %v1159_v22 }
 0x343   : > { %1224 = vst.msk [vmem:[#allocation3 + $0x18] sm:$0xff] %vm578_vm0, %v1207_v12  ;;  %v929_v12 = vld [vmem:[#allocation3 + $0x68] sm:$0xff] }
 0x344   : > { %v1185_v49 = vpop.xlane.xlu0 %1184  ;;  %v1169_v11 = vmul.f32 %v4579_v36, %v929_v12 }
 0x345   : > { %v1210_v37 = vadd.f32 %v1185_v49, %v1162_v54 }
 0x347   : > { %1227 = vst.msk [vmem:[#allocation3 + $0x30] sm:$0xff] %vm578_vm0, %v1210_v37 }
 0x348   : > { %v1181_v26 = vpop.xlane.xlu0 %1180 }
 0x349   : > { %v1208_v5 = vadd.f32 %v1181_v26, %v1160_v45 }
 0x34b   : > { %1225 = vst.msk [vmem:[#allocation3 + $0x20] sm:$0xff] %vm578_vm0, %v1208_v5 }
 0x350   : > { %v1187_v61 = vpop.xlane.xlu1 %1186 }
 0x351   : > { %v1211_v16 = vadd.f32 %v1187_v61, %v1163_v60 }
 0x353   : > { %1228 = vst.msk [vmem:[#allocation3 + $0x38] sm:$0xff] %vm578_vm0, %v1211_v16 }
 0x354   : > { %v1183_v34 = vpop.xlane.xlu1 %1182 }
 0x355   : > { %v1209_v38 = vadd.f32 %v1183_v34, %v1161_v20 }
 0x357   : > { %1226 = vst.msk [vmem:[#allocation3 + $0x28] sm:$0xff] %vm578_vm0, %v1209_v38 }
 0x358   : > { %v1193_v41 = vpop.xlane.xlu0 %1192  ;;  %v1195_v43 = vpop.xlane.xlu1 %1194 }
 0x359   : > { %v1214_v18 = vadd.f32 %v1193_v41, %v1166_v40  ;;  %v1215_v0 = vadd.f32 %v1195_v43, %v1167_v53 }
 0x35b   : > { %1231 = vst.msk [vmem:[#allocation3 + $0x50] sm:$0xff] %vm578_vm0, %v1214_v18  ;;  %1232 = vst.msk [vmem:[#allocation3 + $0x58] sm:$0xff] %vm578_vm0, %v1215_v0 }
 0x35c   : > { %v1189_v13 = vpop.xlane.xlu0 %1188  ;;  %v1191_v1 = vpop.xlane.xlu1 %1190 }
 0x35d   : > { %v1212_v44 = vadd.f32 %v1189_v13, %v1164_v2  ;;  %v1213_v4 = vadd.f32 %v1191_v1, %v1165_v15 }
 0x35f   : > { %1229 = vst.msk [vmem:[#allocation3 + $0x40] sm:$0xff] %vm578_vm0, %v1212_v44  ;;  %1230 = vst.msk [vmem:[#allocation3 + $0x48] sm:$0xff] %vm578_vm0, %v1213_v4  ;;  %v3624_v44 = vld [vmem:[%s4274_s25] sm:$0xff]   ;;  %v3625_v4 = vld [vmem:[%s4274_s25 + $0x8] sm:$0xff]  }
 0x360   : > { %v1201_v22 = vpop.xlane.xlu0 %1200  ;;  %v1203_v33 = vpop.xlane.xlu1 %1202  ;;  %3459 = vmatprep.subr.bf16.mxu0 %v3624_v44 }
 0x361   : > { %v1218_v54 = vadd.f32 %v1201_v22, %v1170_v47  ;;  %v1219_v49 = vadd.f32 %v1203_v33, %v1171_v48  ;;  %3460 = vmatpush3.bf16.msra.mxu0 %v3624_v44  ;;  %v3626_v48 = vld [vmem:[%s4274_s25 + $0x10] sm:$0xff]  }
 0x362   : > { %3461 = vmatprep.subr.bf16.mxu0 %v3625_v4 }
 0x363   : > { %1235 = vst.msk [vmem:[#allocation3 + $0x70] sm:$0xff] %vm578_vm0, %v1218_v54  ;;  %1236 = vst.msk [vmem:[#allocation3 + $0x78] sm:$0xff] %vm578_vm0, %v1219_v49  ;;  %v4702_v54 = vld [vmem:[#allocation2 + $0xb0] sm:$0xff]  ;;  %v3627_v49 = vld [vmem:[%s4274_s25 + $0x18] sm:$0xff]  }
 0x364   : > { %v1197_v37 = vpop.xlane.xlu0 %1196  ;;  %v1199_v42 = vpop.xlane.xlu1 %1198 }
 0x365   : > { %v1216_v45 = vadd.f32 %v1197_v37, %v1168_v35  ;;  %v1217_v26 = vadd.f32 %v1199_v42, %v1169_v11  ;;  %3462 = vmatpush3.bf16.msra.mxu0 %v3625_v4  ;;  %v4711_v11 = vld [vmem:[#allocation2 + $0xb8] sm:$0xff] }
 0x366   : > { %3463 = vmatprep.subr.bf16.mxu0 %v3626_v48 }
 0x367   : > { %1233 = vst.msk [vmem:[#allocation3 + $0x60] sm:$0xff] %vm578_vm0, %v1216_v45  ;;  %1234 = vst.msk [vmem:[#allocation3 + $0x68] sm:$0xff] %vm578_vm0, %v1217_v26  ;;  %v4716_v45 = vld [vmem:[#allocation2 + $0xa0] sm:$0xff] }
 0x368   : > { %v3628_v26 = vld [vmem:[%s4274_s25 + $0x20] sm:$0xff]  }
 0x369   : > { %3464 = vmatpush3.bf16.msra.mxu0 %v3626_v48 }
 0x36a   : > { %3465 = vmatprep.subr.bf16.mxu0 %v3627_v49 }
 0x36d   : > { %3466 = vmatpush3.bf16.msra.mxu0 %v3627_v49 }
 0x36e   : > { %3467 = vmatprep.subr.bf16.mxu0 %v3628_v26 }
 0x371   : > { %3468 = vmatpush3.bf16.msra.mxu0 %v3628_v26 }
 0x388   : > { %v4587_v28 = vpop.f32.mrb[0].mxu1 }
 0x389   : > { %v4589_v5 = vpop.f32.mrb[1].mxu1 }
 0x38a   : > { %5199 = vst [vmem:[#allocation14_spill] sm:$0xff] %v4589_v5  ;;  %v4591_v51 = vpop.f32.mrb[2].mxu1 }
 0x38b   : > { %5200 = vst [vmem:[#allocation15_spill] sm:$0xff] %v4591_v51  ;;  %v4593_v56 = vpop.f32.mrb[3].mxu1 }
 0x38c   : > { %5201 = vst [vmem:[#allocation16_spill] sm:$0xff] %v4593_v56 }
 0x398   : > { %v4595_v57 = vpop.f32.mrb[4].mxu1 }
 0x399   : > { %5202 = vst [vmem:[#allocation17_spill] sm:$0xff] %v4595_v57  ;;  %v4597_v58 = vpop.f32.mrb[5].mxu1 }
 0x39a   : > { %5203 = vst [vmem:[#allocation18_spill] sm:$0xff] %v4597_v58  ;;  %v4599_v60 = vpop.f32.mrb[6].mxu1  ;;  %v4758_v58 = vld [vmem:[#allocation2 + $0xc8] sm:$0xff] }
 0x39b   : > { %v4601_v61 = vpop.f32.mrb[7].mxu1 }
 0x39c   : > { %5204 = vst [vmem:[#allocation19_spill] sm:$0xff] %v4601_v61 }
 0x3a0   : > { %v4603_v59 = vpop.f32.mrb[8].mxu1 }
 0x3a1   : > { %v4605_v10 = vpop.f32.mrb[9].mxu1 }
 0x3a2   : > { %v4607_v16 = vpop.f32.mrb[10].mxu1 }
 0x3a3   : > { %v4609_v19 = vpop.f32.mrb[11].mxu1 }
 0x3a8   : > { %v4611_v21 = vpop.f32.mrb[12].mxu1 }
 0x3a9   : > { %v4613_v20 = vpop.f32.mrb[13].mxu1 }
 0x3aa   : > { %5205 = vst [vmem:[#allocation20_spill] sm:$0xff] %v4613_v20  ;;  %v4615_v34 = vpop.f32.mrb[14].mxu1 }
 0x3ab   : > { %v4617_v29 = vpop.f32.mrb[15].mxu1 }
 0x3ac   : > { %5206 = vst [vmem:[#allocation21_spill] sm:$0xff] %v4617_v29  ;;  %v4749_v29 = vld [vmem:[#allocation2 + $0xc0] sm:$0xff] }
 0x3c8   : > { %v4619_v46 = vpop.f32.mrb[16].mxu1 }
 0x3c9   : > { %1829 = vmax.xlane.f32.xlu0 %v4619_v46  ;;  %v4622_v38 = vpop.f32.mrb[17].mxu1 }
 0x3ca   : > { %1825 = vmax.xlane.f32.xlu1 %v4622_v38  ;;  %v4625_v40 = vpop.f32.mrb[18].mxu1 }
 0x3cb   : > { %v4627_v53 = vpop.f32.mrb[19].mxu1 }
 0x3cd   : > { %1827 = vmax.xlane.f32.xlu0 %v4627_v53 }
 0x3ce   : > { %1831 = vmax.xlane.f32.xlu1 %v4625_v40 }
 0x3d0   : > { %v4631_v41 = vpop.f32.mrb[20].mxu1 }
 0x3d1   : > { %1837 = vmax.xlane.f32.xlu0 %v4631_v41  ;;  %v4634_v43 = vpop.f32.mrb[21].mxu1 }
 0x3d2   : > { %v4636_v55 = vpop.f32.mrb[22].mxu1 }
 0x3d3   : > { %1839 = vmax.xlane.f32.xlu1 %v4636_v55  ;;  %v4639_v63 = vpop.f32.mrb[23].mxu1 }
 0x3d5   : > { %1833 = vmax.xlane.f32.xlu0 %v4634_v43 }
 0x3d7   : > { %1835 = vmax.xlane.f32.xlu1 %v4639_v63 }
 0x3d8   : > { %v4643_v18 = vpop.f32.mrb[24].mxu1 }
 0x3d9   : > { %1845 = vmax.xlane.f32.xlu0 %v4643_v18  ;;  %v4646_v0 = vpop.f32.mrb[25].mxu1 }
 0x3da   : > { %v4648_v2 = vpop.f32.mrb[26].mxu1 }
 0x3db   : > { %1847 = vmax.xlane.f32.xlu1 %v4648_v2  ;;  %v4651_v15 = vpop.f32.mrb[27].mxu1 }
 0x3dd   : > { %1841 = vmax.xlane.f32.xlu0 %v4646_v0 }
 0x3df   : > { %1843 = vmax.xlane.f32.xlu1 %v4651_v15 }
 0x3e0   : > { %v4655_v13 = vpop.f32.mrb[28].mxu1 }
 0x3e1   : > { %1853 = vmax.xlane.f32.xlu0 %v4655_v13  ;;  %v4658_v1 = vpop.f32.mrb[29].mxu1 }
 0x3e2   : > { %v4660_v39 = vpop.f32.mrb[30].mxu1 }
 0x3e3   : > { %1855 = vmax.xlane.f32.xlu1 %v4660_v39  ;;  %v4663_v14 = vpop.f32.mrb[31].mxu1 }
 0x3e5   : > { %1849 = vmax.xlane.f32.xlu0 %v4658_v1 }
 0x3e7   : > { %1851 = vmax.xlane.f32.xlu1 %v4663_v14 }
 0x3f8   : > { %1295 = vperm.xlu1 %3583, %v4558_v50   ;;  %v4676_v50 = vld [vmem:[#allocation2 + $0x90] sm:$0xff] }
 0x3fb   : > { %1290 = vperm.xlu0 %3582, %v4537_v52   ;;  %v4678_v52 = vld [vmem:[#allocation2 + $0x80] sm:$0xff] }
 0x3fc   : > { %1305 = vperm.xlu1 %3583, %v4552_v23  }
 0x3ff   : > { %1300 = vperm.xlu0 %3582, %v4563_v30  }
 0x400   : > { %1320 = vperm.xlu1 %3583, %v4579_v36   ;;  %v4691_v36 = vld [vmem:[#allocation2 + $0x98] sm:$0xff] }
 0x403   : > { %1310 = vperm.xlu0 %3582, %v4556_v31  }
 0x407   : > { %1315 = vperm.xlu0 %3582, %v4573_v7   ;;  %v4686_v7 = vld [vmem:[#allocation2 + $0x88] sm:$0xff] }
 0x456   : > { %v1830_v23 = vpop.xlane.xlu0 %1829 }
 0x457   : > { %v4681_v30 = vmax.f32 %v4676_v50, %v1830_v23  ;;  %v1826_v47 = vpop.xlane.xlu1 %1825  ;;  %v4725_v23 = vld [vmem:[#allocation2 + $0xa8] sm:$0xff] }
 0x458   : > { %v4684_v31 = vmax.f32 %v4678_v52, %v1826_v47 }
 0x459   : > { %2444 = vst.msk [vmem:[#allocation2 + $0x90] sm:$0xff] %vm578_vm0, %v4681_v30 }
 0x45a   : > { %2442 = vst.msk [vmem:[#allocation2 + $0x80] sm:$0xff] %vm578_vm0, %v4684_v31  ;;  %v1828_v22 = vpop.xlane.xlu0 %1827  ;;  %1923 = vperm.xlu1 %3583, %v4684_v31  }
 0x45b   : > { %v4697_v33 = vmax.f32 %v4686_v7, %v1828_v22  ;;  %v1832_v3 = vpop.xlane.xlu1 %1831  ;;  %v4732_v22 = vld [vmem:[#allocation2 + $0xd0] sm:$0xff] }
 0x45c   : > { %v4700_v12 = vmax.f32 %v4691_v36, %v1832_v3  ;;  %v3629_v3 = vld [vmem:[%s4274_s25 + $0x28] sm:$0xff]  }
 0x45d   : > { %2443 = vst.msk [vmem:[#allocation2 + $0x88] sm:$0xff] %vm578_vm0, %v4697_v33  ;;  %1928 = vperm.xlu0 %3582, %v4697_v33   ;;  %3469 = vmatprep.subr.bf16.mxu0 %v3629_v3  ;;  %v1874_v57 = vsub.f32 %v4686_v7, %v4697_v33  ;;  %v1875_v33 = vsub.f32 %v4676_v50, %v4681_v30 }
 0x45e   : > { %2445 = vst.msk [vmem:[#allocation2 + $0x98] sm:$0xff] %vm578_vm0, %v4700_v12  ;;  %v1838_v35 = vpop.xlane.xlu0 %1837  ;;  %1933 = vperm.xlu1 %3583, %v4681_v30   ;;  %3470 = vmatpush3.bf16.msra.mxu0 %v3629_v3  ;;  %v1876_v51 = vsub.f32 %v4691_v36, %v4700_v12 }
 0x45f   : > { %v4714_v37 = vmax.f32 %v4702_v54, %v1838_v35  ;;  %v1893_v30 = vmul.f32 1.442695, %v1875_v33 }
 0x460   : > { %v1840_v42 = vpop.xlane.xlu1 %1839  ;;  %v1895_v36 = vmul.f32 1.442695, %v1876_v51 }
 0x461   : > { %2448 = vst.msk [vmem:[#allocation2 + $0xb0] sm:$0xff] %vm578_vm0, %v4714_v37  ;;  %v4722_v44 = vmax.f32 %v4711_v11, %v1840_v42  ;;  %1938 = vperm.xlu0 %3582, %v4700_v12   ;;  %v4741_v42 = vld [vmem:[#allocation2 + $0xd8] sm:$0xff]  ;;  %v1879_v33 = vsub.f32 %v4702_v54, %v4714_v37 }
 0x462   : > { %v1834_v4 = vpop.xlane.xlu0 %1833 }
 0x463   : > { %2449 = vst.msk [vmem:[#allocation2 + $0xb8] sm:$0xff] %vm578_vm0, %v4722_v44  ;;  %v4730_v47 = vmax.f32 %v4716_v45, %v1834_v4  ;;  %v1880_v51 = vsub.f32 %v4711_v11, %v4722_v44  ;;  %v1901_v54 = vmul.f32 1.442695, %v1879_v33 }
 0x464   : > { %v1836_v48 = vpop.xlane.xlu1 %1835 }
 0x465   : > { %2446 = vst.msk [vmem:[#allocation2 + $0xa0] sm:$0xff] %vm578_vm0, %v4730_v47  ;;  %v4738_v49 = vmax.f32 %v4725_v23, %v1836_v48  ;;  %1943 = vperm.xlu1 %3583, %v4730_v47   ;;  %v3630_v48 = vld [vmem:[%s4274_s25 + $0x30] sm:$0xff]  }
 0x466   : > { %v1846_v35 = vpop.xlane.xlu0 %1845  ;;  %3471 = vmatprep.subr.bf16.mxu0 %v3630_v48 }
 0x467   : > { %2447 = vst.msk [vmem:[#allocation2 + $0xa8] sm:$0xff] %vm578_vm0, %v4738_v49  ;;  %v4746_v26 = vmax.f32 %v4732_v22, %v1846_v35  ;;  %1948 = vperm.xlu0 %3582, %v4738_v49   ;;  %3472 = vmatpush3.bf16.msra.mxu0 %v3630_v48  ;;  %v1878_v12 = vsub.f32 %v4725_v23, %v4738_v49 }
 0x468   : > { %v1848_v4 = vpop.xlane.xlu1 %1847 }
 0x469   : > { %2452 = vst.msk [vmem:[#allocation2 + $0xd0] sm:$0xff] %vm578_vm0, %v4746_v26  ;;  %v4755_v20 = vmax.f32 %v4741_v42, %v1848_v4  ;;  %1953 = vperm.xlu1 %3583, %v4714_v37   ;;  %v3631_v4 = vld [vmem:[%s4274_s25 + $0x38] sm:$0xff]   ;;  %v1899_v23 = vmul.f32 1.442695, %v1878_v12  ;;  %v1883_v37 = vsub.f32 %v4732_v22, %v4746_v26 }
 0x46a   : > { %v1842_v61 = vpop.xlane.xlu0 %1841  ;;  %3473 = vmatprep.subr.bf16.mxu0 %v3631_v4 }
 0x46b   : > { %2453 = vst.msk [vmem:[#allocation2 + $0xd8] sm:$0xff] %vm578_vm0, %v4755_v20  ;;  %v4763_v3 = vmax.f32 %v4749_v29, %v1842_v61  ;;  %1958 = vperm.xlu0 %3582, %v4722_v44   ;;  %3474 = vmatpush3.bf16.msra.mxu0 %v3631_v4  ;;  %v4797_v4 = vld [vmem:[#allocation2 + $0xe8] sm:$0xff]  ;;  %v1903_v44 = vmul.f32 1.442695, %v1880_v51 }
 0x46c   : > { %v1844_v35 = vpop.xlane.xlu1 %1843 }
 0x46d   : > { %2450 = vst.msk [vmem:[#allocation2 + $0xc0] sm:$0xff] %vm578_vm0, %v4763_v3  ;;  %v4772_v24 = vmax.f32 %v4758_v58, %v1844_v35  ;;  %1963 = vperm.xlu1 %3583, %v4763_v3   ;;  %v1873_v35 = vsub.f32 %v4678_v52, %v4684_v31 }
 0x46e   : > { %v1854_v61 = vpop.xlane.xlu0 %1853 }
 0x46f   : > { %2451 = vst.msk [vmem:[#allocation2 + $0xc8] sm:$0xff] %vm578_vm0, %v4772_v24  ;;  %v4782_v48 = vmax.f32 %v4766_v62, %v1854_v61  ;;  %1968 = vperm.xlu0 %3582, %v4772_v24   ;;  %v1891_v61 = vmul.f32 1.442695, %v1874_v57 }
 0x470   : > { %v1856_v56 = vpop.xlane.xlu1 %1855 }
 0x471   : > { %2456 = vst.msk [vmem:[#allocation2 + $0xf0] sm:$0xff] %vm578_vm0, %v4782_v48  ;;  %v4792_v7 = vmax.f32 %v4777_v17, %v1856_v56  ;;  %1973 = vperm.xlu1 %3583, %v4746_v26   ;;  %v1889_v56 = vmul.f32 1.442695, %v1873_v35  ;;  %3696 = vpow2.f32 %v1891_v61  ;;  %v1909_v26 = vmul.f32 1.442695, %v1883_v37 }
 0x472   : > { %v1850_v5 = vpop.xlane.xlu0 %1849 }
 0x473   : > { %2457 = vst.msk [vmem:[#allocation2 + $0xf8] sm:$0xff] %vm578_vm0, %v4792_v7  ;;  %v4804_v31 = vmax.f32 %v4787_v25, %v1850_v5  ;;  %1978 = vperm.xlu0 %3582, %v4755_v20   ;;  %v1877_v5 = vsub.f32 %v4716_v45, %v4730_v47  ;;  %3698 = vpow2.f32 %v1889_v56 }
 0x474   : > { %v1852_v50 = vpop.xlane.xlu1 %1851  ;;  %3700 = vpow2.f32 %v1893_v30 }
 0x475   : > { %2454 = vst.msk [vmem:[#allocation2 + $0xe0] sm:$0xff] %vm578_vm0, %v4804_v31  ;;  %v4812_v57 = vmax.f32 %v4797_v4, %v1852_v50  ;;  %1983 = vperm.xlu1 %3583, %v4804_v31   ;;  %v1897_v61 = vmul.f32 1.442695, %v1877_v5  ;;  %3702 = vpow2.f32 %v1895_v36 }
 0x477   : > { %2455 = vst.msk [vmem:[#allocation2 + $0xe8] sm:$0xff] %vm578_vm0, %v4812_v57  ;;  %1988 = vperm.xlu0 %3582, %v4812_v57   ;;  %3704 = vpow2.f32 %v1897_v61 }
 0x478   : > { %v1296_v35 = vpop.permute.xlu1 %1295  ;;  %3706 = vpow2.f32 %v1899_v23 }
 0x479   : > { %v1341_v50 = vmul.f32 0.0, %v1296_v35  ;;  %1993 = vperm.xlu1 %3583, %v4782_v48   ;;  %3708 = vpow2.f32 %v1901_v54 }
 0x47a   : > { %v1291_v45 = vpop.permute.xlu0 %1290  ;;  %3710 = vpow2.f32 %v1903_v44 }
 0x47b   : > { %v1340_v47 = vmul.f32 0.0, %v1291_v45  ;;  %1998 = vperm.xlu0 %3582, %v4792_v7   ;;  %v4827_v52 = vadd.f32 %v4605_v10, %v1341_v50  ;;  %v4841_v11 = vpop.eup %3696  ;;  %3712 = vpow2.f32 %v1909_v26  ;;  %v1885_v45 = vsub.f32 %v4787_v25, %v4804_v31 }
 0x47c   : > { %v1306_v49 = vpop.permute.xlu1 %1305 }
 0x47d   : > { %v1343_v56 = vmul.f32 0.0, %v1306_v49  ;;  %1325 = vperm.xlu1 %3583, %v4565_v8   ;;  %v4833_v30 = vadd.f32 %v4599_v60, %v1340_v47  ;;  %v1884_v8 = vsub.f32 %v4741_v42, %v4755_v20  ;;  %v4849_v22 = vpop.eup %3698  ;;  %v1882_v42 = vsub.f32 %v4758_v58, %v4772_v24 }
 0x47e   : > { %v1301_v5 = vpop.permute.xlu0 %1300  ;;  %v4854_v35 = vpop.eup %3700  ;;  %v1886_v24 = vsub.f32 %v4797_v4, %v4812_v57  ;;  %v1913_v4 = vmul.f32 1.442695, %v1885_v45 }
 0x47f   : > { %v1342_v10 = vmul.f32 0.0, %v1301_v5  ;;  %1330 = vperm.xlu0 %3582, %v4571_v32   ;;  %v4839_v36 = vadd.f32 %v4603_v59, %v1343_v56  ;;  %v1881_v32 = vsub.f32 %v4749_v29, %v4763_v3  ;;  %v1911_v20 = vmul.f32 1.442695, %v1884_v8  ;;  %v4862_v50 = vpop.eup %3702 }
 0x480   : > { %v1887_v3 = vsub.f32 %v4766_v62, %v4782_v48  ;;  %v1907_v61 = vmul.f32 1.442695, %v1882_v42  ;;  %v1915_v48 = vmul.f32 1.442695, %v1886_v24  ;;  %v4904_v54 = vpop.permute.xlu1 %1320 }
 0x481   : > { %2152 = vperm.xlu1 %3583, %v4841_v11   ;;  %v4847_v60 = vadd.f32 %v4609_v19, %v1342_v10  ;;  %v1905_v29 = vmul.f32 1.442695, %v1881_v32  ;;  %v4867_v33 = vpop.eup %3704  ;;  %3714 = vpow2.f32 %v1911_v20 }
 0x482   : > { %v1311_v59 = vpop.permute.xlu0 %1310  ;;  %v4872_v58 = vpop.eup %3706 }
 0x483   : > { %v1344_v12 = vmul.f32 0.0, %v1311_v59  ;;  %2147 = vperm.xlu0 %3582, %v4849_v22   ;;  %3716 = vpow2.f32 %v1905_v29  ;;  %v4877_v62 = vpop.eup %3708 }
 0x484   : > { %3718 = vpow2.f32 %v1907_v61  ;;  %v4880_v47 = vpop.eup %3710 }
 0x485   : > { %2157 = vperm.xlu1 %3583, %v4854_v35   ;;  %v4860_v19 = vadd.f32 %v4607_v16, %v1344_v12  ;;  %v1917_v16 = vmul.f32 1.442695, %v1887_v3  ;;  %v4883_v57 = vpop.eup %3712 }
 0x486   : > { %v4906_v37 = vpop.permute.xlu0 %1315 }
 0x487   : > { %2162 = vperm.xlu0 %3582, %v4862_v50   ;;  %3720 = vpow2.f32 %v1917_v16 }
 0x488   : > { %3722 = vpow2.f32 %v1915_v48 }
 0x489   : > { %2167 = vperm.xlu1 %3583, %v4867_v33   ;;  %3724 = vpow2.f32 %v1913_v4 }
 0x48b   : > { %2172 = vperm.xlu0 %3582, %v4872_v58   ;;  %v4886_v25 = vpop.eup %3714 }
 0x48d   : > { %2177 = vperm.xlu1 %3583, %v4877_v62   ;;  %v4889_v31 = vpop.eup %3716 }
 0x48e   : > { %v4892_v51 = vpop.eup %3718 }
 0x48f   : > { %2182 = vperm.xlu0 %3582, %v4880_v47  }
 0x491   : > { %2197 = vperm.xlu1 %3583, %v4883_v57   ;;  %v4895_v23 = vpop.eup %3720 }
 0x492   : > { %v4898_v49 = vpop.eup %3722 }
 0x493   : > { %2202 = vperm.xlu0 %3582, %v4886_v25   ;;  %v4901_v56 = vpop.eup %3724 }
 0x495   : > { %2187 = vperm.xlu1 %3583, %v4889_v31  }
 0x497   : > { %2192 = vperm.xlu0 %3582, %v4892_v51  }
 0x499   : > { %2217 = vperm.xlu1 %3583, %v4895_v23  }
 0x49b   : > { %2212 = vperm.xlu0 %3582, %v4898_v49  }
 0x49d   : > { %2207 = vperm.xlu1 %3583, %v4901_v56  }
 0x4d9   : > { %v1924_v5 = vpop.permute.xlu1 %1923 }
 0x4da   : > { %v2001_v10 = vsub.f32 %v4622_v38, %v1924_v5 }
 0x4dc   : > { %v2017_v44 = vmul.f32 1.442695, %v2001_v10  ;;  %v1929_v8 = vpop.permute.xlu0 %1928 }
 0x4dd   : > { %v2002_v26 = vsub.f32 %v4627_v53, %v1929_v8  ;;  %v1934_v32 = vpop.permute.xlu1 %1933 }
 0x4de   : > { %3726 = vpow2.f32 %v2017_v44  ;;  %v2003_v59 = vsub.f32 %v4619_v46, %v1934_v32 }
 0x4df   : > { %v2019_v12 = vmul.f32 1.442695, %v2002_v26 }
 0x4e0   : > { %v2021_v20 = vmul.f32 1.442695, %v2003_v59  ;;  %v1939_v42 = vpop.permute.xlu0 %1938 }
 0x4e1   : > { %3728 = vpow2.f32 %v2019_v12  ;;  %v2004_v29 = vsub.f32 %v4625_v40, %v1939_v42 }
 0x4e2   : > { %3730 = vpow2.f32 %v2021_v20 }
 0x4e3   : > { %v2023_v3 = vmul.f32 1.442695, %v2004_v29 }
 0x4e4   : > { %v1944_v61 = vpop.permute.xlu1 %1943 }
 0x4e5   : > { %3732 = vpow2.f32 %v2023_v3  ;;  %v2005_v38 = vsub.f32 %v4634_v43, %v1944_v61 }
 0x4e6   : > { %v1949_v24 = vpop.permute.xlu0 %1948 }
 0x4e7   : > { %v2025_v16 = vmul.f32 1.442695, %v2005_v38  ;;  %v2006_v53 = vsub.f32 %v4639_v63, %v1949_v24 }
 0x4e8   : > { %v3727_v45 = vpop.eup %3726  ;;  %v1954_v48 = vpop.permute.xlu1 %1953 }
 0x4e9   : > { %v2027_v4 = vmul.f32 1.442695, %v2006_v53  ;;  %v2007_v46 = vsub.f32 %v4631_v41, %v1954_v48  ;;  %2065 = vadd.xlane.f32.xlu1 %v3727_v45  ;;  %3734 = vpow2.f32 %v2025_v16 }
 0x4ea   : > { %v1959_v5 = vpop.permute.xlu0 %1958 }
 0x4eb   : > { %v3729_v10 = vpop.eup %3728  ;;  %3736 = vpow2.f32 %v2027_v4  ;;  %v2029_v40 = vmul.f32 1.442695, %v2007_v46  ;;  %v2008_v44 = vsub.f32 %v4636_v55, %v1959_v5 }
 0x4ec   : > { %v3731_v8 = vpop.eup %3730  ;;  %v1964_v26 = vpop.permute.xlu1 %1963  ;;  %v2241_v43 = vpack.c.bf16 %v3729_v10, %v3727_v45 }
 0x4ed   : > { %3738 = vpow2.f32 %v2029_v40  ;;  %v2031_v32 = vmul.f32 1.442695, %v2008_v44  ;;  %v2009_v63 = vsub.f32 %v4646_v0, %v1964_v26  ;;  %2069 = vadd.xlane.f32.xlu0 %v3731_v8 }
 0x4ee   : > { %v1969_v59 = vpop.permute.xlu0 %1968  ;;  %3475 = vmatprep.mubr.bf16.mxu0 %v2241_v43 }
 0x4ef   : > { %v3733_v12 = vpop.eup %3732  ;;  %3740 = vpow2.f32 %v2031_v32  ;;  %v2033_v41 = vmul.f32 1.442695, %v2009_v63  ;;  %v2010_v20 = vsub.f32 %v4651_v15, %v1969_v59 }
 0x4f0   : > { %2071 = vadd.xlane.f32.xlu1 %v3733_v12  ;;  %v1974_v42 = vpop.permute.xlu1 %1973  ;;  %v2242_v29 = vpack.c.bf16 %v3733_v12, %v3731_v8 }
 0x4f1   : > { %v2035_v3 = vmul.f32 1.442695, %v2010_v20  ;;  %v2011_v55 = vsub.f32 %v4643_v18, %v1974_v42  ;;  %2067 = vadd.xlane.f32.xlu0 %v3729_v10  ;;  %3742 = vpow2.f32 %v2033_v41 }
 0x4f2   : > { %v1979_v61 = vpop.permute.xlu0 %1978  ;;  %3476 = vmatmul.mubr.bf16.vlgmr.msra.gmra.mrb[16].mxu0 %v2242_v29 }
 0x4f3   : > { %3744 = vpow2.f32 %v2035_v3  ;;  %v2037_v0 = vmul.f32 1.442695, %v2011_v55  ;;  %v2012_v38 = vsub.f32 %v4648_v2, %v1979_v61  ;;  %v3735_v24 = vpop.eup %3734 }
 0x4f4   : > { %v1984_v16 = vpop.permute.xlu1 %1983 }
 0x4f5   : > { %v3737_v53 = vpop.eup %3736  ;;  %3746 = vpow2.f32 %v2037_v0  ;;  %v2039_v45 = vmul.f32 1.442695, %v2012_v38  ;;  %v2013_v15 = vsub.f32 %v4658_v1, %v1984_v16 }
 0x4f6   : > { %v1989_v48 = vpop.permute.xlu0 %1988  ;;  %v2243_v4 = vpack.c.bf16 %v3737_v53, %v3735_v24 }
 0x4f7   : > { %v3739_v46 = vpop.eup %3738  ;;  %3748 = vpow2.f32 %v2039_v45  ;;  %v2041_v18 = vmul.f32 1.442695, %v2013_v15  ;;  %v2014_v5 = vsub.f32 %v4663_v14, %v1989_v48  ;;  %v2463_v15 = vld [vmem:[#allocation3 + $0x10] sm:$0xff]  ;;  %v2462_v48 = vld [vmem:[#allocation3 + $0x8] sm:$0xff] }
 0x4f8   : > { %3479 = vmatprep.mubr.bf16.mxu0 %v2243_v4  ;;  %2077 = vadd.xlane.f32.xlu0 %v3739_v46  ;;  %v1994_v10 = vpop.permute.xlu1 %1993  ;;  %v2465_v4 = vld [vmem:[#allocation3 + $0x20] sm:$0xff] }
 0x4f9   : > { %v3741_v40 = vpop.eup %3740  ;;  %v2043_v44 = vmul.f32 1.442695, %v2014_v5  ;;  %v2015_v2 = vsub.f32 %v4655_v13, %v1994_v10  ;;  %3750 = vpow2.f32 %v2041_v18  ;;  %v2467_v18 = vld [vmem:[#allocation3 + $0x30] sm:$0xff]  ;;  %v2466_v10 = vld [vmem:[#allocation3 + $0x28] sm:$0xff] }
 0x4fa   : > { %v1999_v8 = vpop.permute.xlu0 %1998  ;;  %2079 = vadd.xlane.f32.xlu1 %v3741_v40  ;;  %v2244_v26 = vpack.c.bf16 %v3741_v40, %v3739_v46  ;;  %v2464_v46 = vld [vmem:[#allocation3 + $0x18] sm:$0xff] }
 0x4fb   : > { %3752 = vpow2.f32 %v2043_v44  ;;  %v2045_v1 = vmul.f32 1.442695, %v2015_v2  ;;  %v2016_v43 = vsub.f32 %v4660_v39, %v1999_v8  ;;  %v3743_v32 = vpop.eup %3742  ;;  %v2469_v44 = vld [vmem:[#allocation3 + $0x40] sm:$0xff]  ;;  %v2471_v8 = vld [vmem:[#allocation3 + $0x50] sm:$0xff] }
 0x4fc   : > { %2073 = vadd.xlane.f32.xlu0 %v3735_v24  ;;  %3480 = vmatmul.mubr.bf16.gmra.mrb[20].mxu0 %v2244_v26  ;;  %v1326_v63 = vpop.permute.xlu1 %1325 }
 0x4fd   : > { %v3745_v14 = vpop.eup %3744  ;;  %3754 = vpow2.f32 %v2045_v1  ;;  %v2047_v59 = vmul.f32 1.442695, %v2016_v43  ;;  %v1347_v12 = vmul.f32 0.0, %v1326_v63  ;;  %v2470_v1 = vld [vmem:[#allocation3 + $0x48] sm:$0xff] }
 0x4fe   : > { %v1331_v41 = vpop.permute.xlu0 %1330  ;;  %2075 = vadd.xlane.f32.xlu1 %v3737_v53  ;;  %v2245_v20 = vpack.c.bf16 %v3745_v14, %v3743_v32  ;;  %v2461_v53 = vld [vmem:[#allocation3] sm:$0xff] }
 0x4ff   : > { %v3747_v13 = vpop.eup %3746  ;;  %3756 = vpow2.f32 %v2047_v59  ;;  %v1348_v42 = vmul.f32 0.0, %v1331_v41  ;;  %v4925_v29 = vadd.f32 %v4611_v21, %v1347_v12  ;;  %v2475_v12 = vld [vmem:[#allocation3 + $0x70] sm:$0xff] }
 0x500   : > { %3483 = vmatprep.mubr.bf16.mxu0 %v2245_v20  ;;  %2085 = vadd.xlane.f32.xlu0 %v3747_v13  ;;  %3758 = vrcp.f32 %v2461_v53  ;;  %v2474_v20 = vld [vmem:[#allocation3 + $0x68] sm:$0xff] }
 0x501   : > { %v3749_v39 = vpop.eup %3748  ;;  %v4928_v3 = vadd.f32 %v4615_v34, %v1348_v42  ;;  %v5207_v34 = vsub.f32 %v4777_v17, %v4792_v7  ;;  %v2468_v7 = vld [vmem:[#allocation3 + $0x38] sm:$0xff] }
 0x502   : > { %2087 = vadd.xlane.f32.xlu1 %v3749_v39  ;;  %v2246_v55 = vpack.c.bf16 %v3749_v39, %v3747_v13  ;;  %v2476_v39 = vld [vmem:[#allocation3 + $0x78] sm:$0xff] }
 0x503   : > { %v3751_v61 = vpop.eup %3750  ;;  %v1919_v45 = vmul.f32 1.442695, %v5207_v34  ;;  %v4940_v34 = vpop.permute.xlu0 %2147 }
 0x504   : > { %2081 = vadd.xlane.f32.xlu0 %v3743_v32  ;;  %3484 = vmatmul.mubr.bf16.gmra.mrb[24].mxu0 %v2246_v55  ;;  %v2473_v32 = vld [vmem:[#allocation3 + $0x60] sm:$0xff] }
 0x505   : > { %v3753_v0 = vpop.eup %3752  ;;  %3760 = vpow2.f32 %v1919_v45 }
 0x506   : > { %2083 = vadd.xlane.f32.xlu1 %v3745_v14  ;;  %v2247_v38 = vpack.c.bf16 %v3753_v0, %v3751_v61  ;;  %3762 = vrcp.f32 %v2463_v15  ;;  %v2472_v14 = vld [vmem:[#allocation3 + $0x58] sm:$0xff] }
 0x507   : > { %v3755_v24 = vpop.eup %3754  ;;  %3764 = vrcp.f32 %v2462_v48  ;;  %v4944_v15 = vpop.permute.xlu0 %2162 }
 0x508   : > { %3487 = vmatprep.mubr.bf16.mxu0 %v2247_v38  ;;  %2093 = vadd.xlane.f32.xlu0 %v3755_v24  ;;  %3766 = vrcp.f32 %v2465_v4 }
 0x509   : > { %v3757_v16 = vpop.eup %3756  ;;  %3768 = vrcp.f32 %v2464_v46 }
 0x50a   : > { %2095 = vadd.xlane.f32.xlu1 %v3757_v16  ;;  %v2248_v21 = vpack.c.bf16 %v3757_v16, %v3755_v24  ;;  %v3759_v5 = vpop.eup %3758  ;;  %3770 = vrcp.f32 %v2467_v18 }
 0x50b   : > { %3772 = vrcp.f32 %v2466_v10  ;;  %v4948_v4 = vpop.permute.xlu0 %2172 }
 0x50c   : > { %2089 = vadd.xlane.f32.xlu0 %v3751_v61  ;;  %3488 = vmatmul.mubr.bf16.gmra.mrb[28].mxu0 %v2248_v21  ;;  %3774 = vrcp.f32 %v2469_v44  ;;  %v4936_v21 = vpop.permute.xlu1 %2152 }
 0x50d   : > { %3776 = vrcp.f32 %v2468_v7 }
 0x50e   : > { %2091 = vadd.xlane.f32.xlu1 %v3753_v0  ;;  %3778 = vrcp.f32 %v2471_v8 }
 0x50f   : > { %v4933_v40 = vpop.eup %3760  ;;  %3780 = vrcp.f32 %v2470_v1  ;;  %v4952_v18 = vpop.permute.xlu0 %2182 }
 0x510   : > { %v3763_v17 = vpop.eup %3762  ;;  %3782 = vrcp.f32 %v2473_v32  ;;  %v4938_v53 = vpop.permute.xlu1 %2157 }
 0x511   : > { %v3765_v2 = vpop.eup %3764  ;;  %3784 = vrcp.f32 %v2472_v14  ;;  %v1812_v14 = vld [vmem:[#allocation3 + $0x98] sm:$0xff] }
 0x512   : > { %v3767_v26 = vpop.eup %3766  ;;  %3786 = vrcp.f32 %v2475_v12  ;;  %v1810_v12 = vld [vmem:[#allocation3 + $0x88] sm:$0xff] }
 0x513   : > { %v3769_v43 = vpop.eup %3768  ;;  %3788 = vrcp.f32 %v2474_v20  ;;  %v4956_v10 = vpop.permute.xlu0 %2202  ;;  %v2052_v20 = vmul.f32 %v4862_v50, %v1812_v14  ;;  %v1813_v50 = vld [vmem:[#allocation3 + $0xa0] sm:$0xff] }
 0x514   : > { %v3771_v63 = vpop.eup %3770  ;;  %3790 = vrcp.f32 %v2476_v39  ;;  %v4942_v45 = vpop.permute.xlu1 %2167 }
 0x515   : > { %v3773_v59 = vpop.eup %3772 }
 0x516   : > { %v3775_v41 = vpop.eup %3774 }
 0x517   : > { %v3777_v13 = vpop.eup %3776 }
 0x518   : > { %v3779_v42 = vpop.eup %3778  ;;  %v4946_v48 = vpop.permute.xlu1 %2177 }
 0x519   : > { %v3781_v55 = vpop.eup %3780 }
 0x51a   : > { %v3783_v61 = vpop.eup %3782 }
 0x51b   : > { %v3785_v0 = vpop.eup %3784 }
 0x51c   : > { %v3787_v38 = vpop.eup %3786  ;;  %v4950_v46 = vpop.permute.xlu1 %2197 }
 0x51d   : > { %v3789_v24 = vpop.eup %3788 }
 0x51e   : > { %v3791_v16 = vpop.eup %3790 }
 0x51f   : > { %2511 = vperm.xlu1 %3583, %v3759_v5  }
 0x520   : > { %v4954_v5 = vpop.permute.xlu1 %2187 }
 0x522   : > { %2222 = vperm.xlu0 %3582, %v4933_v40  }
 0x523   : > { %2521 = vperm.xlu1 %3583, %v3763_v17   ;;  %v4960_v17 = vpop.permute.xlu0 %2192 }
 0x524   : > { %v4958_v44 = vpop.permute.xlu1 %2217 }
 0x526   : > { %2516 = vperm.xlu0 %3582, %v3765_v2   ;;  %v1809_v2 = vld [vmem:[#allocation3 + $0x80] sm:$0xff] }
 0x527   : > { %2531 = vperm.xlu1 %3583, %v3767_v26   ;;  %v2049_v8 = vmul.f32 %v4849_v22, %v1809_v2  ;;  %v4965_v26 = vpop.permute.xlu0 %2212  ;;  %v2050_v22 = vmul.f32 %v4841_v11, %v1810_v12 }
 0x528   : > { %v4962_v7 = vpop.permute.xlu1 %2207 }
 0x52a   : > { %2526 = vperm.xlu0 %3582, %v3769_v43   ;;  %v1811_v43 = vld [vmem:[#allocation3 + $0x90] sm:$0xff] }
 0x52b   : > { %2541 = vperm.xlu1 %3583, %v3771_v63   ;;  %v2051_v63 = vmul.f32 %v4854_v35, %v1811_v43  ;;  %v1816_v35 = vld [vmem:[#allocation3 + $0xb8] sm:$0xff]  ;;  %v1814_v43 = vld [vmem:[#allocation3 + $0xa8] sm:$0xff] }
 0x52e   : > { %2536 = vperm.xlu0 %3582, %v3773_v59  }
 0x52f   : > { %2551 = vperm.xlu1 %3583, %v3775_v41  }
 0x532   : > { %2546 = vperm.xlu0 %3582, %v3777_v13  }
 0x533   : > { %2561 = vperm.xlu1 %3583, %v3779_v42  }
 0x536   : > { %2556 = vperm.xlu0 %3582, %v3781_v55  }
 0x537   : > { %2571 = vperm.xlu1 %3583, %v3783_v61   ;;  %v1815_v61 = vld [vmem:[#allocation3 + $0xb0] sm:$0xff] }
 0x53a   : > { %2566 = vperm.xlu0 %3582, %v3785_v0  }
 0x53b   : > { %2581 = vperm.xlu1 %3583, %v3787_v38   ;;  %v2055_v38 = vmul.f32 %v4877_v62, %v1815_v61  ;;  %v1819_v62 = vld [vmem:[#allocation3 + $0xd0] sm:$0xff] }
 0x53e   : > { %2576 = vperm.xlu0 %3582, %v3789_v24  }
 0x542   : > { %2586 = vperm.xlu0 %3582, %v3791_v16  }
 0x576   : > { %v2066_v1 = vpop.xlane.xlu1 %2065 }
 0x577   : > { %v2097_v32 = vadd.f32 %v2066_v1, %v2049_v8  ;;  %v2056_v8 = vmul.f32 %v4880_v47, %v1816_v35  ;;  %v1820_v47 = vld [vmem:[#allocation3 + $0xd8] sm:$0xff] }
 0x579   : > { %2113 = vst.msk [vmem:[#allocation3 + $0x80] sm:$0xff] %vm578_vm0, %v2097_v32 }
 0x57a   : > { %v2070_v59 = vpop.xlane.xlu0 %2069 }
 0x57b   : > { %v2099_v41 = vadd.f32 %v2070_v59, %v2051_v63  ;;  %v2053_v63 = vmul.f32 %v4867_v33, %v1813_v50 }
 0x57d   : > { %2115 = vst.msk [vmem:[#allocation3 + $0x90] sm:$0xff] %vm578_vm0, %v2099_v41  ;;  %v2072_v13 = vpop.xlane.xlu1 %2071  ;;  %v2054_v41 = vmul.f32 %v4872_v58, %v1814_v43 }
 0x57e   : > { %v2100_v42 = vadd.f32 %v2072_v13, %v2052_v20  ;;  %v2068_v39 = vpop.xlane.xlu0 %2067 }
 0x57f   : > { %v2098_v55 = vadd.f32 %v2068_v39, %v2050_v22  ;;  %v2059_v22 = vmul.f32 %v4883_v57, %v1819_v62  ;;  %v1817_v39 = vld [vmem:[#allocation3 + $0xc0] sm:$0xff] }
 0x580   : > { %2116 = vst.msk [vmem:[#allocation3 + $0x98] sm:$0xff] %vm578_vm0, %v2100_v42  ;;  %v2621_v16 = vld [vmem:[#allocation3 + $0x80] sm:$0xff] }
 0x581   : > { %2114 = vst.msk [vmem:[#allocation3 + $0x88] sm:$0xff] %vm578_vm0, %v2098_v55  ;;  %v2060_v55 = vmul.f32 %v4886_v25, %v1820_v47  ;;  %v1821_v62 = vld [vmem:[#allocation3 + $0xe0] sm:$0xff] }
 0x584   : > { %v2623_v0 = vld [vmem:[#allocation3 + $0x90] sm:$0xff] }
 0x585   : > { %3792 = vrcp.f32 %v2623_v0  ;;  %v2078_v24 = vpop.xlane.xlu0 %2077 }
 0x586   : > { %v2103_v2 = vadd.f32 %v2078_v24, %v2055_v38  ;;  %v1818_v38 = vld [vmem:[#allocation3 + $0xc8] sm:$0xff]  ;;  %v2057_v24 = vmul.f32 %v4889_v31, %v1817_v39 }
 0x587   : > { %v2624_v11 = vld [vmem:[#allocation3 + $0x98] sm:$0xff]  ;;  %v2080_v1 = vpop.xlane.xlu1 %2079  ;;  %v2058_v25 = vmul.f32 %v4892_v51, %v1818_v38 }
 0x588   : > { %3794 = vrcp.f32 %v2624_v11  ;;  %2119 = vst.msk [vmem:[#allocation3 + $0xb0] sm:$0xff] %vm578_vm0, %v2103_v2  ;;  %v2104_v32 = vadd.f32 %v2080_v1, %v2056_v8  ;;  %v2622_v14 = vld [vmem:[#allocation3 + $0x88] sm:$0xff] }
 0x589   : > { %3796 = vrcp.f32 %v2621_v16  ;;  %v2074_v59 = vpop.xlane.xlu0 %2073  ;;  %v1823_v16 = vld [vmem:[#allocation3 + $0xf0] sm:$0xff] }
 0x58a   : > { %2120 = vst.msk [vmem:[#allocation3 + $0xb8] sm:$0xff] %vm578_vm0, %v2104_v32  ;;  %v2101_v12 = vadd.f32 %v2074_v59, %v2053_v63  ;;  %3798 = vrcp.f32 %v2622_v14  ;;  %v1824_v32 = vld [vmem:[#allocation3 + $0xf8] sm:$0xff]  ;;  %v2063_v31 = vmul.f32 %v4895_v23, %v1823_v16  ;;  %v2061_v23 = vmul.f32 %v4901_v56, %v1821_v62 }
 0x58b   : > { %v2076_v20 = vpop.xlane.xlu1 %2075  ;;  %v2228_v62 = vmul.f32 0.0, %v4944_v15  ;;  %v2232_v15 = vmul.f32 0.0, %v4952_v18  ;;  %v2236_v18 = vmul.f32 0.0, %v4956_v10 }
 0x58c   : > { %2117 = vst.msk [vmem:[#allocation3 + $0xa0] sm:$0xff] %vm578_vm0, %v2101_v12  ;;  %v2102_v13 = vadd.f32 %v2076_v20, %v2054_v41  ;;  %v2064_v41 = vmul.f32 %v4933_v40, %v1824_v32 }
 0x58d   : > { %v2086_v42 = vpop.xlane.xlu0 %2085 }
 0x58e   : > { %2118 = vst.msk [vmem:[#allocation3 + $0xa8] sm:$0xff] %vm578_vm0, %v2102_v13  ;;  %v2107_v33 = vadd.f32 %v2086_v42, %v2059_v22  ;;  %v1822_v13 = vld [vmem:[#allocation3 + $0xe8] sm:$0xff] }
 0x58f   : > { %v3793_v61 = vpop.eup %3792  ;;  %v2627_v35 = vld [vmem:[#allocation3 + $0xb0] sm:$0xff]  ;;  %v2088_v0 = vpop.xlane.xlu1 %2087 }
 0x590   : > { %3800 = vrcp.f32 %v2627_v35  ;;  %2123 = vst.msk [vmem:[#allocation3 + $0xd0] sm:$0xff] %vm578_vm0, %v2107_v33  ;;  %v2108_v58 = vadd.f32 %v2088_v0, %v2060_v55  ;;  %2681 = vperm.xlu1 %3583, %v3793_v61   ;;  %v2062_v61 = vmul.f32 %v4898_v49, %v1822_v13 }
 0x591   : > { %v2628_v50 = vld [vmem:[#allocation3 + $0xb8] sm:$0xff]  ;;  %v2082_v57 = vpop.xlane.xlu0 %2081 }
 0x592   : > { %v3795_v2 = vpop.eup %3794  ;;  %3802 = vrcp.f32 %v2628_v50  ;;  %2124 = vst.msk [vmem:[#allocation3 + $0xd8] sm:$0xff] %vm578_vm0, %v2108_v58  ;;  %v2105_v8 = vadd.f32 %v2082_v57, %v2057_v24 }
 0x593   : > { %v3797_v11 = vpop.eup %3796  ;;  %v2625_v1 = vld [vmem:[#allocation3 + $0xa0] sm:$0xff]  ;;  %2686 = vperm.xlu0 %3582, %v3795_v2   ;;  %v2084_v43 = vpop.xlane.xlu1 %2083 }
 0x594   : > { %3804 = vrcp.f32 %v2625_v1  ;;  %2121 = vst.msk [vmem:[#allocation3 + $0xc0] sm:$0xff] %vm578_vm0, %v2105_v8  ;;  %v2106_v63 = vadd.f32 %v2084_v43, %v2058_v25  ;;  %2671 = vperm.xlu1 %3583, %v3797_v11   ;;  %v3799_v12 = vpop.eup %3798 }
 0x595   : > { %v2626_v14 = vld [vmem:[#allocation3 + $0xa8] sm:$0xff]  ;;  %v2094_v59 = vpop.xlane.xlu0 %2093 }
 0x596   : > { %3806 = vrcp.f32 %v2626_v14  ;;  %2122 = vst.msk [vmem:[#allocation3 + $0xc8] sm:$0xff] %vm578_vm0, %v2106_v63  ;;  %v2111_v51 = vadd.f32 %v2094_v59, %v2063_v31  ;;  %v2227_v31 = vmul.f32 0.0, %v4938_v53  ;;  %v2225_v14 = vmul.f32 0.0, %v4940_v34 }
 0x597   : > { %v2631_v20 = vld [vmem:[#allocation3 + $0xd0] sm:$0xff]  ;;  %2676 = vperm.xlu0 %3582, %v3799_v12   ;;  %v2096_v47 = vpop.xlane.xlu1 %2095  ;;  %v2231_v53 = vmul.f32 0.0, %v4946_v48  ;;  %v2229_v34 = vmul.f32 0.0, %v4942_v45  ;;  %v2235_v48 = vmul.f32 0.0, %v4950_v46  ;;  %v2233_v45 = vmul.f32 0.0, %v4954_v5 }
 0x598   : > { %3808 = vrcp.f32 %v2631_v20  ;;  %2127 = vst.msk [vmem:[#allocation3 + $0xf0] sm:$0xff] %vm578_vm0, %v2111_v51  ;;  %v2112_v22 = vadd.f32 %v2096_v47, %v2064_v41  ;;  %v2226_v41 = vmul.f32 0.0, %v4936_v21  ;;  %v2230_v21 = vmul.f32 0.0, %v4948_v4 }
 0x599   : > { %v2632_v42 = vld [vmem:[#allocation3 + $0xd8] sm:$0xff]  ;;  %v2090_v39 = vpop.xlane.xlu0 %2089  ;;  %v2234_v4 = vmul.f32 0.0, %v4960_v17  ;;  %v2239_v46 = vmul.f32 0.0, %v4958_v44 }
 0x59a   : > { %v3801_v33 = vpop.eup %3800  ;;  %3810 = vrcp.f32 %v2632_v42  ;;  %2128 = vst.msk [vmem:[#allocation3 + $0xf8] sm:$0xff] %vm578_vm0, %v2112_v22  ;;  %v2109_v55 = vadd.f32 %v2090_v39, %v2061_v23 }
 0x59b   : > { %v2629_v40 = vld [vmem:[#allocation3 + $0xc0] sm:$0xff]  ;;  %2701 = vperm.xlu1 %3583, %v3801_v33   ;;  %v2092_v35 = vpop.xlane.xlu1 %2091 }
 0x59c   : > { %v3803_v0 = vpop.eup %3802  ;;  %3812 = vrcp.f32 %v2629_v40  ;;  %2125 = vst.msk [vmem:[#allocation3 + $0xe0] sm:$0xff] %vm578_vm0, %v2109_v55  ;;  %v2110_v38 = vadd.f32 %v2092_v35, %v2062_v61 }
 0x59d   : > { %v2630_v58 = vld [vmem:[#allocation3 + $0xc8] sm:$0xff]  ;;  %2706 = vperm.xlu0 %3582, %v3803_v0  }
 0x59e   : > { %v3805_v56 = vpop.eup %3804  ;;  %3814 = vrcp.f32 %v2630_v58  ;;  %2126 = vst.msk [vmem:[#allocation3 + $0xe8] sm:$0xff] %vm578_vm0, %v2110_v38 }
 0x59f   : > { %2691 = vperm.xlu1 %3583, %v3805_v56   ;;  %v2635_v16 = vld [vmem:[#allocation3 + $0xf0] sm:$0xff] }
 0x5a0   : > { %v3807_v24 = vpop.eup %3806 }
 0x5a1   : > { %2696 = vperm.xlu0 %3582, %v3807_v24   ;;  %v2636_v25 = vld [vmem:[#allocation3 + $0xf8] sm:$0xff] }
 0x5a2   : > { %v3809_v50 = vpop.eup %3808 }
 0x5a3   : > { %v2633_v57 = vld [vmem:[#allocation3 + $0xe0] sm:$0xff]  ;;  %2721 = vperm.xlu1 %3583, %v3809_v50  }
 0x5a4   : > { %v3811_v49 = vpop.eup %3810  ;;  %3816 = vrcp.f32 %v2633_v57 }
 0x5a5   : > { %v2634_v2 = vld [vmem:[#allocation3 + $0xe8] sm:$0xff]  ;;  %2726 = vperm.xlu0 %3582, %v3811_v49  }
 0x5a6   : > { %v3813_v8 = vpop.eup %3812  ;;  %3818 = vrcp.f32 %v2634_v2  ;;  %v2223_v2 = vpop.permute.xlu0 %2222 }
 0x5a7   : > { %2711 = vperm.xlu1 %3583, %v3813_v8   ;;  %3820 = vrcp.f32 %v2635_v16  ;;  %v2240_v8 = vmul.f32 0.0, %v2223_v2 }
 0x5a8   : > { %v3815_v11 = vpop.eup %3814  ;;  %3822 = vrcp.f32 %v2636_v25 }
 0x5a9   : > { %2716 = vperm.xlu0 %3582, %v3815_v11   ;;  %v2512_v11 = vpop.permute.xlu1 %2511 }
 0x5ae   : > { %v3817_v1 = vpop.eup %3816 }
 0x5af   : > { %2731 = vperm.xlu1 %3583, %v3817_v1  }
 0x5b0   : > { %v3819_v43 = vpop.eup %3818 }
 0x5b1   : > { %2736 = vperm.xlu0 %3582, %v3819_v43   ;;  %v3821_v32 = vpop.eup %3820 }
 0x5b2   : > { %v3823_v63 = vpop.eup %3822 }
 0x5b3   : > { %2741 = vperm.xlu1 %3583, %v3821_v32   ;;  %v2517_v32 = vpop.permute.xlu0 %2516 }
 0x5b5   : > { %2746 = vperm.xlu0 %3582, %v3823_v63   ;;  %v2522_v63 = vpop.permute.xlu1 %2521 }
 0x5c5   : > { %v3477_v59 = vpop.f32.mrb[16].mxu0 }
 0x5c6   : > { %v5001_v12 = vadd.f32 %v3477_v59, %v2227_v31  ;;  %v2347_v51 = vpop.f32.mrb[17].mxu0  ;;  %v2527_v31 = vpop.permute.xlu0 %2526 }
 0x5c7   : > { %v5004_v20 = vadd.f32 %v2347_v51, %v2225_v14  ;;  %v3478_v47 = vpop.f32.mrb[18].mxu0  ;;  %v2532_v14 = vpop.permute.xlu1 %2531 }
 0x5c8   : > { %v5006_v13 = vadd.f32 %v3478_v47, %v2228_v62  ;;  %v2350_v22 = vpop.f32.mrb[19].mxu0 }
 0x5c9   : > { %v5008_v23 = vadd.f32 %v2350_v22, %v2226_v41 }
 0x5ca   : > { %v2537_v59 = vpop.permute.xlu0 %2536 }
 0x5cb   : > { %v2542_v62 = vpop.permute.xlu1 %2541 }
 0x5ce   : > { %v2547_v51 = vpop.permute.xlu0 %2546 }
 0x5cf   : > { %v3481_v42 = vpop.f32.mrb[20].mxu0  ;;  %v5043_v44 = vpop.permute.xlu1 %2551 }
 0x5d0   : > { %v5013_v39 = vadd.f32 %v3481_v42, %v2231_v53  ;;  %v2363_v33 = vpop.f32.mrb[21].mxu0 }
 0x5d1   : > { %v5016_v55 = vadd.f32 %v2363_v33, %v2229_v34  ;;  %v3482_v61 = vpop.f32.mrb[22].mxu0 }
 0x5d2   : > { %v5018_v40 = vadd.f32 %v3482_v61, %v2232_v15  ;;  %v2366_v35 = vpop.f32.mrb[23].mxu0  ;;  %v5045_v41 = vpop.permute.xlu0 %2556  ;;  %v1335_v15 = vmul.f32 0.0, %v4500_v6  ;;  %v1336_v61 = vmul.f32 0.0, %v4502_v27  ;;  %v5210_v6 = vld [vmem:[#allocation10_spill] sm:$0xff]  ;;  %v5211_v27 = vld [vmem:[#allocation16_spill] sm:$0xff] }
 0x5d3   : > { %v5020_v0 = vadd.f32 %v2366_v35, %v2230_v21  ;;  %v2562_v47 = vpop.permute.xlu1 %2561 }
 0x5d4   : > { %v1520_v33 = vadd.f32 %v4587_v28, %v1335_v15 }
 0x5d6   : > { %v5047_v22 = vpop.permute.xlu0 %2566 }
 0x5d7   : > { %v3485_v38 = vpop.f32.mrb[24].mxu0  ;;  %v5049_v53 = vpop.permute.xlu1 %2571 }
 0x5d8   : > { %v5025_v58 = vadd.f32 %v3485_v38, %v2235_v48  ;;  %v2379_v56 = vpop.f32.mrb[25].mxu0  ;;  %v1333_v48 = vmul.f32 0.0, %v4498_v9 }
 0x5d9   : > { %v5028_v24 = vadd.f32 %v2379_v56, %v2233_v45  ;;  %v3486_v50 = vpop.f32.mrb[26].mxu0  ;;  %v2591_v45 = vmul.f32 %v2522_v63, %v1520_v33 }
 0x5da   : > { %v5030_v57 = vadd.f32 %v3486_v50, %v2236_v18  ;;  %v2382_v49 = vpop.f32.mrb[27].mxu0  ;;  %v5051_v34 = vpop.permute.xlu0 %2576  ;;  %v5208_v18 = vld [vmem:[#allocation15_spill] sm:$0xff] }
 0x5db   : > { %v5032_v16 = vadd.f32 %v2382_v49, %v2234_v4  ;;  %v5053_v42 = vpop.permute.xlu1 %2581  ;;  %v1521_v56 = vadd.f32 %v5208_v18, %v1336_v61  ;;  %v5209_v4 = vld [vmem:[#allocation14_spill] sm:$0xff]  ;;  %v5212_v61 = vld [vmem:[#allocation13_spill] sm:$0xff]  ;;  %v5214_v18 = vld [vmem:[#allocation11_spill] sm:$0xff] }
 0x5dc   : > { %v1518_v50 = vadd.f32 %v5209_v4, %v1333_v48 }
 0x5dd   : > { %v2592_v28 = vmul.f32 %v2527_v31, %v1521_v56  ;;  %v1339_v31 = vmul.f32 0.0, %v5212_v61  ;;  %v1337_v56 = vmul.f32 0.0, %v5214_v18  ;;  %v2600_v61 = vmul.f32 %v5047_v22, %v4860_v19 }
 0x5de   : > { %v5057_v21 = vpop.permute.xlu0 %2586  ;;  %v2598_v19 = vmul.f32 %v5045_v41, %v4847_v60  ;;  %v5219_v41 = vld [vmem:[#allocation21_spill] sm:$0xff] }
 0x5df   : > { %v3489_v5 = vpop.f32.mrb[28].mxu0 }
 0x5e0   : > { %v5035_v25 = vadd.f32 %v3489_v5, %v2239_v46  ;;  %v5037_v10 = vpop.f32.mrb[29].mxu0  ;;  %v1334_v46 = vmul.f32 0.0, %v5210_v6 }
 0x5e1   : > { %v3490_v1 = vpop.f32.mrb[30].mxu0 }
 0x5e2   : > { %v5039_v17 = vadd.f32 %v3490_v1, %v2240_v8  ;;  %v5041_v43 = vpop.f32.mrb[31].mxu0  ;;  %v2589_v1 = vmul.f32 %v2512_v11, %v1518_v50  ;;  %v5213_v11 = vld [vmem:[#allocation17_spill] sm:$0xff]  ;;  %v5215_v50 = vld [vmem:[#allocation12_spill] sm:$0xff] }
 0x5e3   : > { %v1524_v48 = vadd.f32 %v5213_v11, %v1339_v31  ;;  %v2237_v11 = vmul.f32 0.0, %v4962_v7 }
 0x60f   : > { %v2682_v35 = vpop.permute.xlu1 %2681 }
 0x610   : > { %v2751_v38 = vmul.f32 %v2682_v35, %v5001_v12  ;;  %v1519_v12 = vadd.f32 %v5211_v27, %v1334_v46 }
 0x612   : > { %v3285_v49 = vpack.c.bf16 %v2751_v38, %v2591_v45  ;;  %v2687_v2 = vpop.permute.xlu0 %2686  ;;  %v2590_v35 = vmul.f32 %v2517_v32, %v1519_v12  ;;  %v5216_v32 = vld [vmem:[#allocation18_spill] sm:$0xff] }
 0x613   : > { %v2752_v5 = vmul.f32 %v2687_v2, %v5006_v13  ;;  %v2672_v8 = vpop.permute.xlu1 %2671  ;;  %v1522_v6 = vadd.f32 %v5216_v32, %v1337_v56 }
 0x614   : > { %2911 = vst [vmem:[%s5067_s12 + $0x10] sm:$0xff] %v3285_v49  ;;  %v2749_v9 = vmul.f32 %v2672_v8, %v5004_v20  ;;  %v2595_v20 = vmul.f32 %v2542_v62, %v1524_v48  ;;  %v1338_v49 = vmul.f32 0.0, %v5215_v50  ;;  %v5217_v8 = vld [vmem:[#allocation19_spill] sm:$0xff] }
 0x615   : > { %v3286_v63 = vpack.c.bf16 %v2752_v5, %v2592_v28 }
 0x616   : > { %v3283_v15 = vpack.c.bf16 %v2749_v9, %v2589_v1  ;;  %v2677_v33 = vpop.permute.xlu0 %2676  ;;  %v1523_v1 = vadd.f32 %v5217_v8, %v1338_v49  ;;  %v2593_v9 = vmul.f32 %v2532_v14, %v1522_v6 }
 0x617   : > { %2912 = vst [vmem:[%s5067_s12 + $0x18] sm:$0xff] %v3286_v63  ;;  %v2750_v13 = vmul.f32 %v2677_v33, %v5008_v23  ;;  %v2596_v23 = vmul.f32 %v2547_v51, %v4833_v30 }
 0x618   : > { %2909 = vst [vmem:[%s5067_s12] sm:$0xff] %v3283_v15  ;;  %v2594_v12 = vmul.f32 %v2537_v59, %v1523_v1  ;;  %v2599_v15 = vmul.f32 %v2562_v47, %v4839_v36 }
 0x619   : > { %v3284_v45 = vpack.c.bf16 %v2750_v13, %v2590_v35 }
 0x61a   : > { %v2702_v38 = vpop.permute.xlu1 %2701 }
 0x61b   : > { %2910 = vst [vmem:[%s5067_s12 + $0x8] sm:$0xff] %v3284_v45  ;;  %v2755_v4 = vmul.f32 %v2702_v38, %v5013_v39 }
 0x61c   : > { %v2707_v2 = vpop.permute.xlu0 %2706 }
 0x61d   : > { %v3289_v46 = vpack.c.bf16 %v2755_v4, %v2595_v20  ;;  %v2756_v28 = vmul.f32 %v2707_v2, %v5018_v40 }
 0x61e   : > { %v2692_v5 = vpop.permute.xlu1 %2691 }
 0x61f   : > { %2915 = vst [vmem:[%s5067_s12 + $0x30] sm:$0xff] %v3289_v46  ;;  %v3290_v62 = vpack.c.bf16 %v2756_v28, %v2596_v23  ;;  %v2753_v39 = vmul.f32 %v2692_v5, %v5016_v55 }
 0x620   : > { %v2697_v27 = vpop.permute.xlu0 %2696 }
 0x621   : > { %2916 = vst [vmem:[%s5067_s12 + $0x38] sm:$0xff] %v3290_v62  ;;  %v3287_v63 = vpack.c.bf16 %v2753_v39, %v2593_v9  ;;  %v2754_v30 = vmul.f32 %v2697_v27, %v5020_v0  ;;  %v2597_v0 = vmul.f32 %v5043_v44, %v4827_v52  ;;  %v2238_v44 = vmul.f32 0.0, %v4965_v26 }
 0x622   : > { %v2722_v51 = vpop.permute.xlu1 %2721 }
 0x623   : > { %2913 = vst [vmem:[%s5067_s12 + $0x20] sm:$0xff] %v3287_v63  ;;  %v3288_v40 = vpack.c.bf16 %v2754_v30, %v2594_v12  ;;  %v2759_v14 = vmul.f32 %v2722_v51, %v5025_v58  ;;  %v1345_v58 = vmul.f32 0.0, %v4906_v37  ;;  %v2422_v37 = vadd.f32 %v5037_v10, %v2237_v11 }
 0x624   : > { %v2727_v33 = vpop.permute.xlu0 %2726  ;;  %v2603_v10 = vmul.f32 %v5053_v42, %v4925_v29  ;;  %v2997_v29 = vld [vmem:[%s5067_s12] sm:$0xff] (%p4048_p13) }
 0x625   : > { %2914 = vst [vmem:[%s5067_s12 + $0x28] sm:$0xff] %v3288_v40  ;;  %v3293_v55 = vpack.c.bf16 %v2759_v14, %v2599_v15  ;;  %v2760_v59 = vmul.f32 %v2727_v33, %v5030_v57  ;;  %v1346_v57 = vmul.f32 0.0, %v4904_v54  ;;  %v2423_v54 = vadd.f32 %v5041_v43, %v2238_v44  ;;  %2998 = vst [vmem:[%s2939_s27] sm:$0xff] (%p4048_p13), %v2997_v29 }
 0x626   : > { %v2712_v31 = vpop.permute.xlu1 %2711  ;;  %v2604_v43 = vmul.f32 %v5057_v21, %v4928_v3  ;;  %v2999_v3 = vld [vmem:[%s5067_s12 + $0x8] sm:$0xff] (%p4048_p13)  ;;  %v3009_v32 = vld [vmem:[%s5067_s12 + $0x30] sm:$0xff] (%p4048_p13) }
 0x627   : > { %2919 = vst [vmem:[%s5067_s12 + $0x50] sm:$0xff] %v3293_v55  ;;  %v3294_v36 = vpack.c.bf16 %v2760_v59, %v2600_v61  ;;  %v2757_v47 = vmul.f32 %v2712_v31, %v5028_v24  ;;  %v5218_v24 = vld [vmem:[#allocation20_spill] sm:$0xff]  ;;  %3000 = vst [vmem:[%s2939_s27 + $0x10] sm:$0xff] (%p4048_p13), %v2999_v3 }
 0x628   : > { %v2717_v35 = vpop.permute.xlu0 %2716  ;;  %v1530_v48 = vadd.f32 %v5218_v24, %v1345_v58  ;;  %v3011_v6 = vld [vmem:[%s5067_s12 + $0x38] sm:$0xff] (%p4048_p13)  ;;  %3010 = vst [vmem:[%s2939_s27 + $0x60] sm:$0xff] (%p4048_p13), %v3009_v32 }
 0x629   : > { %2920 = vst [vmem:[%s5067_s12 + $0x58] sm:$0xff] %v3294_v36  ;;  %v3291_v22 = vpack.c.bf16 %v2757_v47, %v2597_v0  ;;  %v2758_v13 = vmul.f32 %v2717_v35, %v5032_v16  ;;  %v1531_v16 = vadd.f32 %v5219_v41, %v1346_v57  ;;  %3012 = vst [vmem:[%s2939_s27 + $0x70] sm:$0xff] (%p4048_p13), %v3011_v6 }
 0x62a   : > { %v2601_v60 = vmul.f32 %v5049_v53, %v1530_v48  ;;  %v3005_v42 = vld [vmem:[%s5067_s12 + $0x20] sm:$0xff] (%p4048_p13) }
 0x62b   : > { %2917 = vst [vmem:[%s5067_s12 + $0x40] sm:$0xff] %v3291_v22  ;;  %v3292_v52 = vpack.c.bf16 %v2758_v13, %v2598_v19  ;;  %v2602_v18 = vmul.f32 %v5051_v34, %v1531_v16  ;;  %3006 = vst [vmem:[%s2939_s27 + $0x40] sm:$0xff] (%p4048_p13), %v3005_v42 }
 0x62c   : > { %v3007_v21 = vld [vmem:[%s5067_s12 + $0x28] sm:$0xff] (%p4048_p13) }
 0x62d   : > { %2918 = vst [vmem:[%s5067_s12 + $0x48] sm:$0xff] %v3292_v52  ;;  %3008 = vst [vmem:[%s2939_s27 + $0x50] sm:$0xff] (%p4048_p13), %v3007_v21 }
 0x62e   : > { %v2732_v45 = vpop.permute.xlu1 %2731  ;;  %v3017_v28 = vld [vmem:[%s5067_s12 + $0x50] sm:$0xff] (%p4048_p13) }
 0x62f   : > { %v2761_v7 = vmul.f32 %v2732_v45, %v2422_v37  ;;  %3018 = vst [vmem:[%s2939_s27 + $0xa0] sm:$0xff] (%p4048_p13), %v3017_v28 }
 0x630   : > { %v2737_v38 = vpop.permute.xlu0 %2736  ;;  %v3019_v5 = vld [vmem:[%s5067_s12 + $0x58] sm:$0xff] (%p4048_p13) }
 0x631   : > { %v3295_v26 = vpack.c.bf16 %v2761_v7, %v2601_v60  ;;  %v2762_v56 = vmul.f32 %v2737_v38, %v2423_v54  ;;  %3020 = vst [vmem:[%s2939_s27 + $0xb0] sm:$0xff] (%p4048_p13), %v3019_v5 }
 0x632   : > { %v2742_v20 = vpop.permute.xlu1 %2741  ;;  %v3013_v23 = vld [vmem:[%s5067_s12 + $0x40] sm:$0xff] (%p4048_p13) }
 0x633   : > { %2921 = vst [vmem:[%s5067_s12 + $0x60] sm:$0xff] %v3295_v26  ;;  %v3296_v4 = vpack.c.bf16 %v2762_v56, %v2602_v18  ;;  %v2763_v53 = vmul.f32 %v2742_v20, %v5035_v25  ;;  %2931 = sbr.rel (!%p4048_p13) target bundleno = 1602 (0x642), region = 164  ;;  %v3001_v25 = vld [vmem:[%s5067_s12 + $0x10] sm:$0xff] (%p4048_p13)  ;;  %3014 = vst [vmem:[%s2939_s27 + $0x80] sm:$0xff] (%p4048_p13), %v3013_v23 }
 0x634   : > { %v2747_v50 = vpop.permute.xlu0 %2746  ;;  %v3015_v46 = vld [vmem:[%s5067_s12 + $0x48] sm:$0xff] (%p4048_p13)  ;;  %3002 = vst [vmem:[%s2939_s27 + $0x20] sm:$0xff] (%p4048_p13), %v3001_v25 }
 0x635   : > { %2922 = vst [vmem:[%s5067_s12 + $0x68] sm:$0xff] %v3296_v4  ;;  %v3297_v49 = vpack.c.bf16 %v2763_v53, %v2603_v10  ;;  %v2764_v2 = vmul.f32 %v2747_v50, %v5039_v17  ;;  %v3003_v17 = vld [vmem:[%s5067_s12 + $0x18] sm:$0xff] (%p4048_p13)  ;;  %3016 = vst [vmem:[%s2939_s27 + $0x90] sm:$0xff] (%p4048_p13), %v3015_v46 }
 0x636   : > { %3004 = vst [vmem:[%s2939_s27 + $0x30] sm:$0xff] (%p4048_p13), %v3003_v17 }
 0x637   : > { %2923 = vst [vmem:[%s5067_s12 + $0x70] sm:$0xff] %v3297_v49  ;;  %v3298_v34 = vpack.c.bf16 %v2764_v2, %v2604_v43 }
 0x639   : > { %2924 = vst [vmem:[%s5067_s12 + $0x78] sm:$0xff] %v3298_v34 }
 0x63a   : > { %v3021_v8 = vld [vmem:[%s5067_s12 + $0x60] sm:$0xff] }
 0x63b   : > { %3022 = vst [vmem:[%s2939_s27 + $0xc0] sm:$0xff] %v3021_v8 }
 0x63c   : > { %v3023_v1 = vld [vmem:[%s5067_s12 + $0x68] sm:$0xff] }
 0x63d   : > { %3024 = vst [vmem:[%s2939_s27 + $0xd0] sm:$0xff] %v3023_v1 }
 0x63e   : > { %v3025_v9 = vld [vmem:[%s5067_s12 + $0x70] sm:$0xff] }
 0x63f   : > { %3026 = vst [vmem:[%s2939_s27 + $0xe0] sm:$0xff] %v3025_v9 }
 0x640   : > { %v3027_v62 = vld [vmem:[%s5067_s12 + $0x78] sm:$0xff] }
 0x641   : > { %3028 = vst [vmem:[%s2939_s27 + $0xf0] sm:$0xff] %v3027_v62 }
 0x642 PF: > { %s13_s22 = sadd.s32 1, %s3910_s22   ;;  %s5221_s9 = sld [smem:[#allocation9_spill]] }
 0x643   : > { %p10_p4 = scmp.ge.s32.totalorder %s13_s22, 6   ;;  %s5222_s12 = smov %s3874_s13 }
 0x644   : > { %s5223_s13 = smov %s4053_s26  ;;  %s5224_s14 = smov %s3882_s15 }
 0x645   : > { %s5225_s15 = smov %s4031_s28  ;;  %s5226_s16 = smov %s3890_s17 }
 0x646   : > { %s5227_s17 = smov %s4028_s11  ;;  %s5228_s18 = smov %s3902_s20 }
 0x647   : > { %s5229_s19 = smov %s3906_s21  ;;  %s5230_s20 = smov %s5233_s24 }
 0x648   : > { %s5231_s21 = smov %s5221_s9  ;;  %12 = sbr.rel (!%p10_p4) target bundleno = 8 (0x8), region = 251 }

// kernel: gqa_forward.5
= control target key start
LH: loop header
LB: loop body
LE: loop exit
PB: predicated region body
PF: predicated region fallthrough
CT: control target
= control target key end

     0   :  { %s4265_s0 = inlined_call_operand.vmem [shape: bf16[256,512], index: 0, kind: input, shape index: {}]   ;;  %s4266_s1 = inlined_call_operand.vmem [shape: bf16[512,512], index: 1, kind: input, shape index: {}]   ;;  %s4267_s2 = inlined_call_operand.vmem [shape: f32[1,512], index: 2, kind: input, shape index: {}]   ;;  %s4268_s3 = inlined_call_operand.hbm [shape: f32[256,512], index: 3, kind: output, shape index: {}]  }
   0x1   :  { %v3203_v0 = vld [vmem:[%s4266_s1 + $0x4] ss:$16 sps:$4 sm:$0xff]   ;;  %v3205_v1 = vld [vmem:[%s4266_s1 + $0xc] ss:$16 sps:$4 sm:$0xff]   ;;  %v3207_v2 = vld [vmem:[%s4266_s1] ss:$16 sps:$4 sm:$0xff]  }
   0x2   :  { %1427 = vmatprep.subr.bf16.mxu0 %v3203_v0  ;;  %v3208_v3 = vld [vmem:[%s4266_s1 + $0x8] ss:$16 sps:$4 sm:$0xff]   ;;  %1813 = vmatprep.subr.bf16.mxu1 %v3205_v1  ;;  %v3209_v4 = vld [vmem:[%s4266_s1 + $0x24] ss:$16 sps:$4 sm:$0xff]   ;;  %v3211_v5 = vld [vmem:[%s4266_s1 + $0x2c] ss:$16 sps:$4 sm:$0xff]  }
   0x3   :  { %1428 = vmatpush1.bf16.msra.mxu0 %v3207_v2  ;;  %1814 = vmatpush1.bf16.msra.mxu1 %v3208_v3  ;;  %v3213_v6 = vld [vmem:[%s4266_s1 + $0x20] ss:$16 sps:$4 sm:$0xff]   ;;  %v3214_v7 = vld [vmem:[%s4266_s1 + $0x28] ss:$16 sps:$4 sm:$0xff]   ;;  %v3215_v8 = vld [vmem:[%s4266_s1 + $0x44] ss:$16 sps:$4 sm:$0xff]  }
   0x4   :  { %1429 = vmatprep.subr.bf16.mxu0 %v3209_v4  ;;  %1815 = vmatprep.subr.bf16.mxu1 %v3211_v5  ;;  %v3217_v9 = vld [vmem:[%s4266_s1 + $0x4c] ss:$16 sps:$4 sm:$0xff]   ;;  %v3219_v10 = vld [vmem:[%s4266_s1 + $0x40] ss:$16 sps:$4 sm:$0xff]   ;;  %v3220_v11 = vld [vmem:[%s4266_s1 + $0x48] ss:$16 sps:$4 sm:$0xff]  }
   0x5   :  { %v3221_v12 = vld [vmem:[%s4266_s1 + $0x64] ss:$16 sps:$4 sm:$0xff]   ;;  %v3223_v13 = vld [vmem:[%s4266_s1 + $0x6c] ss:$16 sps:$4 sm:$0xff]   ;;  %v3225_v14 = vld [vmem:[%s4266_s1 + $0x60] ss:$16 sps:$4 sm:$0xff]  }
   0x6   :  { %v3226_v15 = vld [vmem:[%s4266_s1 + $0x68] ss:$16 sps:$4 sm:$0xff]   ;;  %v3227_v16 = vld [vmem:[%s4266_s1 + $0x84] ss:$16 sps:$4 sm:$0xff]   ;;  %v3229_v17 = vld [vmem:[%s4266_s1 + $0x8c] ss:$16 sps:$4 sm:$0xff]  }
   0x7   :  { %1430 = vmatpush1.bf16.msra.mxu0 %v3213_v6  ;;  %1816 = vmatpush1.bf16.msra.mxu1 %v3214_v7  ;;  %v3231_v18 = vld [vmem:[%s4266_s1 + $0x80] ss:$16 sps:$4 sm:$0xff]   ;;  %v3232_v19 = vld [vmem:[%s4266_s1 + $0x88] ss:$16 sps:$4 sm:$0xff]   ;;  %v3233_v20 = vld [vmem:[%s4266_s1 + $0xa4] ss:$16 sps:$4 sm:$0xff]  }
   0x8   :  { %1431 = vmatprep.subr.bf16.mxu0 %v3215_v8  ;;  %1817 = vmatprep.subr.bf16.mxu1 %v3217_v9  ;;  %v3235_v21 = vld [vmem:[%s4266_s1 + $0xac] ss:$16 sps:$4 sm:$0xff]   ;;  %v3237_v22 = vld [vmem:[%s4266_s1 + $0xa0] ss:$16 sps:$4 sm:$0xff]   ;;  %v3238_v23 = vld [vmem:[%s4266_s1 + $0xa8] ss:$16 sps:$4 sm:$0xff]  }
   0x9   :  { %v3239_v24 = vld [vmem:[%s4266_s1 + $0xc4] ss:$16 sps:$4 sm:$0xff]   ;;  %v3241_v25 = vld [vmem:[%s4266_s1 + $0xcc] ss:$16 sps:$4 sm:$0xff]   ;;  %v3243_v26 = vld [vmem:[%s4266_s1 + $0xc0] ss:$16 sps:$4 sm:$0xff]  }
   0xa   :  { %v3244_v27 = vld [vmem:[%s4266_s1 + $0xc8] ss:$16 sps:$4 sm:$0xff]   ;;  %v3245_v28 = vld [vmem:[%s4266_s1 + $0xe4] ss:$16 sps:$4 sm:$0xff]   ;;  %v3247_v29 = vld [vmem:[%s4266_s1 + $0xec] ss:$16 sps:$4 sm:$0xff]  }
   0xb   :  { %1432 = vmatpush1.bf16.msra.mxu0 %v3219_v10  ;;  %1818 = vmatpush1.bf16.msra.mxu1 %v3220_v11  ;;  %v3249_v30 = vld [vmem:[%s4266_s1 + $0xe0] ss:$16 sps:$4 sm:$0xff]   ;;  %v3250_v31 = vld [vmem:[%s4266_s1 + $0xe8] ss:$16 sps:$4 sm:$0xff]   ;;  %v3251_v32 = vld [vmem:[%s4266_s1 + $0x104] ss:$16 sps:$4 sm:$0xff]  }
   0xc   :  { %1433 = vmatprep.subr.bf16.mxu0 %v3221_v12  ;;  %1819 = vmatprep.subr.bf16.mxu1 %v3223_v13  ;;  %v3253_v33 = vld [vmem:[%s4266_s1 + $0x10c] ss:$16 sps:$4 sm:$0xff]   ;;  %v3255_v34 = vld [vmem:[%s4266_s1 + $0x100] ss:$16 sps:$4 sm:$0xff]   ;;  %v3256_v35 = vld [vmem:[%s4266_s1 + $0x108] ss:$16 sps:$4 sm:$0xff]  }
   0xd   :  { %v3257_v36 = vld [vmem:[%s4266_s1 + $0x124] ss:$16 sps:$4 sm:$0xff]   ;;  %v3259_v37 = vld [vmem:[%s4266_s1 + $0x12c] ss:$16 sps:$4 sm:$0xff]   ;;  %v3261_v38 = vld [vmem:[%s4266_s1 + $0x120] ss:$16 sps:$4 sm:$0xff]  }
   0xe   :  { %v3262_v39 = vld [vmem:[%s4266_s1 + $0x128] ss:$16 sps:$4 sm:$0xff]   ;;  %v3263_v40 = vld [vmem:[%s4266_s1 + $0x144] ss:$16 sps:$4 sm:$0xff]   ;;  %v3265_v41 = vld [vmem:[%s4266_s1 + $0x14c] ss:$16 sps:$4 sm:$0xff]  }
   0xf   :  { %1434 = vmatpush1.bf16.msra.mxu0 %v3225_v14  ;;  %1820 = vmatpush1.bf16.msra.mxu1 %v3226_v15  ;;  %v3267_v42 = vld [vmem:[%s4266_s1 + $0x140] ss:$16 sps:$4 sm:$0xff]   ;;  %v3268_v43 = vld [vmem:[%s4266_s1 + $0x148] ss:$16 sps:$4 sm:$0xff]   ;;  %v3269_v44 = vld [vmem:[%s4266_s1 + $0x164] ss:$16 sps:$4 sm:$0xff]  }
  0x10   :  { %1435 = vmatprep.subr.bf16.mxu0 %v3227_v16  ;;  %1821 = vmatprep.subr.bf16.mxu1 %v3229_v17  ;;  %v3271_v45 = vld [vmem:[%s4266_s1 + $0x16c] ss:$16 sps:$4 sm:$0xff]   ;;  %v3273_v46 = vld [vmem:[%s4266_s1 + $0x160] ss:$16 sps:$4 sm:$0xff]   ;;  %v3274_v47 = vld [vmem:[%s4266_s1 + $0x168] ss:$16 sps:$4 sm:$0xff]  }
  0x11   :  { %v3301_v48 = vld [vmem:[%s4265_s0 + $0x4] ss:$16 sps:$4 sm:$0xff]   ;;  %v3277_v50 = vld [vmem:[%s4266_s1 + $0x18c] ss:$16 sps:$4 sm:$0xff]   ;;  %v3279_v51 = vld [vmem:[%s4266_s1 + $0x180] ss:$16 sps:$4 sm:$0xff]  }
  0x12   :  { %v3275_v49 = vld [vmem:[%s4266_s1 + $0x184] ss:$16 sps:$4 sm:$0xff]   ;;  %1459 = vmatprep.mubr.bf16.mxu0 %v3301_v48  ;;  %1845 = vmatprep.mubr.bf16.mxu1 %v3301_v48  ;;  %v3280_v52 = vld [vmem:[%s4266_s1 + $0x188] ss:$16 sps:$4 sm:$0xff]   ;;  %v3283_v54 = vld [vmem:[%s4266_s1 + $0x1ac] ss:$16 sps:$4 sm:$0xff]  }
  0x13   :  { %1436 = vmatpush1.bf16.msra.mxu0 %v3231_v18  ;;  %1822 = vmatpush1.bf16.msra.mxu1 %v3232_v19  ;;  %v3281_v53 = vld [vmem:[%s4266_s1 + $0x1a4] ss:$16 sps:$4 sm:$0xff]   ;;  %v3285_v55 = vld [vmem:[%s4266_s1 + $0x1a0] ss:$16 sps:$4 sm:$0xff]   ;;  %v3286_v56 = vld [vmem:[%s4266_s1 + $0x1a8] ss:$16 sps:$4 sm:$0xff]  }
  0x14   :  { %1437 = vmatprep.subr.bf16.mxu0 %v3233_v20  ;;  %1823 = vmatprep.subr.bf16.mxu1 %v3235_v21  ;;  %v3287_v57 = vld [vmem:[%s4266_s1 + $0x1c4] ss:$16 sps:$4 sm:$0xff]   ;;  %v3289_v58 = vld [vmem:[%s4266_s1 + $0x1cc] ss:$16 sps:$4 sm:$0xff]   ;;  %v3291_v59 = vld [vmem:[%s4266_s1 + $0x1c0] ss:$16 sps:$4 sm:$0xff]  }
  0x15   :  { %v3292_v60 = vld [vmem:[%s4266_s1 + $0x1c8] ss:$16 sps:$4 sm:$0xff]   ;;  %v3293_v61 = vld [vmem:[%s4266_s1 + $0x1e4] ss:$16 sps:$4 sm:$0xff]   ;;  %v3295_v62 = vld [vmem:[%s4266_s1 + $0x1ec] ss:$16 sps:$4 sm:$0xff]  }
  0x16   :  { %v3297_v63 = vld [vmem:[%s4266_s1 + $0x1e0] ss:$16 sps:$4 sm:$0xff]   ;;  %v3298_v0 = vld [vmem:[%s4266_s1 + $0x1e8] ss:$16 sps:$4 sm:$0xff]   ;;  %v3304_v1 = vld [vmem:[%s4266_s1 + $0x204] ss:$16 sps:$4 sm:$0xff]  }
  0x17   :  { %1438 = vmatpush1.bf16.msra.mxu0 %v3237_v22  ;;  %1824 = vmatpush1.bf16.msra.mxu1 %v3238_v23  ;;  %v3307_v2 = vld [vmem:[%s4266_s1 + $0x20c] ss:$16 sps:$4 sm:$0xff]   ;;  %v3299_v3 = vld [vmem:[%s4265_s0] ss:$16 sps:$4 sm:$0xff]   ;;  %v3305_v5 = vld [vmem:[%s4266_s1 + $0x208] ss:$16 sps:$4 sm:$0xff]  }
  0x18   :  { %1439 = vmatprep.subr.bf16.mxu0 %v3239_v24  ;;  %1825 = vmatprep.subr.bf16.mxu1 %v3241_v25  ;;  %v3302_v4 = vld [vmem:[%s4266_s1 + $0x200] ss:$16 sps:$4 sm:$0xff]   ;;  %v3308_v6 = vld [vmem:[%s4265_s0 + $0x24] ss:$16 sps:$4 sm:$0xff]   ;;  %v3316_v8 = vld [vmem:[%s4266_s1 + $0x22c] ss:$16 sps:$4 sm:$0xff]  }
  0x19   :  { %v3313_v7 = vld [vmem:[%s4266_s1 + $0x224] ss:$16 sps:$4 sm:$0xff]   ;;  %v3311_v9 = vld [vmem:[%s4266_s1 + $0x220] ss:$16 sps:$4 sm:$0xff]   ;;  %v3314_v10 = vld [vmem:[%s4266_s1 + $0x228] ss:$16 sps:$4 sm:$0xff]  }
  0x1a   :  { %v3322_v11 = vld [vmem:[%s4266_s1 + $0x244] ss:$16 sps:$4 sm:$0xff]   ;;  %v3325_v12 = vld [vmem:[%s4266_s1 + $0x24c] ss:$16 sps:$4 sm:$0xff]   ;;  %v3310_v13 = vld [vmem:[%s4265_s0 + $0x20] ss:$16 sps:$4 sm:$0xff]  }
  0x1b   :  { %1440 = vmatpush1.bf16.msra.mxu0 %v3243_v26  ;;  %1826 = vmatpush1.bf16.msra.mxu1 %v3244_v27  ;;  %v3317_v14 = vld [vmem:[%s4265_s0 + $0x44] ss:$16 sps:$4 sm:$0xff]   ;;  %v3320_v15 = vld [vmem:[%s4266_s1 + $0x240] ss:$16 sps:$4 sm:$0xff]   ;;  %v3323_v16 = vld [vmem:[%s4266_s1 + $0x248] ss:$16 sps:$4 sm:$0xff]  }
  0x1c   :  { %1441 = vmatprep.subr.bf16.mxu0 %v3245_v28  ;;  %1827 = vmatprep.subr.bf16.mxu1 %v3247_v29  ;;  %v3331_v17 = vld [vmem:[%s4266_s1 + $0x264] ss:$16 sps:$4 sm:$0xff]   ;;  %v3334_v18 = vld [vmem:[%s4266_s1 + $0x26c] ss:$16 sps:$4 sm:$0xff]   ;;  %v3329_v19 = vld [vmem:[%s4266_s1 + $0x260] ss:$16 sps:$4 sm:$0xff]  }
  0x1d   :  { %v3332_v20 = vld [vmem:[%s4266_s1 + $0x268] ss:$16 sps:$4 sm:$0xff]   ;;  %v3340_v21 = vld [vmem:[%s4266_s1 + $0x284] ss:$16 sps:$4 sm:$0xff]   ;;  %v3343_v22 = vld [vmem:[%s4266_s1 + $0x28c] ss:$16 sps:$4 sm:$0xff]  }
  0x1e   :  { %v3319_v23 = vld [vmem:[%s4265_s0 + $0x40] ss:$16 sps:$4 sm:$0xff]   ;;  %v3326_v24 = vld [vmem:[%s4265_s0 + $0x64] ss:$16 sps:$4 sm:$0xff]   ;;  %v3341_v26 = vld [vmem:[%s4266_s1 + $0x288] ss:$16 sps:$4 sm:$0xff]  }
  0x1f   :  { %1442 = vmatpush1.bf16.msra.mxu0 %v3249_v30  ;;  %1828 = vmatpush1.bf16.msra.mxu1 %v3250_v31  ;;  %v3338_v25 = vld [vmem:[%s4266_s1 + $0x280] ss:$16 sps:$4 sm:$0xff]   ;;  %v3349_v27 = vld [vmem:[%s4266_s1 + $0x2a4] ss:$16 sps:$4 sm:$0xff]   ;;  %v3352_v28 = vld [vmem:[%s4266_s1 + $0x2ac] ss:$16 sps:$4 sm:$0xff]  }
  0x20   :  { %1443 = vmatprep.subr.bf16.mxu0 %v3251_v32  ;;  %1829 = vmatprep.subr.bf16.mxu1 %v3253_v33  ;;  %v3347_v29 = vld [vmem:[%s4266_s1 + $0x2a0] ss:$16 sps:$4 sm:$0xff]   ;;  %v3350_v30 = vld [vmem:[%s4266_s1 + $0x2a8] ss:$16 sps:$4 sm:$0xff]   ;;  %v3358_v31 = vld [vmem:[%s4266_s1 + $0x2c4] ss:$16 sps:$4 sm:$0xff]  }
  0x21   :  { %v3361_v32 = vld [vmem:[%s4266_s1 + $0x2cc] ss:$16 sps:$4 sm:$0xff]   ;;  %v3328_v33 = vld [vmem:[%s4265_s0 + $0x60] ss:$16 sps:$4 sm:$0xff]  }
  0x22   :  { %v3388_v48 = vld [vmem:[%s4266_s1 + $0x32c] ss:$16 sps:$4 sm:$0xff]  }
  0x23   :  { %1444 = vmatpush1.bf16.msra.mxu0 %v3255_v34  ;;  %1830 = vmatpush1.bf16.msra.mxu1 %v3256_v35  ;;  %v3335_v34 = vld [vmem:[%s4265_s0 + $0x84] ss:$16 sps:$4 sm:$0xff]   ;;  %v3356_v35 = vld [vmem:[%s4266_s1 + $0x2c0] ss:$16 sps:$4 sm:$0xff]  }
  0x24   :  { %1445 = vmatprep.subr.bf16.mxu0 %v3257_v36  ;;  %1831 = vmatprep.subr.bf16.mxu1 %v3259_v37  ;;  %v3359_v36 = vld [vmem:[%s4266_s1 + $0x2c8] ss:$16 sps:$4 sm:$0xff]   ;;  %v3367_v37 = vld [vmem:[%s4266_s1 + $0x2e4] ss:$16 sps:$4 sm:$0xff]  }
  0x27   :  { %1446 = vmatpush1.bf16.msra.mxu0 %v3261_v38  ;;  %1832 = vmatpush1.bf16.msra.mxu1 %v3262_v39  ;;  %v3370_v38 = vld [vmem:[%s4266_s1 + $0x2ec] ss:$16 sps:$4 sm:$0xff]   ;;  %v3365_v39 = vld [vmem:[%s4266_s1 + $0x2e0] ss:$16 sps:$4 sm:$0xff]  }
  0x28   :  { %1447 = vmatprep.subr.bf16.mxu0 %v3263_v40  ;;  %1833 = vmatprep.subr.bf16.mxu1 %v3265_v41  ;;  %v3368_v40 = vld [vmem:[%s4266_s1 + $0x2e8] ss:$16 sps:$4 sm:$0xff]   ;;  %v3376_v41 = vld [vmem:[%s4266_s1 + $0x304] ss:$16 sps:$4 sm:$0xff]  }
  0x2b   :  { %1448 = vmatpush1.bf16.msra.mxu0 %v3267_v42  ;;  %1834 = vmatpush1.bf16.msra.mxu1 %v3268_v43  ;;  %v3379_v42 = vld [vmem:[%s4266_s1 + $0x30c] ss:$16 sps:$4 sm:$0xff]   ;;  %v3337_v43 = vld [vmem:[%s4265_s0 + $0x80] ss:$16 sps:$4 sm:$0xff]  }
  0x2c   :  { %1449 = vmatprep.subr.bf16.mxu0 %v3269_v44  ;;  %1835 = vmatprep.subr.bf16.mxu1 %v3271_v45  ;;  %v3344_v44 = vld [vmem:[%s4265_s0 + $0xa4] ss:$16 sps:$4 sm:$0xff]   ;;  %v3374_v45 = vld [vmem:[%s4266_s1 + $0x300] ss:$16 sps:$4 sm:$0xff]  }
  0x2f   :  { %1450 = vmatpush1.bf16.msra.mxu0 %v3273_v46  ;;  %1836 = vmatpush1.bf16.msra.mxu1 %v3274_v47  ;;  %v3377_v46 = vld [vmem:[%s4266_s1 + $0x308] ss:$16 sps:$4 sm:$0xff]   ;;  %v3385_v47 = vld [vmem:[%s4266_s1 + $0x324] ss:$16 sps:$4 sm:$0xff]  }
  0x30   :  { %1451 = vmatprep.subr.bf16.mxu0 %v3275_v49  ;;  %1837 = vmatprep.subr.bf16.mxu1 %v3277_v50  ;;  %v3383_v49 = vld [vmem:[%s4266_s1 + $0x320] ss:$16 sps:$4 sm:$0xff]   ;;  %v3386_v50 = vld [vmem:[%s4266_s1 + $0x328] ss:$16 sps:$4 sm:$0xff]  }
  0x33   :  { %1452 = vmatpush1.bf16.msra.mxu0 %v3279_v51  ;;  %1838 = vmatpush1.bf16.msra.mxu1 %v3280_v52  ;;  %v3394_v51 = vld [vmem:[%s4266_s1 + $0x344] ss:$16 sps:$4 sm:$0xff]   ;;  %v3397_v52 = vld [vmem:[%s4266_s1 + $0x34c] ss:$16 sps:$4 sm:$0xff]  }
  0x34   :  { %1453 = vmatprep.subr.bf16.mxu0 %v3281_v53  ;;  %1839 = vmatprep.subr.bf16.mxu1 %v3283_v54  ;;  %v3346_v53 = vld [vmem:[%s4265_s0 + $0xa0] ss:$16 sps:$4 sm:$0xff]   ;;  %v3353_v54 = vld [vmem:[%s4265_s0 + $0xc4] ss:$16 sps:$4 sm:$0xff]  }
  0x37   :  { %1454 = vmatpush1.bf16.msra.mxu0 %v3285_v55  ;;  %1840 = vmatpush1.bf16.msra.mxu1 %v3286_v56  ;;  %v3392_v55 = vld [vmem:[%s4266_s1 + $0x340] ss:$16 sps:$4 sm:$0xff]   ;;  %v3395_v56 = vld [vmem:[%s4266_s1 + $0x348] ss:$16 sps:$4 sm:$0xff]  }
  0x38   :  { %1455 = vmatprep.subr.bf16.mxu0 %v3287_v57  ;;  %1841 = vmatprep.subr.bf16.mxu1 %v3289_v58  ;;  %v3403_v57 = vld [vmem:[%s4266_s1 + $0x364] ss:$16 sps:$4 sm:$0xff]   ;;  %v3406_v58 = vld [vmem:[%s4266_s1 + $0x36c] ss:$16 sps:$4 sm:$0xff]  }
  0x3b   :  { %1456 = vmatpush1.bf16.msra.mxu0 %v3291_v59  ;;  %1842 = vmatpush1.bf16.msra.mxu1 %v3292_v60  ;;  %v3401_v59 = vld [vmem:[%s4266_s1 + $0x360] ss:$16 sps:$4 sm:$0xff]   ;;  %v3404_v60 = vld [vmem:[%s4266_s1 + $0x368] ss:$16 sps:$4 sm:$0xff]  }
  0x3c   :  { %1457 = vmatprep.subr.bf16.mxu0 %v3293_v61  ;;  %1843 = vmatprep.subr.bf16.mxu1 %v3295_v62  ;;  %v3412_v61 = vld [vmem:[%s4266_s1 + $0x384] ss:$16 sps:$4 sm:$0xff]   ;;  %v3415_v62 = vld [vmem:[%s4266_s1 + $0x38c] ss:$16 sps:$4 sm:$0xff]  }
  0x3f   :  { %1458 = vmatpush1.bf16.msra.mxu0 %v3297_v63  ;;  %1844 = vmatpush1.bf16.msra.mxu1 %v3298_v0  ;;  %v3355_v63 = vld [vmem:[%s4265_s0 + $0xc0] ss:$16 sps:$4 sm:$0xff]   ;;  %v3362_v0 = vld [vmem:[%s4265_s0 + $0xe4] ss:$16 sps:$4 sm:$0xff]  }
  0x40   :  { %1620 = vmatprep.subr.bf16.mxu0 %v3304_v1  ;;  %2006 = vmatprep.subr.bf16.mxu1 %v3307_v2  ;;  %v3410_v1 = vld [vmem:[%s4266_s1 + $0x380] ss:$16 sps:$4 sm:$0xff]   ;;  %v3413_v2 = vld [vmem:[%s4266_s1 + $0x388] ss:$16 sps:$4 sm:$0xff]  }
  0x42   :  { %1460 = vmatmul.mubr.bf16.vlgmr.msra.gmra.mrb[0].mxu0 %v3299_v3  ;;  %1846 = vmatmul.mubr.bf16.vlgmr.msra.gmra.mrb[0].mxu1 %v3299_v3  ;;  %v3421_v3 = vld [vmem:[%s4266_s1 + $0x3a4] ss:$16 sps:$4 sm:$0xff]  }
  0x43   :  { %1621 = vmatpush1.bf16.msra.mxu0 %v3302_v4  ;;  %2007 = vmatpush1.bf16.msra.mxu1 %v3305_v5  ;;  %v3424_v4 = vld [vmem:[%s4266_s1 + $0x3ac] ss:$16 sps:$4 sm:$0xff]   ;;  %v3419_v5 = vld [vmem:[%s4266_s1 + $0x3a0] ss:$16 sps:$4 sm:$0xff]  }
  0x44   :  { %1469 = vmatprep.mubr.bf16.mxu0 %v3308_v6  ;;  %1855 = vmatprep.mubr.bf16.mxu1 %v3308_v6  ;;  %v3422_v6 = vld [vmem:[%s4266_s1 + $0x3a8] ss:$16 sps:$4 sm:$0xff]  }
  0x45   :  { %1622 = vmatprep.subr.bf16.mxu0 %v3313_v7  ;;  %2008 = vmatprep.subr.bf16.mxu1 %v3316_v8  ;;  %v3430_v7 = vld [vmem:[%s4266_s1 + $0x3c4] ss:$16 sps:$4 sm:$0xff]   ;;  %v3364_v8 = vld [vmem:[%s4265_s0 + $0xe0] ss:$16 sps:$4 sm:$0xff]  }
  0x47   :  { %1623 = vmatpush1.bf16.msra.mxu0 %v3311_v9  ;;  %2009 = vmatpush1.bf16.msra.mxu1 %v3314_v10  ;;  %v3433_v9 = vld [vmem:[%s4266_s1 + $0x3cc] ss:$16 sps:$4 sm:$0xff]   ;;  %v3371_v10 = vld [vmem:[%s4265_s0 + $0x104] ss:$16 sps:$4 sm:$0xff]  }
  0x48   :  { %1624 = vmatprep.subr.bf16.mxu0 %v3322_v11  ;;  %2010 = vmatprep.subr.bf16.mxu1 %v3325_v12  ;;  %v3428_v11 = vld [vmem:[%s4266_s1 + $0x3c0] ss:$16 sps:$4 sm:$0xff]   ;;  %v3431_v12 = vld [vmem:[%s4266_s1 + $0x3c8] ss:$16 sps:$4 sm:$0xff]  }
  0x4a   :  { %1470 = vmatmul.mubr.bf16.gmra.mrb[4].mxu0 %v3310_v13  ;;  %1856 = vmatmul.mubr.bf16.gmra.mrb[4].mxu1 %v3310_v13  ;;  %v3439_v13 = vld [vmem:[%s4266_s1 + $0x3e4] ss:$16 sps:$4 sm:$0xff]  }
  0x4b   :  { %1479 = vmatprep.mubr.bf16.mxu0 %v3317_v14  ;;  %1865 = vmatprep.mubr.bf16.mxu1 %v3317_v14  ;;  %v3442_v14 = vld [vmem:[%s4266_s1 + $0x3ec] ss:$16 sps:$4 sm:$0xff]  }
  0x4c   :  { %1625 = vmatpush1.bf16.msra.mxu0 %v3320_v15  ;;  %2011 = vmatpush1.bf16.msra.mxu1 %v3323_v16 }
  0x4d   :  { %1626 = vmatprep.subr.bf16.mxu0 %v3331_v17  ;;  %2012 = vmatprep.subr.bf16.mxu1 %v3334_v18 }
  0x50   :  { %1627 = vmatpush1.bf16.msra.mxu0 %v3329_v19  ;;  %2013 = vmatpush1.bf16.msra.mxu1 %v3332_v20 }
  0x51   :  { %1628 = vmatprep.subr.bf16.mxu0 %v3340_v21  ;;  %2014 = vmatprep.subr.bf16.mxu1 %v3343_v22 }
  0x52   :  { %1480 = vmatmul.mubr.bf16.gmra.mrb[8].mxu0 %v3319_v23  ;;  %1866 = vmatmul.mubr.bf16.gmra.mrb[8].mxu1 %v3319_v23 }
  0x53   :  { %1489 = vmatprep.mubr.bf16.mxu0 %v3326_v24  ;;  %1875 = vmatprep.mubr.bf16.mxu1 %v3326_v24 }
  0x54   :  { %1629 = vmatpush1.bf16.msra.mxu0 %v3338_v25  ;;  %2015 = vmatpush1.bf16.msra.mxu1 %v3341_v26 }
  0x55   :  { %1630 = vmatprep.subr.bf16.mxu0 %v3349_v27  ;;  %2016 = vmatprep.subr.bf16.mxu1 %v3352_v28 }
  0x58   :  { %1631 = vmatpush1.bf16.msra.mxu0 %v3347_v29  ;;  %2017 = vmatpush1.bf16.msra.mxu1 %v3350_v30 }
  0x59   :  { %1632 = vmatprep.subr.bf16.mxu0 %v3358_v31  ;;  %2018 = vmatprep.subr.bf16.mxu1 %v3361_v32 }
  0x5a   :  { %1490 = vmatmul.mubr.bf16.gmra.mrb[12].mxu0 %v3328_v33  ;;  %1876 = vmatmul.mubr.bf16.gmra.mrb[12].mxu1 %v3328_v33 }
  0x5b   :  { %1499 = vmatprep.mubr.bf16.mxu0 %v3335_v34  ;;  %1885 = vmatprep.mubr.bf16.mxu1 %v3335_v34 }
  0x5c   :  { %1633 = vmatpush1.bf16.msra.mxu0 %v3356_v35  ;;  %2019 = vmatpush1.bf16.msra.mxu1 %v3359_v36 }
  0x5d   :  { %1634 = vmatprep.subr.bf16.mxu0 %v3367_v37  ;;  %2020 = vmatprep.subr.bf16.mxu1 %v3370_v38 }
  0x60   :  { %1635 = vmatpush1.bf16.msra.mxu0 %v3365_v39  ;;  %2021 = vmatpush1.bf16.msra.mxu1 %v3368_v40 }
  0x61   :  { %1636 = vmatprep.subr.bf16.mxu0 %v3376_v41  ;;  %2022 = vmatprep.subr.bf16.mxu1 %v3379_v42 }
  0x62   :  { %1500 = vmatmul.mubr.bf16.gmra.mrb[16].mxu0 %v3337_v43  ;;  %1886 = vmatmul.mubr.bf16.gmra.mrb[16].mxu1 %v3337_v43 }
  0x63   :  { %1509 = vmatprep.mubr.bf16.mxu0 %v3344_v44  ;;  %1895 = vmatprep.mubr.bf16.mxu1 %v3344_v44 }
  0x64   :  { %1637 = vmatpush1.bf16.msra.mxu0 %v3374_v45  ;;  %2023 = vmatpush1.bf16.msra.mxu1 %v3377_v46 }
  0x65   :  { %1638 = vmatprep.subr.bf16.mxu0 %v3385_v47  ;;  %2024 = vmatprep.subr.bf16.mxu1 %v3388_v48 }
  0x68   :  { %1639 = vmatpush1.bf16.msra.mxu0 %v3383_v49  ;;  %2025 = vmatpush1.bf16.msra.mxu1 %v3386_v50 }
  0x69   :  { %1640 = vmatprep.subr.bf16.mxu0 %v3394_v51  ;;  %2026 = vmatprep.subr.bf16.mxu1 %v3397_v52 }
  0x6a   :  { %1510 = vmatmul.mubr.bf16.gmra.mrb[20].mxu0 %v3346_v53  ;;  %1896 = vmatmul.mubr.bf16.gmra.mrb[20].mxu1 %v3346_v53 }
  0x6b   :  { %1519 = vmatprep.mubr.bf16.mxu0 %v3353_v54  ;;  %1905 = vmatprep.mubr.bf16.mxu1 %v3353_v54 }
  0x6c   :  { %1641 = vmatpush1.bf16.msra.mxu0 %v3392_v55  ;;  %2027 = vmatpush1.bf16.msra.mxu1 %v3395_v56 }
  0x6d   :  { %1642 = vmatprep.subr.bf16.mxu0 %v3403_v57  ;;  %2028 = vmatprep.subr.bf16.mxu1 %v3406_v58 }
  0x70   :  { %1643 = vmatpush1.bf16.msra.mxu0 %v3401_v59  ;;  %2029 = vmatpush1.bf16.msra.mxu1 %v3404_v60 }
  0x71   :  { %1644 = vmatprep.subr.bf16.mxu0 %v3412_v61  ;;  %2030 = vmatprep.subr.bf16.mxu1 %v3415_v62 }
  0x72   :  { %1520 = vmatmul.mubr.bf16.gmra.mrb[24].mxu0 %v3355_v63  ;;  %1906 = vmatmul.mubr.bf16.gmra.mrb[24].mxu1 %v3355_v63 }
  0x73   :  { %1529 = vmatprep.mubr.bf16.mxu0 %v3362_v0  ;;  %1915 = vmatprep.mubr.bf16.mxu1 %v3362_v0 }
  0x74   :  { %1645 = vmatpush1.bf16.msra.mxu0 %v3410_v1  ;;  %2031 = vmatpush1.bf16.msra.mxu1 %v3413_v2 }
  0x75   :  { %1646 = vmatprep.subr.bf16.mxu0 %v3421_v3  ;;  %2032 = vmatprep.subr.bf16.mxu1 %v3424_v4 }
  0x78   :  { %1647 = vmatpush1.bf16.msra.mxu0 %v3419_v5  ;;  %2033 = vmatpush1.bf16.msra.mxu1 %v3422_v6 }
  0x79   :  { %1648 = vmatprep.subr.bf16.mxu0 %v3430_v7  ;;  %2034 = vmatprep.subr.bf16.mxu1 %v3433_v9 }
  0x7a   :  { %8 = vsyncpa [#allocation4], 0  ;;  %1530 = vmatmul.mubr.bf16.gmra.mrb[28].mxu0 %v3364_v8  ;;  %1916 = vmatmul.mubr.bf16.gmra.mrb[28].mxu1 %v3364_v8  ;;  %v3437_v15 = vld [vmem:[%s4266_s1 + $0x3e0] ss:$16 sps:$4 sm:$0xff]   ;;  %v3440_v16 = vld [vmem:[%s4266_s1 + $0x3e8] ss:$16 sps:$4 sm:$0xff]   ;;  %v2588_v0 = vlaneseq }
  0x7b   :  { %1539 = vmatprep.mubr.bf16.mxu0 %v3371_v10  ;;  %1925 = vmatprep.mubr.bf16.mxu1 %v3371_v10  ;;  %v3373_v17 = vld [vmem:[%s4265_s0 + $0x100] ss:$16 sps:$4 sm:$0xff]   ;;  %v3380_v18 = vld [vmem:[%s4265_s0 + $0x124] ss:$16 sps:$4 sm:$0xff]   ;;  %v3445_v32 = vld [vmem:[%s4265_s0 + $0xc] ss:$16 sps:$4 sm:$0xff]  }
  0x7c   :  { %1649 = vmatpush1.bf16.msra.mxu0 %v3428_v11  ;;  %2035 = vmatpush1.bf16.msra.mxu1 %v3431_v12  ;;  %v3382_v19 = vld [vmem:[%s4265_s0 + $0x120] ss:$16 sps:$4 sm:$0xff]   ;;  %v3389_v20 = vld [vmem:[%s4265_s0 + $0x144] ss:$16 sps:$4 sm:$0xff]   ;;  %v3443_v33 = vld [vmem:[%s4265_s0 + $0x8] ss:$16 sps:$4 sm:$0xff]  }
  0x7d   :  { %1650 = vmatprep.subr.bf16.mxu0 %v3439_v13  ;;  %2036 = vmatprep.subr.bf16.mxu1 %v3442_v14  ;;  %v3391_v21 = vld [vmem:[%s4265_s0 + $0x140] ss:$16 sps:$4 sm:$0xff]   ;;  %v3398_v22 = vld [vmem:[%s4265_s0 + $0x164] ss:$16 sps:$4 sm:$0xff]   ;;  %v3446_v34 = vld [vmem:[%s4265_s0 + $0x2c] ss:$16 sps:$4 sm:$0xff]  }
  0x7e   :  { %v3400_v23 = vld [vmem:[%s4265_s0 + $0x160] ss:$16 sps:$4 sm:$0xff]   ;;  %v3407_v24 = vld [vmem:[%s4265_s0 + $0x184] ss:$16 sps:$4 sm:$0xff]   ;;  %v3448_v35 = vld [vmem:[%s4265_s0 + $0x28] ss:$16 sps:$4 sm:$0xff]  }
  0x7f   :  { %v3409_v25 = vld [vmem:[%s4265_s0 + $0x180] ss:$16 sps:$4 sm:$0xff]   ;;  %v3416_v26 = vld [vmem:[%s4265_s0 + $0x1a4] ss:$16 sps:$4 sm:$0xff]   ;;  %v3449_v36 = vld [vmem:[%s4265_s0 + $0x4c] ss:$16 sps:$4 sm:$0xff]  }
  0x80   :  { %1651 = vmatpush1.bf16.msra.mxu0 %v3437_v15  ;;  %2037 = vmatpush1.bf16.msra.mxu1 %v3440_v16  ;;  %v3418_v27 = vld [vmem:[%s4265_s0 + $0x1a0] ss:$16 sps:$4 sm:$0xff]   ;;  %v3425_v28 = vld [vmem:[%s4265_s0 + $0x1c4] ss:$16 sps:$4 sm:$0xff]   ;;  %v3451_v37 = vld [vmem:[%s4265_s0 + $0x48] ss:$16 sps:$4 sm:$0xff]  }
  0x81   :  { %v3427_v29 = vld [vmem:[%s4265_s0 + $0x1c0] ss:$16 sps:$4 sm:$0xff]   ;;  %v3434_v30 = vld [vmem:[%s4265_s0 + $0x1e4] ss:$16 sps:$4 sm:$0xff]   ;;  %v3452_v38 = vld [vmem:[%s4265_s0 + $0x6c] ss:$16 sps:$4 sm:$0xff]  }
  0x82   :  { %1540 = vmatmul.mubr.bf16.gmra.mrb[32].mxu0 %v3373_v17  ;;  %1926 = vmatmul.mubr.bf16.gmra.mrb[32].mxu1 %v3373_v17  ;;  %v3436_v31 = vld [vmem:[%s4265_s0 + $0x1e0] ss:$16 sps:$4 sm:$0xff]   ;;  %v3454_v39 = vld [vmem:[%s4265_s0 + $0x68] ss:$16 sps:$4 sm:$0xff]   ;;  %v3455_v40 = vld [vmem:[%s4265_s0 + $0x8c] ss:$16 sps:$4 sm:$0xff]  }
  0x83   :  { %1549 = vmatprep.mubr.bf16.mxu0 %v3380_v18  ;;  %1935 = vmatprep.mubr.bf16.mxu1 %v3380_v18  ;;  %v3457_v41 = vld [vmem:[%s4265_s0 + $0x88] ss:$16 sps:$4 sm:$0xff]   ;;  %v3458_v42 = vld [vmem:[%s4265_s0 + $0xac] ss:$16 sps:$4 sm:$0xff]   ;;  %v2589_v1 = vshrl.u32 %v2588_v0, 7 }
  0x84   :  { %v3460_v43 = vld [vmem:[%s4265_s0 + $0xa8] ss:$16 sps:$4 sm:$0xff]   ;;  %v3461_v44 = vld [vmem:[%s4265_s0 + $0xcc] ss:$16 sps:$4 sm:$0xff]   ;;  %v2586_v4 = vld [vmem:[%s4267_s2] sm:$0xf] }
  0x85   :  { %v3463_v45 = vld [vmem:[%s4265_s0 + $0xc8] ss:$16 sps:$4 sm:$0xff]   ;;  %v3464_v46 = vld [vmem:[%s4265_s0 + $0xec] ss:$16 sps:$4 sm:$0xff]   ;;  %v2590_v2 = vsub.s32 0, %v2589_v1  ;;  %v2598_v3 = vsub.s32 2, %v2589_v1 }
  0x86   :  { %v3466_v47 = vld [vmem:[%s4265_s0 + $0xe8] ss:$16 sps:$4 sm:$0xff]   ;;  %v3467_v48 = vld [vmem:[%s4265_s0 + $0x10c] ss:$16 sps:$4 sm:$0xff]   ;;  %v2594_v5 = vsub.s32 1, %v2589_v1  ;;  %v2602_v6 = vsub.s32 3, %v2589_v1 }
  0x87   :  { %v3469_v49 = vld [vmem:[%s4265_s0 + $0x108] ss:$16 sps:$4 sm:$0xff]   ;;  %v3470_v50 = vld [vmem:[%s4265_s0 + $0x12c] ss:$16 sps:$4 sm:$0xff]   ;;  %v4117_v7 = vrot.slane %v2586_v4, %v2590_v2  ;;  %v4119_v8 = vrot.slane %v2586_v4, %v2598_v3 }
  0x88   :  { %v3472_v51 = vld [vmem:[%s4265_s0 + $0x128] ss:$16 sps:$4 sm:$0xff]   ;;  %v3473_v52 = vld [vmem:[%s4265_s0 + $0x14c] ss:$16 sps:$4 sm:$0xff]   ;;  %v4121_v9 = vrot.slane %v2586_v4, %v2594_v5  ;;  %v4123_v10 = vrot.slane %v2586_v4, %v2602_v6 }
  0x89   :  { %v3475_v53 = vld [vmem:[%s4265_s0 + $0x148] ss:$16 sps:$4 sm:$0xff]   ;;  %v3476_v54 = vld [vmem:[%s4265_s0 + $0x16c] ss:$16 sps:$4 sm:$0xff]  }
  0x8a   :  { %1550 = vmatmul.mubr.bf16.gmra.mrb[36].mxu0 %v3382_v19  ;;  %1936 = vmatmul.mubr.bf16.gmra.mrb[36].mxu1 %v3382_v19  ;;  %v3478_v55 = vld [vmem:[%s4265_s0 + $0x168] ss:$16 sps:$4 sm:$0xff]   ;;  %v3479_v56 = vld [vmem:[%s4265_s0 + $0x18c] ss:$16 sps:$4 sm:$0xff]  }
  0x8b   :  { %1559 = vmatprep.mubr.bf16.mxu0 %v3389_v20  ;;  %1945 = vmatprep.mubr.bf16.mxu1 %v3389_v20  ;;  %v3481_v57 = vld [vmem:[%s4265_s0 + $0x188] ss:$16 sps:$4 sm:$0xff]   ;;  %v3482_v58 = vld [vmem:[%s4265_s0 + $0x1ac] ss:$16 sps:$4 sm:$0xff]  }
  0x8c   :  { %v3484_v59 = vld [vmem:[%s4265_s0 + $0x1a8] ss:$16 sps:$4 sm:$0xff]   ;;  %v3485_v60 = vld [vmem:[%s4265_s0 + $0x1cc] ss:$16 sps:$4 sm:$0xff]  }
  0x8d   :  { %v3487_v61 = vld [vmem:[%s4265_s0 + $0x1c8] ss:$16 sps:$4 sm:$0xff]   ;;  %v3488_v62 = vld [vmem:[%s4265_s0 + $0x1ec] ss:$16 sps:$4 sm:$0xff]  }
  0x8e   :  { %v3490_v63 = vld [vmem:[%s4265_s0 + $0x1e8] ss:$16 sps:$4 sm:$0xff]   ;;  %s3515_s0 = smov [#allocation3]  }
  0x8f   :  { %s2869_s2 = sshll.u32 %s3515_s0, 4  ;;  %s2870_s2 = int_to_ptr.vmem [resolvable:$true] %s2869_s2 }
  0x90   :  { %s3491_s16 = scalar_lea.vmem %s2870_s2, 16384  ;;  %p3496_p1 = scmp.lt.s32.totalorder %s2870_s2, %s2870_s2 }
  0x91   :  { %p3492_p0 = scmp.ne.s32.totalorder %s2870_s2, %s3491_s16  ;;  %p3497_p2 = scmp.lt.s32.totalorder %s3491_s16, %s3491_s16 }
  0x92   :  { %1560 = vmatmul.mubr.bf16.gmra.mrb[40].mxu0 %v3391_v21  ;;  %1946 = vmatmul.mubr.bf16.gmra.mrb[40].mxu1 %v3391_v21 }
  0x93   :  { %1569 = vmatprep.mubr.bf16.mxu0 %v3398_v22  ;;  %1955 = vmatprep.mubr.bf16.mxu1 %v3398_v22  ;;  %p3498_p3 = por %p3497_p2, %p3496_p1 }
  0x95   :  { %p3499_p4 = pnand %p3498_p3, %p3492_p0 }
  0x9a   :  { %1570 = vmatmul.mubr.bf16.gmra.mrb[44].mxu0 %v3400_v23  ;;  %1956 = vmatmul.mubr.bf16.gmra.mrb[44].mxu1 %v3400_v23 }
  0x9b   :  { %1579 = vmatprep.mubr.bf16.mxu0 %v3407_v24  ;;  %1965 = vmatprep.mubr.bf16.mxu1 %v3407_v24 }
  0xa2   :  { %1580 = vmatmul.mubr.bf16.gmra.mrb[48].mxu0 %v3409_v25  ;;  %1966 = vmatmul.mubr.bf16.gmra.mrb[48].mxu1 %v3409_v25 }
  0xa3   :  { %1589 = vmatprep.mubr.bf16.mxu0 %v3416_v26  ;;  %1975 = vmatprep.mubr.bf16.mxu1 %v3416_v26 }
  0xaa   :  { %1590 = vmatmul.mubr.bf16.gmra.mrb[52].mxu0 %v3418_v27  ;;  %1976 = vmatmul.mubr.bf16.gmra.mrb[52].mxu1 %v3418_v27 }
  0xab   :  { %1599 = vmatprep.mubr.bf16.mxu0 %v3425_v28  ;;  %1985 = vmatprep.mubr.bf16.mxu1 %v3425_v28 }
  0xb2   :  { %1600 = vmatmul.mubr.bf16.gmra.mrb[56].mxu0 %v3427_v29  ;;  %1986 = vmatmul.mubr.bf16.gmra.mrb[56].mxu1 %v3427_v29 }
  0xb3   :  { %1609 = vmatprep.mubr.bf16.mxu0 %v3434_v30  ;;  %1995 = vmatprep.mubr.bf16.mxu1 %v3434_v30 }
  0xba   :  { %1610 = vmatmul.mubr.bf16.gmra.mrb[60].mxu0 %v3436_v31  ;;  %1996 = vmatmul.mubr.bf16.gmra.mrb[60].mxu1 %v3436_v31 }
  0xbb   :  { %1652 = vmatprep.mubr.bf16.mxu0 %v3445_v32  ;;  %2038 = vmatprep.mubr.bf16.mxu1 %v3445_v32 }
  0xc2   :  { %1653 = vmatmul.mubr.bf16.vlgmr.msra.gmra.mrb[0].mxu0 %v3443_v33  ;;  %2039 = vmatmul.mubr.bf16.vlgmr.msra.gmra.mrb[0].mxu1 %v3443_v33 }
  0xc3   :  { %1662 = vmatprep.mubr.bf16.mxu0 %v3446_v34  ;;  %2048 = vmatprep.mubr.bf16.mxu1 %v3446_v34 }
  0xca   :  { %1663 = vmatmul.mubr.bf16.gmra.mrb[4].mxu0 %v3448_v35  ;;  %2049 = vmatmul.mubr.bf16.gmra.mrb[4].mxu1 %v3448_v35 }
  0xcb   :  { %1672 = vmatprep.mubr.bf16.mxu0 %v3449_v36  ;;  %2058 = vmatprep.mubr.bf16.mxu1 %v3449_v36 }
  0xd2   :  { %1673 = vmatmul.mubr.bf16.gmra.mrb[8].mxu0 %v3451_v37  ;;  %2059 = vmatmul.mubr.bf16.gmra.mrb[8].mxu1 %v3451_v37 }
  0xd3   :  { %1682 = vmatprep.mubr.bf16.mxu0 %v3452_v38  ;;  %2068 = vmatprep.mubr.bf16.mxu1 %v3452_v38 }
  0xda   :  { %1683 = vmatmul.mubr.bf16.gmra.mrb[12].mxu0 %v3454_v39  ;;  %2069 = vmatmul.mubr.bf16.gmra.mrb[12].mxu1 %v3454_v39 }
  0xdb   :  { %1692 = vmatprep.mubr.bf16.mxu0 %v3455_v40  ;;  %2078 = vmatprep.mubr.bf16.mxu1 %v3455_v40 }
  0xe2   :  { %1693 = vmatmul.mubr.bf16.gmra.mrb[16].mxu0 %v3457_v41  ;;  %2079 = vmatmul.mubr.bf16.gmra.mrb[16].mxu1 %v3457_v41 }
  0xe3   :  { %1702 = vmatprep.mubr.bf16.mxu0 %v3458_v42  ;;  %2088 = vmatprep.mubr.bf16.mxu1 %v3458_v42 }
  0xea   :  { %1703 = vmatmul.mubr.bf16.gmra.mrb[20].mxu0 %v3460_v43  ;;  %2089 = vmatmul.mubr.bf16.gmra.mrb[20].mxu1 %v3460_v43 }
  0xeb   :  { %1712 = vmatprep.mubr.bf16.mxu0 %v3461_v44  ;;  %2098 = vmatprep.mubr.bf16.mxu1 %v3461_v44 }
  0xf2   :  { %1713 = vmatmul.mubr.bf16.gmra.mrb[24].mxu0 %v3463_v45  ;;  %2099 = vmatmul.mubr.bf16.gmra.mrb[24].mxu1 %v3463_v45 }
  0xf3   :  { %1722 = vmatprep.mubr.bf16.mxu0 %v3464_v46  ;;  %2108 = vmatprep.mubr.bf16.mxu1 %v3464_v46 }
  0xfa   :  { %1723 = vmatmul.mubr.bf16.gmra.mrb[28].mxu0 %v3466_v47  ;;  %2109 = vmatmul.mubr.bf16.gmra.mrb[28].mxu1 %v3466_v47 }
  0xfb   :  { %1732 = vmatprep.mubr.bf16.mxu0 %v3467_v48  ;;  %2118 = vmatprep.mubr.bf16.mxu1 %v3467_v48 }
 0x102   :  { %1733 = vmatmul.mubr.bf16.gmra.mrb[32].mxu0 %v3469_v49  ;;  %2119 = vmatmul.mubr.bf16.gmra.mrb[32].mxu1 %v3469_v49 }
 0x103   :  { %1742 = vmatprep.mubr.bf16.mxu0 %v3470_v50  ;;  %2128 = vmatprep.mubr.bf16.mxu1 %v3470_v50 }
 0x10a   :  { %1743 = vmatmul.mubr.bf16.gmra.mrb[36].mxu0 %v3472_v51  ;;  %2129 = vmatmul.mubr.bf16.gmra.mrb[36].mxu1 %v3472_v51 }
 0x10b   :  { %1752 = vmatprep.mubr.bf16.mxu0 %v3473_v52  ;;  %2138 = vmatprep.mubr.bf16.mxu1 %v3473_v52 }
 0x112   :  { %1753 = vmatmul.mubr.bf16.gmra.mrb[40].mxu0 %v3475_v53  ;;  %2139 = vmatmul.mubr.bf16.gmra.mrb[40].mxu1 %v3475_v53 }
 0x113   :  { %1762 = vmatprep.mubr.bf16.mxu0 %v3476_v54  ;;  %2148 = vmatprep.mubr.bf16.mxu1 %v3476_v54 }
 0x11a   :  { %1763 = vmatmul.mubr.bf16.gmra.mrb[44].mxu0 %v3478_v55  ;;  %2149 = vmatmul.mubr.bf16.gmra.mrb[44].mxu1 %v3478_v55 }
 0x11b   :  { %1772 = vmatprep.mubr.bf16.mxu0 %v3479_v56  ;;  %2158 = vmatprep.mubr.bf16.mxu1 %v3479_v56 }
 0x122   :  { %1773 = vmatmul.mubr.bf16.gmra.mrb[48].mxu0 %v3481_v57  ;;  %2159 = vmatmul.mubr.bf16.gmra.mrb[48].mxu1 %v3481_v57 }
 0x123   :  { %1782 = vmatprep.mubr.bf16.mxu0 %v3482_v58  ;;  %2168 = vmatprep.mubr.bf16.mxu1 %v3482_v58 }
 0x12a   :  { %1783 = vmatmul.mubr.bf16.gmra.mrb[52].mxu0 %v3484_v59  ;;  %2169 = vmatmul.mubr.bf16.gmra.mrb[52].mxu1 %v3484_v59 }
 0x12b   :  { %1792 = vmatprep.mubr.bf16.mxu0 %v3485_v60  ;;  %2178 = vmatprep.mubr.bf16.mxu1 %v3485_v60 }
 0x132   :  { %1793 = vmatmul.mubr.bf16.gmra.mrb[56].mxu0 %v3487_v61  ;;  %2179 = vmatmul.mubr.bf16.gmra.mrb[56].mxu1 %v3487_v61 }
 0x133   :  { %1802 = vmatprep.mubr.bf16.mxu0 %v3488_v62  ;;  %2188 = vmatprep.mubr.bf16.mxu1 %v3488_v62 }
 0x13a   :  { %1803 = vmatmul.mubr.bf16.gmra.mrb[60].mxu0 %v3490_v63  ;;  %2189 = vmatmul.mubr.bf16.gmra.mrb[60].mxu1 %v3490_v63 }
 0x195   :  { %v1654_v11 = vpop.f32.mrb[0].mxu0  ;;  %v2040_v12 = vpop.f32.mrb[0].mxu1 }
 0x196   :  { %v2608_v13 = vadd.f32 %v4117_v7, %v1654_v11  ;;  %v2610_v14 = vadd.f32 %v4119_v8, %v2040_v12  ;;  %v1656_v15 = vpop.f32.mrb[1].mxu0  ;;  %v2042_v16 = vpop.f32.mrb[1].mxu1 }
 0x197   :  { %v2609_v17 = vadd.f32 %v4121_v9, %v1656_v15  ;;  %v2611_v18 = vadd.f32 %v4123_v10, %v2042_v16  ;;  %v1658_v19 = vpop.f32.mrb[2].mxu0  ;;  %v2044_v20 = vpop.f32.mrb[2].mxu1 }
 0x198   :  { %2736 = vst [vmem:[#allocation3] sm:$0xff] %v2608_v13  ;;  %2738 = vst [vmem:[#allocation3 + $0x10] sm:$0xff] %v2610_v14  ;;  %v2612_v21 = vadd.f32 %v4117_v7, %v1658_v19  ;;  %v2614_v22 = vadd.f32 %v4119_v8, %v2044_v20  ;;  %v1660_v23 = vpop.f32.mrb[3].mxu0  ;;  %v2046_v24 = vpop.f32.mrb[3].mxu1 }
 0x199   :  { %2737 = vst [vmem:[#allocation3 + $0x8] sm:$0xff] %v2609_v17  ;;  %2739 = vst [vmem:[#allocation3 + $0x18] sm:$0xff] %v2611_v18  ;;  %v2613_v25 = vadd.f32 %v4121_v9, %v1660_v23  ;;  %v2615_v26 = vadd.f32 %v4123_v10, %v2046_v24 }
 0x19a   :  { %2740 = vst [vmem:[#allocation3 + $0x20] sm:$0xff] %v2612_v21  ;;  %2742 = vst [vmem:[#allocation3 + $0x30] sm:$0xff] %v2614_v22 }
 0x19b   :  { %2741 = vst [vmem:[#allocation3 + $0x28] sm:$0xff] %v2613_v25  ;;  %2743 = vst [vmem:[#allocation3 + $0x38] sm:$0xff] %v2615_v26 }
 0x19d   :  { %v1664_v27 = vpop.f32.mrb[4].mxu0  ;;  %v2050_v28 = vpop.f32.mrb[4].mxu1 }
 0x19e   :  { %v2616_v29 = vadd.f32 %v4117_v7, %v1664_v27  ;;  %v2618_v30 = vadd.f32 %v4119_v8, %v2050_v28  ;;  %v1666_v31 = vpop.f32.mrb[5].mxu0  ;;  %v2052_v32 = vpop.f32.mrb[5].mxu1 }
 0x19f   :  { %v2617_v33 = vadd.f32 %v4121_v9, %v1666_v31  ;;  %v2619_v34 = vadd.f32 %v4123_v10, %v2052_v32  ;;  %v1668_v35 = vpop.f32.mrb[6].mxu0  ;;  %v2054_v36 = vpop.f32.mrb[6].mxu1 }
 0x1a0   :  { %2744 = vst [vmem:[#allocation3 + $0x40] sm:$0xff] %v2616_v29  ;;  %2746 = vst [vmem:[#allocation3 + $0x50] sm:$0xff] %v2618_v30  ;;  %v2620_v37 = vadd.f32 %v4117_v7, %v1668_v35  ;;  %v2622_v38 = vadd.f32 %v4119_v8, %v2054_v36  ;;  %v1670_v39 = vpop.f32.mrb[7].mxu0  ;;  %v2056_v40 = vpop.f32.mrb[7].mxu1 }
 0x1a1   :  { %2745 = vst [vmem:[#allocation3 + $0x48] sm:$0xff] %v2617_v33  ;;  %2747 = vst [vmem:[#allocation3 + $0x58] sm:$0xff] %v2619_v34  ;;  %v2621_v41 = vadd.f32 %v4121_v9, %v1670_v39  ;;  %v2623_v42 = vadd.f32 %v4123_v10, %v2056_v40 }
 0x1a2   :  { %2748 = vst [vmem:[#allocation3 + $0x60] sm:$0xff] %v2620_v37  ;;  %2750 = vst [vmem:[#allocation3 + $0x70] sm:$0xff] %v2622_v38 }
 0x1a3   :  { %2749 = vst [vmem:[#allocation3 + $0x68] sm:$0xff] %v2621_v41  ;;  %2751 = vst [vmem:[#allocation3 + $0x78] sm:$0xff] %v2623_v42 }
 0x1a5   :  { %v1674_v43 = vpop.f32.mrb[8].mxu0  ;;  %v2060_v44 = vpop.f32.mrb[8].mxu1 }
 0x1a6   :  { %v2624_v45 = vadd.f32 %v4117_v7, %v1674_v43  ;;  %v2626_v46 = vadd.f32 %v4119_v8, %v2060_v44  ;;  %v1676_v47 = vpop.f32.mrb[9].mxu0  ;;  %v2062_v48 = vpop.f32.mrb[9].mxu1 }
 0x1a7   :  { %v2625_v49 = vadd.f32 %v4121_v9, %v1676_v47  ;;  %v2627_v50 = vadd.f32 %v4123_v10, %v2062_v48  ;;  %v1678_v51 = vpop.f32.mrb[10].mxu0  ;;  %v2064_v52 = vpop.f32.mrb[10].mxu1 }
 0x1a8   :  { %2752 = vst [vmem:[#allocation3 + $0x80] sm:$0xff] %v2624_v45  ;;  %2754 = vst [vmem:[#allocation3 + $0x90] sm:$0xff] %v2626_v46  ;;  %v2628_v53 = vadd.f32 %v4117_v7, %v1678_v51  ;;  %v2630_v54 = vadd.f32 %v4119_v8, %v2064_v52  ;;  %v1680_v55 = vpop.f32.mrb[11].mxu0  ;;  %v2066_v56 = vpop.f32.mrb[11].mxu1 }
 0x1a9   :  { %2753 = vst [vmem:[#allocation3 + $0x88] sm:$0xff] %v2625_v49  ;;  %2755 = vst [vmem:[#allocation3 + $0x98] sm:$0xff] %v2627_v50  ;;  %v2629_v57 = vadd.f32 %v4121_v9, %v1680_v55  ;;  %v2631_v58 = vadd.f32 %v4123_v10, %v2066_v56 }
 0x1aa   :  { %2756 = vst [vmem:[#allocation3 + $0xa0] sm:$0xff] %v2628_v53  ;;  %2758 = vst [vmem:[#allocation3 + $0xb0] sm:$0xff] %v2630_v54 }
 0x1ab   :  { %2757 = vst [vmem:[#allocation3 + $0xa8] sm:$0xff] %v2629_v57  ;;  %2759 = vst [vmem:[#allocation3 + $0xb8] sm:$0xff] %v2631_v58 }
 0x1ad   :  { %v1684_v59 = vpop.f32.mrb[12].mxu0  ;;  %v2070_v60 = vpop.f32.mrb[12].mxu1 }
 0x1ae   :  { %v2632_v61 = vadd.f32 %v4117_v7, %v1684_v59  ;;  %v2634_v62 = vadd.f32 %v4119_v8, %v2070_v60  ;;  %v1686_v63 = vpop.f32.mrb[13].mxu0  ;;  %v2072_v0 = vpop.f32.mrb[13].mxu1 }
 0x1af   :  { %v2633_v1 = vadd.f32 %v4121_v9, %v1686_v63  ;;  %v2635_v2 = vadd.f32 %v4123_v10, %v2072_v0  ;;  %v1688_v3 = vpop.f32.mrb[14].mxu0  ;;  %v2074_v4 = vpop.f32.mrb[14].mxu1 }
 0x1b0   :  { %2760 = vst [vmem:[#allocation3 + $0xc0] sm:$0xff] %v2632_v61  ;;  %2762 = vst [vmem:[#allocation3 + $0xd0] sm:$0xff] %v2634_v62  ;;  %v2636_v5 = vadd.f32 %v4117_v7, %v1688_v3  ;;  %v2638_v6 = vadd.f32 %v4119_v8, %v2074_v4  ;;  %v1690_v11 = vpop.f32.mrb[15].mxu0  ;;  %v2076_v12 = vpop.f32.mrb[15].mxu1 }
 0x1b1   :  { %2761 = vst [vmem:[#allocation3 + $0xc8] sm:$0xff] %v2633_v1  ;;  %2763 = vst [vmem:[#allocation3 + $0xd8] sm:$0xff] %v2635_v2  ;;  %v2637_v13 = vadd.f32 %v4121_v9, %v1690_v11  ;;  %v2639_v14 = vadd.f32 %v4123_v10, %v2076_v12 }
 0x1b2   :  { %2764 = vst [vmem:[#allocation3 + $0xe0] sm:$0xff] %v2636_v5  ;;  %2766 = vst [vmem:[#allocation3 + $0xf0] sm:$0xff] %v2638_v6 }
 0x1b3   :  { %2765 = vst [vmem:[#allocation3 + $0xe8] sm:$0xff] %v2637_v13  ;;  %2767 = vst [vmem:[#allocation3 + $0xf8] sm:$0xff] %v2639_v14 }
 0x1b5   :  { %v1694_v15 = vpop.f32.mrb[16].mxu0  ;;  %v2080_v16 = vpop.f32.mrb[16].mxu1 }
 0x1b6   :  { %v2640_v17 = vadd.f32 %v4117_v7, %v1694_v15  ;;  %v2642_v18 = vadd.f32 %v4119_v8, %v2080_v16  ;;  %v1696_v19 = vpop.f32.mrb[17].mxu0  ;;  %v2082_v20 = vpop.f32.mrb[17].mxu1 }
 0x1b7   :  { %v2641_v21 = vadd.f32 %v4121_v9, %v1696_v19  ;;  %v2643_v22 = vadd.f32 %v4123_v10, %v2082_v20  ;;  %v1698_v23 = vpop.f32.mrb[18].mxu0  ;;  %v2084_v24 = vpop.f32.mrb[18].mxu1 }
 0x1b8   :  { %2768 = vst [vmem:[#allocation3 + $0x100] sm:$0xff] %v2640_v17  ;;  %2770 = vst [vmem:[#allocation3 + $0x110] sm:$0xff] %v2642_v18  ;;  %v2644_v25 = vadd.f32 %v4117_v7, %v1698_v23  ;;  %v2646_v26 = vadd.f32 %v4119_v8, %v2084_v24  ;;  %v1700_v27 = vpop.f32.mrb[19].mxu0  ;;  %v2086_v28 = vpop.f32.mrb[19].mxu1 }
 0x1b9   :  { %2769 = vst [vmem:[#allocation3 + $0x108] sm:$0xff] %v2641_v21  ;;  %2771 = vst [vmem:[#allocation3 + $0x118] sm:$0xff] %v2643_v22  ;;  %v2645_v29 = vadd.f32 %v4121_v9, %v1700_v27  ;;  %v2647_v30 = vadd.f32 %v4123_v10, %v2086_v28 }
 0x1ba   :  { %2772 = vst [vmem:[#allocation3 + $0x120] sm:$0xff] %v2644_v25  ;;  %2774 = vst [vmem:[#allocation3 + $0x130] sm:$0xff] %v2646_v26 }
 0x1bb   :  { %2773 = vst [vmem:[#allocation3 + $0x128] sm:$0xff] %v2645_v29  ;;  %2775 = vst [vmem:[#allocation3 + $0x138] sm:$0xff] %v2647_v30 }
 0x1bd   :  { %v1704_v31 = vpop.f32.mrb[20].mxu0  ;;  %v2090_v32 = vpop.f32.mrb[20].mxu1 }
 0x1be   :  { %v2648_v33 = vadd.f32 %v4117_v7, %v1704_v31  ;;  %v2650_v34 = vadd.f32 %v4119_v8, %v2090_v32  ;;  %v1706_v35 = vpop.f32.mrb[21].mxu0  ;;  %v2092_v36 = vpop.f32.mrb[21].mxu1 }
 0x1bf   :  { %v2649_v37 = vadd.f32 %v4121_v9, %v1706_v35  ;;  %v2651_v38 = vadd.f32 %v4123_v10, %v2092_v36  ;;  %v1708_v39 = vpop.f32.mrb[22].mxu0  ;;  %v2094_v40 = vpop.f32.mrb[22].mxu1 }
 0x1c0   :  { %2776 = vst [vmem:[#allocation3 + $0x140] sm:$0xff] %v2648_v33  ;;  %2778 = vst [vmem:[#allocation3 + $0x150] sm:$0xff] %v2650_v34  ;;  %v2652_v41 = vadd.f32 %v4117_v7, %v1708_v39  ;;  %v2654_v42 = vadd.f32 %v4119_v8, %v2094_v40  ;;  %v1710_v43 = vpop.f32.mrb[23].mxu0  ;;  %v2096_v44 = vpop.f32.mrb[23].mxu1 }
 0x1c1   :  { %2777 = vst [vmem:[#allocation3 + $0x148] sm:$0xff] %v2649_v37  ;;  %2779 = vst [vmem:[#allocation3 + $0x158] sm:$0xff] %v2651_v38  ;;  %v2653_v45 = vadd.f32 %v4121_v9, %v1710_v43  ;;  %v2655_v46 = vadd.f32 %v4123_v10, %v2096_v44 }
 0x1c2   :  { %2780 = vst [vmem:[#allocation3 + $0x160] sm:$0xff] %v2652_v41  ;;  %2782 = vst [vmem:[#allocation3 + $0x170] sm:$0xff] %v2654_v42 }
 0x1c3   :  { %2781 = vst [vmem:[#allocation3 + $0x168] sm:$0xff] %v2653_v45  ;;  %2783 = vst [vmem:[#allocation3 + $0x178] sm:$0xff] %v2655_v46 }
 0x1c5   :  { %v1714_v47 = vpop.f32.mrb[24].mxu0  ;;  %v2100_v48 = vpop.f32.mrb[24].mxu1 }
 0x1c6   :  { %v2656_v49 = vadd.f32 %v4117_v7, %v1714_v47  ;;  %v2658_v50 = vadd.f32 %v4119_v8, %v2100_v48  ;;  %v1716_v51 = vpop.f32.mrb[25].mxu0  ;;  %v2102_v52 = vpop.f32.mrb[25].mxu1 }
 0x1c7   :  { %v2657_v53 = vadd.f32 %v4121_v9, %v1716_v51  ;;  %v2659_v54 = vadd.f32 %v4123_v10, %v2102_v52  ;;  %v1718_v55 = vpop.f32.mrb[26].mxu0  ;;  %v2104_v56 = vpop.f32.mrb[26].mxu1 }
 0x1c8   :  { %2784 = vst [vmem:[#allocation3 + $0x180] sm:$0xff] %v2656_v49  ;;  %2786 = vst [vmem:[#allocation3 + $0x190] sm:$0xff] %v2658_v50  ;;  %v2660_v57 = vadd.f32 %v4117_v7, %v1718_v55  ;;  %v2662_v58 = vadd.f32 %v4119_v8, %v2104_v56  ;;  %v1720_v59 = vpop.f32.mrb[27].mxu0  ;;  %v2106_v60 = vpop.f32.mrb[27].mxu1 }
 0x1c9   :  { %2785 = vst [vmem:[#allocation3 + $0x188] sm:$0xff] %v2657_v53  ;;  %2787 = vst [vmem:[#allocation3 + $0x198] sm:$0xff] %v2659_v54  ;;  %v2661_v61 = vadd.f32 %v4121_v9, %v1720_v59  ;;  %v2663_v62 = vadd.f32 %v4123_v10, %v2106_v60 }
 0x1ca   :  { %2788 = vst [vmem:[#allocation3 + $0x1a0] sm:$0xff] %v2660_v57  ;;  %2790 = vst [vmem:[#allocation3 + $0x1b0] sm:$0xff] %v2662_v58 }
 0x1cb   :  { %2789 = vst [vmem:[#allocation3 + $0x1a8] sm:$0xff] %v2661_v61  ;;  %2791 = vst [vmem:[#allocation3 + $0x1b8] sm:$0xff] %v2663_v62 }
 0x1cd   :  { %v1724_v63 = vpop.f32.mrb[28].mxu0  ;;  %v2110_v0 = vpop.f32.mrb[28].mxu1 }
 0x1ce   :  { %v2664_v1 = vadd.f32 %v4117_v7, %v1724_v63  ;;  %v2666_v2 = vadd.f32 %v4119_v8, %v2110_v0  ;;  %v1726_v3 = vpop.f32.mrb[29].mxu0  ;;  %v2112_v4 = vpop.f32.mrb[29].mxu1 }
 0x1cf   :  { %v2665_v5 = vadd.f32 %v4121_v9, %v1726_v3  ;;  %v2667_v6 = vadd.f32 %v4123_v10, %v2112_v4  ;;  %v1728_v11 = vpop.f32.mrb[30].mxu0  ;;  %v2114_v12 = vpop.f32.mrb[30].mxu1 }
 0x1d0   :  { %2792 = vst [vmem:[#allocation3 + $0x1c0] sm:$0xff] %v2664_v1  ;;  %2794 = vst [vmem:[#allocation3 + $0x1d0] sm:$0xff] %v2666_v2  ;;  %v2668_v13 = vadd.f32 %v4117_v7, %v1728_v11  ;;  %v2670_v14 = vadd.f32 %v4119_v8, %v2114_v12  ;;  %v1730_v15 = vpop.f32.mrb[31].mxu0  ;;  %v2116_v16 = vpop.f32.mrb[31].mxu1 }
 0x1d1   :  { %2793 = vst [vmem:[#allocation3 + $0x1c8] sm:$0xff] %v2665_v5  ;;  %2795 = vst [vmem:[#allocation3 + $0x1d8] sm:$0xff] %v2667_v6  ;;  %v2669_v17 = vadd.f32 %v4121_v9, %v1730_v15  ;;  %v2671_v18 = vadd.f32 %v4123_v10, %v2116_v16 }
 0x1d2   :  { %2796 = vst [vmem:[#allocation3 + $0x1e0] sm:$0xff] %v2668_v13  ;;  %2798 = vst [vmem:[#allocation3 + $0x1f0] sm:$0xff] %v2670_v14 }
 0x1d3   :  { %2797 = vst [vmem:[#allocation3 + $0x1e8] sm:$0xff] %v2669_v17  ;;  %2799 = vst [vmem:[#allocation3 + $0x1f8] sm:$0xff] %v2671_v18 }
 0x1d5   :  { %v1734_v19 = vpop.f32.mrb[32].mxu0  ;;  %v2120_v20 = vpop.f32.mrb[32].mxu1 }
 0x1d6   :  { %v2672_v21 = vadd.f32 %v4117_v7, %v1734_v19  ;;  %v2674_v22 = vadd.f32 %v4119_v8, %v2120_v20  ;;  %v1736_v23 = vpop.f32.mrb[33].mxu0  ;;  %v2122_v24 = vpop.f32.mrb[33].mxu1 }
 0x1d7   :  { %v2673_v25 = vadd.f32 %v4121_v9, %v1736_v23  ;;  %v2675_v26 = vadd.f32 %v4123_v10, %v2122_v24  ;;  %v1738_v27 = vpop.f32.mrb[34].mxu0  ;;  %v2124_v28 = vpop.f32.mrb[34].mxu1 }
 0x1d8   :  { %2800 = vst [vmem:[#allocation3 + $0x200] sm:$0xff] %v2672_v21  ;;  %2802 = vst [vmem:[#allocation3 + $0x210] sm:$0xff] %v2674_v22  ;;  %v2676_v29 = vadd.f32 %v4117_v7, %v1738_v27  ;;  %v2678_v30 = vadd.f32 %v4119_v8, %v2124_v28  ;;  %v1740_v31 = vpop.f32.mrb[35].mxu0  ;;  %v2126_v32 = vpop.f32.mrb[35].mxu1 }
 0x1d9   :  { %2801 = vst [vmem:[#allocation3 + $0x208] sm:$0xff] %v2673_v25  ;;  %2803 = vst [vmem:[#allocation3 + $0x218] sm:$0xff] %v2675_v26  ;;  %v2677_v33 = vadd.f32 %v4121_v9, %v1740_v31  ;;  %v2679_v34 = vadd.f32 %v4123_v10, %v2126_v32 }
 0x1da   :  { %2804 = vst [vmem:[#allocation3 + $0x220] sm:$0xff] %v2676_v29  ;;  %2806 = vst [vmem:[#allocation3 + $0x230] sm:$0xff] %v2678_v30 }
 0x1db   :  { %2805 = vst [vmem:[#allocation3 + $0x228] sm:$0xff] %v2677_v33  ;;  %2807 = vst [vmem:[#allocation3 + $0x238] sm:$0xff] %v2679_v34 }
 0x1dd   :  { %v1744_v35 = vpop.f32.mrb[36].mxu0  ;;  %v2130_v36 = vpop.f32.mrb[36].mxu1 }
 0x1de   :  { %v2680_v37 = vadd.f32 %v4117_v7, %v1744_v35  ;;  %v2682_v38 = vadd.f32 %v4119_v8, %v2130_v36  ;;  %v1746_v39 = vpop.f32.mrb[37].mxu0  ;;  %v2132_v40 = vpop.f32.mrb[37].mxu1 }
 0x1df   :  { %v2681_v41 = vadd.f32 %v4121_v9, %v1746_v39  ;;  %v2683_v42 = vadd.f32 %v4123_v10, %v2132_v40  ;;  %v1748_v43 = vpop.f32.mrb[38].mxu0  ;;  %v2134_v44 = vpop.f32.mrb[38].mxu1 }
 0x1e0   :  { %2808 = vst [vmem:[#allocation3 + $0x240] sm:$0xff] %v2680_v37  ;;  %2810 = vst [vmem:[#allocation3 + $0x250] sm:$0xff] %v2682_v38  ;;  %v2684_v45 = vadd.f32 %v4117_v7, %v1748_v43  ;;  %v2686_v46 = vadd.f32 %v4119_v8, %v2134_v44  ;;  %v1750_v47 = vpop.f32.mrb[39].mxu0  ;;  %v2136_v48 = vpop.f32.mrb[39].mxu1 }
 0x1e1   :  { %2809 = vst [vmem:[#allocation3 + $0x248] sm:$0xff] %v2681_v41  ;;  %2811 = vst [vmem:[#allocation3 + $0x258] sm:$0xff] %v2683_v42  ;;  %v2685_v49 = vadd.f32 %v4121_v9, %v1750_v47  ;;  %v2687_v50 = vadd.f32 %v4123_v10, %v2136_v48 }
 0x1e2   :  { %2812 = vst [vmem:[#allocation3 + $0x260] sm:$0xff] %v2684_v45  ;;  %2814 = vst [vmem:[#allocation3 + $0x270] sm:$0xff] %v2686_v46 }
 0x1e3   :  { %2813 = vst [vmem:[#allocation3 + $0x268] sm:$0xff] %v2685_v49  ;;  %2815 = vst [vmem:[#allocation3 + $0x278] sm:$0xff] %v2687_v50 }
 0x1e5   :  { %v1754_v51 = vpop.f32.mrb[40].mxu0  ;;  %v2140_v52 = vpop.f32.mrb[40].mxu1 }
 0x1e6   :  { %v2688_v53 = vadd.f32 %v4117_v7, %v1754_v51  ;;  %v2690_v54 = vadd.f32 %v4119_v8, %v2140_v52  ;;  %v1756_v55 = vpop.f32.mrb[41].mxu0  ;;  %v2142_v56 = vpop.f32.mrb[41].mxu1 }
 0x1e7   :  { %v2689_v57 = vadd.f32 %v4121_v9, %v1756_v55  ;;  %v2691_v58 = vadd.f32 %v4123_v10, %v2142_v56  ;;  %v1758_v59 = vpop.f32.mrb[42].mxu0  ;;  %v2144_v60 = vpop.f32.mrb[42].mxu1 }
 0x1e8   :  { %2816 = vst [vmem:[#allocation3 + $0x280] sm:$0xff] %v2688_v53  ;;  %2818 = vst [vmem:[#allocation3 + $0x290] sm:$0xff] %v2690_v54  ;;  %v2692_v61 = vadd.f32 %v4117_v7, %v1758_v59  ;;  %v2694_v62 = vadd.f32 %v4119_v8, %v2144_v60  ;;  %v1760_v63 = vpop.f32.mrb[43].mxu0  ;;  %v2146_v0 = vpop.f32.mrb[43].mxu1 }
 0x1e9   :  { %2817 = vst [vmem:[#allocation3 + $0x288] sm:$0xff] %v2689_v57  ;;  %2819 = vst [vmem:[#allocation3 + $0x298] sm:$0xff] %v2691_v58  ;;  %v2693_v1 = vadd.f32 %v4121_v9, %v1760_v63  ;;  %v2695_v2 = vadd.f32 %v4123_v10, %v2146_v0 }
 0x1ea   :  { %2820 = vst [vmem:[#allocation3 + $0x2a0] sm:$0xff] %v2692_v61  ;;  %2822 = vst [vmem:[#allocation3 + $0x2b0] sm:$0xff] %v2694_v62 }
 0x1eb   :  { %2821 = vst [vmem:[#allocation3 + $0x2a8] sm:$0xff] %v2693_v1  ;;  %2823 = vst [vmem:[#allocation3 + $0x2b8] sm:$0xff] %v2695_v2 }
 0x1ed   :  { %v1764_v3 = vpop.f32.mrb[44].mxu0  ;;  %v2150_v4 = vpop.f32.mrb[44].mxu1 }
 0x1ee   :  { %v2696_v5 = vadd.f32 %v4117_v7, %v1764_v3  ;;  %v2698_v6 = vadd.f32 %v4119_v8, %v2150_v4  ;;  %v1766_v11 = vpop.f32.mrb[45].mxu0  ;;  %v2152_v12 = vpop.f32.mrb[45].mxu1 }
 0x1ef   :  { %v2697_v13 = vadd.f32 %v4121_v9, %v1766_v11  ;;  %v2699_v14 = vadd.f32 %v4123_v10, %v2152_v12  ;;  %v1768_v15 = vpop.f32.mrb[46].mxu0  ;;  %v2154_v16 = vpop.f32.mrb[46].mxu1 }
 0x1f0   :  { %2824 = vst [vmem:[#allocation3 + $0x2c0] sm:$0xff] %v2696_v5  ;;  %2826 = vst [vmem:[#allocation3 + $0x2d0] sm:$0xff] %v2698_v6  ;;  %v2700_v17 = vadd.f32 %v4117_v7, %v1768_v15  ;;  %v2702_v18 = vadd.f32 %v4119_v8, %v2154_v16  ;;  %v1770_v19 = vpop.f32.mrb[47].mxu0  ;;  %v2156_v20 = vpop.f32.mrb[47].mxu1 }
 0x1f1   :  { %2825 = vst [vmem:[#allocation3 + $0x2c8] sm:$0xff] %v2697_v13  ;;  %2827 = vst [vmem:[#allocation3 + $0x2d8] sm:$0xff] %v2699_v14  ;;  %v2701_v21 = vadd.f32 %v4121_v9, %v1770_v19  ;;  %v2703_v22 = vadd.f32 %v4123_v10, %v2156_v20 }
 0x1f2   :  { %2828 = vst [vmem:[#allocation3 + $0x2e0] sm:$0xff] %v2700_v17  ;;  %2830 = vst [vmem:[#allocation3 + $0x2f0] sm:$0xff] %v2702_v18 }
 0x1f3   :  { %2829 = vst [vmem:[#allocation3 + $0x2e8] sm:$0xff] %v2701_v21  ;;  %2831 = vst [vmem:[#allocation3 + $0x2f8] sm:$0xff] %v2703_v22 }
 0x1f5   :  { %v1774_v23 = vpop.f32.mrb[48].mxu0  ;;  %v2160_v24 = vpop.f32.mrb[48].mxu1 }
 0x1f6   :  { %v2704_v25 = vadd.f32 %v4117_v7, %v1774_v23  ;;  %v2706_v26 = vadd.f32 %v4119_v8, %v2160_v24  ;;  %v1776_v27 = vpop.f32.mrb[49].mxu0  ;;  %v2162_v28 = vpop.f32.mrb[49].mxu1 }
 0x1f7   :  { %v2705_v29 = vadd.f32 %v4121_v9, %v1776_v27  ;;  %v2707_v30 = vadd.f32 %v4123_v10, %v2162_v28  ;;  %v1778_v31 = vpop.f32.mrb[50].mxu0  ;;  %v2164_v32 = vpop.f32.mrb[50].mxu1 }
 0x1f8   :  { %2832 = vst [vmem:[#allocation3 + $0x300] sm:$0xff] %v2704_v25  ;;  %2834 = vst [vmem:[#allocation3 + $0x310] sm:$0xff] %v2706_v26  ;;  %v2708_v33 = vadd.f32 %v4117_v7, %v1778_v31  ;;  %v2710_v34 = vadd.f32 %v4119_v8, %v2164_v32  ;;  %v1780_v35 = vpop.f32.mrb[51].mxu0  ;;  %v2166_v36 = vpop.f32.mrb[51].mxu1 }
 0x1f9   :  { %2833 = vst [vmem:[#allocation3 + $0x308] sm:$0xff] %v2705_v29  ;;  %2835 = vst [vmem:[#allocation3 + $0x318] sm:$0xff] %v2707_v30  ;;  %v2709_v37 = vadd.f32 %v4121_v9, %v1780_v35  ;;  %v2711_v38 = vadd.f32 %v4123_v10, %v2166_v36 }
 0x1fa   :  { %2836 = vst [vmem:[#allocation3 + $0x320] sm:$0xff] %v2708_v33  ;;  %2838 = vst [vmem:[#allocation3 + $0x330] sm:$0xff] %v2710_v34 }
 0x1fb   :  { %2837 = vst [vmem:[#allocation3 + $0x328] sm:$0xff] %v2709_v37  ;;  %2839 = vst [vmem:[#allocation3 + $0x338] sm:$0xff] %v2711_v38 }
 0x1fd   :  { %v1784_v39 = vpop.f32.mrb[52].mxu0  ;;  %v2170_v40 = vpop.f32.mrb[52].mxu1 }
 0x1fe   :  { %v2712_v41 = vadd.f32 %v4117_v7, %v1784_v39  ;;  %v2714_v42 = vadd.f32 %v4119_v8, %v2170_v40  ;;  %v1786_v43 = vpop.f32.mrb[53].mxu0  ;;  %v2172_v44 = vpop.f32.mrb[53].mxu1 }
 0x1ff   :  { %v2713_v45 = vadd.f32 %v4121_v9, %v1786_v43  ;;  %v2715_v46 = vadd.f32 %v4123_v10, %v2172_v44  ;;  %v1788_v47 = vpop.f32.mrb[54].mxu0  ;;  %v2174_v48 = vpop.f32.mrb[54].mxu1 }
 0x200   :  { %2840 = vst [vmem:[#allocation3 + $0x340] sm:$0xff] %v2712_v41  ;;  %2842 = vst [vmem:[#allocation3 + $0x350] sm:$0xff] %v2714_v42  ;;  %v2716_v49 = vadd.f32 %v4117_v7, %v1788_v47  ;;  %v2718_v50 = vadd.f32 %v4119_v8, %v2174_v48  ;;  %v1790_v51 = vpop.f32.mrb[55].mxu0  ;;  %v2176_v52 = vpop.f32.mrb[55].mxu1 }
 0x201   :  { %2841 = vst [vmem:[#allocation3 + $0x348] sm:$0xff] %v2713_v45  ;;  %2843 = vst [vmem:[#allocation3 + $0x358] sm:$0xff] %v2715_v46  ;;  %v2717_v53 = vadd.f32 %v4121_v9, %v1790_v51  ;;  %v2719_v54 = vadd.f32 %v4123_v10, %v2176_v52 }
 0x202   :  { %2844 = vst [vmem:[#allocation3 + $0x360] sm:$0xff] %v2716_v49  ;;  %2846 = vst [vmem:[#allocation3 + $0x370] sm:$0xff] %v2718_v50 }
 0x203   :  { %2845 = vst [vmem:[#allocation3 + $0x368] sm:$0xff] %v2717_v53  ;;  %2847 = vst [vmem:[#allocation3 + $0x378] sm:$0xff] %v2719_v54 }
 0x205   :  { %v1794_v55 = vpop.f32.mrb[56].mxu0  ;;  %v2180_v56 = vpop.f32.mrb[56].mxu1 }
 0x206   :  { %v2720_v57 = vadd.f32 %v4117_v7, %v1794_v55  ;;  %v2722_v58 = vadd.f32 %v4119_v8, %v2180_v56  ;;  %v1796_v59 = vpop.f32.mrb[57].mxu0  ;;  %v2182_v60 = vpop.f32.mrb[57].mxu1 }
 0x207   :  { %v2721_v61 = vadd.f32 %v4121_v9, %v1796_v59  ;;  %v2723_v62 = vadd.f32 %v4123_v10, %v2182_v60  ;;  %v1798_v63 = vpop.f32.mrb[58].mxu0  ;;  %v2184_v0 = vpop.f32.mrb[58].mxu1 }
 0x208   :  { %2848 = vst [vmem:[#allocation3 + $0x380] sm:$0xff] %v2720_v57  ;;  %2850 = vst [vmem:[#allocation3 + $0x390] sm:$0xff] %v2722_v58  ;;  %v2724_v1 = vadd.f32 %v4117_v7, %v1798_v63  ;;  %v2726_v2 = vadd.f32 %v4119_v8, %v2184_v0  ;;  %v1800_v3 = vpop.f32.mrb[59].mxu0  ;;  %v2186_v4 = vpop.f32.mrb[59].mxu1 }
 0x209   :  { %2849 = vst [vmem:[#allocation3 + $0x388] sm:$0xff] %v2721_v61  ;;  %2851 = vst [vmem:[#allocation3 + $0x398] sm:$0xff] %v2723_v62  ;;  %v2725_v5 = vadd.f32 %v4121_v9, %v1800_v3  ;;  %v2727_v6 = vadd.f32 %v4123_v10, %v2186_v4 }
 0x20a   :  { %2852 = vst [vmem:[#allocation3 + $0x3a0] sm:$0xff] %v2724_v1  ;;  %2854 = vst [vmem:[#allocation3 + $0x3b0] sm:$0xff] %v2726_v2 }
 0x20b   :  { %2853 = vst [vmem:[#allocation3 + $0x3a8] sm:$0xff] %v2725_v5  ;;  %2855 = vst [vmem:[#allocation3 + $0x3b8] sm:$0xff] %v2727_v6 }
 0x20d   :  { %v1804_v11 = vpop.f32.mrb[60].mxu0  ;;  %v2190_v12 = vpop.f32.mrb[60].mxu1 }
 0x20e   :  { %v2728_v13 = vadd.f32 %v4117_v7, %v1804_v11  ;;  %v2730_v14 = vadd.f32 %v4119_v8, %v2190_v12  ;;  %v1806_v15 = vpop.f32.mrb[61].mxu0  ;;  %v2192_v16 = vpop.f32.mrb[61].mxu1 }
 0x20f   :  { %v2729_v17 = vadd.f32 %v4121_v9, %v1806_v15  ;;  %v2731_v18 = vadd.f32 %v4123_v10, %v2192_v16  ;;  %v1808_v19 = vpop.f32.mrb[62].mxu0  ;;  %v2194_v20 = vpop.f32.mrb[62].mxu1 }
 0x210   :  { %2856 = vst [vmem:[#allocation3 + $0x3c0] sm:$0xff] %v2728_v13  ;;  %2858 = vst [vmem:[#allocation3 + $0x3d0] sm:$0xff] %v2730_v14  ;;  %v2732_v21 = vadd.f32 %v4117_v7, %v1808_v19  ;;  %v2734_v22 = vadd.f32 %v4119_v8, %v2194_v20  ;;  %v1810_v23 = vpop.f32.mrb[63].mxu0  ;;  %v2196_v24 = vpop.f32.mrb[63].mxu1 }
 0x211   :  { %2857 = vst [vmem:[#allocation3 + $0x3c8] sm:$0xff] %v2729_v17  ;;  %2859 = vst [vmem:[#allocation3 + $0x3d8] sm:$0xff] %v2731_v18  ;;  %v2733_v25 = vadd.f32 %v4121_v9, %v1810_v23  ;;  %v2735_v26 = vadd.f32 %v4123_v10, %v2196_v24 }
 0x212   :  { %2860 = vst [vmem:[#allocation3 + $0x3e0] sm:$0xff] %v2732_v21  ;;  %2862 = vst [vmem:[#allocation3 + $0x3f0] sm:$0xff] %v2734_v22 }
 0x213   :  { %2861 = vst [vmem:[#allocation3 + $0x3e8] sm:$0xff] %v2733_v25  ;;  %2863 = vst [vmem:[#allocation3 + $0x3f8] sm:$0xff] %v2735_v26 }
 0x214   :  { %3502 = shalt.err (!%p3499_p4)
}
 0x215   :  { %s3503_s19 = scalar_lea.hbm %s4268_s3, 16384 }
 0x216   :  { %p3504_p5 = scmp.ne.s32.totalorder %s4268_s3, %s3503_s19  ;;  %p3507_p6 = scmp.lt.u32.totalorder %s3503_s19, %s4268_s3 }
 0x218   :  { %p3509_p7 = pnand %p3507_p6, %p3504_p5 }
 0x21a   :  { %3512 = shalt.err (!%p3509_p7)
}
 0x21b   :  { %s3516_s24 = smov 512   ;;  %s3517_s25 = smov 32  }
 0x21c   :  { %2875 = dma.vmem_to_hbm [thread:$0]  %s2870_s2, 16384, %s4268_s3, [#allocation4], %s3516_s24, %s3516_s24, %s3517_s25  }
 0x21d   :  { %3513 = dma.done.wait [#allocation4], 16384  }
 0x21e   :  { %3514 = vsyncadd [#allocation4], 4294950912 }
 0x21f   :  { %2879 = vsyncpa [#allocation4], 1 }

// kernel: gqa_forward.3
= control target key start
LH: loop header
LB: loop body
LE: loop exit
PB: predicated region body
PF: predicated region fallthrough
CT: control target
= control target key end

     0   :  { %8 = vsyncpa [#allocation4], 0  ;;  %s5422_s0 = inlined_call_operand.vmem [shape: bf16[256,512], index: 0, kind: input, shape index: {}]   ;;  %s5423_s1 = inlined_call_operand.hbm [shape: bf16[512,1024], index: 1, kind: input, shape index: {}]   ;;  %s5424_s2 = inlined_call_operand.vmem [shape: f32[1,1024], index: 2, kind: input, shape index: {}]   ;;  %s5425_s3 = inlined_call_operand.vmem [shape: bf16[256,1024], index: 3, kind: output, shape index: {}]  }
   0x1   :  { %10 = vsyncpa [#allocation4 + $0x1], 0  ;;  %s4628_s12 = smov 0   ;;  %s4630_s13 = smov 0  }
   0x2   :  { %s4632_s14 = smov 0   ;;  %s4634_s15 = smov 0  }
   0x3   :  { %s4636_s16 = smov 0   ;;  %s4638_s17 = smov 0  }
   0x4 LB: > { %s3709_s18 = sadd.s32 4294967295, %s4602_s17   ;;  %s31_s19 = sadd.s32 1, %s4598_s16  ;;  %s4602_s17 = sphi %s4638_s17, %s16_s17   ;;  %s4598_s16 = sphi %s4636_s16, %s5436_s16   ;;  %s4594_s15 = sphi %s4634_s15, %s5435_s15   ;;  %s4590_s14 = sphi %s4632_s14, %s5434_s14   ;;  %s4586_s13 = sphi %s4630_s13, %s5433_s13   ;;  %s4582_s12 = sphi %s4628_s12, %s5432_s12  }
   0x5   : > { %p33_p0 = scmp.ge.s32.totalorder %s31_s19, 2  ;;  %s72_s20 = sadd.s32 1, %s4590_s14 }
   0x6   : > { %p79_p1 = scmp.ne.s32.totalorder %s4590_s14, %s4586_s13  ;;  %p80_p2 = scmp.eq.s32.totalorder %s4602_s17, 0 }
   0x7   : > { %s5438_s19 = smov (%p33_p0, %s31_s19), 0  ;;  %p85_p4 = scmp.ne.s32.totalorder %s4586_s13, %s4582_s12 }
   0x8   : > { %p4664_p3 = por %p80_p2, %p79_p1  ;;  %s68_s22 = ssub.s32 %s4598_s16, %s5438_s19 }
   0x9   : > { %p86_p5 = scmp.eq.s32.totalorder %s3709_s18, 0  ;;  %p70_p6 = scmp.eq.s32.totalorder %s68_s22, 0 }
   0xa   : > { %p137_p7 = scmp.eq.s32.totalorder %s3709_s18, 1  ;;  %p4182_p10 = scmp.lt.s32.totalorder %s4602_s17, 2 }
   0xb   : > { %p4671_p8 = por %p86_p5, %p85_p4  ;;  %s178_s26 = sand.u32 1, %s4590_s14  }
   0xc   : > { %s4676_s24 = scalar_select %p70_p6, %s4590_s14, %s72_s20  }
   0xd   : > { %p4678_p9 = por %p137_p7, %p79_p1  ;;  %s3982_s27 = sshll.u32 %s4598_s16, 8 }
   0xe   : > { %s3714_s28 = sshll.u32 %s178_s26, 10  ;;  %s4688_s4 = scalar_lea.hbm %s5423_s1, %s3982_s27 }
   0xf   : > { %s5428_s25 = scalar_select %p4678_p9, 1, 0 }
  0x10   : > { %s182_s5 = scalar_lea.vmem [#allocation3], %s3714_s28  ;;  %p4692_p11 = pnand %p4182_p10, %p4664_p3 }
  0x11   : > { %s192_s6 = sshll.u32 %s182_s5, 4  ;;  %s4699_s8 = scalar_lea.sflag [#allocation4], %s178_s26  ;;  %s4696_s6 = int_to_ptr.vmem [resolvable:$true] %s192_s6 }
  0x12   : > { %s4522_s9 = scalar_lea.hbm %s4688_s4, 16384  ;;  %p4524_p0 = pneg %p4692_p11 }
  0x13   : > { %p4523_p13 = scmp.ne.s32.totalorder %s4688_s4, %s4522_s9  ;;  %s4527_s12 = scalar_lea.hbm %s5423_s1, 32768 }
  0x14   : > { %p4528_p3 = scmp.lt.u32.totalorder %s4688_s4, %s5423_s1  ;;  %p4529_p4 = scmp.lt.u32.totalorder %s4527_s12, %s4522_s9 }
  0x15   : > { %p4525_p1 = pnand %p4524_p0, %p4523_p13  ;;  %p4531_p6 = scmp.lt.u32.totalorder %s4522_s9, %s4688_s4 }
  0x16   : > { %p4530_p5 = por %p4529_p4, %p4528_p3 }
  0x17   : > { %p4526_p2 = pneg %p4525_p1 }
  0x18   : > { %p4532_p7 = por %p4531_p6, %p4530_p5 }
  0x1a   : > { %p4533_p10 = pnand %p4532_p7, %p4526_p2 }
  0x1c   : > { %4536 = shalt.err (!%p4533_p10)
}
  0x1d   : > { %s4537_s21 = scalar_lea.vmem %s4696_s6, 16384  ;;  %s4604_s22 = smov [#allocation3]  }
  0x1e   : > { %p4538_p13 = scmp.ne.s32.totalorder %s4696_s6, %s4537_s21  ;;  %s4542_s26 = sshll.u32 %s4604_s22, 4  ;;  %s4543_s26 = int_to_ptr.vmem [resolvable:$false] %s4542_s26 }
  0x1f   : > { %s4544_s27 = scalar_lea.vmem %s4543_s26, 32768  ;;  %p4545_p9 = scmp.lt.s32.totalorder %s4696_s6, %s4543_s26 }
  0x20   : > { %p4540_p1 = pnand %p4538_p13, %p4524_p0  ;;  %p4546_p3 = scmp.lt.s32.totalorder %s4544_s27, %s4537_s21 }
  0x22   : > { %p4541_p12 = pneg %p4540_p1  ;;  %p4547_p4 = por %p4546_p3, %p4545_p9 }
  0x24   : > { %p4548_p5 = pnand %p4547_p4, %p4541_p12 }
  0x26   : > { %4551 = shalt.err (!%p4548_p5)
}
  0x27   : > { %s4605_s28 = smov 512   ;;  %s4606_s29 = smov 256  }
  0x28   : > { %s4607_s30 = smov 16   ;;  %p208_p0 = scmp.lt.s32.totalorder %s4602_s17, 3 }
  0x29   : > { %4181 = dma.hbm_to_vmem [thread:$0]  (!%p4692_p11), %s4688_s4, 16384, %s4696_s6, %s4699_s8, %s4605_s28, %s4606_s29, %s4607_s30  }
  0x2a   : > { %p5430_p2 = scmp.ge.s32.totalorder %s4602_s17, 1 }
  0x2c   : > { %p209_p6 = pnand %p5430_p2, %p208_p0 }
  0x2d   : > { %s4731_s5 = sand.u32 (!%p209_p6), 1, %s4586_s13  }
  0x2e   : > { %212 = sbr.rel (%p209_p6) target bundleno = 604 (0x25c), region = 32  ;;  %s3718_s9 = sshll.u32 (!%p209_p6), %s4731_s5, 10 }
  0x2f   : > { %s215_s10 = scalar_lea.sflag (!%p209_p6), [#allocation4], %s4731_s5  ;;  %s4735_s11 = scalar_lea.vmem (!%p209_p6), [#allocation3], %s3718_s9 }
  0x35   : > { %4577 = dma.done.wait (%p4671_p8), %s215_s10, 16384  }
  0x36   : > { %4579 = vsyncadd (%p4671_p8), %s215_s10, 4294950912  ;;  %v4234_v0 = vld [vmem:[%s4735_s11 + $0x4] ss:$16 sps:$4 sm:$0xff]   ;;  %v4236_v1 = vld [vmem:[%s4735_s11 + $0xc] ss:$16 sps:$4 sm:$0xff]   ;;  %s3720_s8 = sshll.u32 %s4594_s15, 2 }
  0x37   : > { %1687 = vmatprep.subr.bf16.mxu0 %v4234_v0  ;;  %v4238_v2 = vld [vmem:[%s4735_s11] ss:$16 sps:$4 sm:$0xff]   ;;  %v4239_v3 = vld [vmem:[%s4735_s11 + $0x8] ss:$16 sps:$4 sm:$0xff]   ;;  %2073 = vmatprep.subr.bf16.mxu1 %v4236_v1  ;;  %v4240_v4 = vld [vmem:[%s4735_s11 + $0x24] ss:$16 sps:$4 sm:$0xff]  }
  0x38   : > { %1688 = vmatpush1.bf16.msra.mxu0 %v4238_v2  ;;  %2074 = vmatpush1.bf16.msra.mxu1 %v4239_v3  ;;  %v4242_v5 = vld [vmem:[%s4735_s11 + $0x2c] ss:$16 sps:$4 sm:$0xff]   ;;  %v4244_v6 = vld [vmem:[%s4735_s11 + $0x20] ss:$16 sps:$4 sm:$0xff]   ;;  %v4245_v7 = vld [vmem:[%s4735_s11 + $0x28] ss:$16 sps:$4 sm:$0xff]  }
  0x39   : > { %1689 = vmatprep.subr.bf16.mxu0 %v4240_v4  ;;  %2075 = vmatprep.subr.bf16.mxu1 %v4242_v5  ;;  %v4246_v8 = vld [vmem:[%s4735_s11 + $0x44] ss:$16 sps:$4 sm:$0xff]   ;;  %v4248_v9 = vld [vmem:[%s4735_s11 + $0x4c] ss:$16 sps:$4 sm:$0xff]   ;;  %v4250_v10 = vld [vmem:[%s4735_s11 + $0x40] ss:$16 sps:$4 sm:$0xff]  }
  0x3a   : > { %v4251_v11 = vld [vmem:[%s4735_s11 + $0x48] ss:$16 sps:$4 sm:$0xff]   ;;  %v4252_v12 = vld [vmem:[%s4735_s11 + $0x64] ss:$16 sps:$4 sm:$0xff]   ;;  %v4254_v13 = vld [vmem:[%s4735_s11 + $0x6c] ss:$16 sps:$4 sm:$0xff]  }
  0x3b   : > { %v4256_v14 = vld [vmem:[%s4735_s11 + $0x60] ss:$16 sps:$4 sm:$0xff]   ;;  %v4257_v15 = vld [vmem:[%s4735_s11 + $0x68] ss:$16 sps:$4 sm:$0xff]   ;;  %v4258_v16 = vld [vmem:[%s4735_s11 + $0x84] ss:$16 sps:$4 sm:$0xff]  }
  0x3c   : > { %1690 = vmatpush1.bf16.msra.mxu0 %v4244_v6  ;;  %2076 = vmatpush1.bf16.msra.mxu1 %v4245_v7  ;;  %v4260_v17 = vld [vmem:[%s4735_s11 + $0x8c] ss:$16 sps:$4 sm:$0xff]   ;;  %v4262_v18 = vld [vmem:[%s4735_s11 + $0x80] ss:$16 sps:$4 sm:$0xff]   ;;  %v4263_v19 = vld [vmem:[%s4735_s11 + $0x88] ss:$16 sps:$4 sm:$0xff]  }
  0x3d   : > { %1691 = vmatprep.subr.bf16.mxu0 %v4246_v8  ;;  %2077 = vmatprep.subr.bf16.mxu1 %v4248_v9  ;;  %v4264_v20 = vld [vmem:[%s4735_s11 + $0xa4] ss:$16 sps:$4 sm:$0xff]   ;;  %v4266_v21 = vld [vmem:[%s4735_s11 + $0xac] ss:$16 sps:$4 sm:$0xff]   ;;  %v4268_v22 = vld [vmem:[%s4735_s11 + $0xa0] ss:$16 sps:$4 sm:$0xff]  }
  0x3e   : > { %v4269_v23 = vld [vmem:[%s4735_s11 + $0xa8] ss:$16 sps:$4 sm:$0xff]   ;;  %v4270_v24 = vld [vmem:[%s4735_s11 + $0xc4] ss:$16 sps:$4 sm:$0xff]   ;;  %v4272_v25 = vld [vmem:[%s4735_s11 + $0xcc] ss:$16 sps:$4 sm:$0xff]  }
  0x3f   : > { %v4274_v26 = vld [vmem:[%s4735_s11 + $0xc0] ss:$16 sps:$4 sm:$0xff]   ;;  %v4275_v27 = vld [vmem:[%s4735_s11 + $0xc8] ss:$16 sps:$4 sm:$0xff]   ;;  %v4276_v28 = vld [vmem:[%s4735_s11 + $0xe4] ss:$16 sps:$4 sm:$0xff]  }
  0x40   : > { %1692 = vmatpush1.bf16.msra.mxu0 %v4250_v10  ;;  %2078 = vmatpush1.bf16.msra.mxu1 %v4251_v11  ;;  %v4278_v29 = vld [vmem:[%s4735_s11 + $0xec] ss:$16 sps:$4 sm:$0xff]   ;;  %v4280_v30 = vld [vmem:[%s4735_s11 + $0xe0] ss:$16 sps:$4 sm:$0xff]   ;;  %v4281_v31 = vld [vmem:[%s4735_s11 + $0xe8] ss:$16 sps:$4 sm:$0xff]  }
  0x41   : > { %1693 = vmatprep.subr.bf16.mxu0 %v4252_v12  ;;  %2079 = vmatprep.subr.bf16.mxu1 %v4254_v13  ;;  %v4282_v32 = vld [vmem:[%s4735_s11 + $0x104] ss:$16 sps:$4 sm:$0xff]   ;;  %v4284_v33 = vld [vmem:[%s4735_s11 + $0x10c] ss:$16 sps:$4 sm:$0xff]   ;;  %v4286_v34 = vld [vmem:[%s4735_s11 + $0x100] ss:$16 sps:$4 sm:$0xff]  }
  0x42   : > { %v4287_v35 = vld [vmem:[%s4735_s11 + $0x108] ss:$16 sps:$4 sm:$0xff]   ;;  %v4288_v36 = vld [vmem:[%s4735_s11 + $0x124] ss:$16 sps:$4 sm:$0xff]   ;;  %v4290_v37 = vld [vmem:[%s4735_s11 + $0x12c] ss:$16 sps:$4 sm:$0xff]  }
  0x43   : > { %v4292_v38 = vld [vmem:[%s4735_s11 + $0x120] ss:$16 sps:$4 sm:$0xff]   ;;  %v4293_v39 = vld [vmem:[%s4735_s11 + $0x128] ss:$16 sps:$4 sm:$0xff]   ;;  %v4294_v40 = vld [vmem:[%s4735_s11 + $0x144] ss:$16 sps:$4 sm:$0xff]  }
  0x44   : > { %1694 = vmatpush1.bf16.msra.mxu0 %v4256_v14  ;;  %2080 = vmatpush1.bf16.msra.mxu1 %v4257_v15  ;;  %v4296_v41 = vld [vmem:[%s4735_s11 + $0x14c] ss:$16 sps:$4 sm:$0xff]   ;;  %v4298_v42 = vld [vmem:[%s4735_s11 + $0x140] ss:$16 sps:$4 sm:$0xff]   ;;  %v4299_v43 = vld [vmem:[%s4735_s11 + $0x148] ss:$16 sps:$4 sm:$0xff]  }
  0x45   : > { %1695 = vmatprep.subr.bf16.mxu0 %v4258_v16  ;;  %2081 = vmatprep.subr.bf16.mxu1 %v4260_v17  ;;  %v4300_v44 = vld [vmem:[%s4735_s11 + $0x164] ss:$16 sps:$4 sm:$0xff]   ;;  %v4302_v45 = vld [vmem:[%s4735_s11 + $0x16c] ss:$16 sps:$4 sm:$0xff]   ;;  %v4304_v46 = vld [vmem:[%s4735_s11 + $0x160] ss:$16 sps:$4 sm:$0xff]  }
  0x46   : > { %v4305_v47 = vld [vmem:[%s4735_s11 + $0x168] ss:$16 sps:$4 sm:$0xff]   ;;  %v4332_v48 = vld [vmem:[%s5422_s0 + $0x4] ss:$16 sps:$4 sm:$0xff]   ;;  %v4308_v50 = vld [vmem:[%s4735_s11 + $0x18c] ss:$16 sps:$4 sm:$0xff]  }
  0x47   : > { %v4306_v49 = vld [vmem:[%s4735_s11 + $0x184] ss:$16 sps:$4 sm:$0xff]   ;;  %1719 = vmatprep.mubr.bf16.mxu0 %v4332_v48  ;;  %2105 = vmatprep.mubr.bf16.mxu1 %v4332_v48  ;;  %v4310_v51 = vld [vmem:[%s4735_s11 + $0x180] ss:$16 sps:$4 sm:$0xff]   ;;  %v4311_v52 = vld [vmem:[%s4735_s11 + $0x188] ss:$16 sps:$4 sm:$0xff]  }
  0x48   : > { %1696 = vmatpush1.bf16.msra.mxu0 %v4262_v18  ;;  %2082 = vmatpush1.bf16.msra.mxu1 %v4263_v19  ;;  %v4312_v53 = vld [vmem:[%s4735_s11 + $0x1a4] ss:$16 sps:$4 sm:$0xff]   ;;  %v4314_v54 = vld [vmem:[%s4735_s11 + $0x1ac] ss:$16 sps:$4 sm:$0xff]   ;;  %v4316_v55 = vld [vmem:[%s4735_s11 + $0x1a0] ss:$16 sps:$4 sm:$0xff]  }
  0x49   : > { %1697 = vmatprep.subr.bf16.mxu0 %v4264_v20  ;;  %2083 = vmatprep.subr.bf16.mxu1 %v4266_v21  ;;  %v4317_v56 = vld [vmem:[%s4735_s11 + $0x1a8] ss:$16 sps:$4 sm:$0xff]   ;;  %v4318_v57 = vld [vmem:[%s4735_s11 + $0x1c4] ss:$16 sps:$4 sm:$0xff]   ;;  %v4320_v58 = vld [vmem:[%s4735_s11 + $0x1cc] ss:$16 sps:$4 sm:$0xff]  }
  0x4a   : > { %v4322_v59 = vld [vmem:[%s4735_s11 + $0x1c0] ss:$16 sps:$4 sm:$0xff]   ;;  %v4323_v60 = vld [vmem:[%s4735_s11 + $0x1c8] ss:$16 sps:$4 sm:$0xff]   ;;  %v4324_v61 = vld [vmem:[%s4735_s11 + $0x1e4] ss:$16 sps:$4 sm:$0xff]  }
  0x4b   : > { %v4326_v62 = vld [vmem:[%s4735_s11 + $0x1ec] ss:$16 sps:$4 sm:$0xff]   ;;  %v4328_v63 = vld [vmem:[%s4735_s11 + $0x1e0] ss:$16 sps:$4 sm:$0xff]   ;;  %v4329_v0 = vld [vmem:[%s4735_s11 + $0x1e8] ss:$16 sps:$4 sm:$0xff]  }
  0x4c   : > { %1698 = vmatpush1.bf16.msra.mxu0 %v4268_v22  ;;  %2084 = vmatpush1.bf16.msra.mxu1 %v4269_v23  ;;  %v4335_v1 = vld [vmem:[%s4735_s11 + $0x204] ss:$16 sps:$4 sm:$0xff]   ;;  %v4338_v2 = vld [vmem:[%s4735_s11 + $0x20c] ss:$16 sps:$4 sm:$0xff]   ;;  %v4330_v3 = vld [vmem:[%s5422_s0] ss:$16 sps:$4 sm:$0xff]  }
  0x4d   : > { %1699 = vmatprep.subr.bf16.mxu0 %v4270_v24  ;;  %2085 = vmatprep.subr.bf16.mxu1 %v4272_v25  ;;  %v4333_v4 = vld [vmem:[%s4735_s11 + $0x200] ss:$16 sps:$4 sm:$0xff]   ;;  %v4336_v5 = vld [vmem:[%s4735_s11 + $0x208] ss:$16 sps:$4 sm:$0xff]   ;;  %v4339_v6 = vld [vmem:[%s5422_s0 + $0x24] ss:$16 sps:$4 sm:$0xff]  }
  0x4e   : > { %v4344_v7 = vld [vmem:[%s4735_s11 + $0x224] ss:$16 sps:$4 sm:$0xff]   ;;  %v4347_v8 = vld [vmem:[%s4735_s11 + $0x22c] ss:$16 sps:$4 sm:$0xff]   ;;  %v4342_v9 = vld [vmem:[%s4735_s11 + $0x220] ss:$16 sps:$4 sm:$0xff]  }
  0x4f   : > { %v4345_v10 = vld [vmem:[%s4735_s11 + $0x228] ss:$16 sps:$4 sm:$0xff]   ;;  %v4353_v11 = vld [vmem:[%s4735_s11 + $0x244] ss:$16 sps:$4 sm:$0xff]   ;;  %v4356_v12 = vld [vmem:[%s4735_s11 + $0x24c] ss:$16 sps:$4 sm:$0xff]  }
  0x50   : > { %1700 = vmatpush1.bf16.msra.mxu0 %v4274_v26  ;;  %2086 = vmatpush1.bf16.msra.mxu1 %v4275_v27  ;;  %v4341_v13 = vld [vmem:[%s5422_s0 + $0x20] ss:$16 sps:$4 sm:$0xff]   ;;  %v4348_v14 = vld [vmem:[%s5422_s0 + $0x44] ss:$16 sps:$4 sm:$0xff]   ;;  %v4354_v16 = vld [vmem:[%s4735_s11 + $0x248] ss:$16 sps:$4 sm:$0xff]  }
  0x51   : > { %1701 = vmatprep.subr.bf16.mxu0 %v4276_v28  ;;  %2087 = vmatprep.subr.bf16.mxu1 %v4278_v29  ;;  %v4351_v15 = vld [vmem:[%s4735_s11 + $0x240] ss:$16 sps:$4 sm:$0xff]   ;;  %v4362_v17 = vld [vmem:[%s4735_s11 + $0x264] ss:$16 sps:$4 sm:$0xff]   ;;  %v4365_v18 = vld [vmem:[%s4735_s11 + $0x26c] ss:$16 sps:$4 sm:$0xff]  }
  0x52   : > { %v4360_v19 = vld [vmem:[%s4735_s11 + $0x260] ss:$16 sps:$4 sm:$0xff]   ;;  %v4363_v20 = vld [vmem:[%s4735_s11 + $0x268] ss:$16 sps:$4 sm:$0xff]   ;;  %v4371_v21 = vld [vmem:[%s4735_s11 + $0x284] ss:$16 sps:$4 sm:$0xff]  }
  0x53   : > { %v4374_v22 = vld [vmem:[%s4735_s11 + $0x28c] ss:$16 sps:$4 sm:$0xff]   ;;  %v4350_v23 = vld [vmem:[%s5422_s0 + $0x40] ss:$16 sps:$4 sm:$0xff]   ;;  %v4357_v24 = vld [vmem:[%s5422_s0 + $0x64] ss:$16 sps:$4 sm:$0xff]  }
  0x54   : > { %1702 = vmatpush1.bf16.msra.mxu0 %v4280_v30  ;;  %2088 = vmatpush1.bf16.msra.mxu1 %v4281_v31  ;;  %v4369_v25 = vld [vmem:[%s4735_s11 + $0x280] ss:$16 sps:$4 sm:$0xff]   ;;  %v4372_v26 = vld [vmem:[%s4735_s11 + $0x288] ss:$16 sps:$4 sm:$0xff]   ;;  %v4380_v27 = vld [vmem:[%s4735_s11 + $0x2a4] ss:$16 sps:$4 sm:$0xff]  }
  0x55   : > { %1703 = vmatprep.subr.bf16.mxu0 %v4282_v32  ;;  %2089 = vmatprep.subr.bf16.mxu1 %v4284_v33  ;;  %v4383_v28 = vld [vmem:[%s4735_s11 + $0x2ac] ss:$16 sps:$4 sm:$0xff]   ;;  %v4378_v29 = vld [vmem:[%s4735_s11 + $0x2a0] ss:$16 sps:$4 sm:$0xff]   ;;  %v4381_v30 = vld [vmem:[%s4735_s11 + $0x2a8] ss:$16 sps:$4 sm:$0xff]  }
  0x56   : > { %v4389_v31 = vld [vmem:[%s4735_s11 + $0x2c4] ss:$16 sps:$4 sm:$0xff]   ;;  %v4392_v32 = vld [vmem:[%s4735_s11 + $0x2cc] ss:$16 sps:$4 sm:$0xff]   ;;  %v4359_v33 = vld [vmem:[%s5422_s0 + $0x60] ss:$16 sps:$4 sm:$0xff]  }
  0x57   : > { %v4419_v48 = vld [vmem:[%s4735_s11 + $0x32c] ss:$16 sps:$4 sm:$0xff]   ;;  %p269_p8 = scmp.lt.s32.totalorder %s3720_s8, 7  ;;  %s3719_s20 = sshll.u32 %s4731_s5, 9 }
  0x58   : > { %1704 = vmatpush1.bf16.msra.mxu0 %v4286_v34  ;;  %2090 = vmatpush1.bf16.msra.mxu1 %v4287_v35  ;;  %v4366_v34 = vld [vmem:[%s5422_s0 + $0x84] ss:$16 sps:$4 sm:$0xff]   ;;  %v4387_v35 = vld [vmem:[%s4735_s11 + $0x2c0] ss:$16 sps:$4 sm:$0xff]   ;;  %s5082_s5 = scalar_lea.vmem [#allocation5], %s3719_s20  ;;  %p5431_p9 = scmp.ne.s32.totalorder %s5428_s25, 0 }
  0x59   : > { %1705 = vmatprep.subr.bf16.mxu0 %v4288_v36  ;;  %2091 = vmatprep.subr.bf16.mxu1 %v4290_v37  ;;  %v4390_v36 = vld [vmem:[%s4735_s11 + $0x2c8] ss:$16 sps:$4 sm:$0xff]   ;;  %v4398_v37 = vld [vmem:[%s4735_s11 + $0x2e4] ss:$16 sps:$4 sm:$0xff]   ;;  %s5440_s8 = smov (!%p269_p8, %s3720_s8), 7  ;;  %s4047_s21 = sshll.u32 (%p5431_p9), %s4594_s15, 4 }
  0x5a   : > { %s271_s18 = scalar_lea.vmem %s5424_s2, %s5440_s8  ;;  %s5277_s27 = scalar_lea.vmem (%p5431_p9), %s5425_s3, %s4047_s21 }
  0x5c   : > { %1706 = vmatpush1.bf16.msra.mxu0 %v4292_v38  ;;  %2092 = vmatpush1.bf16.msra.mxu1 %v4293_v39  ;;  %v4401_v38 = vld [vmem:[%s4735_s11 + $0x2ec] ss:$16 sps:$4 sm:$0xff]   ;;  %v4396_v39 = vld [vmem:[%s4735_s11 + $0x2e0] ss:$16 sps:$4 sm:$0xff]  }
  0x5d   : > { %1707 = vmatprep.subr.bf16.mxu0 %v4294_v40  ;;  %2093 = vmatprep.subr.bf16.mxu1 %v4296_v41  ;;  %v4399_v40 = vld [vmem:[%s4735_s11 + $0x2e8] ss:$16 sps:$4 sm:$0xff]   ;;  %v4407_v41 = vld [vmem:[%s4735_s11 + $0x304] ss:$16 sps:$4 sm:$0xff]  }
  0x60   : > { %1708 = vmatpush1.bf16.msra.mxu0 %v4298_v42  ;;  %2094 = vmatpush1.bf16.msra.mxu1 %v4299_v43  ;;  %v4410_v42 = vld [vmem:[%s4735_s11 + $0x30c] ss:$16 sps:$4 sm:$0xff]   ;;  %v4368_v43 = vld [vmem:[%s5422_s0 + $0x80] ss:$16 sps:$4 sm:$0xff]  }
  0x61   : > { %1709 = vmatprep.subr.bf16.mxu0 %v4300_v44  ;;  %2095 = vmatprep.subr.bf16.mxu1 %v4302_v45  ;;  %v4375_v44 = vld [vmem:[%s5422_s0 + $0xa4] ss:$16 sps:$4 sm:$0xff]   ;;  %v4405_v45 = vld [vmem:[%s4735_s11 + $0x300] ss:$16 sps:$4 sm:$0xff]  }
  0x64   : > { %1710 = vmatpush1.bf16.msra.mxu0 %v4304_v46  ;;  %2096 = vmatpush1.bf16.msra.mxu1 %v4305_v47  ;;  %v4408_v46 = vld [vmem:[%s4735_s11 + $0x308] ss:$16 sps:$4 sm:$0xff]   ;;  %v4416_v47 = vld [vmem:[%s4735_s11 + $0x324] ss:$16 sps:$4 sm:$0xff]  }
  0x65   : > { %1711 = vmatprep.subr.bf16.mxu0 %v4306_v49  ;;  %2097 = vmatprep.subr.bf16.mxu1 %v4308_v50  ;;  %v4414_v49 = vld [vmem:[%s4735_s11 + $0x320] ss:$16 sps:$4 sm:$0xff]   ;;  %v4417_v50 = vld [vmem:[%s4735_s11 + $0x328] ss:$16 sps:$4 sm:$0xff]  }
  0x68   : > { %1712 = vmatpush1.bf16.msra.mxu0 %v4310_v51  ;;  %2098 = vmatpush1.bf16.msra.mxu1 %v4311_v52  ;;  %v4425_v51 = vld [vmem:[%s4735_s11 + $0x344] ss:$16 sps:$4 sm:$0xff]   ;;  %v4428_v52 = vld [vmem:[%s4735_s11 + $0x34c] ss:$16 sps:$4 sm:$0xff]  }
  0x69   : > { %1713 = vmatprep.subr.bf16.mxu0 %v4312_v53  ;;  %2099 = vmatprep.subr.bf16.mxu1 %v4314_v54  ;;  %v4377_v53 = vld [vmem:[%s5422_s0 + $0xa0] ss:$16 sps:$4 sm:$0xff]   ;;  %v4384_v54 = vld [vmem:[%s5422_s0 + $0xc4] ss:$16 sps:$4 sm:$0xff]  }
  0x6c   : > { %1714 = vmatpush1.bf16.msra.mxu0 %v4316_v55  ;;  %2100 = vmatpush1.bf16.msra.mxu1 %v4317_v56  ;;  %v4423_v55 = vld [vmem:[%s4735_s11 + $0x340] ss:$16 sps:$4 sm:$0xff]   ;;  %v4426_v56 = vld [vmem:[%s4735_s11 + $0x348] ss:$16 sps:$4 sm:$0xff]  }
  0x6d   : > { %1715 = vmatprep.subr.bf16.mxu0 %v4318_v57  ;;  %2101 = vmatprep.subr.bf16.mxu1 %v4320_v58  ;;  %v4434_v57 = vld [vmem:[%s4735_s11 + $0x364] ss:$16 sps:$4 sm:$0xff]   ;;  %v4437_v58 = vld [vmem:[%s4735_s11 + $0x36c] ss:$16 sps:$4 sm:$0xff]  }
  0x70   : > { %1716 = vmatpush1.bf16.msra.mxu0 %v4322_v59  ;;  %2102 = vmatpush1.bf16.msra.mxu1 %v4323_v60  ;;  %v4432_v59 = vld [vmem:[%s4735_s11 + $0x360] ss:$16 sps:$4 sm:$0xff]   ;;  %v4435_v60 = vld [vmem:[%s4735_s11 + $0x368] ss:$16 sps:$4 sm:$0xff]  }
  0x71   : > { %1717 = vmatprep.subr.bf16.mxu0 %v4324_v61  ;;  %2103 = vmatprep.subr.bf16.mxu1 %v4326_v62  ;;  %v4443_v61 = vld [vmem:[%s4735_s11 + $0x384] ss:$16 sps:$4 sm:$0xff]   ;;  %v4446_v62 = vld [vmem:[%s4735_s11 + $0x38c] ss:$16 sps:$4 sm:$0xff]  }
  0x74   : > { %1718 = vmatpush1.bf16.msra.mxu0 %v4328_v63  ;;  %2104 = vmatpush1.bf16.msra.mxu1 %v4329_v0  ;;  %v4386_v63 = vld [vmem:[%s5422_s0 + $0xc0] ss:$16 sps:$4 sm:$0xff]   ;;  %v4393_v0 = vld [vmem:[%s5422_s0 + $0xe4] ss:$16 sps:$4 sm:$0xff]  }
  0x75   : > { %1880 = vmatprep.subr.bf16.mxu0 %v4335_v1  ;;  %2266 = vmatprep.subr.bf16.mxu1 %v4338_v2  ;;  %v4441_v1 = vld [vmem:[%s4735_s11 + $0x380] ss:$16 sps:$4 sm:$0xff]   ;;  %v4444_v2 = vld [vmem:[%s4735_s11 + $0x388] ss:$16 sps:$4 sm:$0xff]  }
  0x77   : > { %1720 = vmatmul.mubr.bf16.vlgmr.msra.gmra.mrb[0].mxu0 %v4330_v3  ;;  %2106 = vmatmul.mubr.bf16.vlgmr.msra.gmra.mrb[0].mxu1 %v4330_v3  ;;  %v4452_v3 = vld [vmem:[%s4735_s11 + $0x3a4] ss:$16 sps:$4 sm:$0xff]  }
  0x78   : > { %1881 = vmatpush1.bf16.msra.mxu0 %v4333_v4  ;;  %2267 = vmatpush1.bf16.msra.mxu1 %v4336_v5  ;;  %v4455_v4 = vld [vmem:[%s4735_s11 + $0x3ac] ss:$16 sps:$4 sm:$0xff]   ;;  %v4450_v5 = vld [vmem:[%s4735_s11 + $0x3a0] ss:$16 sps:$4 sm:$0xff]  }
  0x79   : > { %1729 = vmatprep.mubr.bf16.mxu0 %v4339_v6  ;;  %2115 = vmatprep.mubr.bf16.mxu1 %v4339_v6  ;;  %v4453_v6 = vld [vmem:[%s4735_s11 + $0x3a8] ss:$16 sps:$4 sm:$0xff]  }
  0x7a   : > { %1882 = vmatprep.subr.bf16.mxu0 %v4344_v7  ;;  %2268 = vmatprep.subr.bf16.mxu1 %v4347_v8  ;;  %v4461_v7 = vld [vmem:[%s4735_s11 + $0x3c4] ss:$16 sps:$4 sm:$0xff]   ;;  %v4395_v8 = vld [vmem:[%s5422_s0 + $0xe0] ss:$16 sps:$4 sm:$0xff]  }
  0x7c   : > { %1883 = vmatpush1.bf16.msra.mxu0 %v4342_v9  ;;  %2269 = vmatpush1.bf16.msra.mxu1 %v4345_v10  ;;  %v4464_v9 = vld [vmem:[%s4735_s11 + $0x3cc] ss:$16 sps:$4 sm:$0xff]   ;;  %v4402_v10 = vld [vmem:[%s5422_s0 + $0x104] ss:$16 sps:$4 sm:$0xff]  }
  0x7d   : > { %1884 = vmatprep.subr.bf16.mxu0 %v4353_v11  ;;  %2270 = vmatprep.subr.bf16.mxu1 %v4356_v12  ;;  %v4459_v11 = vld [vmem:[%s4735_s11 + $0x3c0] ss:$16 sps:$4 sm:$0xff]   ;;  %v4462_v12 = vld [vmem:[%s4735_s11 + $0x3c8] ss:$16 sps:$4 sm:$0xff]  }
  0x7f   : > { %1730 = vmatmul.mubr.bf16.gmra.mrb[4].mxu0 %v4341_v13  ;;  %2116 = vmatmul.mubr.bf16.gmra.mrb[4].mxu1 %v4341_v13  ;;  %v4470_v13 = vld [vmem:[%s4735_s11 + $0x3e4] ss:$16 sps:$4 sm:$0xff]  }
  0x80   : > { %1739 = vmatprep.mubr.bf16.mxu0 %v4348_v14  ;;  %2125 = vmatprep.mubr.bf16.mxu1 %v4348_v14  ;;  %v4473_v14 = vld [vmem:[%s4735_s11 + $0x3ec] ss:$16 sps:$4 sm:$0xff]  }
  0x81   : > { %1885 = vmatpush1.bf16.msra.mxu0 %v4351_v15  ;;  %2271 = vmatpush1.bf16.msra.mxu1 %v4354_v16  ;;  %v4468_v15 = vld [vmem:[%s4735_s11 + $0x3e0] ss:$16 sps:$4 sm:$0xff]   ;;  %v4471_v16 = vld [vmem:[%s4735_s11 + $0x3e8] ss:$16 sps:$4 sm:$0xff]  }
  0x82   : > { %1886 = vmatprep.subr.bf16.mxu0 %v4362_v17  ;;  %2272 = vmatprep.subr.bf16.mxu1 %v4365_v18  ;;  %v4404_v17 = vld [vmem:[%s5422_s0 + $0x100] ss:$16 sps:$4 sm:$0xff]   ;;  %v4411_v18 = vld [vmem:[%s5422_s0 + $0x124] ss:$16 sps:$4 sm:$0xff]  }
  0x85   : > { %1887 = vmatpush1.bf16.msra.mxu0 %v4360_v19  ;;  %2273 = vmatpush1.bf16.msra.mxu1 %v4363_v20  ;;  %v4413_v19 = vld [vmem:[%s5422_s0 + $0x120] ss:$16 sps:$4 sm:$0xff]   ;;  %v4420_v20 = vld [vmem:[%s5422_s0 + $0x144] ss:$16 sps:$4 sm:$0xff]  }
  0x86   : > { %1888 = vmatprep.subr.bf16.mxu0 %v4371_v21  ;;  %2274 = vmatprep.subr.bf16.mxu1 %v4374_v22  ;;  %v4422_v21 = vld [vmem:[%s5422_s0 + $0x140] ss:$16 sps:$4 sm:$0xff]   ;;  %v4429_v22 = vld [vmem:[%s5422_s0 + $0x164] ss:$16 sps:$4 sm:$0xff]  }
  0x87   : > { %1740 = vmatmul.mubr.bf16.gmra.mrb[8].mxu0 %v4350_v23  ;;  %2126 = vmatmul.mubr.bf16.gmra.mrb[8].mxu1 %v4350_v23  ;;  %v4431_v23 = vld [vmem:[%s5422_s0 + $0x160] ss:$16 sps:$4 sm:$0xff]  }
  0x88   : > { %1749 = vmatprep.mubr.bf16.mxu0 %v4357_v24  ;;  %2135 = vmatprep.mubr.bf16.mxu1 %v4357_v24  ;;  %v4438_v24 = vld [vmem:[%s5422_s0 + $0x184] ss:$16 sps:$4 sm:$0xff]  }
  0x89   : > { %1889 = vmatpush1.bf16.msra.mxu0 %v4369_v25  ;;  %2275 = vmatpush1.bf16.msra.mxu1 %v4372_v26  ;;  %v4440_v25 = vld [vmem:[%s5422_s0 + $0x180] ss:$16 sps:$4 sm:$0xff]   ;;  %v4447_v26 = vld [vmem:[%s5422_s0 + $0x1a4] ss:$16 sps:$4 sm:$0xff]  }
  0x8a   : > { %1890 = vmatprep.subr.bf16.mxu0 %v4380_v27  ;;  %2276 = vmatprep.subr.bf16.mxu1 %v4383_v28  ;;  %v4449_v27 = vld [vmem:[%s5422_s0 + $0x1a0] ss:$16 sps:$4 sm:$0xff]   ;;  %v4456_v28 = vld [vmem:[%s5422_s0 + $0x1c4] ss:$16 sps:$4 sm:$0xff]  }
  0x8d   : > { %1891 = vmatpush1.bf16.msra.mxu0 %v4378_v29  ;;  %2277 = vmatpush1.bf16.msra.mxu1 %v4381_v30  ;;  %v4458_v29 = vld [vmem:[%s5422_s0 + $0x1c0] ss:$16 sps:$4 sm:$0xff]   ;;  %v4465_v30 = vld [vmem:[%s5422_s0 + $0x1e4] ss:$16 sps:$4 sm:$0xff]  }
  0x8e   : > { %1892 = vmatprep.subr.bf16.mxu0 %v4389_v31  ;;  %2278 = vmatprep.subr.bf16.mxu1 %v4392_v32  ;;  %v4467_v31 = vld [vmem:[%s5422_s0 + $0x1e0] ss:$16 sps:$4 sm:$0xff]   ;;  %v4476_v32 = vld [vmem:[%s5422_s0 + $0xc] ss:$16 sps:$4 sm:$0xff]  }
  0x8f   : > { %1750 = vmatmul.mubr.bf16.gmra.mrb[12].mxu0 %v4359_v33  ;;  %2136 = vmatmul.mubr.bf16.gmra.mrb[12].mxu1 %v4359_v33  ;;  %v4474_v33 = vld [vmem:[%s5422_s0 + $0x8] ss:$16 sps:$4 sm:$0xff]  }
  0x90   : > { %1759 = vmatprep.mubr.bf16.mxu0 %v4366_v34  ;;  %2145 = vmatprep.mubr.bf16.mxu1 %v4366_v34  ;;  %v4477_v34 = vld [vmem:[%s5422_s0 + $0x2c] ss:$16 sps:$4 sm:$0xff]  }
  0x91   : > { %1893 = vmatpush1.bf16.msra.mxu0 %v4387_v35  ;;  %2279 = vmatpush1.bf16.msra.mxu1 %v4390_v36  ;;  %v4479_v35 = vld [vmem:[%s5422_s0 + $0x28] ss:$16 sps:$4 sm:$0xff]   ;;  %v4480_v36 = vld [vmem:[%s5422_s0 + $0x4c] ss:$16 sps:$4 sm:$0xff]  }
  0x92   : > { %1894 = vmatprep.subr.bf16.mxu0 %v4398_v37  ;;  %2280 = vmatprep.subr.bf16.mxu1 %v4401_v38  ;;  %v4482_v37 = vld [vmem:[%s5422_s0 + $0x48] ss:$16 sps:$4 sm:$0xff]   ;;  %v4483_v38 = vld [vmem:[%s5422_s0 + $0x6c] ss:$16 sps:$4 sm:$0xff]  }
  0x95   : > { %1895 = vmatpush1.bf16.msra.mxu0 %v4396_v39  ;;  %2281 = vmatpush1.bf16.msra.mxu1 %v4399_v40  ;;  %v4485_v39 = vld [vmem:[%s5422_s0 + $0x68] ss:$16 sps:$4 sm:$0xff]   ;;  %v4486_v40 = vld [vmem:[%s5422_s0 + $0x8c] ss:$16 sps:$4 sm:$0xff]  }
  0x96   : > { %1896 = vmatprep.subr.bf16.mxu0 %v4407_v41  ;;  %2282 = vmatprep.subr.bf16.mxu1 %v4410_v42  ;;  %v4488_v41 = vld [vmem:[%s5422_s0 + $0x88] ss:$16 sps:$4 sm:$0xff]   ;;  %v4489_v42 = vld [vmem:[%s5422_s0 + $0xac] ss:$16 sps:$4 sm:$0xff]  }
  0x97   : > { %1760 = vmatmul.mubr.bf16.gmra.mrb[16].mxu0 %v4368_v43  ;;  %2146 = vmatmul.mubr.bf16.gmra.mrb[16].mxu1 %v4368_v43  ;;  %v4491_v43 = vld [vmem:[%s5422_s0 + $0xa8] ss:$16 sps:$4 sm:$0xff]  }
  0x98   : > { %1769 = vmatprep.mubr.bf16.mxu0 %v4375_v44  ;;  %2155 = vmatprep.mubr.bf16.mxu1 %v4375_v44  ;;  %v4492_v44 = vld [vmem:[%s5422_s0 + $0xcc] ss:$16 sps:$4 sm:$0xff]  }
  0x99   : > { %1897 = vmatpush1.bf16.msra.mxu0 %v4405_v45  ;;  %2283 = vmatpush1.bf16.msra.mxu1 %v4408_v46  ;;  %v4494_v45 = vld [vmem:[%s5422_s0 + $0xc8] ss:$16 sps:$4 sm:$0xff]   ;;  %v4495_v46 = vld [vmem:[%s5422_s0 + $0xec] ss:$16 sps:$4 sm:$0xff]  }
  0x9a   : > { %1898 = vmatprep.subr.bf16.mxu0 %v4416_v47  ;;  %2284 = vmatprep.subr.bf16.mxu1 %v4419_v48  ;;  %v4497_v47 = vld [vmem:[%s5422_s0 + $0xe8] ss:$16 sps:$4 sm:$0xff]   ;;  %v4498_v48 = vld [vmem:[%s5422_s0 + $0x10c] ss:$16 sps:$4 sm:$0xff]  }
  0x9d   : > { %1899 = vmatpush1.bf16.msra.mxu0 %v4414_v49  ;;  %2285 = vmatpush1.bf16.msra.mxu1 %v4417_v50  ;;  %v4500_v49 = vld [vmem:[%s5422_s0 + $0x108] ss:$16 sps:$4 sm:$0xff]   ;;  %v4501_v50 = vld [vmem:[%s5422_s0 + $0x12c] ss:$16 sps:$4 sm:$0xff]  }
  0x9e   : > { %1900 = vmatprep.subr.bf16.mxu0 %v4425_v51  ;;  %2286 = vmatprep.subr.bf16.mxu1 %v4428_v52  ;;  %v4503_v51 = vld [vmem:[%s5422_s0 + $0x128] ss:$16 sps:$4 sm:$0xff]   ;;  %v4504_v52 = vld [vmem:[%s5422_s0 + $0x14c] ss:$16 sps:$4 sm:$0xff]  }
  0x9f   : > { %1770 = vmatmul.mubr.bf16.gmra.mrb[20].mxu0 %v4377_v53  ;;  %2156 = vmatmul.mubr.bf16.gmra.mrb[20].mxu1 %v4377_v53  ;;  %v4506_v53 = vld [vmem:[%s5422_s0 + $0x148] ss:$16 sps:$4 sm:$0xff]  }
  0xa0   : > { %1779 = vmatprep.mubr.bf16.mxu0 %v4384_v54  ;;  %2165 = vmatprep.mubr.bf16.mxu1 %v4384_v54  ;;  %v4507_v54 = vld [vmem:[%s5422_s0 + $0x16c] ss:$16 sps:$4 sm:$0xff]  }
  0xa1   : > { %1901 = vmatpush1.bf16.msra.mxu0 %v4423_v55  ;;  %2287 = vmatpush1.bf16.msra.mxu1 %v4426_v56  ;;  %v4509_v55 = vld [vmem:[%s5422_s0 + $0x168] ss:$16 sps:$4 sm:$0xff]   ;;  %v4510_v56 = vld [vmem:[%s5422_s0 + $0x18c] ss:$16 sps:$4 sm:$0xff]  }
  0xa2   : > { %1902 = vmatprep.subr.bf16.mxu0 %v4434_v57  ;;  %2288 = vmatprep.subr.bf16.mxu1 %v4437_v58  ;;  %v4512_v57 = vld [vmem:[%s5422_s0 + $0x188] ss:$16 sps:$4 sm:$0xff]   ;;  %v4513_v58 = vld [vmem:[%s5422_s0 + $0x1ac] ss:$16 sps:$4 sm:$0xff]  }
  0xa5   : > { %1903 = vmatpush1.bf16.msra.mxu0 %v4432_v59  ;;  %2289 = vmatpush1.bf16.msra.mxu1 %v4435_v60  ;;  %v4515_v59 = vld [vmem:[%s5422_s0 + $0x1a8] ss:$16 sps:$4 sm:$0xff]   ;;  %v4516_v60 = vld [vmem:[%s5422_s0 + $0x1cc] ss:$16 sps:$4 sm:$0xff]  }
  0xa6   : > { %1904 = vmatprep.subr.bf16.mxu0 %v4443_v61  ;;  %2290 = vmatprep.subr.bf16.mxu1 %v4446_v62  ;;  %v4518_v61 = vld [vmem:[%s5422_s0 + $0x1c8] ss:$16 sps:$4 sm:$0xff]   ;;  %v4519_v62 = vld [vmem:[%s5422_s0 + $0x1ec] ss:$16 sps:$4 sm:$0xff]  }
  0xa7   : > { %1780 = vmatmul.mubr.bf16.gmra.mrb[24].mxu0 %v4386_v63  ;;  %2166 = vmatmul.mubr.bf16.gmra.mrb[24].mxu1 %v4386_v63  ;;  %v4521_v63 = vld [vmem:[%s5422_s0 + $0x1e8] ss:$16 sps:$4 sm:$0xff]  }
  0xa8   : > { %1789 = vmatprep.mubr.bf16.mxu0 %v4393_v0  ;;  %2175 = vmatprep.mubr.bf16.mxu1 %v4393_v0  ;;  %v2848_v0 = vlaneseq }
  0xa9   : > { %1905 = vmatpush1.bf16.msra.mxu0 %v4441_v1  ;;  %2291 = vmatpush1.bf16.msra.mxu1 %v4444_v2 }
  0xaa   : > { %1906 = vmatprep.subr.bf16.mxu0 %v4452_v3  ;;  %2292 = vmatprep.subr.bf16.mxu1 %v4455_v4  ;;  %v2849_v1 = vshrl.u32 %v2848_v0, 7  ;;  %v2846_v4 = vld [vmem:[%s271_s18] sm:$0xf] }
  0xac   : > { %v2850_v2 = vsub.s32 0, %v2849_v1  ;;  %v2858_v3 = vsub.s32 2, %v2849_v1 }
  0xad   : > { %1907 = vmatpush1.bf16.msra.mxu0 %v4450_v5  ;;  %2293 = vmatpush1.bf16.msra.mxu1 %v4453_v6  ;;  %v2854_v5 = vsub.s32 1, %v2849_v1  ;;  %v2862_v6 = vsub.s32 3, %v2849_v1 }
  0xae   : > { %1908 = vmatprep.subr.bf16.mxu0 %v4461_v7  ;;  %2294 = vmatprep.subr.bf16.mxu1 %v4464_v9  ;;  %v5065_v7 = vrot.slane %v2846_v4, %v2850_v2 }
  0xaf   : > { %1790 = vmatmul.mubr.bf16.gmra.mrb[28].mxu0 %v4395_v8  ;;  %2176 = vmatmul.mubr.bf16.gmra.mrb[28].mxu1 %v4395_v8  ;;  %v5067_v8 = vrot.slane %v2846_v4, %v2858_v3  ;;  %v5069_v9 = vrot.slane %v2846_v4, %v2854_v5 }
  0xb0   : > { %1799 = vmatprep.mubr.bf16.mxu0 %v4402_v10  ;;  %2185 = vmatprep.mubr.bf16.mxu1 %v4402_v10  ;;  %v5071_v10 = vrot.slane %v2846_v4, %v2862_v6 }
  0xb1   : > { %1909 = vmatpush1.bf16.msra.mxu0 %v4459_v11  ;;  %2295 = vmatpush1.bf16.msra.mxu1 %v4462_v12 }
  0xb2   : > { %1910 = vmatprep.subr.bf16.mxu0 %v4470_v13  ;;  %2296 = vmatprep.subr.bf16.mxu1 %v4473_v14 }
  0xb5   : > { %1911 = vmatpush1.bf16.msra.mxu0 %v4468_v15  ;;  %2297 = vmatpush1.bf16.msra.mxu1 %v4471_v16 }
  0xb7   : > { %1800 = vmatmul.mubr.bf16.gmra.mrb[32].mxu0 %v4404_v17  ;;  %2186 = vmatmul.mubr.bf16.gmra.mrb[32].mxu1 %v4404_v17 }
  0xb8   : > { %1809 = vmatprep.mubr.bf16.mxu0 %v4411_v18  ;;  %2195 = vmatprep.mubr.bf16.mxu1 %v4411_v18 }
  0xbf   : > { %1810 = vmatmul.mubr.bf16.gmra.mrb[36].mxu0 %v4413_v19  ;;  %2196 = vmatmul.mubr.bf16.gmra.mrb[36].mxu1 %v4413_v19 }
  0xc0   : > { %1819 = vmatprep.mubr.bf16.mxu0 %v4420_v20  ;;  %2205 = vmatprep.mubr.bf16.mxu1 %v4420_v20 }
  0xc7   : > { %1820 = vmatmul.mubr.bf16.gmra.mrb[40].mxu0 %v4422_v21  ;;  %2206 = vmatmul.mubr.bf16.gmra.mrb[40].mxu1 %v4422_v21 }
  0xc8   : > { %1829 = vmatprep.mubr.bf16.mxu0 %v4429_v22  ;;  %2215 = vmatprep.mubr.bf16.mxu1 %v4429_v22 }
  0xcf   : > { %1830 = vmatmul.mubr.bf16.gmra.mrb[44].mxu0 %v4431_v23  ;;  %2216 = vmatmul.mubr.bf16.gmra.mrb[44].mxu1 %v4431_v23 }
  0xd0   : > { %1839 = vmatprep.mubr.bf16.mxu0 %v4438_v24  ;;  %2225 = vmatprep.mubr.bf16.mxu1 %v4438_v24 }
  0xd7   : > { %1840 = vmatmul.mubr.bf16.gmra.mrb[48].mxu0 %v4440_v25  ;;  %2226 = vmatmul.mubr.bf16.gmra.mrb[48].mxu1 %v4440_v25 }
  0xd8   : > { %1849 = vmatprep.mubr.bf16.mxu0 %v4447_v26  ;;  %2235 = vmatprep.mubr.bf16.mxu1 %v4447_v26 }
  0xdf   : > { %1850 = vmatmul.mubr.bf16.gmra.mrb[52].mxu0 %v4449_v27  ;;  %2236 = vmatmul.mubr.bf16.gmra.mrb[52].mxu1 %v4449_v27 }
  0xe0   : > { %1859 = vmatprep.mubr.bf16.mxu0 %v4456_v28  ;;  %2245 = vmatprep.mubr.bf16.mxu1 %v4456_v28 }
  0xe7   : > { %1860 = vmatmul.mubr.bf16.gmra.mrb[56].mxu0 %v4458_v29  ;;  %2246 = vmatmul.mubr.bf16.gmra.mrb[56].mxu1 %v4458_v29 }
  0xe8   : > { %1869 = vmatprep.mubr.bf16.mxu0 %v4465_v30  ;;  %2255 = vmatprep.mubr.bf16.mxu1 %v4465_v30 }
  0xef   : > { %1870 = vmatmul.mubr.bf16.gmra.mrb[60].mxu0 %v4467_v31  ;;  %2256 = vmatmul.mubr.bf16.gmra.mrb[60].mxu1 %v4467_v31 }
  0xf0   : > { %1912 = vmatprep.mubr.bf16.mxu0 %v4476_v32  ;;  %2298 = vmatprep.mubr.bf16.mxu1 %v4476_v32 }
  0xf7   : > { %1913 = vmatmul.mubr.bf16.vlgmr.msra.gmra.mrb[0].mxu0 %v4474_v33  ;;  %2299 = vmatmul.mubr.bf16.vlgmr.msra.gmra.mrb[0].mxu1 %v4474_v33 }
  0xf8   : > { %1922 = vmatprep.mubr.bf16.mxu0 %v4477_v34  ;;  %2308 = vmatprep.mubr.bf16.mxu1 %v4477_v34 }
  0xff   : > { %1923 = vmatmul.mubr.bf16.gmra.mrb[4].mxu0 %v4479_v35  ;;  %2309 = vmatmul.mubr.bf16.gmra.mrb[4].mxu1 %v4479_v35 }
 0x100   : > { %1932 = vmatprep.mubr.bf16.mxu0 %v4480_v36  ;;  %2318 = vmatprep.mubr.bf16.mxu1 %v4480_v36 }
 0x107   : > { %1933 = vmatmul.mubr.bf16.gmra.mrb[8].mxu0 %v4482_v37  ;;  %2319 = vmatmul.mubr.bf16.gmra.mrb[8].mxu1 %v4482_v37 }
 0x108   : > { %1942 = vmatprep.mubr.bf16.mxu0 %v4483_v38  ;;  %2328 = vmatprep.mubr.bf16.mxu1 %v4483_v38 }
 0x10f   : > { %1943 = vmatmul.mubr.bf16.gmra.mrb[12].mxu0 %v4485_v39  ;;  %2329 = vmatmul.mubr.bf16.gmra.mrb[12].mxu1 %v4485_v39 }
 0x110   : > { %1952 = vmatprep.mubr.bf16.mxu0 %v4486_v40  ;;  %2338 = vmatprep.mubr.bf16.mxu1 %v4486_v40 }
 0x117   : > { %1953 = vmatmul.mubr.bf16.gmra.mrb[16].mxu0 %v4488_v41  ;;  %2339 = vmatmul.mubr.bf16.gmra.mrb[16].mxu1 %v4488_v41 }
 0x118   : > { %1962 = vmatprep.mubr.bf16.mxu0 %v4489_v42  ;;  %2348 = vmatprep.mubr.bf16.mxu1 %v4489_v42 }
 0x11f   : > { %1963 = vmatmul.mubr.bf16.gmra.mrb[20].mxu0 %v4491_v43  ;;  %2349 = vmatmul.mubr.bf16.gmra.mrb[20].mxu1 %v4491_v43 }
 0x120   : > { %1972 = vmatprep.mubr.bf16.mxu0 %v4492_v44  ;;  %2358 = vmatprep.mubr.bf16.mxu1 %v4492_v44 }
 0x127   : > { %1973 = vmatmul.mubr.bf16.gmra.mrb[24].mxu0 %v4494_v45  ;;  %2359 = vmatmul.mubr.bf16.gmra.mrb[24].mxu1 %v4494_v45 }
 0x128   : > { %1982 = vmatprep.mubr.bf16.mxu0 %v4495_v46  ;;  %2368 = vmatprep.mubr.bf16.mxu1 %v4495_v46 }
 0x12f   : > { %1983 = vmatmul.mubr.bf16.gmra.mrb[28].mxu0 %v4497_v47  ;;  %2369 = vmatmul.mubr.bf16.gmra.mrb[28].mxu1 %v4497_v47 }
 0x130   : > { %1992 = vmatprep.mubr.bf16.mxu0 %v4498_v48  ;;  %2378 = vmatprep.mubr.bf16.mxu1 %v4498_v48 }
 0x137   : > { %1993 = vmatmul.mubr.bf16.gmra.mrb[32].mxu0 %v4500_v49  ;;  %2379 = vmatmul.mubr.bf16.gmra.mrb[32].mxu1 %v4500_v49 }
 0x138   : > { %2002 = vmatprep.mubr.bf16.mxu0 %v4501_v50  ;;  %2388 = vmatprep.mubr.bf16.mxu1 %v4501_v50 }
 0x13f   : > { %2003 = vmatmul.mubr.bf16.gmra.mrb[36].mxu0 %v4503_v51  ;;  %2389 = vmatmul.mubr.bf16.gmra.mrb[36].mxu1 %v4503_v51 }
 0x140   : > { %2012 = vmatprep.mubr.bf16.mxu0 %v4504_v52  ;;  %2398 = vmatprep.mubr.bf16.mxu1 %v4504_v52 }
 0x147   : > { %2013 = vmatmul.mubr.bf16.gmra.mrb[40].mxu0 %v4506_v53  ;;  %2399 = vmatmul.mubr.bf16.gmra.mrb[40].mxu1 %v4506_v53 }
 0x148   : > { %2022 = vmatprep.mubr.bf16.mxu0 %v4507_v54  ;;  %2408 = vmatprep.mubr.bf16.mxu1 %v4507_v54 }
 0x14f   : > { %2023 = vmatmul.mubr.bf16.gmra.mrb[44].mxu0 %v4509_v55  ;;  %2409 = vmatmul.mubr.bf16.gmra.mrb[44].mxu1 %v4509_v55 }
 0x150   : > { %2032 = vmatprep.mubr.bf16.mxu0 %v4510_v56  ;;  %2418 = vmatprep.mubr.bf16.mxu1 %v4510_v56 }
 0x157   : > { %2033 = vmatmul.mubr.bf16.gmra.mrb[48].mxu0 %v4512_v57  ;;  %2419 = vmatmul.mubr.bf16.gmra.mrb[48].mxu1 %v4512_v57 }
 0x158   : > { %2042 = vmatprep.mubr.bf16.mxu0 %v4513_v58  ;;  %2428 = vmatprep.mubr.bf16.mxu1 %v4513_v58 }
 0x15f   : > { %2043 = vmatmul.mubr.bf16.gmra.mrb[52].mxu0 %v4515_v59  ;;  %2429 = vmatmul.mubr.bf16.gmra.mrb[52].mxu1 %v4515_v59 }
 0x160   : > { %2052 = vmatprep.mubr.bf16.mxu0 %v4516_v60  ;;  %2438 = vmatprep.mubr.bf16.mxu1 %v4516_v60 }
 0x167   : > { %2053 = vmatmul.mubr.bf16.gmra.mrb[56].mxu0 %v4518_v61  ;;  %2439 = vmatmul.mubr.bf16.gmra.mrb[56].mxu1 %v4518_v61 }
 0x168   : > { %2062 = vmatprep.mubr.bf16.mxu0 %v4519_v62  ;;  %2448 = vmatprep.mubr.bf16.mxu1 %v4519_v62 }
 0x16f   : > { %2063 = vmatmul.mubr.bf16.gmra.mrb[60].mxu0 %v4521_v63  ;;  %2449 = vmatmul.mubr.bf16.gmra.mrb[60].mxu1 %v4521_v63 }
 0x1ca   : > { %v1914_v11 = vpop.f32.mrb[0].mxu0  ;;  %v2300_v12 = vpop.f32.mrb[0].mxu1 }
 0x1cb   : > { %v2868_v13 = vadd.f32 %v5065_v7, %v1914_v11  ;;  %v2870_v14 = vadd.f32 %v5067_v8, %v2300_v12  ;;  %v1916_v15 = vpop.f32.mrb[1].mxu0  ;;  %v2302_v16 = vpop.f32.mrb[1].mxu1 }
 0x1cc   : > { %v2869_v17 = vadd.f32 %v5069_v9, %v1916_v15  ;;  %v2871_v18 = vadd.f32 %v5071_v10, %v2302_v16  ;;  %v1918_v19 = vpop.f32.mrb[2].mxu0  ;;  %v2304_v20 = vpop.f32.mrb[2].mxu1 }
 0x1cd   : > { %v2872_v21 = vadd.f32 %v5065_v7, %v1918_v19  ;;  %v2874_v22 = vadd.f32 %v5067_v8, %v2304_v20  ;;  %v1920_v23 = vpop.f32.mrb[3].mxu0  ;;  %v2306_v24 = vpop.f32.mrb[3].mxu1 }
 0x1ce   : > { %v3983_v25 = vpack.c.bf16 %v2869_v17, %v2868_v13  ;;  %v3984_v26 = vpack.c.bf16 %v2871_v18, %v2870_v14  ;;  %v2873_v27 = vadd.f32 %v5069_v9, %v1920_v23  ;;  %v2875_v28 = vadd.f32 %v5071_v10, %v2306_v24 }
 0x1d0   : > { %3380 = vst [vmem:[%s5082_s5] sm:$0xff] %v3983_v25  ;;  %3381 = vst [vmem:[%s5082_s5 + $0x8] sm:$0xff] %v3984_v26  ;;  %v3985_v29 = vpack.c.bf16 %v2873_v27, %v2872_v21  ;;  %v3986_v30 = vpack.c.bf16 %v2875_v28, %v2874_v22 }
 0x1d2   : > { %3382 = vst [vmem:[%s5082_s5 + $0x10] sm:$0xff] %v3985_v29  ;;  %3383 = vst [vmem:[%s5082_s5 + $0x18] sm:$0xff] %v3986_v30  ;;  %v1924_v31 = vpop.f32.mrb[4].mxu0  ;;  %v2310_v32 = vpop.f32.mrb[4].mxu1 }
 0x1d3   : > { %v2876_v33 = vadd.f32 %v5065_v7, %v1924_v31  ;;  %v2878_v34 = vadd.f32 %v5067_v8, %v2310_v32  ;;  %v1926_v35 = vpop.f32.mrb[5].mxu0  ;;  %v2312_v36 = vpop.f32.mrb[5].mxu1 }
 0x1d4   : > { %v2877_v37 = vadd.f32 %v5069_v9, %v1926_v35  ;;  %v2879_v38 = vadd.f32 %v5071_v10, %v2312_v36  ;;  %v1928_v39 = vpop.f32.mrb[6].mxu0  ;;  %v2314_v40 = vpop.f32.mrb[6].mxu1 }
 0x1d5   : > { %v2880_v41 = vadd.f32 %v5065_v7, %v1928_v39  ;;  %v2882_v42 = vadd.f32 %v5067_v8, %v2314_v40  ;;  %v1930_v43 = vpop.f32.mrb[7].mxu0  ;;  %v2316_v44 = vpop.f32.mrb[7].mxu1 }
 0x1d6   : > { %v3987_v45 = vpack.c.bf16 %v2877_v37, %v2876_v33  ;;  %v3988_v46 = vpack.c.bf16 %v2879_v38, %v2878_v34  ;;  %v2881_v47 = vadd.f32 %v5069_v9, %v1930_v43  ;;  %v2883_v48 = vadd.f32 %v5071_v10, %v2316_v44 }
 0x1d8   : > { %3384 = vst [vmem:[%s5082_s5 + $0x20] sm:$0xff] %v3987_v45  ;;  %3385 = vst [vmem:[%s5082_s5 + $0x28] sm:$0xff] %v3988_v46  ;;  %v3989_v49 = vpack.c.bf16 %v2881_v47, %v2880_v41  ;;  %v3990_v50 = vpack.c.bf16 %v2883_v48, %v2882_v42 }
 0x1da   : > { %3386 = vst [vmem:[%s5082_s5 + $0x30] sm:$0xff] %v3989_v49  ;;  %3387 = vst [vmem:[%s5082_s5 + $0x38] sm:$0xff] %v3990_v50  ;;  %v1934_v51 = vpop.f32.mrb[8].mxu0  ;;  %v2320_v52 = vpop.f32.mrb[8].mxu1 }
 0x1db   : > { %v2884_v53 = vadd.f32 %v5065_v7, %v1934_v51  ;;  %v2886_v54 = vadd.f32 %v5067_v8, %v2320_v52  ;;  %v1936_v55 = vpop.f32.mrb[9].mxu0  ;;  %v2322_v56 = vpop.f32.mrb[9].mxu1 }
 0x1dc   : > { %v2885_v57 = vadd.f32 %v5069_v9, %v1936_v55  ;;  %v2887_v58 = vadd.f32 %v5071_v10, %v2322_v56  ;;  %v1938_v59 = vpop.f32.mrb[10].mxu0  ;;  %v2324_v60 = vpop.f32.mrb[10].mxu1 }
 0x1dd   : > { %v2888_v61 = vadd.f32 %v5065_v7, %v1938_v59  ;;  %v2890_v62 = vadd.f32 %v5067_v8, %v2324_v60  ;;  %v1940_v63 = vpop.f32.mrb[11].mxu0  ;;  %v2326_v0 = vpop.f32.mrb[11].mxu1 }
 0x1de   : > { %v3991_v1 = vpack.c.bf16 %v2885_v57, %v2884_v53  ;;  %v3992_v2 = vpack.c.bf16 %v2887_v58, %v2886_v54  ;;  %v2889_v3 = vadd.f32 %v5069_v9, %v1940_v63  ;;  %v2891_v4 = vadd.f32 %v5071_v10, %v2326_v0 }
 0x1e0   : > { %3388 = vst [vmem:[%s5082_s5 + $0x40] sm:$0xff] %v3991_v1  ;;  %3389 = vst [vmem:[%s5082_s5 + $0x48] sm:$0xff] %v3992_v2  ;;  %v3993_v5 = vpack.c.bf16 %v2889_v3, %v2888_v61  ;;  %v3994_v6 = vpack.c.bf16 %v2891_v4, %v2890_v62 }
 0x1e2   : > { %3390 = vst [vmem:[%s5082_s5 + $0x50] sm:$0xff] %v3993_v5  ;;  %3391 = vst [vmem:[%s5082_s5 + $0x58] sm:$0xff] %v3994_v6  ;;  %v1944_v11 = vpop.f32.mrb[12].mxu0  ;;  %v2330_v12 = vpop.f32.mrb[12].mxu1 }
 0x1e3   : > { %v2892_v13 = vadd.f32 %v5065_v7, %v1944_v11  ;;  %v2894_v14 = vadd.f32 %v5067_v8, %v2330_v12  ;;  %v1946_v15 = vpop.f32.mrb[13].mxu0  ;;  %v2332_v16 = vpop.f32.mrb[13].mxu1 }
 0x1e4   : > { %v2893_v17 = vadd.f32 %v5069_v9, %v1946_v15  ;;  %v2895_v18 = vadd.f32 %v5071_v10, %v2332_v16  ;;  %v1948_v19 = vpop.f32.mrb[14].mxu0  ;;  %v2334_v20 = vpop.f32.mrb[14].mxu1 }
 0x1e5   : > { %v2896_v21 = vadd.f32 %v5065_v7, %v1948_v19  ;;  %v2898_v22 = vadd.f32 %v5067_v8, %v2334_v20  ;;  %v1950_v23 = vpop.f32.mrb[15].mxu0  ;;  %v2336_v24 = vpop.f32.mrb[15].mxu1 }
 0x1e6   : > { %v3995_v25 = vpack.c.bf16 %v2893_v17, %v2892_v13  ;;  %v3996_v26 = vpack.c.bf16 %v2895_v18, %v2894_v14  ;;  %v2897_v27 = vadd.f32 %v5069_v9, %v1950_v23  ;;  %v2899_v28 = vadd.f32 %v5071_v10, %v2336_v24 }
 0x1e8   : > { %3392 = vst [vmem:[%s5082_s5 + $0x60] sm:$0xff] %v3995_v25  ;;  %3393 = vst [vmem:[%s5082_s5 + $0x68] sm:$0xff] %v3996_v26  ;;  %v3997_v29 = vpack.c.bf16 %v2897_v27, %v2896_v21  ;;  %v3998_v30 = vpack.c.bf16 %v2899_v28, %v2898_v22 }
 0x1ea   : > { %3394 = vst [vmem:[%s5082_s5 + $0x70] sm:$0xff] %v3997_v29  ;;  %3395 = vst [vmem:[%s5082_s5 + $0x78] sm:$0xff] %v3998_v30  ;;  %v1954_v31 = vpop.f32.mrb[16].mxu0  ;;  %v2340_v32 = vpop.f32.mrb[16].mxu1 }
 0x1eb   : > { %v2900_v33 = vadd.f32 %v5065_v7, %v1954_v31  ;;  %v2902_v34 = vadd.f32 %v5067_v8, %v2340_v32  ;;  %v1956_v35 = vpop.f32.mrb[17].mxu0  ;;  %v2342_v36 = vpop.f32.mrb[17].mxu1 }
 0x1ec   : > { %v2901_v37 = vadd.f32 %v5069_v9, %v1956_v35  ;;  %v2903_v38 = vadd.f32 %v5071_v10, %v2342_v36  ;;  %v1958_v39 = vpop.f32.mrb[18].mxu0  ;;  %v2344_v40 = vpop.f32.mrb[18].mxu1 }
 0x1ed   : > { %v2904_v41 = vadd.f32 %v5065_v7, %v1958_v39  ;;  %v2906_v42 = vadd.f32 %v5067_v8, %v2344_v40  ;;  %v1960_v43 = vpop.f32.mrb[19].mxu0  ;;  %v2346_v44 = vpop.f32.mrb[19].mxu1 }
 0x1ee   : > { %v3999_v45 = vpack.c.bf16 %v2901_v37, %v2900_v33  ;;  %v4000_v46 = vpack.c.bf16 %v2903_v38, %v2902_v34  ;;  %v2905_v47 = vadd.f32 %v5069_v9, %v1960_v43  ;;  %v2907_v48 = vadd.f32 %v5071_v10, %v2346_v44 }
 0x1f0   : > { %3396 = vst [vmem:[%s5082_s5 + $0x80] sm:$0xff] %v3999_v45  ;;  %3397 = vst [vmem:[%s5082_s5 + $0x88] sm:$0xff] %v4000_v46  ;;  %v4001_v49 = vpack.c.bf16 %v2905_v47, %v2904_v41  ;;  %v4002_v50 = vpack.c.bf16 %v2907_v48, %v2906_v42 }
 0x1f2   : > { %3398 = vst [vmem:[%s5082_s5 + $0x90] sm:$0xff] %v4001_v49  ;;  %3399 = vst [vmem:[%s5082_s5 + $0x98] sm:$0xff] %v4002_v50  ;;  %v1964_v51 = vpop.f32.mrb[20].mxu0  ;;  %v2350_v52 = vpop.f32.mrb[20].mxu1 }
 0x1f3   : > { %v2908_v53 = vadd.f32 %v5065_v7, %v1964_v51  ;;  %v2910_v54 = vadd.f32 %v5067_v8, %v2350_v52  ;;  %v1966_v55 = vpop.f32.mrb[21].mxu0  ;;  %v2352_v56 = vpop.f32.mrb[21].mxu1 }
 0x1f4   : > { %v2909_v57 = vadd.f32 %v5069_v9, %v1966_v55  ;;  %v2911_v58 = vadd.f32 %v5071_v10, %v2352_v56  ;;  %v1968_v59 = vpop.f32.mrb[22].mxu0  ;;  %v2354_v60 = vpop.f32.mrb[22].mxu1 }
 0x1f5   : > { %v2912_v61 = vadd.f32 %v5065_v7, %v1968_v59  ;;  %v2914_v62 = vadd.f32 %v5067_v8, %v2354_v60  ;;  %v1970_v63 = vpop.f32.mrb[23].mxu0  ;;  %v2356_v0 = vpop.f32.mrb[23].mxu1 }
 0x1f6   : > { %v4003_v1 = vpack.c.bf16 %v2909_v57, %v2908_v53  ;;  %v4004_v2 = vpack.c.bf16 %v2911_v58, %v2910_v54  ;;  %v2913_v3 = vadd.f32 %v5069_v9, %v1970_v63  ;;  %v2915_v4 = vadd.f32 %v5071_v10, %v2356_v0 }
 0x1f8   : > { %3400 = vst [vmem:[%s5082_s5 + $0xa0] sm:$0xff] %v4003_v1  ;;  %3401 = vst [vmem:[%s5082_s5 + $0xa8] sm:$0xff] %v4004_v2  ;;  %v4005_v5 = vpack.c.bf16 %v2913_v3, %v2912_v61  ;;  %v4006_v6 = vpack.c.bf16 %v2915_v4, %v2914_v62 }
 0x1fa   : > { %3402 = vst [vmem:[%s5082_s5 + $0xb0] sm:$0xff] %v4005_v5  ;;  %3403 = vst [vmem:[%s5082_s5 + $0xb8] sm:$0xff] %v4006_v6  ;;  %v1974_v11 = vpop.f32.mrb[24].mxu0  ;;  %v2360_v12 = vpop.f32.mrb[24].mxu1 }
 0x1fb   : > { %v2916_v13 = vadd.f32 %v5065_v7, %v1974_v11  ;;  %v2918_v14 = vadd.f32 %v5067_v8, %v2360_v12  ;;  %v1976_v15 = vpop.f32.mrb[25].mxu0  ;;  %v2362_v16 = vpop.f32.mrb[25].mxu1 }
 0x1fc   : > { %v2917_v17 = vadd.f32 %v5069_v9, %v1976_v15  ;;  %v2919_v18 = vadd.f32 %v5071_v10, %v2362_v16  ;;  %v1978_v19 = vpop.f32.mrb[26].mxu0  ;;  %v2364_v20 = vpop.f32.mrb[26].mxu1 }
 0x1fd   : > { %v2920_v21 = vadd.f32 %v5065_v7, %v1978_v19  ;;  %v2922_v22 = vadd.f32 %v5067_v8, %v2364_v20  ;;  %v1980_v23 = vpop.f32.mrb[27].mxu0  ;;  %v2366_v24 = vpop.f32.mrb[27].mxu1 }
 0x1fe   : > { %v4007_v25 = vpack.c.bf16 %v2917_v17, %v2916_v13  ;;  %v4008_v26 = vpack.c.bf16 %v2919_v18, %v2918_v14  ;;  %v2921_v27 = vadd.f32 %v5069_v9, %v1980_v23  ;;  %v2923_v28 = vadd.f32 %v5071_v10, %v2366_v24 }
 0x200   : > { %3404 = vst [vmem:[%s5082_s5 + $0xc0] sm:$0xff] %v4007_v25  ;;  %3405 = vst [vmem:[%s5082_s5 + $0xc8] sm:$0xff] %v4008_v26  ;;  %v4009_v29 = vpack.c.bf16 %v2921_v27, %v2920_v21  ;;  %v4010_v30 = vpack.c.bf16 %v2923_v28, %v2922_v22 }
 0x202   : > { %3406 = vst [vmem:[%s5082_s5 + $0xd0] sm:$0xff] %v4009_v29  ;;  %3407 = vst [vmem:[%s5082_s5 + $0xd8] sm:$0xff] %v4010_v30  ;;  %v1984_v31 = vpop.f32.mrb[28].mxu0  ;;  %v2370_v32 = vpop.f32.mrb[28].mxu1 }
 0x203   : > { %v2924_v33 = vadd.f32 %v5065_v7, %v1984_v31  ;;  %v2926_v34 = vadd.f32 %v5067_v8, %v2370_v32  ;;  %v1986_v35 = vpop.f32.mrb[29].mxu0  ;;  %v2372_v36 = vpop.f32.mrb[29].mxu1 }
 0x204   : > { %v2925_v37 = vadd.f32 %v5069_v9, %v1986_v35  ;;  %v2927_v38 = vadd.f32 %v5071_v10, %v2372_v36  ;;  %v1988_v39 = vpop.f32.mrb[30].mxu0  ;;  %v2374_v40 = vpop.f32.mrb[30].mxu1 }
 0x205   : > { %v2928_v41 = vadd.f32 %v5065_v7, %v1988_v39  ;;  %v2930_v42 = vadd.f32 %v5067_v8, %v2374_v40  ;;  %v1990_v43 = vpop.f32.mrb[31].mxu0  ;;  %v2376_v44 = vpop.f32.mrb[31].mxu1 }
 0x206   : > { %v4011_v45 = vpack.c.bf16 %v2925_v37, %v2924_v33  ;;  %v4012_v46 = vpack.c.bf16 %v2927_v38, %v2926_v34  ;;  %v2929_v47 = vadd.f32 %v5069_v9, %v1990_v43  ;;  %v2931_v48 = vadd.f32 %v5071_v10, %v2376_v44 }
 0x208   : > { %3408 = vst [vmem:[%s5082_s5 + $0xe0] sm:$0xff] %v4011_v45  ;;  %3409 = vst [vmem:[%s5082_s5 + $0xe8] sm:$0xff] %v4012_v46  ;;  %v4013_v49 = vpack.c.bf16 %v2929_v47, %v2928_v41  ;;  %v4014_v50 = vpack.c.bf16 %v2931_v48, %v2930_v42 }
 0x20a   : > { %3410 = vst [vmem:[%s5082_s5 + $0xf0] sm:$0xff] %v4013_v49  ;;  %3411 = vst [vmem:[%s5082_s5 + $0xf8] sm:$0xff] %v4014_v50  ;;  %v1994_v51 = vpop.f32.mrb[32].mxu0  ;;  %v2380_v52 = vpop.f32.mrb[32].mxu1 }
 0x20b   : > { %v2932_v53 = vadd.f32 %v5065_v7, %v1994_v51  ;;  %v2934_v54 = vadd.f32 %v5067_v8, %v2380_v52  ;;  %v1996_v55 = vpop.f32.mrb[33].mxu0  ;;  %v2382_v56 = vpop.f32.mrb[33].mxu1 }
 0x20c   : > { %v2933_v57 = vadd.f32 %v5069_v9, %v1996_v55  ;;  %v2935_v58 = vadd.f32 %v5071_v10, %v2382_v56  ;;  %v1998_v59 = vpop.f32.mrb[34].mxu0  ;;  %v2384_v60 = vpop.f32.mrb[34].mxu1 }
 0x20d   : > { %v2936_v61 = vadd.f32 %v5065_v7, %v1998_v59  ;;  %v2938_v62 = vadd.f32 %v5067_v8, %v2384_v60  ;;  %v2000_v63 = vpop.f32.mrb[35].mxu0  ;;  %v2386_v0 = vpop.f32.mrb[35].mxu1 }
 0x20e   : > { %v4015_v1 = vpack.c.bf16 %v2933_v57, %v2932_v53  ;;  %v4016_v2 = vpack.c.bf16 %v2935_v58, %v2934_v54  ;;  %v2937_v3 = vadd.f32 %v5069_v9, %v2000_v63  ;;  %v2939_v4 = vadd.f32 %v5071_v10, %v2386_v0 }
 0x210   : > { %3412 = vst [vmem:[%s5082_s5 + $0x100] sm:$0xff] %v4015_v1  ;;  %3413 = vst [vmem:[%s5082_s5 + $0x108] sm:$0xff] %v4016_v2  ;;  %v4017_v5 = vpack.c.bf16 %v2937_v3, %v2936_v61  ;;  %v4018_v6 = vpack.c.bf16 %v2939_v4, %v2938_v62 }
 0x212   : > { %3414 = vst [vmem:[%s5082_s5 + $0x110] sm:$0xff] %v4017_v5  ;;  %3415 = vst [vmem:[%s5082_s5 + $0x118] sm:$0xff] %v4018_v6  ;;  %v2004_v11 = vpop.f32.mrb[36].mxu0  ;;  %v2390_v12 = vpop.f32.mrb[36].mxu1 }
 0x213   : > { %v2940_v13 = vadd.f32 %v5065_v7, %v2004_v11  ;;  %v2942_v14 = vadd.f32 %v5067_v8, %v2390_v12  ;;  %v2006_v15 = vpop.f32.mrb[37].mxu0  ;;  %v2392_v16 = vpop.f32.mrb[37].mxu1 }
 0x214   : > { %v2941_v17 = vadd.f32 %v5069_v9, %v2006_v15  ;;  %v2943_v18 = vadd.f32 %v5071_v10, %v2392_v16  ;;  %v2008_v19 = vpop.f32.mrb[38].mxu0  ;;  %v2394_v20 = vpop.f32.mrb[38].mxu1 }
 0x215   : > { %v2944_v21 = vadd.f32 %v5065_v7, %v2008_v19  ;;  %v2946_v22 = vadd.f32 %v5067_v8, %v2394_v20  ;;  %v2010_v23 = vpop.f32.mrb[39].mxu0  ;;  %v2396_v24 = vpop.f32.mrb[39].mxu1 }
 0x216   : > { %v4019_v25 = vpack.c.bf16 %v2941_v17, %v2940_v13  ;;  %v4020_v26 = vpack.c.bf16 %v2943_v18, %v2942_v14  ;;  %v2945_v27 = vadd.f32 %v5069_v9, %v2010_v23  ;;  %v2947_v28 = vadd.f32 %v5071_v10, %v2396_v24 }
 0x218   : > { %3416 = vst [vmem:[%s5082_s5 + $0x120] sm:$0xff] %v4019_v25  ;;  %3417 = vst [vmem:[%s5082_s5 + $0x128] sm:$0xff] %v4020_v26  ;;  %v4021_v29 = vpack.c.bf16 %v2945_v27, %v2944_v21  ;;  %v4022_v30 = vpack.c.bf16 %v2947_v28, %v2946_v22 }
 0x21a   : > { %3418 = vst [vmem:[%s5082_s5 + $0x130] sm:$0xff] %v4021_v29  ;;  %3419 = vst [vmem:[%s5082_s5 + $0x138] sm:$0xff] %v4022_v30  ;;  %v2014_v31 = vpop.f32.mrb[40].mxu0  ;;  %v2400_v32 = vpop.f32.mrb[40].mxu1 }
 0x21b   : > { %v2948_v33 = vadd.f32 %v5065_v7, %v2014_v31  ;;  %v2950_v34 = vadd.f32 %v5067_v8, %v2400_v32  ;;  %v2016_v35 = vpop.f32.mrb[41].mxu0  ;;  %v2402_v36 = vpop.f32.mrb[41].mxu1 }
 0x21c   : > { %v2949_v37 = vadd.f32 %v5069_v9, %v2016_v35  ;;  %v2951_v38 = vadd.f32 %v5071_v10, %v2402_v36  ;;  %v2018_v39 = vpop.f32.mrb[42].mxu0  ;;  %v2404_v40 = vpop.f32.mrb[42].mxu1 }
 0x21d   : > { %v2952_v41 = vadd.f32 %v5065_v7, %v2018_v39  ;;  %v2954_v42 = vadd.f32 %v5067_v8, %v2404_v40  ;;  %v2020_v43 = vpop.f32.mrb[43].mxu0  ;;  %v2406_v44 = vpop.f32.mrb[43].mxu1 }
 0x21e   : > { %v4023_v45 = vpack.c.bf16 %v2949_v37, %v2948_v33  ;;  %v4024_v46 = vpack.c.bf16 %v2951_v38, %v2950_v34  ;;  %v2953_v47 = vadd.f32 %v5069_v9, %v2020_v43  ;;  %v2955_v48 = vadd.f32 %v5071_v10, %v2406_v44 }
 0x220   : > { %3420 = vst [vmem:[%s5082_s5 + $0x140] sm:$0xff] %v4023_v45  ;;  %3421 = vst [vmem:[%s5082_s5 + $0x148] sm:$0xff] %v4024_v46  ;;  %v4025_v49 = vpack.c.bf16 %v2953_v47, %v2952_v41  ;;  %v4026_v50 = vpack.c.bf16 %v2955_v48, %v2954_v42 }
 0x222   : > { %3422 = vst [vmem:[%s5082_s5 + $0x150] sm:$0xff] %v4025_v49  ;;  %3423 = vst [vmem:[%s5082_s5 + $0x158] sm:$0xff] %v4026_v50  ;;  %v2024_v51 = vpop.f32.mrb[44].mxu0  ;;  %v2410_v52 = vpop.f32.mrb[44].mxu1 }
 0x223   : > { %v2956_v53 = vadd.f32 %v5065_v7, %v2024_v51  ;;  %v2958_v54 = vadd.f32 %v5067_v8, %v2410_v52  ;;  %v2026_v55 = vpop.f32.mrb[45].mxu0  ;;  %v2412_v56 = vpop.f32.mrb[45].mxu1 }
 0x224   : > { %v2957_v57 = vadd.f32 %v5069_v9, %v2026_v55  ;;  %v2959_v58 = vadd.f32 %v5071_v10, %v2412_v56  ;;  %v2028_v59 = vpop.f32.mrb[46].mxu0  ;;  %v2414_v60 = vpop.f32.mrb[46].mxu1 }
 0x225   : > { %v2960_v61 = vadd.f32 %v5065_v7, %v2028_v59  ;;  %v2962_v62 = vadd.f32 %v5067_v8, %v2414_v60  ;;  %v2030_v63 = vpop.f32.mrb[47].mxu0  ;;  %v2416_v0 = vpop.f32.mrb[47].mxu1 }
 0x226   : > { %v4027_v1 = vpack.c.bf16 %v2957_v57, %v2956_v53  ;;  %v4028_v2 = vpack.c.bf16 %v2959_v58, %v2958_v54  ;;  %v2961_v3 = vadd.f32 %v5069_v9, %v2030_v63  ;;  %v2963_v4 = vadd.f32 %v5071_v10, %v2416_v0 }
 0x228   : > { %3424 = vst [vmem:[%s5082_s5 + $0x160] sm:$0xff] %v4027_v1  ;;  %3425 = vst [vmem:[%s5082_s5 + $0x168] sm:$0xff] %v4028_v2  ;;  %v4029_v5 = vpack.c.bf16 %v2961_v3, %v2960_v61  ;;  %v4030_v6 = vpack.c.bf16 %v2963_v4, %v2962_v62 }
 0x22a   : > { %3426 = vst [vmem:[%s5082_s5 + $0x170] sm:$0xff] %v4029_v5  ;;  %3427 = vst [vmem:[%s5082_s5 + $0x178] sm:$0xff] %v4030_v6  ;;  %v2034_v11 = vpop.f32.mrb[48].mxu0  ;;  %v2420_v12 = vpop.f32.mrb[48].mxu1 }
 0x22b   : > { %v2964_v13 = vadd.f32 %v5065_v7, %v2034_v11  ;;  %v2966_v14 = vadd.f32 %v5067_v8, %v2420_v12  ;;  %v2036_v15 = vpop.f32.mrb[49].mxu0  ;;  %v2422_v16 = vpop.f32.mrb[49].mxu1 }
 0x22c   : > { %v2965_v17 = vadd.f32 %v5069_v9, %v2036_v15  ;;  %v2967_v18 = vadd.f32 %v5071_v10, %v2422_v16  ;;  %v2038_v19 = vpop.f32.mrb[50].mxu0  ;;  %v2424_v20 = vpop.f32.mrb[50].mxu1 }
 0x22d   : > { %v2968_v21 = vadd.f32 %v5065_v7, %v2038_v19  ;;  %v2970_v22 = vadd.f32 %v5067_v8, %v2424_v20  ;;  %v2040_v23 = vpop.f32.mrb[51].mxu0  ;;  %v2426_v24 = vpop.f32.mrb[51].mxu1 }
 0x22e   : > { %v4031_v25 = vpack.c.bf16 %v2965_v17, %v2964_v13  ;;  %v4032_v26 = vpack.c.bf16 %v2967_v18, %v2966_v14  ;;  %v2969_v27 = vadd.f32 %v5069_v9, %v2040_v23  ;;  %v2971_v28 = vadd.f32 %v5071_v10, %v2426_v24 }
 0x230   : > { %3428 = vst [vmem:[%s5082_s5 + $0x180] sm:$0xff] %v4031_v25  ;;  %3429 = vst [vmem:[%s5082_s5 + $0x188] sm:$0xff] %v4032_v26  ;;  %v4033_v29 = vpack.c.bf16 %v2969_v27, %v2968_v21  ;;  %v4034_v30 = vpack.c.bf16 %v2971_v28, %v2970_v22 }
 0x232   : > { %3430 = vst [vmem:[%s5082_s5 + $0x190] sm:$0xff] %v4033_v29  ;;  %3431 = vst [vmem:[%s5082_s5 + $0x198] sm:$0xff] %v4034_v30  ;;  %v2044_v31 = vpop.f32.mrb[52].mxu0  ;;  %v2430_v32 = vpop.f32.mrb[52].mxu1 }
 0x233   : > { %v2972_v33 = vadd.f32 %v5065_v7, %v2044_v31  ;;  %v2974_v34 = vadd.f32 %v5067_v8, %v2430_v32  ;;  %v2046_v35 = vpop.f32.mrb[53].mxu0  ;;  %v2432_v36 = vpop.f32.mrb[53].mxu1  ;;  %v3477_v31 = vld [vmem:[%s5082_s5 + $0x20] sm:$0xff] (%p5431_p9)  ;;  %v3479_v32 = vld [vmem:[%s5082_s5 + $0x28] sm:$0xff] (%p5431_p9) }
 0x234   : > { %v2973_v37 = vadd.f32 %v5069_v9, %v2046_v35  ;;  %v2975_v38 = vadd.f32 %v5071_v10, %v2432_v36  ;;  %v2048_v39 = vpop.f32.mrb[54].mxu0  ;;  %v2434_v40 = vpop.f32.mrb[54].mxu1  ;;  %3478 = vst [vmem:[%s5277_s27 + $0x40] sm:$0xff] (%p5431_p9), %v3477_v31  ;;  %3480 = vst [vmem:[%s5277_s27 + $0x48] sm:$0xff] (%p5431_p9), %v3479_v32  ;;  %v3485_v35 = vld [vmem:[%s5082_s5 + $0x40] sm:$0xff] (%p5431_p9)  ;;  %v3487_v36 = vld [vmem:[%s5082_s5 + $0x48] sm:$0xff] (%p5431_p9) }
 0x235   : > { %v2976_v41 = vadd.f32 %v5065_v7, %v2048_v39  ;;  %v2978_v42 = vadd.f32 %v5067_v8, %v2434_v40  ;;  %v2050_v43 = vpop.f32.mrb[55].mxu0  ;;  %v2436_v44 = vpop.f32.mrb[55].mxu1  ;;  %3486 = vst [vmem:[%s5277_s27 + $0x80] sm:$0xff] (%p5431_p9), %v3485_v35  ;;  %3488 = vst [vmem:[%s5277_s27 + $0x88] sm:$0xff] (%p5431_p9), %v3487_v36  ;;  %v3493_v39 = vld [vmem:[%s5082_s5 + $0x60] sm:$0xff] (%p5431_p9)  ;;  %v3495_v40 = vld [vmem:[%s5082_s5 + $0x68] sm:$0xff] (%p5431_p9) }
 0x236   : > { %v4035_v45 = vpack.c.bf16 %v2973_v37, %v2972_v33  ;;  %v4036_v46 = vpack.c.bf16 %v2975_v38, %v2974_v34  ;;  %v2977_v47 = vadd.f32 %v5069_v9, %v2050_v43  ;;  %v2979_v48 = vadd.f32 %v5071_v10, %v2436_v44  ;;  %v3481_v33 = vld [vmem:[%s5082_s5 + $0x30] sm:$0xff] (%p5431_p9)  ;;  %v3483_v34 = vld [vmem:[%s5082_s5 + $0x38] sm:$0xff] (%p5431_p9)  ;;  %3494 = vst [vmem:[%s5277_s27 + $0xc0] sm:$0xff] (%p5431_p9), %v3493_v39  ;;  %v3501_v43 = vld [vmem:[%s5082_s5 + $0x80] sm:$0xff] (%p5431_p9) }
 0x237   : > { %3482 = vst [vmem:[%s5277_s27 + $0x60] sm:$0xff] (%p5431_p9), %v3481_v33  ;;  %3484 = vst [vmem:[%s5277_s27 + $0x68] sm:$0xff] (%p5431_p9), %v3483_v34  ;;  %v3489_v37 = vld [vmem:[%s5082_s5 + $0x50] sm:$0xff] (%p5431_p9)  ;;  %v3491_v38 = vld [vmem:[%s5082_s5 + $0x58] sm:$0xff] (%p5431_p9) }
 0x238   : > { %3432 = vst [vmem:[%s5082_s5 + $0x1a0] sm:$0xff] %v4035_v45  ;;  %3433 = vst [vmem:[%s5082_s5 + $0x1a8] sm:$0xff] %v4036_v46  ;;  %v4037_v49 = vpack.c.bf16 %v2977_v47, %v2976_v41  ;;  %v4038_v50 = vpack.c.bf16 %v2979_v48, %v2978_v42  ;;  %v3497_v41 = vld [vmem:[%s5082_s5 + $0x70] sm:$0xff] (%p5431_p9)  ;;  %v3499_v42 = vld [vmem:[%s5082_s5 + $0x78] sm:$0xff] (%p5431_p9) }
 0x239   : > { %3490 = vst [vmem:[%s5277_s27 + $0xa0] sm:$0xff] (%p5431_p9), %v3489_v37  ;;  %3492 = vst [vmem:[%s5277_s27 + $0xa8] sm:$0xff] (%p5431_p9), %v3491_v38  ;;  %v3503_v44 = vld [vmem:[%s5082_s5 + $0x88] sm:$0xff] (%p5431_p9)  ;;  %v3505_v45 = vld [vmem:[%s5082_s5 + $0x90] sm:$0xff] (%p5431_p9) }
 0x23a   : > { %3434 = vst [vmem:[%s5082_s5 + $0x1b0] sm:$0xff] %v4037_v49  ;;  %3435 = vst [vmem:[%s5082_s5 + $0x1b8] sm:$0xff] %v4038_v50  ;;  %v2054_v51 = vpop.f32.mrb[56].mxu0  ;;  %v2440_v52 = vpop.f32.mrb[56].mxu1  ;;  %v3507_v46 = vld [vmem:[%s5082_s5 + $0x98] sm:$0xff] (%p5431_p9)  ;;  %v3509_v47 = vld [vmem:[%s5082_s5 + $0xa0] sm:$0xff] (%p5431_p9) }
 0x23b   : > { %v2980_v53 = vadd.f32 %v5065_v7, %v2054_v51  ;;  %v2982_v54 = vadd.f32 %v5067_v8, %v2440_v52  ;;  %v2056_v55 = vpop.f32.mrb[57].mxu0  ;;  %v2442_v56 = vpop.f32.mrb[57].mxu1  ;;  %3496 = vst [vmem:[%s5277_s27 + $0xc8] sm:$0xff] (%p5431_p9), %v3495_v40  ;;  %3498 = vst [vmem:[%s5277_s27 + $0xe0] sm:$0xff] (%p5431_p9), %v3497_v41  ;;  %v3511_v48 = vld [vmem:[%s5082_s5 + $0xa8] sm:$0xff] (%p5431_p9)  ;;  %v3513_v49 = vld [vmem:[%s5082_s5 + $0xb0] sm:$0xff] (%p5431_p9) }
 0x23c   : > { %v2981_v57 = vadd.f32 %v5069_v9, %v2056_v55  ;;  %v2983_v58 = vadd.f32 %v5071_v10, %v2442_v56  ;;  %v2058_v59 = vpop.f32.mrb[58].mxu0  ;;  %v2444_v60 = vpop.f32.mrb[58].mxu1  ;;  %3500 = vst [vmem:[%s5277_s27 + $0xe8] sm:$0xff] (%p5431_p9), %v3499_v42  ;;  %3502 = vst [vmem:[%s5277_s27 + $0x100] sm:$0xff] (%p5431_p9), %v3501_v43  ;;  %v3515_v50 = vld [vmem:[%s5082_s5 + $0xb8] sm:$0xff] (%p5431_p9)  ;;  %v3517_v51 = vld [vmem:[%s5082_s5 + $0xc0] sm:$0xff] (%p5431_p9) }
 0x23d   : > { %v2984_v61 = vadd.f32 %v5065_v7, %v2058_v59  ;;  %v2986_v62 = vadd.f32 %v5067_v8, %v2444_v60  ;;  %v2060_v63 = vpop.f32.mrb[59].mxu0  ;;  %v2446_v0 = vpop.f32.mrb[59].mxu1  ;;  %3504 = vst [vmem:[%s5277_s27 + $0x108] sm:$0xff] (%p5431_p9), %v3503_v44  ;;  %3506 = vst [vmem:[%s5277_s27 + $0x120] sm:$0xff] (%p5431_p9), %v3505_v45  ;;  %v3519_v52 = vld [vmem:[%s5082_s5 + $0xc8] sm:$0xff] (%p5431_p9)  ;;  %v3525_v55 = vld [vmem:[%s5082_s5 + $0xe0] sm:$0xff] (%p5431_p9) }
 0x23e   : > { %v4039_v1 = vpack.c.bf16 %v2981_v57, %v2980_v53  ;;  %v4040_v2 = vpack.c.bf16 %v2983_v58, %v2982_v54  ;;  %v2985_v3 = vadd.f32 %v5069_v9, %v2060_v63  ;;  %v2987_v4 = vadd.f32 %v5071_v10, %v2446_v0  ;;  %3508 = vst [vmem:[%s5277_s27 + $0x128] sm:$0xff] (%p5431_p9), %v3507_v46  ;;  %v3521_v53 = vld [vmem:[%s5082_s5 + $0xd0] sm:$0xff] (%p5431_p9)  ;;  %v3523_v54 = vld [vmem:[%s5082_s5 + $0xd8] sm:$0xff] (%p5431_p9)  ;;  %v3527_v56 = vld [vmem:[%s5082_s5 + $0xe8] sm:$0xff] (%p5431_p9) }
 0x23f   : > { %3510 = vst [vmem:[%s5277_s27 + $0x140] sm:$0xff] (%p5431_p9), %v3509_v47  ;;  %3512 = vst [vmem:[%s5277_s27 + $0x148] sm:$0xff] (%p5431_p9), %v3511_v48  ;;  %v3529_v57 = vld [vmem:[%s5082_s5 + $0xf0] sm:$0xff] (%p5431_p9)  ;;  %v3531_v58 = vld [vmem:[%s5082_s5 + $0xf8] sm:$0xff] (%p5431_p9) }
 0x240   : > { %3436 = vst [vmem:[%s5082_s5 + $0x1c0] sm:$0xff] %v4039_v1  ;;  %3437 = vst [vmem:[%s5082_s5 + $0x1c8] sm:$0xff] %v4040_v2  ;;  %v4041_v5 = vpack.c.bf16 %v2985_v3, %v2984_v61  ;;  %v4042_v6 = vpack.c.bf16 %v2987_v4, %v2986_v62  ;;  %v3533_v59 = vld [vmem:[%s5082_s5 + $0x100] sm:$0xff] (%p5431_p9)  ;;  %v3535_v60 = vld [vmem:[%s5082_s5 + $0x108] sm:$0xff] (%p5431_p9) }
 0x241   : > { %3514 = vst [vmem:[%s5277_s27 + $0x160] sm:$0xff] (%p5431_p9), %v3513_v49  ;;  %3516 = vst [vmem:[%s5277_s27 + $0x168] sm:$0xff] (%p5431_p9), %v3515_v50  ;;  %v3537_v61 = vld [vmem:[%s5082_s5 + $0x110] sm:$0xff] (%p5431_p9)  ;;  %v3539_v62 = vld [vmem:[%s5082_s5 + $0x118] sm:$0xff] (%p5431_p9) }
 0x242   : > { %3438 = vst [vmem:[%s5082_s5 + $0x1d0] sm:$0xff] %v4041_v5  ;;  %3439 = vst [vmem:[%s5082_s5 + $0x1d8] sm:$0xff] %v4042_v6  ;;  %v2064_v11 = vpop.f32.mrb[60].mxu0  ;;  %v2450_v12 = vpop.f32.mrb[60].mxu1  ;;  %v3541_v63 = vld [vmem:[%s5082_s5 + $0x120] sm:$0xff] (%p5431_p9)  ;;  %v3543_v0 = vld [vmem:[%s5082_s5 + $0x128] sm:$0xff] (%p5431_p9) }
 0x243   : > { %v2988_v13 = vadd.f32 %v5065_v7, %v2064_v11  ;;  %v2990_v14 = vadd.f32 %v5067_v8, %v2450_v12  ;;  %v2066_v15 = vpop.f32.mrb[61].mxu0  ;;  %v2452_v16 = vpop.f32.mrb[61].mxu1  ;;  %3518 = vst [vmem:[%s5277_s27 + $0x180] sm:$0xff] (%p5431_p9), %v3517_v51  ;;  %3520 = vst [vmem:[%s5277_s27 + $0x188] sm:$0xff] (%p5431_p9), %v3519_v52  ;;  %v3545_v1 = vld [vmem:[%s5082_s5 + $0x130] sm:$0xff] (%p5431_p9)  ;;  %v3547_v2 = vld [vmem:[%s5082_s5 + $0x138] sm:$0xff] (%p5431_p9) }
 0x244   : > { %v2989_v17 = vadd.f32 %v5069_v9, %v2066_v15  ;;  %v2991_v18 = vadd.f32 %v5071_v10, %v2452_v16  ;;  %v2068_v19 = vpop.f32.mrb[62].mxu0  ;;  %v2454_v20 = vpop.f32.mrb[62].mxu1  ;;  %3450 = sbr.rel (!%p5431_p9) target bundleno = 604 (0x25c), region = 48  ;;  %3522 = vst [vmem:[%s5277_s27 + $0x1a0] sm:$0xff] (%p5431_p9), %v3521_v53  ;;  %3524 = vst [vmem:[%s5277_s27 + $0x1a8] sm:$0xff] (%p5431_p9), %v3523_v54  ;;  %v3549_v3 = vld [vmem:[%s5082_s5 + $0x140] sm:$0xff] (%p5431_p9) }
 0x245   : > { %v2992_v21 = vadd.f32 %v5065_v7, %v2068_v19  ;;  %v2994_v22 = vadd.f32 %v5067_v8, %v2454_v20  ;;  %v2070_v23 = vpop.f32.mrb[63].mxu0  ;;  %v2456_v24 = vpop.f32.mrb[63].mxu1  ;;  %v3469_v7 = vld [vmem:[%s5082_s5] sm:$0xff] (%p5431_p9)  ;;  %v3471_v8 = vld [vmem:[%s5082_s5 + $0x8] sm:$0xff] (%p5431_p9)  ;;  %3526 = vst [vmem:[%s5277_s27 + $0x1c0] sm:$0xff] (%p5431_p9), %v3525_v55  ;;  %3528 = vst [vmem:[%s5277_s27 + $0x1c8] sm:$0xff] (%p5431_p9), %v3527_v56 }
 0x246   : > { %v4043_v25 = vpack.c.bf16 %v2989_v17, %v2988_v13  ;;  %v4044_v26 = vpack.c.bf16 %v2991_v18, %v2990_v14  ;;  %v2993_v27 = vadd.f32 %v5069_v9, %v2070_v23  ;;  %v2995_v28 = vadd.f32 %v5071_v10, %v2456_v24  ;;  %v3473_v9 = vld [vmem:[%s5082_s5 + $0x10] sm:$0xff] (%p5431_p9)  ;;  %v3475_v10 = vld [vmem:[%s5082_s5 + $0x18] sm:$0xff] (%p5431_p9)  ;;  %3470 = vst [vmem:[%s5277_s27] sm:$0xff] (%p5431_p9), %v3469_v7  ;;  %v3551_v4 = vld [vmem:[%s5082_s5 + $0x148] sm:$0xff] (%p5431_p9) }
 0x247   : > { %3472 = vst [vmem:[%s5277_s27 + $0x8] sm:$0xff] (%p5431_p9), %v3471_v8  ;;  %3474 = vst [vmem:[%s5277_s27 + $0x20] sm:$0xff] (%p5431_p9), %v3473_v9  ;;  %v3553_v5 = vld [vmem:[%s5082_s5 + $0x150] sm:$0xff] (%p5431_p9)  ;;  %v3555_v6 = vld [vmem:[%s5082_s5 + $0x158] sm:$0xff] (%p5431_p9) }
 0x248   : > { %3440 = vst [vmem:[%s5082_s5 + $0x1e0] sm:$0xff] %v4043_v25  ;;  %3441 = vst [vmem:[%s5082_s5 + $0x1e8] sm:$0xff] %v4044_v26  ;;  %v4045_v29 = vpack.c.bf16 %v2993_v27, %v2992_v21  ;;  %v4046_v30 = vpack.c.bf16 %v2995_v28, %v2994_v22  ;;  %v3557_v11 = vld [vmem:[%s5082_s5 + $0x160] sm:$0xff] (%p5431_p9)  ;;  %v3559_v12 = vld [vmem:[%s5082_s5 + $0x168] sm:$0xff] (%p5431_p9) }
 0x249   : > { %3476 = vst [vmem:[%s5277_s27 + $0x28] sm:$0xff] (%p5431_p9), %v3475_v10  ;;  %3530 = vst [vmem:[%s5277_s27 + $0x1e0] sm:$0xff] (%p5431_p9), %v3529_v57  ;;  %v3561_v13 = vld [vmem:[%s5082_s5 + $0x170] sm:$0xff] (%p5431_p9)  ;;  %v3563_v14 = vld [vmem:[%s5082_s5 + $0x178] sm:$0xff] (%p5431_p9) }
 0x24a   : > { %3442 = vst [vmem:[%s5082_s5 + $0x1f0] sm:$0xff] %v4045_v29  ;;  %3443 = vst [vmem:[%s5082_s5 + $0x1f8] sm:$0xff] %v4046_v30  ;;  %v3565_v15 = vld [vmem:[%s5082_s5 + $0x180] sm:$0xff] (%p5431_p9)  ;;  %v3567_v16 = vld [vmem:[%s5082_s5 + $0x188] sm:$0xff] (%p5431_p9) }
 0x24b   : > { %3532 = vst [vmem:[%s5277_s27 + $0x1e8] sm:$0xff] %v3531_v58  ;;  %3534 = vst [vmem:[%s5277_s27 + $0x200] sm:$0xff] %v3533_v59  ;;  %v3569_v17 = vld [vmem:[%s5082_s5 + $0x190] sm:$0xff]  ;;  %v3571_v18 = vld [vmem:[%s5082_s5 + $0x198] sm:$0xff] }
 0x24c   : > { %3536 = vst [vmem:[%s5277_s27 + $0x208] sm:$0xff] %v3535_v60  ;;  %3538 = vst [vmem:[%s5277_s27 + $0x220] sm:$0xff] %v3537_v61  ;;  %v3573_v19 = vld [vmem:[%s5082_s5 + $0x1a0] sm:$0xff]  ;;  %v3575_v20 = vld [vmem:[%s5082_s5 + $0x1a8] sm:$0xff] }
 0x24d   : > { %3540 = vst [vmem:[%s5277_s27 + $0x228] sm:$0xff] %v3539_v62  ;;  %3542 = vst [vmem:[%s5277_s27 + $0x240] sm:$0xff] %v3541_v63  ;;  %v3577_v21 = vld [vmem:[%s5082_s5 + $0x1b0] sm:$0xff]  ;;  %v3579_v22 = vld [vmem:[%s5082_s5 + $0x1b8] sm:$0xff] }
 0x24e   : > { %3544 = vst [vmem:[%s5277_s27 + $0x248] sm:$0xff] %v3543_v0  ;;  %3546 = vst [vmem:[%s5277_s27 + $0x260] sm:$0xff] %v3545_v1  ;;  %v3581_v23 = vld [vmem:[%s5082_s5 + $0x1c0] sm:$0xff]  ;;  %v3583_v24 = vld [vmem:[%s5082_s5 + $0x1c8] sm:$0xff] }
 0x24f   : > { %3548 = vst [vmem:[%s5277_s27 + $0x268] sm:$0xff] %v3547_v2  ;;  %3550 = vst [vmem:[%s5277_s27 + $0x280] sm:$0xff] %v3549_v3  ;;  %v3585_v25 = vld [vmem:[%s5082_s5 + $0x1d0] sm:$0xff]  ;;  %v3587_v26 = vld [vmem:[%s5082_s5 + $0x1d8] sm:$0xff] }
 0x250   : > { %3552 = vst [vmem:[%s5277_s27 + $0x288] sm:$0xff] %v3551_v4  ;;  %3554 = vst [vmem:[%s5277_s27 + $0x2a0] sm:$0xff] %v3553_v5  ;;  %v3589_v27 = vld [vmem:[%s5082_s5 + $0x1e0] sm:$0xff]  ;;  %v3591_v28 = vld [vmem:[%s5082_s5 + $0x1e8] sm:$0xff] }
 0x251   : > { %3556 = vst [vmem:[%s5277_s27 + $0x2a8] sm:$0xff] %v3555_v6  ;;  %3558 = vst [vmem:[%s5277_s27 + $0x2c0] sm:$0xff] %v3557_v11  ;;  %v3593_v29 = vld [vmem:[%s5082_s5 + $0x1f0] sm:$0xff]  ;;  %v3595_v30 = vld [vmem:[%s5082_s5 + $0x1f8] sm:$0xff] }
 0x252   : > { %3560 = vst [vmem:[%s5277_s27 + $0x2c8] sm:$0xff] %v3559_v12  ;;  %3562 = vst [vmem:[%s5277_s27 + $0x2e0] sm:$0xff] %v3561_v13 }
 0x253   : > { %3564 = vst [vmem:[%s5277_s27 + $0x2e8] sm:$0xff] %v3563_v14  ;;  %3566 = vst [vmem:[%s5277_s27 + $0x300] sm:$0xff] %v3565_v15 }
 0x254   : > { %3568 = vst [vmem:[%s5277_s27 + $0x308] sm:$0xff] %v3567_v16  ;;  %3570 = vst [vmem:[%s5277_s27 + $0x320] sm:$0xff] %v3569_v17 }
 0x255   : > { %3572 = vst [vmem:[%s5277_s27 + $0x328] sm:$0xff] %v3571_v18  ;;  %3574 = vst [vmem:[%s5277_s27 + $0x340] sm:$0xff] %v3573_v19 }
 0x256   : > { %3576 = vst [vmem:[%s5277_s27 + $0x348] sm:$0xff] %v3575_v20  ;;  %3578 = vst [vmem:[%s5277_s27 + $0x360] sm:$0xff] %v3577_v21 }
 0x257   : > { %3580 = vst [vmem:[%s5277_s27 + $0x368] sm:$0xff] %v3579_v22  ;;  %3582 = vst [vmem:[%s5277_s27 + $0x380] sm:$0xff] %v3581_v23 }
 0x258   : > { %3584 = vst [vmem:[%s5277_s27 + $0x388] sm:$0xff] %v3583_v24  ;;  %3586 = vst [vmem:[%s5277_s27 + $0x3a0] sm:$0xff] %v3585_v25 }
 0x259   : > { %3588 = vst [vmem:[%s5277_s27 + $0x3a8] sm:$0xff] %v3587_v26  ;;  %3590 = vst [vmem:[%s5277_s27 + $0x3c0] sm:$0xff] %v3589_v27 }
 0x25a   : > { %3592 = vst [vmem:[%s5277_s27 + $0x3c8] sm:$0xff] %v3591_v28  ;;  %3594 = vst [vmem:[%s5277_s27 + $0x3e0] sm:$0xff] %v3593_v29 }
 0x25b   : > { %3596 = vst [vmem:[%s5277_s27 + $0x3e8] sm:$0xff] %v3595_v30 }
 0x25c PF: > { %s16_s17 = sadd.s32 1, %s4602_s17   ;;  %s5432_s12 = smov %s4586_s13 }
 0x25d   : > { %p13_p11 = scmp.ge.s32.totalorder %s16_s17, 4   ;;  %s5433_s13 = smov %s4590_s14 }
 0x25e   : > { %s5434_s14 = smov %s4676_s24  ;;  %s5435_s15 = smov %s4598_s16 }
 0x25f   : > { %s5436_s16 = smov %s5438_s19  ;;  %15 = sbr.rel (!%p13_p11) target bundleno = 4 (0x4), region = 109 }
 0x266   :  { %3612 = vsyncpa [#allocation4], 1 }
 0x267   :  { %3614 = vsyncpa [#allocation4 + $0x1], 1 }

</bundles_post_ra>
